<compile_context>
chip_gen: v7x
topology: tpu7x:2x2x1
jax: 0.10.0
libtpu: 0.0.40
codegen_flags: <defaults>
</compile_context>

<pallas_src>
import jax
import jax.numpy as jnp
import numpy as np
from jax.experimental import pallas as pl
from jax.experimental.pallas import tpu as pltpu


# --------------------------------------------------------------------------
# Kernel 1: conv3x3 (+bias) + ReLU + 2x2 max-pool for one image, as four
# pooling-phase matmuls + elementwise max (one image per grid step).
# --------------------------------------------------------------------------
def conv_relu_pool_kernel(x_ref, w_ref, b_ref, o_ref):
    # x_ref: (4, P, K) bf16 im2col patches of the 4 pooling phases
    # w_ref: (K, Cout) bf16 ; b_ref: (1, Cout) f32 ; o_ref: (P, Cout) bf16
    w = w_ref[...]
    m = jnp.dot(x_ref[0], w, preferred_element_type=jnp.float32)
    for t in range(1, 4):                       # static unroll
        m = jnp.maximum(m, jnp.dot(x_ref[t], w,
                                   preferred_element_type=jnp.float32))
    # relu(max_k(dot_k) + b) == max_k(relu(dot_k + b))
    o_ref[...] = jnp.maximum(m + b_ref[...], 0.0).astype(o_ref.dtype)


def conv3x3_relu_pool(x_phases, w, b):
    # x_phases: (N, 4, P, K) bf16 ; w: (K, Cout) bf16 ; b: (1, Cout) f32
    N, _, P, K = x_phases.shape
    Cout = w.shape[1]
    return pl.pallas_call(
        conv_relu_pool_kernel,
        out_shape=jax.ShapeDtypeStruct((N, P, Cout), jnp.bfloat16),
        grid_spec=pltpu.PrefetchScalarGridSpec(
            num_scalar_prefetch=0,
            grid=(N,),
            in_specs=[
                pl.BlockSpec((None, 4, P, K), lambda n: (n, 0, 0, 0)),
                pl.BlockSpec((K, Cout), lambda n: (0, 0)),
                pl.BlockSpec((1, Cout), lambda n: (0, 0)),
            ],
            out_specs=pl.BlockSpec((None, P, Cout), lambda n: (n, 0, 0)),
        ),
        compiler_params=pltpu.CompilerParams(
            dimension_semantics=("parallel",),          # megacore on v7x
            vmem_limit_bytes=32 * 1024 * 1024,
        ),
    )(x_phases, w, b)


# --------------------------------------------------------------------------
# Kernel 2: fused MLP head: fc1 (K-tiled matmul, bf16) + bias + ReLU + fc2.
# --------------------------------------------------------------------------
def mlp_head_kernel(x_ref, w1_ref, b1_ref, w2_ref, b2_ref, o_ref, acc_ref):
    k = pl.program_id(0)

    @pl.when(k == 0)
    def _():
        acc_ref[...] = jnp.zeros_like(acc_ref)

    acc_ref[...] += jnp.dot(x_ref[...], w1_ref[...],
                            preferred_element_type=jnp.float32)

    @pl.when(k == pl.num_programs(0) - 1)
    def _():
        h = jnp.maximum(acc_ref[...] + b1_ref[...], 0.0)
        out = jnp.dot(h, w2_ref[...],
                      preferred_element_type=jnp.float32) + b2_ref[...]
        o_ref[...] = out.astype(o_ref.dtype)


def mlp_head(x_flat, w1, b1, w2, b2, *, tk=8192):
    N, K = x_flat.shape
    H1 = w1.shape[1]
    O = w2.shape[1]
    assert K % tk == 0
    nk = K // tk
    return pl.pallas_call(
        mlp_head_kernel,
        out_shape=jax.ShapeDtypeStruct((N, O), jnp.float32),
        grid_spec=pltpu.PrefetchScalarGridSpec(
            num_scalar_prefetch=0,
            grid=(nk,),
            in_specs=[
                pl.BlockSpec((N, tk), lambda k: (0, k)),
                pl.BlockSpec((tk, H1), lambda k: (k, 0)),
                pl.BlockSpec((1, H1), lambda k: (0, 0)),
                pl.BlockSpec((H1, O), lambda k: (0, 0)),
                pl.BlockSpec((1, O), lambda k: (0, 0)),
            ],
            out_specs=pl.BlockSpec((N, O), lambda k: (0, 0)),
            scratch_shapes=[pltpu.VMEM((N, H1), jnp.float32)],
        ),
        compiler_params=pltpu.CompilerParams(
            dimension_semantics=("arbitrary",),         # K is a reduction
            vmem_limit_bytes=32 * 1024 * 1024,
        ),
    )(x_flat, w1, b1, w2, b2)


# --------------------------------------------------------------------------
# Wrapper-side im2col + pooling-phase split (data re-org only; all compute
# stays in the kernels).  Tap order (ky, kx, cin) with cin fastest, matching
# an HWIO conv weight reshaped to (9*Cin, Cout).
# --------------------------------------------------------------------------
def im2col_pool_phases(x_nhwc):
    N, H, W, C = x_nhwc.shape
    xp = jnp.pad(x_nhwc, ((0, 0), (1, 1), (1, 1), (0, 0)))       # zero "SAME"
    cols = jnp.concatenate(
        [xp[:, ky:ky + H, kx:kx + W, :] for ky in range(3) for kx in range(3)],
        axis=-1)                                                  # (N,H,W,9C)
    P = (H // 2) * (W // 2)
    phases = [cols[:, i::2, j::2, :].reshape(N, P, 9 * C)
              for i in range(2) for j in range(2)]
    return jnp.stack(phases, axis=1)                              # (N,4,P,9C)


# --------------------------------------------------------------------------
# Full forward pass.
# --------------------------------------------------------------------------
def dddqn_forward(x_nchw, p):
    N = x_nchw.shape[0]
    x = jnp.transpose(x_nchw, (0, 2, 3, 1)).astype(jnp.bfloat16)  # NHWC bf16
    x = conv3x3_relu_pool(im2col_pool_phases(x), p["cw1_k"], p["cb1_2d"])
    x = x.reshape(N, 32, 32, 32)                                  # NHWC
    x = conv3x3_relu_pool(im2col_pool_phases(x), p["cw2_k"], p["cb2_2d"])
    x_flat = x.reshape(N, 16 * 16 * 64)          # (h, w, c) flatten order
    return mlp_head(x_flat, p["fw1_hwc"], p["fb1_2d"], p["fw2"], p["fb2_2d"],
                    tk=8192)


# Pure-JAX f32 reference (for correctness checking only; torch semantics).
def reference_forward(x_nchw, p):
    def conv(x, w_hwio, b):
        y = jax.lax.conv_general_dilated(
            x, w_hwio, (1, 1), "SAME",
            dimension_numbers=("NHWC", "HWIO", "NHWC"))
        return y + b
    x = jnp.transpose(x_nchw, (0, 2, 3, 1))
    x = jax.nn.relu(conv(x, p["cw1_hwio"], p["cb1"]))
    x = jax.lax.reduce_window(x, -jnp.inf, jax.lax.max,
                              (1, 2, 2, 1), (1, 2, 2, 1), "VALID")
    x = jax.nn.relu(conv(x, p["cw2_hwio"], p["cb2"]))
    x = jax.lax.reduce_window(x, -jnp.inf, jax.lax.max,
                              (1, 2, 2, 1), (1, 2, 2, 1), "VALID")
    x = jnp.transpose(x, (0, 3, 1, 2)).reshape(x.shape[0], -1)   # torch flatten
    x = jax.nn.relu(x @ p["fw1"] + p["fb1"])
    return x @ p["fw2"] + p["fb2"]


def init_params(key):
    ks = jax.random.split(key, 8)
    cw1 = jax.random.normal(ks[0], (3, 3, 3, 32), jnp.float32) * 0.05    # HWIO
    cb1 = jax.random.normal(ks[1], (32,), jnp.float32) * 0.01
    cw2 = jax.random.normal(ks[2], (3, 3, 32, 64), jnp.float32) * 0.05   # HWIO
    cb2 = jax.random.normal(ks[3], (64,), jnp.float32) * 0.01
    fw1 = jax.random.normal(ks[4], (64 * 16 * 16, 128), jnp.float32) * (
        1.0 / np.sqrt(64 * 16 * 16))
    fb1 = jax.random.normal(ks[5], (128,), jnp.float32) * 0.01
    fw2 = jax.random.normal(ks[6], (128, 3), jnp.float32) * (1.0 / np.sqrt(128))
    fb2 = jax.random.normal(ks[7], (3,), jnp.float32) * 0.01

    # fc1 rows permuted from torch (c, h, w) flatten order to NHWC (h, w, c).
    fw1_hwc = (fw1.reshape(64, 16, 16, 128)
               .transpose(1, 2, 0, 3)
               .reshape(16 * 16 * 64, 128))

    return {
        # reference (f32, torch layouts)
        "cw1_hwio": cw1, "cb1": cb1,
        "cw2_hwio": cw2, "cb2": cb2,
        "fw1": fw1, "fb1": fb1, "fw2": fw2, "fb2": fb2,
        # kernel-friendly: im2col weights (9*Cin, Cout) bf16, f32 biases,
        # NHWC-permuted bf16 fc1 weight.
        "cw1_k": cw1.reshape(27, 32).astype(jnp.bfloat16),
        "cw2_k": cw2.reshape(288, 64).astype(jnp.bfloat16),
        "cb1_2d": cb1.reshape(1, 32),
        "cb2_2d": cb2.reshape(1, 64),
        "fw1_hwc": fw1_hwc.astype(jnp.bfloat16),
        "fb1_2d": fb1.reshape(1, 128),
        "fb2_2d": fb2.reshape(1, 3),
    }


if __name__ == "__main__":
    key = jax.random.PRNGKey(0)
    pkey, xkey = jax.random.split(key)
    params = init_params(pkey)

    # Spatial size is forced to 64x64 by fc1's 64*16*16 input dim; batch=2.
    x = jax.random.normal(xkey, (2, 3, 64, 64), jnp.float32)

    out = jax.block_until_ready(jax.jit(dddqn_forward)(x, params))
    assert out.shape == (2, 3), out.shape

    ref = jax.block_until_ready(jax.jit(reference_forward)(x, params))
    np.testing.assert_allclose(np.asarray(out), np.asarray(ref),
                               rtol=3e-2, atol=2e-2)

    print("KERNEL_OK")
</pallas_src>

<mosaic_0001>
module attributes {stable_mosaic.version = 11 : i64} {
  func.func @conv_relu_pool_kernel(%arg0: i32, %arg1: memref<1x4x1024x27xbf16, #tpu.memory_space<vmem>>, %arg2: memref<27x32xbf16, #tpu.memory_space<vmem>>, %arg3: memref<1x32xf32, #tpu.memory_space<vmem>>, %arg4: memref<1x1024x32xbf16, #tpu.memory_space<vmem>>) attributes {dimension_semantics = [#tpu.dimension_semantics<parallel>], iteration_bounds = array<i64: 2>, scalar_prefetch = 0 : i64, scratch_operands = 0 : i64, tpu.core_type = #tpu.core_type<tc>, window_params = [{transform_indices = @transform_0, window_bounds = array<i64: 1, 4, 1024, 27>}, {pipeline_mode = #tpu.pipeline_mode<synchronous>, transform_indices = @transform_1, window_bounds = array<i64: 27, 32>}, {pipeline_mode = #tpu.pipeline_mode<synchronous>, transform_indices = @transform_2, window_bounds = array<i64: 1, 32>}, {transform_indices = @transform_3, window_bounds = array<i64: 1, 1024, 32>}]} {
    %c0 = arith.constant 0 : index
    %c0_0 = arith.constant 0 : index
    %0 = vector.load %arg2[%c0, %c0_0] : memref<27x32xbf16, #tpu.memory_space<vmem>>, vector<27x32xbf16>
    %c0_1 = arith.constant 0 : index
    %c0_2 = arith.constant 0 : index
    %c0_3 = arith.constant 0 : index
    %c0_4 = arith.constant 0 : index
    %1 = vector.load %arg1[%c0_1, %c0_2, %c0_3, %c0_4] : memref<1x4x1024x27xbf16, #tpu.memory_space<vmem>>, vector<1x1x1024x27xbf16>
    %2 = vector.shape_cast %1 : vector<1x1x1024x27xbf16> to vector<1024x27xbf16>
    %cst = arith.constant dense<0.000000e+00> : vector<1024x32xf32>
    %3 = tpu.matmul %2, %0, %cst {dimension_numbers = #tpu.dot_dimension_numbers<[1], [0], [0], [1], [0, 0, 1, 1], [], []>} : vector<1024x27xbf16>, vector<27x32xbf16>, vector<1024x32xf32> -> vector<1024x32xf32>
    %c0_5 = arith.constant 0 : index
    %c1 = arith.constant 1 : index
    %c0_6 = arith.constant 0 : index
    %c0_7 = arith.constant 0 : index
    %4 = vector.load %arg1[%c0_5, %c1, %c0_6, %c0_7] : memref<1x4x1024x27xbf16, #tpu.memory_space<vmem>>, vector<1x1x1024x27xbf16>
    %5 = vector.shape_cast %4 : vector<1x1x1024x27xbf16> to vector<1024x27xbf16>
    %cst_8 = arith.constant dense<0.000000e+00> : vector<1024x32xf32>
    %6 = tpu.matmul %5, %0, %cst_8 {dimension_numbers = #tpu.dot_dimension_numbers<[1], [0], [0], [1], [0, 0, 1, 1], [], []>} : vector<1024x27xbf16>, vector<27x32xbf16>, vector<1024x32xf32> -> vector<1024x32xf32>
    %7 = arith.maximumf %3, %6 : vector<1024x32xf32>
    %c0_9 = arith.constant 0 : index
    %c2 = arith.constant 2 : index
    %c0_10 = arith.constant 0 : index
    %c0_11 = arith.constant 0 : index
    %8 = vector.load %arg1[%c0_9, %c2, %c0_10, %c0_11] : memref<1x4x1024x27xbf16, #tpu.memory_space<vmem>>, vector<1x1x1024x27xbf16>
    %9 = vector.shape_cast %8 : vector<1x1x1024x27xbf16> to vector<1024x27xbf16>
    %cst_12 = arith.constant dense<0.000000e+00> : vector<1024x32xf32>
    %10 = tpu.matmul %9, %0, %cst_12 {dimension_numbers = #tpu.dot_dimension_numbers<[1], [0], [0], [1], [0, 0, 1, 1], [], []>} : vector<1024x27xbf16>, vector<27x32xbf16>, vector<1024x32xf32> -> vector<1024x32xf32>
    %11 = arith.maximumf %7, %10 : vector<1024x32xf32>
    %c0_13 = arith.constant 0 : index
    %c3 = arith.constant 3 : index
    %c0_14 = arith.constant 0 : index
    %c0_15 = arith.constant 0 : index
    %12 = vector.load %arg1[%c0_13, %c3, %c0_14, %c0_15] : memref<1x4x1024x27xbf16, #tpu.memory_space<vmem>>, vector<1x1x1024x27xbf16>
    %13 = vector.shape_cast %12 : vector<1x1x1024x27xbf16> to vector<1024x27xbf16>
    %cst_16 = arith.constant dense<0.000000e+00> : vector<1024x32xf32>
    %14 = tpu.matmul %13, %0, %cst_16 {dimension_numbers = #tpu.dot_dimension_numbers<[1], [0], [0], [1], [0, 0, 1, 1], [], []>} : vector<1024x27xbf16>, vector<27x32xbf16>, vector<1024x32xf32> -> vector<1024x32xf32>
    %15 = arith.maximumf %11, %14 : vector<1024x32xf32>
    %c0_17 = arith.constant 0 : index
    %c0_18 = arith.constant 0 : index
    %16 = vector.load %arg3[%c0_17, %c0_18] : memref<1x32xf32, #tpu.memory_space<vmem>>, vector<1x32xf32>
    %17 = vector.broadcast %16 : vector<1x32xf32> to vector<1024x32xf32>
    %18 = arith.addf %15, %17 : vector<1024x32xf32>
    %cst_19 = arith.constant 0.000000e+00 : f32
    %19 = vector.broadcast %cst_19 : f32 to vector<1024x32xf32>
    %20 = arith.maximumf %18, %19 : vector<1024x32xf32>
    %21 = arith.truncf %20 : vector<1024x32xf32> to vector<1024x32xbf16>
    %c0_20 = arith.constant 0 : index
    %c0_21 = arith.constant 0 : index
    %c0_22 = arith.constant 0 : index
    %22 = vector.load %arg4[%c0_20, %c0_21, %c0_22] : memref<1x1024x32xbf16, #tpu.memory_space<vmem>>, vector<1x1024x32xbf16>
    %23 = vector.shape_cast %22 : vector<1x1024x32xbf16> to vector<1024x32xbf16>
    %24 = vector.shape_cast %21 : vector<1024x32xbf16> to vector<1x1024x32xbf16>
    tpu.vector_store %arg4[%c0_20, %c0_21, %c0_22], %24 {strides = array<i32>} : memref<1x1024x32xbf16, #tpu.memory_space<vmem>>, vector<1x1024x32xbf16>,
    return
  }
  func.func @transform_0(%arg0: i32) -> (i32, i32, i32, i32) {
    %c0_i32 = arith.constant 0 : i32
    %c0_i32_0 = arith.constant 0 : i32
    %c0_i32_1 = arith.constant 0 : i32
    %c0_i32_2 = arith.constant 0 : i32
    return %arg0, %c0_i32, %c0_i32_0, %c0_i32_1 : i32, i32, i32, i32
  }
  func.func @transform_1(%arg0: i32) -> (i32, i32) {
    %c0_i32 = arith.constant 0 : i32
    %c0_i32_0 = arith.constant 0 : i32
    %c0_i32_1 = arith.constant 0 : i32
    return %c0_i32, %c0_i32_0 : i32, i32
  }
  func.func @transform_2(%arg0: i32) -> (i32, i32) {
    %c0_i32 = arith.constant 0 : i32
    %c0_i32_0 = arith.constant 0 : i32
    %c0_i32_1 = arith.constant 0 : i32
    return %c0_i32, %c0_i32_0 : i32, i32
  }
  func.func @transform_3(%arg0: i32) -> (i32, i32, i32) {
    %c0_i32 = arith.constant 0 : i32
    %c0_i32_0 = arith.constant 0 : i32
    %c0_i32_1 = arith.constant 0 : i32
    return %arg0, %c0_i32, %c0_i32_0 : i32, i32, i32
  }
}

module attributes {stable_mosaic.version = 11 : i64} {
  func.func @conv_relu_pool_kernel(%arg0: i32, %arg1: memref<1x4x256x288xbf16, #tpu.memory_space<vmem>>, %arg2: memref<288x64xbf16, #tpu.memory_space<vmem>>, %arg3: memref<1x64xf32, #tpu.memory_space<vmem>>, %arg4: memref<1x256x64xbf16, #tpu.memory_space<vmem>>) attributes {dimension_semantics = [#tpu.dimension_semantics<parallel>], iteration_bounds = array<i64: 2>, scalar_prefetch = 0 : i64, scratch_operands = 0 : i64, tpu.core_type = #tpu.core_type<tc>, window_params = [{transform_indices = @transform_0, window_bounds = array<i64: 1, 4, 256, 288>}, {pipeline_mode = #tpu.pipeline_mode<synchronous>, transform_indices = @transform_1, window_bounds = array<i64: 288, 64>}, {pipeline_mode = #tpu.pipeline_mode<synchronous>, transform_indices = @transform_2, window_bounds = array<i64: 1, 64>}, {transform_indices = @transform_3, window_bounds = array<i64: 1, 256, 64>}]} {
    %c0 = arith.constant 0 : index
    %c0_0 = arith.constant 0 : index
    %0 = vector.load %arg2[%c0, %c0_0] : memref<288x64xbf16, #tpu.memory_space<vmem>>, vector<288x64xbf16>
    %c0_1 = arith.constant 0 : index
    %c0_2 = arith.constant 0 : index
    %c0_3 = arith.constant 0 : index
    %c0_4 = arith.constant 0 : index
    %1 = vector.load %arg1[%c0_1, %c0_2, %c0_3, %c0_4] : memref<1x4x256x288xbf16, #tpu.memory_space<vmem>>, vector<1x1x256x288xbf16>
    %2 = vector.shape_cast %1 : vector<1x1x256x288xbf16> to vector<256x288xbf16>
    %cst = arith.constant dense<0.000000e+00> : vector<256x64xf32>
    %3 = tpu.matmul %2, %0, %cst {dimension_numbers = #tpu.dot_dimension_numbers<[1], [0], [0], [1], [0, 0, 1, 1], [], []>} : vector<256x288xbf16>, vector<288x64xbf16>, vector<256x64xf32> -> vector<256x64xf32>
    %c0_5 = arith.constant 0 : index
    %c1 = arith.constant 1 : index
    %c0_6 = arith.constant 0 : index
    %c0_7 = arith.constant 0 : index
    %4 = vector.load %arg1[%c0_5, %c1, %c0_6, %c0_7] : memref<1x4x256x288xbf16, #tpu.memory_space<vmem>>, vector<1x1x256x288xbf16>
    %5 = vector.shape_cast %4 : vector<1x1x256x288xbf16> to vector<256x288xbf16>
    %cst_8 = arith.constant dense<0.000000e+00> : vector<256x64xf32>
    %6 = tpu.matmul %5, %0, %cst_8 {dimension_numbers = #tpu.dot_dimension_numbers<[1], [0], [0], [1], [0, 0, 1, 1], [], []>} : vector<256x288xbf16>, vector<288x64xbf16>, vector<256x64xf32> -> vector<256x64xf32>
    %7 = arith.maximumf %3, %6 : vector<256x64xf32>
    %c0_9 = arith.constant 0 : index
    %c2 = arith.constant 2 : index
    %c0_10 = arith.constant 0 : index
    %c0_11 = arith.constant 0 : index
    %8 = vector.load %arg1[%c0_9, %c2, %c0_10, %c0_11] : memref<1x4x256x288xbf16, #tpu.memory_space<vmem>>, vector<1x1x256x288xbf16>
    %9 = vector.shape_cast %8 : vector<1x1x256x288xbf16> to vector<256x288xbf16>
    %cst_12 = arith.constant dense<0.000000e+00> : vector<256x64xf32>
    %10 = tpu.matmul %9, %0, %cst_12 {dimension_numbers = #tpu.dot_dimension_numbers<[1], [0], [0], [1], [0, 0, 1, 1], [], []>} : vector<256x288xbf16>, vector<288x64xbf16>, vector<256x64xf32> -> vector<256x64xf32>
    %11 = arith.maximumf %7, %10 : vector<256x64xf32>
    %c0_13 = arith.constant 0 : index
    %c3 = arith.constant 3 : index
    %c0_14 = arith.constant 0 : index
    %c0_15 = arith.constant 0 : index
    %12 = vector.load %arg1[%c0_13, %c3, %c0_14, %c0_15] : memref<1x4x256x288xbf16, #tpu.memory_space<vmem>>, vector<1x1x256x288xbf16>
    %13 = vector.shape_cast %12 : vector<1x1x256x288xbf16> to vector<256x288xbf16>
    %cst_16 = arith.constant dense<0.000000e+00> : vector<256x64xf32>
    %14 = tpu.matmul %13, %0, %cst_16 {dimension_numbers = #tpu.dot_dimension_numbers<[1], [0], [0], [1], [0, 0, 1, 1], [], []>} : vector<256x288xbf16>, vector<288x64xbf16>, vector<256x64xf32> -> vector<256x64xf32>
    %15 = arith.maximumf %11, %14 : vector<256x64xf32>
    %c0_17 = arith.constant 0 : index
    %c0_18 = arith.constant 0 : index
    %16 = vector.load %arg3[%c0_17, %c0_18] : memref<1x64xf32, #tpu.memory_space<vmem>>, vector<1x64xf32>
    %17 = vector.broadcast %16 : vector<1x64xf32> to vector<256x64xf32>
    %18 = arith.addf %15, %17 : vector<256x64xf32>
    %cst_19 = arith.constant 0.000000e+00 : f32
    %19 = vector.broadcast %cst_19 : f32 to vector<256x64xf32>
    %20 = arith.maximumf %18, %19 : vector<256x64xf32>
    %21 = arith.truncf %20 : vector<256x64xf32> to vector<256x64xbf16>
    %c0_20 = arith.constant 0 : index
    %c0_21 = arith.constant 0 : index
    %c0_22 = arith.constant 0 : index
    %22 = vector.load %arg4[%c0_20, %c0_21, %c0_22] : memref<1x256x64xbf16, #tpu.memory_space<vmem>>, vector<1x256x64xbf16>
    %23 = vector.shape_cast %22 : vector<1x256x64xbf16> to vector<256x64xbf16>
    %24 = vector.shape_cast %21 : vector<256x64xbf16> to vector<1x256x64xbf16>
    tpu.vector_store %arg4[%c0_20, %c0_21, %c0_22], %24 {strides = array<i32>} : memref<1x256x64xbf16, #tpu.memory_space<vmem>>, vector<1x256x64xbf16>,
    return
  }
  func.func @transform_0(%arg0: i32) -> (i32, i32, i32, i32) {
    %c0_i32 = arith.constant 0 : i32
    %c0_i32_0 = arith.constant 0 : i32
    %c0_i32_1 = arith.constant 0 : i32
    %c0_i32_2 = arith.constant 0 : i32
    return %arg0, %c0_i32, %c0_i32_0, %c0_i32_1 : i32, i32, i32, i32
  }
  func.func @transform_1(%arg0: i32) -> (i32, i32) {
    %c0_i32 = arith.constant 0 : i32
    %c0_i32_0 = arith.constant 0 : i32
    %c0_i32_1 = arith.constant 0 : i32
    return %c0_i32, %c0_i32_0 : i32, i32
  }
  func.func @transform_2(%arg0: i32) -> (i32, i32) {
    %c0_i32 = arith.constant 0 : i32
    %c0_i32_0 = arith.constant 0 : i32
    %c0_i32_1 = arith.constant 0 : i32
    return %c0_i32, %c0_i32_0 : i32, i32
  }
  func.func @transform_3(%arg0: i32) -> (i32, i32, i32) {
    %c0_i32 = arith.constant 0 : i32
    %c0_i32_0 = arith.constant 0 : i32
    %c0_i32_1 = arith.constant 0 : i32
    return %arg0, %c0_i32, %c0_i32_0 : i32, i32, i32
  }
}

module attributes {stable_mosaic.version = 11 : i64} {
  func.func @mlp_head_kernel(%arg0: i32, %arg1: memref<2x8192xbf16, #tpu.memory_space<vmem>>, %arg2: memref<8192x128xbf16, #tpu.memory_space<vmem>>, %arg3: memref<1x128xf32, #tpu.memory_space<vmem>>, %arg4: memref<128x3xf32, #tpu.memory_space<vmem>>, %arg5: memref<1x3xf32, #tpu.memory_space<vmem>>, %arg6: memref<2x3xf32, #tpu.memory_space<vmem>>, %arg7: memref<2x128xf32, #tpu.memory_space<vmem>>) attributes {dimension_semantics = [#tpu.dimension_semantics<arbitrary>], iteration_bounds = array<i64: 2>, scalar_prefetch = 0 : i64, scratch_operands = 1 : i64, tpu.core_type = #tpu.core_type<tc>, window_params = [{transform_indices = @transform_0, window_bounds = array<i64: 2, 8192>}, {transform_indices = @transform_1, window_bounds = array<i64: 8192, 128>}, {pipeline_mode = #tpu.pipeline_mode<synchronous>, transform_indices = @transform_2, window_bounds = array<i64: 1, 128>}, {pipeline_mode = #tpu.pipeline_mode<synchronous>, transform_indices = @transform_3, window_bounds = array<i64: 128, 3>}, {pipeline_mode = #tpu.pipeline_mode<synchronous>, transform_indices = @transform_4, window_bounds = array<i64: 1, 3>}, {pipeline_mode = #tpu.pipeline_mode<synchronous>, transform_indices = @transform_5, window_bounds = array<i64: 2, 3>}]} {
    %c0_i32 = arith.constant 0 : i32
    %0 = arith.cmpi eq, %arg0, %c0_i32 : i32
    %1 = arith.extui %0 : i1 to i32
    %c0_i32_0 = arith.constant 0 : i32
    %2 = arith.cmpi ne, %1, %c0_i32_0 : i32
    scf.if %2 {
      %cst_9 = arith.constant 0.000000e+00 : f32
      %12 = vector.broadcast %cst_9 : f32 to vector<2x128xf32>
      %c0_10 = arith.constant 0 : index
      %c0_11 = arith.constant 0 : index
      %13 = vector.load %arg7[%c0_10, %c0_11] : memref<2x128xf32, #tpu.memory_space<vmem>>, vector<2x128xf32>
      tpu.vector_store %arg7[%c0_10, %c0_11], %12 {strides = array<i32>} : memref<2x128xf32, #tpu.memory_space<vmem>>, vector<2x128xf32>,
    } else {
    }
    %c0 = arith.constant 0 : index
    %c0_1 = arith.constant 0 : index
    %3 = vector.load %arg7[%c0, %c0_1] : memref<2x128xf32, #tpu.memory_space<vmem>>, vector<2x128xf32>
    %c0_2 = arith.constant 0 : index
    %c0_3 = arith.constant 0 : index
    %4 = vector.load %arg1[%c0_2, %c0_3] : memref<2x8192xbf16, #tpu.memory_space<vmem>>, vector<2x8192xbf16>
    %c0_4 = arith.constant 0 : index
    %c0_5 = arith.constant 0 : index
    %5 = vector.load %arg2[%c0_4, %c0_5] : memref<8192x128xbf16, #tpu.memory_space<vmem>>, vector<8192x128xbf16>
    %cst = arith.constant dense<0.000000e+00> : vector<2x128xf32>
    %6 = tpu.matmul %4, %5, %cst {dimension_numbers = #tpu.dot_dimension_numbers<[1], [0], [0], [1], [0, 0, 1, 1], [], []>} : vector<2x8192xbf16>, vector<8192x128xbf16>, vector<2x128xf32> -> vector<2x128xf32>
    %7 = arith.addf %3, %6 : vector<2x128xf32>
    %c0_6 = arith.constant 0 : index
    %c0_7 = arith.constant 0 : index
    %8 = vector.load %arg7[%c0_6, %c0_7] : memref<2x128xf32, #tpu.memory_space<vmem>>, vector<2x128xf32>
    tpu.vector_store %arg7[%c0_6, %c0_7], %7 {strides = array<i32>} : memref<2x128xf32, #tpu.memory_space<vmem>>, vector<2x128xf32>,
    %c1_i32 = arith.constant 1 : i32
    %9 = arith.cmpi eq, %arg0, %c1_i32 : i32
    %10 = arith.extui %9 : i1 to i32
    %c0_i32_8 = arith.constant 0 : i32
    %11 = arith.cmpi ne, %10, %c0_i32_8 : i32
    scf.if %11 {
      %c0_9 = arith.constant 0 : index
      %c0_10 = arith.constant 0 : index
      %12 = vector.load %arg7[%c0_9, %c0_10] : memref<2x128xf32, #tpu.memory_space<vmem>>, vector<2x128xf32>
      %c0_11 = arith.constant 0 : index
      %c0_12 = arith.constant 0 : index
      %13 = vector.load %arg3[%c0_11, %c0_12] : memref<1x128xf32, #tpu.memory_space<vmem>>, vector<1x128xf32>
      %14 = vector.broadcast %13 : vector<1x128xf32> to vector<2x128xf32>
      %15 = arith.addf %12, %14 : vector<2x128xf32>
      %cst_13 = arith.constant 0.000000e+00 : f32
      %16 = vector.broadcast %cst_13 : f32 to vector<2x128xf32>
      %17 = arith.maximumf %15, %16 : vector<2x128xf32>
      %c0_14 = arith.constant 0 : index
      %c0_15 = arith.constant 0 : index
      %18 = vector.load %arg4[%c0_14, %c0_15] : memref<128x3xf32, #tpu.memory_space<vmem>>, vector<128x3xf32>
      %cst_16 = arith.constant dense<0.000000e+00> : vector<2x3xf32>
      %19 = tpu.matmul %17, %18, %cst_16 {dimension_numbers = #tpu.dot_dimension_numbers<[1], [0], [0], [1], [0, 0, 1, 1], [], []>} : vector<2x128xf32>, vector<128x3xf32>, vector<2x3xf32> -> vector<2x3xf32>
      %c0_17 = arith.constant 0 : index
      %c0_18 = arith.constant 0 : index
      %20 = vector.load %arg5[%c0_17, %c0_18] : memref<1x3xf32, #tpu.memory_space<vmem>>, vector<1x3xf32>
      %21 = vector.broadcast %20 : vector<1x3xf32> to vector<2x3xf32>
      %22 = arith.addf %19, %21 : vector<2x3xf32>
      %c0_19 = arith.constant 0 : index
      %c0_20 = arith.constant 0 : index
      %23 = vector.load %arg6[%c0_19, %c0_20] : memref<2x3xf32, #tpu.memory_space<vmem>>, vector<2x3xf32>
      tpu.vector_store %arg6[%c0_19, %c0_20], %22 {strides = array<i32>} : memref<2x3xf32, #tpu.memory_space<vmem>>, vector<2x3xf32>,
    } else {
    }
    return
  }
  func.func @transform_0(%arg0: i32) -> (i32, i32) {
    %c0_i32 = arith.constant 0 : i32
    %c0_i32_0 = arith.constant 0 : i32
    return %c0_i32, %arg0 : i32, i32
  }
  func.func @transform_1(%arg0: i32) -> (i32, i32) {
    %c0_i32 = arith.constant 0 : i32
    %c0_i32_0 = arith.constant 0 : i32
    return %arg0, %c0_i32 : i32, i32
  }
  func.func @transform_2(%arg0: i32) -> (i32, i32) {
    %c0_i32 = arith.constant 0 : i32
    %c0_i32_0 = arith.constant 0 : i32
    %c0_i32_1 = arith.constant 0 : i32
    return %c0_i32, %c0_i32_0 : i32, i32
  }
  func.func @transform_3(%arg0: i32) -> (i32, i32) {
    %c0_i32 = arith.constant 0 : i32
    %c0_i32_0 = arith.constant 0 : i32
    %c0_i32_1 = arith.constant 0 : i32
    return %c0_i32, %c0_i32_0 : i32, i32
  }
  func.func @transform_4(%arg0: i32) -> (i32, i32) {
    %c0_i32 = arith.constant 0 : i32
    %c0_i32_0 = arith.constant 0 : i32
    %c0_i32_1 = arith.constant 0 : i32
    return %c0_i32, %c0_i32_0 : i32, i32
  }
  func.func @transform_5(%arg0: i32) -> (i32, i32) {
    %c0_i32 = arith.constant 0 : i32
    %c0_i32_0 = arith.constant 0 : i32
    %c0_i32_1 = arith.constant 0 : i32
    return %c0_i32, %c0_i32_0 : i32, i32
  }
}

</mosaic_0001>

<bundles_post_ra>
// kernel: dddqn_forward.3
= control target key start
LH: loop header
LB: loop body
LE: loop exit
PB: predicated region body
PF: predicated region fallthrough
CT: control target
= control target key end

     0   :  { %s8539_s12 = smov 0   ;;  %s10627_s0 = inlined_call_operand.vmem [shape: bf16[2,4,1024,27], index: 0, kind: input, shape index: {}]   ;;  %s10628_s1 = inlined_call_operand.vmem [shape: bf16[27,32], index: 1, kind: input, shape index: {}]   ;;  %s10629_s2 = inlined_call_operand.vmem [shape: f32[1,32], index: 2, kind: input, shape index: {}]   ;;  %s10630_s3 = inlined_call_operand.vmem [shape: bf16[2,1024,32], index: 3, kind: output, shape index: {}]  }
   0x1 LB: > { %s6281_s13 = sadd.s32 4294967295, %s8516_s12   ;;  %p6285_p0 = scmp.ge.s32.totalorder %s8516_s12, 1  ;;  %s8516_s12 = sphi %s8539_s12, %s13_s12  }
   0x2   : > { %p137_p1 = scmp.lt.s32.totalorder %s8516_s12, 3 }
   0x4   : > { %p138_p2 = pnand %p6285_p0, %p137_p1 }
   0x6   : > { %141 = sbr.rel (%p138_p2) target bundleno = 753 (0x2f1), region = 32 }
   0xd   : > { %v8250_v0 = vld [vmem:[%s10628_s1] sm:$0xff]   ;;  %vm828_vm0 = vcmask 1044480   ;;  %v8251_v1 = vld [vmem:[%s10628_s1 + $0x8] sm:$0x3f]   ;;  %vm829_vm1 = vcmask 1045504   ;;  %p161_p3 = scmp.lt.s32.totalorder %s6281_s13, 1 }
   0xe   : > { %7713 = vmatprep.subr.bf16.mxu0 %v8250_v0  ;;  %7845 = vmatprep.subr.bf16.mxu1 %v8250_v0  ;;  %v8518_v2 = vmov 65535   ;;  %vm635_vm2 = vcmask 220160   ;;  %vm6097_vm3 = vcmask 257024  }
   0xf   : > { %7714 = vmatpush3.bf16.msra.mxu0 %v8250_v0  ;;  %7846 = vmatpush3.bf16.msra.mxu1 %v8250_v0  ;;  %v830_v3 = vsel %vm828_vm0, 4294967295, %v8518_v2  ;;  %s11393_s13 = smov (!%p161_p3, %s6281_s13), 1 }
  0x10   : > { %v831_v4 = vsel %vm829_vm1, %v830_v3, 0  ;;  %s7319_s18 = sshll.u32 %s11393_s13, 11  ;;  %s7320_s24 = sshll.u32 %s11393_s13, 9 }
  0x11   : > { %v833_v5 = vand.u32 %v8251_v1, %v831_v4  ;;  %s8559_s21 = scalar_lea.vmem %s10627_s0, %s7319_s18  ;;  %s9837_s27 = scalar_lea.vmem %s10630_s3, %s7320_s24 }
  0x12   : > { %v8252_v6 = vld [vmem:[%s8559_s21] sm:$0xff]   ;;  %v8254_v8 = vld [vmem:[%s8559_s21 + $0x8] sm:$0xff]   ;;  %v8256_v10 = vld [vmem:[%s8559_s21 + $0x10] sm:$0xff]  }
  0x13   : > { %7715 = vmatprep.subr.bf16.mxu0 %v833_v5  ;;  %7847 = vmatprep.subr.bf16.mxu1 %v833_v5  ;;  %v8253_v7 = vld [vmem:[%s8559_s21 + $0x200] sm:$0xff]   ;;  %v8255_v9 = vld [vmem:[%s8559_s21 + $0x208] sm:$0xff]   ;;  %v8257_v11 = vld [vmem:[%s8559_s21 + $0x210] sm:$0xff]  }
  0x14   : > { %7716 = vmatpush3.bf16.msra.mxu0 %v833_v5  ;;  %7848 = vmatpush3.bf16.msra.mxu1 %v833_v5  ;;  %v8258_v12 = vld [vmem:[%s8559_s21 + $0x18] sm:$0xff]   ;;  %v8260_v14 = vld [vmem:[%s8559_s21 + $0x20] sm:$0xff]   ;;  %v8262_v16 = vld [vmem:[%s8559_s21 + $0x28] sm:$0xff]  }
  0x15   : > { %7977 = vmatprep.subr.bf16.mxu0 %v8250_v0  ;;  %8109 = vmatprep.subr.bf16.mxu1 %v8250_v0  ;;  %v8259_v13 = vld [vmem:[%s8559_s21 + $0x218] sm:$0xff]   ;;  %v8261_v15 = vld [vmem:[%s8559_s21 + $0x220] sm:$0xff]   ;;  %v8263_v17 = vld [vmem:[%s8559_s21 + $0x228] sm:$0xff]  }
  0x16   : > { %7717 = vmatprep.mubr.msk.bf16.mxu0 %vm635_vm2, %v8252_v6  ;;  %7849 = vmatprep.mubr.msk.bf16.mxu1 %vm635_vm2, %v8253_v7  ;;  %v8264_v18 = vld [vmem:[%s8559_s21 + $0x30] sm:$0xff]   ;;  %v8266_v20 = vld [vmem:[%s8559_s21 + $0x38] sm:$0xff]   ;;  %v8268_v22 = vld [vmem:[%s8559_s21 + $0x40] sm:$0xff]  }
  0x17   : > { %7718 = vmatmul.mubr.msk.bf16.vlgmr.msra.gmra.mrb[0].mxu0 %vm635_vm2, %v8254_v8  ;;  %7850 = vmatmul.mubr.msk.bf16.vlgmr.msra.gmra.mrb[0].mxu1 %vm635_vm2, %v8255_v9  ;;  %v8265_v19 = vld [vmem:[%s8559_s21 + $0x230] sm:$0xff]   ;;  %v8267_v21 = vld [vmem:[%s8559_s21 + $0x238] sm:$0xff]   ;;  %v8269_v23 = vld [vmem:[%s8559_s21 + $0x240] sm:$0xff]  }
  0x18   : > { %7978 = vmatpush3.bf16.msra.mxu0 %v8250_v0  ;;  %8110 = vmatpush3.bf16.msra.mxu1 %v8250_v0  ;;  %v8270_v24 = vld [vmem:[%s8559_s21 + $0x48] sm:$0xff]   ;;  %v8272_v26 = vld [vmem:[%s8559_s21 + $0x50] sm:$0xff]   ;;  %v8274_v28 = vld [vmem:[%s8559_s21 + $0x58] sm:$0xff]  }
  0x19   : > { %7721 = vmatprep.mubr.msk.bf16.mxu0 %vm635_vm2, %v8256_v10  ;;  %7853 = vmatprep.mubr.msk.bf16.mxu1 %vm635_vm2, %v8257_v11  ;;  %v8271_v25 = vld [vmem:[%s8559_s21 + $0x248] sm:$0xff]   ;;  %v8273_v27 = vld [vmem:[%s8559_s21 + $0x250] sm:$0xff]   ;;  %v8275_v29 = vld [vmem:[%s8559_s21 + $0x258] sm:$0xff]  }
  0x1a   : > { %7979 = vmatprep.subr.bf16.mxu0 %v833_v5  ;;  %8111 = vmatprep.subr.bf16.mxu1 %v833_v5  ;;  %v8276_v30 = vld [vmem:[%s8559_s21 + $0x60] sm:$0xff]   ;;  %v8278_v32 = vld [vmem:[%s8559_s21 + $0x68] sm:$0xff]   ;;  %v8280_v34 = vld [vmem:[%s8559_s21 + $0x70] sm:$0xff]  }
  0x1b   : > { %v8277_v31 = vld [vmem:[%s8559_s21 + $0x260] sm:$0xff]   ;;  %v8279_v33 = vld [vmem:[%s8559_s21 + $0x268] sm:$0xff]   ;;  %v8281_v35 = vld [vmem:[%s8559_s21 + $0x270] sm:$0xff]  }
  0x1c   : > { %7980 = vmatpush3.bf16.msra.mxu0 %v833_v5  ;;  %8112 = vmatpush3.bf16.msra.mxu1 %v833_v5  ;;  %v8282_v36 = vld [vmem:[%s8559_s21 + $0x78] sm:$0xff]   ;;  %v8284_v38 = vld [vmem:[%s8559_s21 + $0x80] sm:$0xff]   ;;  %v8286_v40 = vld [vmem:[%s8559_s21 + $0x88] sm:$0xff]  }
  0x1d   : > { %v8283_v37 = vld [vmem:[%s8559_s21 + $0x278] sm:$0xff]   ;;  %v8285_v39 = vld [vmem:[%s8559_s21 + $0x280] sm:$0xff]   ;;  %v8287_v41 = vld [vmem:[%s8559_s21 + $0x288] sm:$0xff]  }
  0x1e   : > { %v8288_v42 = vld [vmem:[%s8559_s21 + $0x90] sm:$0xff]   ;;  %v8290_v44 = vld [vmem:[%s8559_s21 + $0x98] sm:$0xff]   ;;  %v8292_v46 = vld [vmem:[%s8559_s21 + $0xa0] sm:$0xff]  }
  0x1f   : > { %7722 = vmatmul.mubr.msk.bf16.gmra.mrb[4].mxu0 %vm635_vm2, %v8258_v12  ;;  %7854 = vmatmul.mubr.msk.bf16.gmra.mrb[4].mxu1 %vm635_vm2, %v8259_v13  ;;  %v8289_v43 = vld [vmem:[%s8559_s21 + $0x290] sm:$0xff]   ;;  %v8291_v45 = vld [vmem:[%s8559_s21 + $0x298] sm:$0xff]   ;;  %v8293_v47 = vld [vmem:[%s8559_s21 + $0x2a0] sm:$0xff]  }
  0x20   : > { %7725 = vmatprep.mubr.msk.bf16.mxu0 %vm635_vm2, %v8260_v14  ;;  %7857 = vmatprep.mubr.msk.bf16.mxu1 %vm635_vm2, %v8261_v15  ;;  %v8294_v48 = vld [vmem:[%s8559_s21 + $0xa8] sm:$0xff]   ;;  %v8296_v50 = vld [vmem:[%s8559_s21 + $0xb0] sm:$0xff]   ;;  %v8298_v52 = vld [vmem:[%s8559_s21 + $0xb8] sm:$0xff]  }
  0x21   : > { %v8295_v49 = vld [vmem:[%s8559_s21 + $0x2a8] sm:$0xff]   ;;  %v8297_v51 = vld [vmem:[%s8559_s21 + $0x2b0] sm:$0xff]   ;;  %v8299_v53 = vld [vmem:[%s8559_s21 + $0x2b8] sm:$0xff]  }
  0x22   : > { %v8300_v54 = vld [vmem:[%s8559_s21 + $0xc0] sm:$0xff]   ;;  %v8302_v56 = vld [vmem:[%s8559_s21 + $0xc8] sm:$0xff]   ;;  %v8304_v58 = vld [vmem:[%s8559_s21 + $0xd0] sm:$0xff]  }
  0x23   : > { %v8301_v55 = vld [vmem:[%s8559_s21 + $0x2c0] sm:$0xff]   ;;  %v8303_v57 = vld [vmem:[%s8559_s21 + $0x2c8] sm:$0xff]   ;;  %v8305_v59 = vld [vmem:[%s8559_s21 + $0x2d0] sm:$0xff]  }
  0x24   : > { %v8306_v60 = vld [vmem:[%s8559_s21 + $0xd8] sm:$0xff]   ;;  %v8308_v62 = vld [vmem:[%s8559_s21 + $0xe0] sm:$0xff]   ;;  %v8310_v0 = vld [vmem:[%s8559_s21 + $0xe8] sm:$0xff]  }
  0x25   : > { %v8307_v61 = vld [vmem:[%s8559_s21 + $0x2d8] sm:$0xff]   ;;  %v8309_v63 = vld [vmem:[%s8559_s21 + $0x2e0] sm:$0xff]   ;;  %v8311_v1 = vld [vmem:[%s8559_s21 + $0x2e8] sm:$0xff]  }
  0x26   : > { %v8312_v2 = vld [vmem:[%s8559_s21 + $0xf0] sm:$0xff]   ;;  %v8314_v4 = vld [vmem:[%s8559_s21 + $0xf8] sm:$0xff]   ;;  %v8316_v6 = vld [vmem:[%s8559_s21 + $0x100] sm:$0xff]  }
  0x27   : > { %7726 = vmatmul.mubr.msk.bf16.gmra.mrb[8].mxu0 %vm635_vm2, %v8262_v16  ;;  %7858 = vmatmul.mubr.msk.bf16.gmra.mrb[8].mxu1 %vm635_vm2, %v8263_v17  ;;  %v8313_v3 = vld [vmem:[%s8559_s21 + $0x2f0] sm:$0xff]   ;;  %v8315_v5 = vld [vmem:[%s8559_s21 + $0x2f8] sm:$0xff]   ;;  %v8317_v7 = vld [vmem:[%s8559_s21 + $0x300] sm:$0xff]  }
  0x28   : > { %7729 = vmatprep.mubr.msk.bf16.mxu0 %vm635_vm2, %v8264_v18  ;;  %7861 = vmatprep.mubr.msk.bf16.mxu1 %vm635_vm2, %v8265_v19  ;;  %v8318_v8 = vld [vmem:[%s8559_s21 + $0x108] sm:$0xff]   ;;  %v8320_v10 = vld [vmem:[%s8559_s21 + $0x110] sm:$0xff]   ;;  %v8322_v12 = vld [vmem:[%s8559_s21 + $0x118] sm:$0xff]  }
  0x29   : > { %v8319_v9 = vld [vmem:[%s8559_s21 + $0x308] sm:$0xff]   ;;  %v8321_v11 = vld [vmem:[%s8559_s21 + $0x310] sm:$0xff]   ;;  %v8323_v13 = vld [vmem:[%s8559_s21 + $0x318] sm:$0xff]  }
  0x2a   : > { %v8324_v14 = vld [vmem:[%s8559_s21 + $0x120] sm:$0xff]   ;;  %v8326_v16 = vld [vmem:[%s8559_s21 + $0x128] sm:$0xff]   ;;  %v8328_v18 = vld [vmem:[%s8559_s21 + $0x130] sm:$0xff]  }
  0x2b   : > { %v8325_v15 = vld [vmem:[%s8559_s21 + $0x320] sm:$0xff]   ;;  %v8327_v17 = vld [vmem:[%s8559_s21 + $0x328] sm:$0xff]   ;;  %v8329_v19 = vld [vmem:[%s8559_s21 + $0x330] sm:$0xff]  }
  0x2f   : > { %7730 = vmatmul.mubr.msk.bf16.gmra.mrb[12].mxu0 %vm635_vm2, %v8266_v20  ;;  %7862 = vmatmul.mubr.msk.bf16.gmra.mrb[12].mxu1 %vm635_vm2, %v8267_v21  ;;  %v8330_v20 = vld [vmem:[%s8559_s21 + $0x138] sm:$0xff]  }
  0x30   : > { %7733 = vmatprep.mubr.msk.bf16.mxu0 %vm635_vm2, %v8268_v22  ;;  %7865 = vmatprep.mubr.msk.bf16.mxu1 %vm635_vm2, %v8269_v23  ;;  %v8331_v21 = vld [vmem:[%s8559_s21 + $0x338] sm:$0xff]   ;;  %v8332_v22 = vld [vmem:[%s8559_s21 + $0x140] sm:$0xff]  }
  0x31   : > { %v8333_v23 = vld [vmem:[%s8559_s21 + $0x340] sm:$0xff]  }
  0x37   : > { %7734 = vmatmul.mubr.msk.bf16.gmra.mrb[16].mxu0 %vm635_vm2, %v8270_v24  ;;  %7866 = vmatmul.mubr.msk.bf16.gmra.mrb[16].mxu1 %vm635_vm2, %v8271_v25  ;;  %v8334_v24 = vld [vmem:[%s8559_s21 + $0x148] sm:$0xff]  }
  0x38   : > { %7737 = vmatprep.mubr.msk.bf16.mxu0 %vm635_vm2, %v8272_v26  ;;  %7869 = vmatprep.mubr.msk.bf16.mxu1 %vm635_vm2, %v8273_v27  ;;  %v8335_v25 = vld [vmem:[%s8559_s21 + $0x348] sm:$0xff]   ;;  %v8336_v26 = vld [vmem:[%s8559_s21 + $0x150] sm:$0xff]  }
  0x39   : > { %v8337_v27 = vld [vmem:[%s8559_s21 + $0x350] sm:$0xff]  }
  0x3f   : > { %7738 = vmatmul.mubr.msk.bf16.gmra.mrb[20].mxu0 %vm635_vm2, %v8274_v28  ;;  %7870 = vmatmul.mubr.msk.bf16.gmra.mrb[20].mxu1 %vm635_vm2, %v8275_v29  ;;  %v8338_v28 = vld [vmem:[%s8559_s21 + $0x158] sm:$0xff]  }
  0x40   : > { %7741 = vmatprep.mubr.msk.bf16.mxu0 %vm635_vm2, %v8276_v30  ;;  %7873 = vmatprep.mubr.msk.bf16.mxu1 %vm635_vm2, %v8277_v31  ;;  %v8339_v29 = vld [vmem:[%s8559_s21 + $0x358] sm:$0xff]   ;;  %v8340_v30 = vld [vmem:[%s8559_s21 + $0x160] sm:$0xff]  }
  0x41   : > { %v8341_v31 = vld [vmem:[%s8559_s21 + $0x360] sm:$0xff]  }
  0x47   : > { %7742 = vmatmul.mubr.msk.bf16.gmra.mrb[24].mxu0 %vm635_vm2, %v8278_v32  ;;  %7874 = vmatmul.mubr.msk.bf16.gmra.mrb[24].mxu1 %vm635_vm2, %v8279_v33  ;;  %v8342_v32 = vld [vmem:[%s8559_s21 + $0x168] sm:$0xff]  }
  0x48   : > { %7745 = vmatprep.mubr.msk.bf16.mxu0 %vm635_vm2, %v8280_v34  ;;  %7877 = vmatprep.mubr.msk.bf16.mxu1 %vm635_vm2, %v8281_v35  ;;  %v8343_v33 = vld [vmem:[%s8559_s21 + $0x368] sm:$0xff]   ;;  %v8344_v34 = vld [vmem:[%s8559_s21 + $0x170] sm:$0xff]  }
  0x49   : > { %v8345_v35 = vld [vmem:[%s8559_s21 + $0x370] sm:$0xff]  }
  0x4f   : > { %7746 = vmatmul.mubr.msk.bf16.gmra.mrb[28].mxu0 %vm635_vm2, %v8282_v36  ;;  %7878 = vmatmul.mubr.msk.bf16.gmra.mrb[28].mxu1 %vm635_vm2, %v8283_v37  ;;  %v8346_v36 = vld [vmem:[%s8559_s21 + $0x178] sm:$0xff]  }
  0x50   : > { %7749 = vmatprep.mubr.msk.bf16.mxu0 %vm635_vm2, %v8284_v38  ;;  %7881 = vmatprep.mubr.msk.bf16.mxu1 %vm635_vm2, %v8285_v39  ;;  %v8347_v37 = vld [vmem:[%s8559_s21 + $0x378] sm:$0xff]   ;;  %v8348_v38 = vld [vmem:[%s8559_s21 + $0x180] sm:$0xff]  }
  0x51   : > { %v8349_v39 = vld [vmem:[%s8559_s21 + $0x380] sm:$0xff]  }
  0x57   : > { %7750 = vmatmul.mubr.msk.bf16.gmra.mrb[32].mxu0 %vm635_vm2, %v8286_v40  ;;  %7882 = vmatmul.mubr.msk.bf16.gmra.mrb[32].mxu1 %vm635_vm2, %v8287_v41  ;;  %v8350_v40 = vld [vmem:[%s8559_s21 + $0x188] sm:$0xff]  }
  0x58   : > { %7753 = vmatprep.mubr.msk.bf16.mxu0 %vm635_vm2, %v8288_v42  ;;  %7885 = vmatprep.mubr.msk.bf16.mxu1 %vm635_vm2, %v8289_v43  ;;  %v8351_v41 = vld [vmem:[%s8559_s21 + $0x388] sm:$0xff]   ;;  %v8352_v42 = vld [vmem:[%s8559_s21 + $0x190] sm:$0xff]  }
  0x59   : > { %v8353_v43 = vld [vmem:[%s8559_s21 + $0x390] sm:$0xff]  }
  0x5f   : > { %7754 = vmatmul.mubr.msk.bf16.gmra.mrb[36].mxu0 %vm635_vm2, %v8290_v44  ;;  %7886 = vmatmul.mubr.msk.bf16.gmra.mrb[36].mxu1 %vm635_vm2, %v8291_v45  ;;  %v8354_v44 = vld [vmem:[%s8559_s21 + $0x198] sm:$0xff]  }
  0x60   : > { %7757 = vmatprep.mubr.msk.bf16.mxu0 %vm635_vm2, %v8292_v46  ;;  %7889 = vmatprep.mubr.msk.bf16.mxu1 %vm635_vm2, %v8293_v47  ;;  %v8355_v45 = vld [vmem:[%s8559_s21 + $0x398] sm:$0xff]   ;;  %v8356_v46 = vld [vmem:[%s8559_s21 + $0x1a0] sm:$0xff]  }
  0x61   : > { %v8357_v47 = vld [vmem:[%s8559_s21 + $0x3a0] sm:$0xff]  }
  0x67   : > { %7758 = vmatmul.mubr.msk.bf16.gmra.mrb[40].mxu0 %vm635_vm2, %v8294_v48  ;;  %7890 = vmatmul.mubr.msk.bf16.gmra.mrb[40].mxu1 %vm635_vm2, %v8295_v49  ;;  %v8358_v48 = vld [vmem:[%s8559_s21 + $0x1a8] sm:$0xff]  }
  0x68   : > { %7761 = vmatprep.mubr.msk.bf16.mxu0 %vm635_vm2, %v8296_v50  ;;  %7893 = vmatprep.mubr.msk.bf16.mxu1 %vm635_vm2, %v8297_v51  ;;  %v8359_v49 = vld [vmem:[%s8559_s21 + $0x3a8] sm:$0xff]   ;;  %v8360_v50 = vld [vmem:[%s8559_s21 + $0x1b0] sm:$0xff]  }
  0x69   : > { %v8361_v51 = vld [vmem:[%s8559_s21 + $0x3b0] sm:$0xff]  }
  0x6f   : > { %7762 = vmatmul.mubr.msk.bf16.gmra.mrb[44].mxu0 %vm635_vm2, %v8298_v52  ;;  %7894 = vmatmul.mubr.msk.bf16.gmra.mrb[44].mxu1 %vm635_vm2, %v8299_v53  ;;  %v8362_v52 = vld [vmem:[%s8559_s21 + $0x1b8] sm:$0xff]  }
  0x70   : > { %7765 = vmatprep.mubr.msk.bf16.mxu0 %vm635_vm2, %v8300_v54  ;;  %7897 = vmatprep.mubr.msk.bf16.mxu1 %vm635_vm2, %v8301_v55  ;;  %v8363_v54 = vld [vmem:[%s8559_s21 + $0x3b8] sm:$0xff]   ;;  %v8364_v55 = vld [vmem:[%s8559_s21 + $0x1c0] sm:$0xff]  }
  0x77   : > { %7766 = vmatmul.mubr.msk.bf16.gmra.mrb[48].mxu0 %vm635_vm2, %v8302_v56  ;;  %7898 = vmatmul.mubr.msk.bf16.gmra.mrb[48].mxu1 %vm635_vm2, %v8303_v57 }
  0x78   : > { %7769 = vmatprep.mubr.msk.bf16.mxu0 %vm635_vm2, %v8304_v58  ;;  %7901 = vmatprep.mubr.msk.bf16.mxu1 %vm635_vm2, %v8305_v59 }
  0x7f   : > { %7770 = vmatmul.mubr.msk.bf16.gmra.mrb[52].mxu0 %vm635_vm2, %v8306_v60  ;;  %7902 = vmatmul.mubr.msk.bf16.gmra.mrb[52].mxu1 %vm635_vm2, %v8307_v61 }
  0x80   : > { %7773 = vmatprep.mubr.msk.bf16.mxu0 %vm635_vm2, %v8308_v62  ;;  %7905 = vmatprep.mubr.msk.bf16.mxu1 %vm635_vm2, %v8309_v63 }
  0x87   : > { %7774 = vmatmul.mubr.msk.bf16.gmra.mrb[56].mxu0 %vm635_vm2, %v8310_v0  ;;  %7906 = vmatmul.mubr.msk.bf16.gmra.mrb[56].mxu1 %vm635_vm2, %v8311_v1  ;;  %v8365_v0 = vld [vmem:[%s8559_s21 + $0x3c0] sm:$0xff]  }
  0x88   : > { %7777 = vmatprep.mubr.msk.bf16.mxu0 %vm635_vm2, %v8312_v2  ;;  %7909 = vmatprep.mubr.msk.bf16.mxu1 %vm635_vm2, %v8313_v3  ;;  %v8389_v3 = vld [vmem:[%s8559_s21 + $0x620] sm:$0xff]  }
  0x8f   : > { %7778 = vmatmul.mubr.msk.bf16.gmra.mrb[60].mxu0 %vm635_vm2, %v8314_v4  ;;  %7910 = vmatmul.mubr.msk.bf16.gmra.mrb[60].mxu1 %vm635_vm2, %v8315_v5  ;;  %v8366_v4 = vld [vmem:[%s8559_s21 + $0x1c8] sm:$0xff]  }
  0x90   : > { %7781 = vmatprep.mubr.msk.bf16.mxu0 %vm635_vm2, %v8316_v6  ;;  %7913 = vmatprep.mubr.msk.bf16.mxu1 %vm635_vm2, %v8317_v7  ;;  %v8367_v6 = vld [vmem:[%s8559_s21 + $0x3c8] sm:$0xff]   ;;  %v8368_v7 = vld [vmem:[%s8559_s21 + $0x1d0] sm:$0xff]  }
  0x97   : > { %7782 = vmatmul.mubr.msk.bf16.gmra.mrb[64].mxu0 %vm635_vm2, %v8318_v8  ;;  %7914 = vmatmul.mubr.msk.bf16.gmra.mrb[64].mxu1 %vm635_vm2, %v8319_v9 }
  0x98   : > { %7785 = vmatprep.mubr.msk.bf16.mxu0 %vm635_vm2, %v8320_v10  ;;  %7917 = vmatprep.mubr.msk.bf16.mxu1 %vm635_vm2, %v8321_v11 }
  0x9f   : > { %7786 = vmatmul.mubr.msk.bf16.gmra.mrb[68].mxu0 %vm635_vm2, %v8322_v12  ;;  %7918 = vmatmul.mubr.msk.bf16.gmra.mrb[68].mxu1 %vm635_vm2, %v8323_v13  ;;  %v8387_v13 = vld [vmem:[%s8559_s21 + $0x618] sm:$0xff]  }
  0xa0   : > { %7789 = vmatprep.mubr.msk.bf16.mxu0 %vm635_vm2, %v8324_v14  ;;  %7921 = vmatprep.mubr.msk.bf16.mxu1 %vm635_vm2, %v8325_v15 }
  0xa7   : > { %7790 = vmatmul.mubr.msk.bf16.gmra.mrb[72].mxu0 %vm635_vm2, %v8326_v16  ;;  %7922 = vmatmul.mubr.msk.bf16.gmra.mrb[72].mxu1 %vm635_vm2, %v8327_v17  ;;  %v8369_v16 = vld [vmem:[%s8559_s21 + $0x3d0] sm:$0xff]   ;;  %v8390_v17 = vld [vmem:[%s8559_s21 + $0x428] sm:$0xff]  }
  0xa8   : > { %7793 = vmatprep.mubr.msk.bf16.mxu0 %vm635_vm2, %v8328_v18  ;;  %7925 = vmatprep.mubr.msk.bf16.mxu1 %vm635_vm2, %v8329_v19 }
  0xaf   : > { %7794 = vmatmul.mubr.msk.bf16.gmra.mrb[76].mxu0 %vm635_vm2, %v8330_v20  ;;  %7926 = vmatmul.mubr.msk.bf16.gmra.mrb[76].mxu1 %vm635_vm2, %v8331_v21  ;;  %v8370_v21 = vld [vmem:[%s8559_s21 + $0x1d8] sm:$0xff]  }
  0xb0   : > { %7797 = vmatprep.mubr.msk.bf16.mxu0 %vm635_vm2, %v8332_v22  ;;  %7929 = vmatprep.mubr.msk.bf16.mxu1 %vm635_vm2, %v8333_v23 }
  0xb7   : > { %7798 = vmatmul.mubr.msk.bf16.gmra.mrb[80].mxu0 %vm635_vm2, %v8334_v24  ;;  %7930 = vmatmul.mubr.msk.bf16.gmra.mrb[80].mxu1 %vm635_vm2, %v8335_v25 }
  0xb8   : > { %7801 = vmatprep.mubr.msk.bf16.mxu0 %vm635_vm2, %v8336_v26  ;;  %7933 = vmatprep.mubr.msk.bf16.mxu1 %vm635_vm2, %v8337_v27  ;;  %v8371_v27 = vld [vmem:[%s8559_s21 + $0x3d8] sm:$0xff]  }
  0xbf   : > { %7802 = vmatmul.mubr.msk.bf16.gmra.mrb[84].mxu0 %vm635_vm2, %v8338_v28  ;;  %7934 = vmatmul.mubr.msk.bf16.gmra.mrb[84].mxu1 %vm635_vm2, %v8339_v29  ;;  %v8372_v28 = vld [vmem:[%s8559_s21 + $0x1e0] sm:$0xff]  }
  0xc0   : > { %7805 = vmatprep.mubr.msk.bf16.mxu0 %vm635_vm2, %v8340_v30  ;;  %7937 = vmatprep.mubr.msk.bf16.mxu1 %vm635_vm2, %v8341_v31 }
  0xc7   : > { %7806 = vmatmul.mubr.msk.bf16.gmra.mrb[88].mxu0 %vm635_vm2, %v8342_v32  ;;  %7938 = vmatmul.mubr.msk.bf16.gmra.mrb[88].mxu1 %vm635_vm2, %v8343_v33  ;;  %v8373_v32 = vld [vmem:[%s8559_s21 + $0x3e0] sm:$0xff]  }
  0xc8   : > { %7809 = vmatprep.mubr.msk.bf16.mxu0 %vm635_vm2, %v8344_v34  ;;  %7941 = vmatprep.mubr.msk.bf16.mxu1 %vm635_vm2, %v8345_v35  ;;  %v8385_v35 = vld [vmem:[%s8559_s21 + $0x610] sm:$0xff]  }
  0xcf   : > { %7810 = vmatmul.mubr.msk.bf16.gmra.mrb[92].mxu0 %vm635_vm2, %v8346_v36  ;;  %7942 = vmatmul.mubr.msk.bf16.gmra.mrb[92].mxu1 %vm635_vm2, %v8347_v37 }
  0xd0   : > { %7813 = vmatprep.mubr.msk.bf16.mxu0 %vm635_vm2, %v8348_v38  ;;  %7945 = vmatprep.mubr.msk.bf16.mxu1 %vm635_vm2, %v8349_v39  ;;  %v8374_v39 = vld [vmem:[%s8559_s21 + $0x1e8] sm:$0xff]  }
  0xd7   : > { %7814 = vmatmul.mubr.msk.bf16.gmra.mrb[96].mxu0 %vm635_vm2, %v8350_v40  ;;  %7946 = vmatmul.mubr.msk.bf16.gmra.mrb[96].mxu1 %vm635_vm2, %v8351_v41 }
  0xd8   : > { %7817 = vmatprep.mubr.msk.bf16.mxu0 %vm635_vm2, %v8352_v42  ;;  %7949 = vmatprep.mubr.msk.bf16.mxu1 %vm635_vm2, %v8353_v43  ;;  %v8375_v43 = vld [vmem:[%s8559_s21 + $0x3e8] sm:$0xff]  }
  0xdf   : > { %7818 = vmatmul.mubr.msk.bf16.gmra.mrb[100].mxu0 %vm635_vm2, %v8354_v44  ;;  %7950 = vmatmul.mubr.msk.bf16.gmra.mrb[100].mxu1 %vm635_vm2, %v8355_v45  ;;  %v8376_v44 = vld [vmem:[%s8559_s21 + $0x1f0] sm:$0xff]   ;;  %v8383_v45 = vld [vmem:[%s8559_s21 + $0x608] sm:$0xff]  }
  0xe0   : > { %7821 = vmatprep.mubr.msk.bf16.mxu0 %vm635_vm2, %v8356_v46  ;;  %7953 = vmatprep.mubr.msk.bf16.mxu1 %vm635_vm2, %v8357_v47 }
  0xe7   : > { %7822 = vmatmul.mubr.msk.bf16.gmra.mrb[104].mxu0 %vm635_vm2, %v8358_v48  ;;  %7954 = vmatmul.mubr.msk.bf16.gmra.mrb[104].mxu1 %vm635_vm2, %v8359_v49  ;;  %v8377_v48 = vld [vmem:[%s8559_s21 + $0x3f0] sm:$0xff]   ;;  %v8386_v49 = vld [vmem:[%s8559_s21 + $0x418] sm:$0xff]  }
  0xe8   : > { %7825 = vmatprep.mubr.msk.bf16.mxu0 %vm635_vm2, %v8360_v50  ;;  %7957 = vmatprep.mubr.msk.bf16.mxu1 %vm635_vm2, %v8361_v51 }
  0xea   : > { %v8782_v53 = vpop.f32.mrb[0].mxu0  ;;  %v8786_v56 = vpop.f32.mrb[0].mxu1 }
  0xeb   : > { %v8788_v57 = vpop.f32.mrb[1].mxu0  ;;  %v8792_v59 = vpop.f32.mrb[1].mxu1 }
  0xec   : > { %v8794_v60 = vpop.f32.mrb[2].mxu0  ;;  %v8798_v62 = vpop.f32.mrb[2].mxu1 }
  0xed   : > { %v8800_v63 = vpop.f32.mrb[3].mxu0  ;;  %v8805_v2 = vpop.f32.mrb[3].mxu1 }
  0xef   : > { %7826 = vmatmul.mubr.msk.bf16.gmra.mrb[108].mxu0 %vm635_vm2, %v8362_v52  ;;  %7958 = vmatmul.mubr.msk.bf16.gmra.mrb[108].mxu1 %vm635_vm2, %v8363_v54 }
  0xf0   : > { %7829 = vmatprep.mubr.msk.bf16.mxu0 %vm635_vm2, %v8364_v55  ;;  %7961 = vmatprep.mubr.msk.bf16.mxu1 %vm635_vm2, %v8365_v0  ;;  %v8378_v0 = vld [vmem:[%s8559_s21 + $0x1f8] sm:$0xff]  }
  0xf2   : > { %v8814_v5 = vpop.f32.mrb[4].mxu0  ;;  %v8818_v8 = vpop.f32.mrb[4].mxu1 }
  0xf3   : > { %v8820_v9 = vpop.f32.mrb[5].mxu0  ;;  %v8824_v11 = vpop.f32.mrb[5].mxu1 }
  0xf4   : > { %v8826_v12 = vpop.f32.mrb[6].mxu0  ;;  %v8830_v14 = vpop.f32.mrb[6].mxu1 }
  0xf5   : > { %v8832_v15 = vpop.f32.mrb[7].mxu0  ;;  %v8837_v18 = vpop.f32.mrb[7].mxu1 }
  0xf7   : > { %7830 = vmatmul.mubr.msk.bf16.gmra.mrb[112].mxu0 %vm635_vm2, %v8366_v4  ;;  %7962 = vmatmul.mubr.msk.bf16.gmra.mrb[112].mxu1 %vm635_vm2, %v8367_v6 }
  0xf8   : > { %7833 = vmatprep.mubr.msk.bf16.mxu0 %vm635_vm2, %v8368_v7  ;;  %7965 = vmatprep.mubr.msk.bf16.mxu1 %vm635_vm2, %v8369_v16  ;;  %v8379_v16 = vld [vmem:[%s8559_s21 + $0x3f8] sm:$0xff]  }
  0xfa   : > { %v8845_v20 = vpop.f32.mrb[8].mxu0  ;;  %v8848_v22 = vpop.f32.mrb[8].mxu1 }
  0xfb   : > { %v8850_v23 = vpop.f32.mrb[9].mxu0  ;;  %v8854_v25 = vpop.f32.mrb[9].mxu1 }
  0xfc   : > { %v8856_v26 = vpop.f32.mrb[10].mxu0  ;;  %v8862_v30 = vpop.f32.mrb[10].mxu1 }
  0xfd   : > { %v8864_v31 = vpop.f32.mrb[11].mxu0  ;;  %v8869_v34 = vpop.f32.mrb[11].mxu1 }
  0xff   : > { %7834 = vmatmul.mubr.msk.bf16.gmra.mrb[116].mxu0 %vm635_vm2, %v8370_v21  ;;  %7966 = vmatmul.mubr.msk.bf16.gmra.mrb[116].mxu1 %vm635_vm2, %v8371_v27  ;;  %v8380_v21 = vld [vmem:[%s8559_s21 + $0x400] sm:$0xff]  }
 0x100   : > { %7837 = vmatprep.mubr.msk.bf16.mxu0 %vm635_vm2, %v8372_v28  ;;  %7969 = vmatprep.mubr.msk.bf16.mxu1 %vm635_vm2, %v8373_v32 }
 0x102   : > { %v8877_v36 = vpop.f32.mrb[12].mxu0  ;;  %v8879_v37 = vpop.f32.mrb[12].mxu1 }
 0x103   : > { %v8881_v38 = vpop.f32.mrb[13].mxu0  ;;  %v8886_v41 = vpop.f32.mrb[13].mxu1 }
 0x104   : > { %v8888_v42 = vpop.f32.mrb[14].mxu0  ;;  %v8894_v46 = vpop.f32.mrb[14].mxu1 }
 0x105   : > { %v8896_v47 = vpop.f32.mrb[15].mxu0  ;;  %v8901_v50 = vpop.f32.mrb[15].mxu1 }
 0x107   : > { %7838 = vmatmul.mubr.msk.bf16.gmra.mrb[120].mxu0 %vm635_vm2, %v8374_v39  ;;  %7970 = vmatmul.mubr.msk.bf16.gmra.mrb[120].mxu1 %vm635_vm2, %v8375_v43  ;;  %v8381_v39 = vld [vmem:[%s8559_s21 + $0x600] sm:$0xff]   ;;  %v8382_v43 = vld [vmem:[%s8559_s21 + $0x408] sm:$0xff]  }
 0x108   : > { %7841 = vmatprep.mubr.msk.bf16.mxu0 %vm635_vm2, %v8376_v44  ;;  %7973 = vmatprep.mubr.msk.bf16.mxu1 %vm635_vm2, %v8377_v48 }
 0x10a   : > { %v8909_v52 = vpop.f32.mrb[16].mxu0  ;;  %v8911_v54 = vpop.f32.mrb[16].mxu1 }
 0x10b   : > { %v8913_v55 = vpop.f32.mrb[17].mxu0  ;;  %v8918_v6 = vpop.f32.mrb[17].mxu1 }
 0x10c   : > { %v8920_v7 = vpop.f32.mrb[18].mxu0  ;;  %v8926_v28 = vpop.f32.mrb[18].mxu1 }
 0x10d   : > { %v8928_v32 = vpop.f32.mrb[19].mxu0  ;;  %v8933_v44 = vpop.f32.mrb[19].mxu1 }
 0x10f   : > { %7842 = vmatmul.mubr.msk.bf16.gmra.mrb[124].mxu0 %vm635_vm2, %v8378_v0  ;;  %7974 = vmatmul.mubr.msk.bf16.gmra.mrb[124].mxu1 %vm635_vm2, %v8379_v16  ;;  %v8384_v16 = vld [vmem:[%s8559_s21 + $0x410] sm:$0xff]  }
 0x110   : > { %7981 = vmatprep.mubr.msk.bf16.mxu0 %vm635_vm2, %v8380_v21  ;;  %8113 = vmatprep.mubr.msk.bf16.mxu1 %vm635_vm2, %v8381_v39 }
 0x112   : > { %v8941_v27 = vpop.f32.mrb[20].mxu0  ;;  %v8943_v4 = vpop.f32.mrb[20].mxu1 }
 0x113   : > { %v8945_v51 = vpop.f32.mrb[21].mxu0  ;;  %v8950_v48 = vpop.f32.mrb[21].mxu1 }
 0x114   : > { %v8952_v0 = vpop.f32.mrb[22].mxu0  ;;  %v8958_v39 = vpop.f32.mrb[22].mxu1 }
 0x115   : > { %10842 = vst [vmem:[#allocation2_spill] sm:$0xff] %v8958_v39  ;;  %v8960_v40 = vpop.f32.mrb[23].mxu0  ;;  %v8965_v33 = vpop.f32.mrb[23].mxu1 }
 0x116   : > { %10843 = vst [vmem:[#allocation3_spill] sm:$0xff] %v8960_v40  ;;  %10844 = vst [vmem:[#allocation4_spill] sm:$0xff] %v8965_v33  ;;  %v11056_v33 = vmax.f32 %v8800_v63, %v8805_v2 }
 0x117   : > { %7982 = vmatmul.mubr.msk.bf16.vlgmr.msra.gmra.mrb[128].mxu0 %vm635_vm2, %v8382_v43  ;;  %8114 = vmatmul.mubr.msk.bf16.vlgmr.msra.gmra.mrb[128].mxu1 %vm635_vm2, %v8383_v45  ;;  %v8388_v45 = vld [vmem:[%s8559_s21 + $0x420] sm:$0xff]  }
 0x118   : > { %7985 = vmatprep.mubr.msk.bf16.mxu0 %vm635_vm2, %v8384_v16  ;;  %8117 = vmatprep.mubr.msk.bf16.mxu1 %vm635_vm2, %v8385_v35 }
 0x11a   : > { %v8973_v21 = vpop.f32.mrb[24].mxu0  ;;  %v8975_v24 = vpop.f32.mrb[24].mxu1 }
 0x11b   : > { %10845 = vst [vmem:[#allocation5_spill] sm:$0xff] %v8973_v21  ;;  %10846 = vst [vmem:[#allocation6_spill] sm:$0xff] %v8975_v24  ;;  %v8977_v19 = vpop.f32.mrb[25].mxu0  ;;  %v8982_v29 = vpop.f32.mrb[25].mxu1  ;;  %v8493_v24 = vld [vmem:[%s8559_s21 + $0x7c0] sm:$0xff]  }
 0x11c   : > { %10847 = vst [vmem:[#allocation7_spill] sm:$0xff] %v8977_v19  ;;  %10848 = vst [vmem:[#allocation8_spill] sm:$0xff] %v8982_v29  ;;  %v8984_v43 = vpop.f32.mrb[26].mxu0  ;;  %v8990_v16 = vpop.f32.mrb[26].mxu1  ;;  %v11053_v19 = vmax.f32 %v8782_v53, %v8786_v56  ;;  %v11055_v53 = vmax.f32 %v8794_v60, %v8798_v62 }
 0x11d   : > { %10849 = vst [vmem:[#allocation9_spill] sm:$0xff] %v8984_v43  ;;  %10850 = vst [vmem:[#allocation10_spill] sm:$0xff] %v8990_v16  ;;  %v8992_v10 = vpop.f32.mrb[27].mxu0  ;;  %v8997_v1 = vpop.f32.mrb[27].mxu1  ;;  %v8393_v43 = vld [vmem:[%s8559_s21 + $0x630] sm:$0xff]   ;;  %v8394_v16 = vld [vmem:[%s8559_s21 + $0x438] sm:$0xff]  }
 0x11e   : > { %10851 = vst [vmem:[#allocation11_spill] sm:$0xff] %v8992_v10  ;;  %10852 = vst [vmem:[#allocation12_spill] sm:$0xff] %v8997_v1  ;;  %v8391_v1 = vld [vmem:[%s8559_s21 + $0x628] sm:$0xff]  }
 0x11f   : > { %7986 = vmatmul.mubr.msk.bf16.gmra.mrb[132].mxu0 %vm635_vm2, %v8386_v49  ;;  %8118 = vmatmul.mubr.msk.bf16.gmra.mrb[132].mxu1 %vm635_vm2, %v8387_v13  ;;  %v8392_v13 = vld [vmem:[%s8559_s21 + $0x430] sm:$0xff]  }
 0x120   : > { %7989 = vmatprep.mubr.msk.bf16.mxu0 %vm635_vm2, %v8388_v45  ;;  %8121 = vmatprep.mubr.msk.bf16.mxu1 %vm635_vm2, %v8389_v3 }
 0x122   : > { %v9005_v35 = vpop.f32.mrb[28].mxu0  ;;  %v9007_v58 = vpop.f32.mrb[28].mxu1 }
 0x123   : > { %10853 = vst [vmem:[#allocation13_spill] sm:$0xff] %v9005_v35  ;;  %10854 = vst [vmem:[#allocation14_spill] sm:$0xff] %v9007_v58  ;;  %v9009_v29 = vpop.f32.mrb[29].mxu0  ;;  %v9014_v61 = vpop.f32.mrb[29].mxu1 }
 0x124   : > { %10855 = vst [vmem:[#allocation15_spill] sm:$0xff] %v9009_v29  ;;  %10856 = vst [vmem:[#allocation16_spill] sm:$0xff] %v9014_v61  ;;  %v9016_v49 = vpop.f32.mrb[30].mxu0  ;;  %v9022_v45 = vpop.f32.mrb[30].mxu1 }
 0x125   : > { %10857 = vst [vmem:[#allocation17_spill] sm:$0xff] %v9016_v49  ;;  %10858 = vst [vmem:[#allocation18_spill] sm:$0xff] %v9022_v45  ;;  %v9024_v10 = vpop.f32.mrb[31].mxu0  ;;  %v9029_v58 = vpop.f32.mrb[31].mxu1  ;;  %v8397_v49 = vld [vmem:[%s8559_s21 + $0x640] sm:$0xff]   ;;  %v8398_v45 = vld [vmem:[%s8559_s21 + $0x448] sm:$0xff]  }
 0x126   : > { %10859 = vst [vmem:[#allocation19_spill] sm:$0xff] %v9024_v10  ;;  %10860 = vst [vmem:[#allocation20_spill] sm:$0xff] %v9029_v58  ;;  %v8395_v58 = vld [vmem:[%s8559_s21 + $0x638] sm:$0xff]  }
 0x127   : > { %7990 = vmatmul.mubr.msk.bf16.gmra.mrb[136].mxu0 %vm635_vm2, %v8390_v17  ;;  %8122 = vmatmul.mubr.msk.bf16.gmra.mrb[136].mxu1 %vm635_vm2, %v8391_v1  ;;  %v8396_v1 = vld [vmem:[%s8559_s21 + $0x440] sm:$0xff]  }
 0x128   : > { %7993 = vmatprep.mubr.msk.bf16.mxu0 %vm635_vm2, %v8392_v13  ;;  %8125 = vmatprep.mubr.msk.bf16.mxu1 %vm635_vm2, %v8393_v43 }
 0x12a   : > { %v9037_v3 = vpop.f32.mrb[32].mxu0  ;;  %v9039_v61 = vpop.f32.mrb[32].mxu1 }
 0x12b   : > { %10861 = vst [vmem:[#allocation21_spill] sm:$0xff] %v9037_v3  ;;  %10862 = vst [vmem:[#allocation22_spill] sm:$0xff] %v9039_v61  ;;  %v9041_v29 = vpop.f32.mrb[33].mxu0  ;;  %v9046_v35 = vpop.f32.mrb[33].mxu1 }
 0x12c   : > { %10863 = vst [vmem:[#allocation23_spill] sm:$0xff] %v9041_v29  ;;  %10864 = vst [vmem:[#allocation24_spill] sm:$0xff] %v9046_v35  ;;  %v9048_v17 = vpop.f32.mrb[34].mxu0  ;;  %v9054_v13 = vpop.f32.mrb[34].mxu1 }
 0x12d   : > { %10865 = vst [vmem:[#allocation25_spill] sm:$0xff] %v9048_v17  ;;  %10866 = vst [vmem:[#allocation26_spill] sm:$0xff] %v9054_v13  ;;  %v9056_v10 = vpop.f32.mrb[35].mxu0  ;;  %v9061_v61 = vpop.f32.mrb[35].mxu1  ;;  %v8401_v17 = vld [vmem:[%s8559_s21 + $0x650] sm:$0xff]   ;;  %v8402_v13 = vld [vmem:[%s8559_s21 + $0x458] sm:$0xff]  }
 0x12e   : > { %10867 = vst [vmem:[#allocation27_spill] sm:$0xff] %v9056_v10  ;;  %10868 = vst [vmem:[#allocation28_spill] sm:$0xff] %v9061_v61  ;;  %v8399_v61 = vld [vmem:[%s8559_s21 + $0x648] sm:$0xff]  }
 0x12f   : > { %7994 = vmatmul.mubr.msk.bf16.gmra.mrb[140].mxu0 %vm635_vm2, %v8394_v16  ;;  %8126 = vmatmul.mubr.msk.bf16.gmra.mrb[140].mxu1 %vm635_vm2, %v8395_v58  ;;  %v8400_v58 = vld [vmem:[%s8559_s21 + $0x450] sm:$0xff]  }
 0x130   : > { %7997 = vmatprep.mubr.msk.bf16.mxu0 %vm635_vm2, %v8396_v1  ;;  %8129 = vmatprep.mubr.msk.bf16.mxu1 %vm635_vm2, %v8397_v49 }
 0x132   : > { %v9069_v43 = vpop.f32.mrb[36].mxu0  ;;  %v9071_v35 = vpop.f32.mrb[36].mxu1 }
 0x133   : > { %10869 = vst [vmem:[#allocation29_spill] sm:$0xff] %v9069_v43  ;;  %10870 = vst [vmem:[#allocation30_spill] sm:$0xff] %v9071_v35  ;;  %v9073_v29 = vpop.f32.mrb[37].mxu0  ;;  %v9078_v3 = vpop.f32.mrb[37].mxu1 }
 0x134   : > { %10871 = vst [vmem:[#allocation31_spill] sm:$0xff] %v9073_v29  ;;  %10872 = vst [vmem:[#allocation32_spill] sm:$0xff] %v9078_v3  ;;  %v9080_v16 = vpop.f32.mrb[38].mxu0  ;;  %v9086_v1 = vpop.f32.mrb[38].mxu1 }
 0x135   : > { %10873 = vst [vmem:[#allocation33_spill] sm:$0xff] %v9080_v16  ;;  %10874 = vst [vmem:[#allocation34_spill] sm:$0xff] %v9086_v1  ;;  %v9088_v10 = vpop.f32.mrb[39].mxu0  ;;  %v9093_v35 = vpop.f32.mrb[39].mxu1  ;;  %v8405_v16 = vld [vmem:[%s8559_s21 + $0x660] sm:$0xff]   ;;  %v8406_v1 = vld [vmem:[%s8559_s21 + $0x468] sm:$0xff]  }
 0x136   : > { %10875 = vst [vmem:[#allocation35_spill] sm:$0xff] %v9088_v10  ;;  %10876 = vst [vmem:[#allocation36_spill] sm:$0xff] %v9093_v35  ;;  %v8403_v35 = vld [vmem:[%s8559_s21 + $0x658] sm:$0xff]  }
 0x137   : > { %7998 = vmatmul.mubr.msk.bf16.gmra.mrb[144].mxu0 %vm635_vm2, %v8398_v45  ;;  %8130 = vmatmul.mubr.msk.bf16.gmra.mrb[144].mxu1 %vm635_vm2, %v8399_v61  ;;  %v8404_v61 = vld [vmem:[%s8559_s21 + $0x460] sm:$0xff]  }
 0x138   : > { %8001 = vmatprep.mubr.msk.bf16.mxu0 %vm635_vm2, %v8400_v58  ;;  %8133 = vmatprep.mubr.msk.bf16.mxu1 %vm635_vm2, %v8401_v17 }
 0x13a   : > { %v9101_v49 = vpop.f32.mrb[40].mxu0  ;;  %v9103_v3 = vpop.f32.mrb[40].mxu1 }
 0x13b   : > { %10877 = vst [vmem:[#allocation37_spill] sm:$0xff] %v9101_v49  ;;  %10878 = vst [vmem:[#allocation38_spill] sm:$0xff] %v9103_v3  ;;  %v9105_v29 = vpop.f32.mrb[41].mxu0  ;;  %v9110_v43 = vpop.f32.mrb[41].mxu1 }
 0x13c   : > { %10879 = vst [vmem:[#allocation39_spill] sm:$0xff] %v9105_v29  ;;  %10880 = vst [vmem:[#allocation40_spill] sm:$0xff] %v9110_v43  ;;  %v9112_v45 = vpop.f32.mrb[42].mxu0  ;;  %v9118_v58 = vpop.f32.mrb[42].mxu1 }
 0x13d   : > { %10881 = vst [vmem:[#allocation41_spill] sm:$0xff] %v9112_v45  ;;  %10882 = vst [vmem:[#allocation42_spill] sm:$0xff] %v9118_v58  ;;  %v9120_v10 = vpop.f32.mrb[43].mxu0  ;;  %v9125_v3 = vpop.f32.mrb[43].mxu1  ;;  %v8409_v45 = vld [vmem:[%s8559_s21 + $0x670] sm:$0xff]   ;;  %v8410_v58 = vld [vmem:[%s8559_s21 + $0x478] sm:$0xff]  }
 0x13e   : > { %10883 = vst [vmem:[#allocation43_spill] sm:$0xff] %v9120_v10  ;;  %10884 = vst [vmem:[#allocation44_spill] sm:$0xff] %v9125_v3  ;;  %v8407_v3 = vld [vmem:[%s8559_s21 + $0x668] sm:$0xff]  }
 0x13f   : > { %8002 = vmatmul.mubr.msk.bf16.gmra.mrb[148].mxu0 %vm635_vm2, %v8402_v13  ;;  %8134 = vmatmul.mubr.msk.bf16.gmra.mrb[148].mxu1 %vm635_vm2, %v8403_v35  ;;  %v8408_v35 = vld [vmem:[%s8559_s21 + $0x470] sm:$0xff]  }
 0x140   : > { %8005 = vmatprep.mubr.msk.bf16.mxu0 %vm635_vm2, %v8404_v61  ;;  %8137 = vmatprep.mubr.msk.bf16.mxu1 %vm635_vm2, %v8405_v16 }
 0x142   : > { %v9133_v17 = vpop.f32.mrb[44].mxu0  ;;  %v9135_v43 = vpop.f32.mrb[44].mxu1 }
 0x143   : > { %10885 = vst [vmem:[#allocation45_spill] sm:$0xff] %v9133_v17  ;;  %10886 = vst [vmem:[#allocation46_spill] sm:$0xff] %v9135_v43  ;;  %v9137_v29 = vpop.f32.mrb[45].mxu0  ;;  %v9142_v49 = vpop.f32.mrb[45].mxu1 }
 0x144   : > { %10887 = vst [vmem:[#allocation47_spill] sm:$0xff] %v9137_v29  ;;  %10888 = vst [vmem:[#allocation48_spill] sm:$0xff] %v9142_v49  ;;  %v9144_v13 = vpop.f32.mrb[46].mxu0  ;;  %v9150_v61 = vpop.f32.mrb[46].mxu1 }
 0x145   : > { %10889 = vst [vmem:[#allocation49_spill] sm:$0xff] %v9144_v13  ;;  %10890 = vst [vmem:[#allocation50_spill] sm:$0xff] %v9150_v61  ;;  %v9152_v10 = vpop.f32.mrb[47].mxu0  ;;  %v9157_v43 = vpop.f32.mrb[47].mxu1  ;;  %v8413_v13 = vld [vmem:[%s8559_s21 + $0x680] sm:$0xff]   ;;  %v8414_v61 = vld [vmem:[%s8559_s21 + $0x488] sm:$0xff]  }
 0x146   : > { %10891 = vst [vmem:[#allocation51_spill] sm:$0xff] %v9152_v10  ;;  %10892 = vst [vmem:[#allocation52_spill] sm:$0xff] %v9157_v43  ;;  %v8411_v43 = vld [vmem:[%s8559_s21 + $0x678] sm:$0xff]  }
 0x147   : > { %8006 = vmatmul.mubr.msk.bf16.gmra.mrb[152].mxu0 %vm635_vm2, %v8406_v1  ;;  %8138 = vmatmul.mubr.msk.bf16.gmra.mrb[152].mxu1 %vm635_vm2, %v8407_v3  ;;  %v8412_v3 = vld [vmem:[%s8559_s21 + $0x480] sm:$0xff]  }
 0x148   : > { %8009 = vmatprep.mubr.msk.bf16.mxu0 %vm635_vm2, %v8408_v35  ;;  %8141 = vmatprep.mubr.msk.bf16.mxu1 %vm635_vm2, %v8409_v45 }
 0x14a   : > { %v9165_v16 = vpop.f32.mrb[48].mxu0  ;;  %v9167_v49 = vpop.f32.mrb[48].mxu1 }
 0x14b   : > { %10893 = vst [vmem:[#allocation53_spill] sm:$0xff] %v9165_v16  ;;  %10894 = vst [vmem:[#allocation54_spill] sm:$0xff] %v9167_v49  ;;  %v9169_v29 = vpop.f32.mrb[49].mxu0  ;;  %v9174_v17 = vpop.f32.mrb[49].mxu1 }
 0x14c   : > { %10895 = vst [vmem:[#allocation55_spill] sm:$0xff] %v9169_v29  ;;  %10896 = vst [vmem:[#allocation56_spill] sm:$0xff] %v9174_v17  ;;  %v9176_v1 = vpop.f32.mrb[50].mxu0  ;;  %v9182_v35 = vpop.f32.mrb[50].mxu1 }
 0x14d   : > { %10897 = vst [vmem:[#allocation57_spill] sm:$0xff] %v9176_v1  ;;  %10898 = vst [vmem:[#allocation58_spill] sm:$0xff] %v9182_v35  ;;  %v9184_v10 = vpop.f32.mrb[51].mxu0  ;;  %v9189_v49 = vpop.f32.mrb[51].mxu1  ;;  %v8417_v1 = vld [vmem:[%s8559_s21 + $0x690] sm:$0xff]   ;;  %v8418_v35 = vld [vmem:[%s8559_s21 + $0x498] sm:$0xff]  }
 0x14e   : > { %10899 = vst [vmem:[#allocation59_spill] sm:$0xff] %v9184_v10  ;;  %10900 = vst [vmem:[#allocation60_spill] sm:$0xff] %v9189_v49  ;;  %v8415_v49 = vld [vmem:[%s8559_s21 + $0x688] sm:$0xff]  }
 0x14f   : > { %8010 = vmatmul.mubr.msk.bf16.gmra.mrb[156].mxu0 %vm635_vm2, %v8410_v58  ;;  %8142 = vmatmul.mubr.msk.bf16.gmra.mrb[156].mxu1 %vm635_vm2, %v8411_v43  ;;  %v8416_v43 = vld [vmem:[%s8559_s21 + $0x490] sm:$0xff]  }
 0x150   : > { %8013 = vmatprep.mubr.msk.bf16.mxu0 %vm635_vm2, %v8412_v3  ;;  %8145 = vmatprep.mubr.msk.bf16.mxu1 %vm635_vm2, %v8413_v13 }
 0x152   : > { %v9197_v45 = vpop.f32.mrb[52].mxu0  ;;  %v9199_v17 = vpop.f32.mrb[52].mxu1 }
 0x153   : > { %10901 = vst [vmem:[#allocation61_spill] sm:$0xff] %v9197_v45  ;;  %10902 = vst [vmem:[#allocation62_spill] sm:$0xff] %v9199_v17  ;;  %v9201_v29 = vpop.f32.mrb[53].mxu0  ;;  %v9206_v16 = vpop.f32.mrb[53].mxu1 }
 0x154   : > { %10903 = vst [vmem:[#allocation63_spill] sm:$0xff] %v9201_v29  ;;  %10904 = vst [vmem:[#allocation64_spill] sm:$0xff] %v9206_v16  ;;  %v9208_v58 = vpop.f32.mrb[54].mxu0  ;;  %v9214_v3 = vpop.f32.mrb[54].mxu1 }
 0x155   : > { %10905 = vst [vmem:[#allocation65_spill] sm:$0xff] %v9208_v58  ;;  %10906 = vst [vmem:[#allocation66_spill] sm:$0xff] %v9214_v3  ;;  %v9216_v10 = vpop.f32.mrb[55].mxu0  ;;  %v9221_v17 = vpop.f32.mrb[55].mxu1  ;;  %v8421_v58 = vld [vmem:[%s8559_s21 + $0x6a0] sm:$0xff]   ;;  %v8422_v3 = vld [vmem:[%s8559_s21 + $0x4a8] sm:$0xff]  }
 0x156   : > { %10907 = vst [vmem:[#allocation67_spill] sm:$0xff] %v9216_v10  ;;  %10908 = vst [vmem:[#allocation68_spill] sm:$0xff] %v9221_v17  ;;  %v8419_v17 = vld [vmem:[%s8559_s21 + $0x698] sm:$0xff]  }
 0x157   : > { %8014 = vmatmul.mubr.msk.bf16.gmra.mrb[160].mxu0 %vm635_vm2, %v8414_v61  ;;  %8146 = vmatmul.mubr.msk.bf16.gmra.mrb[160].mxu1 %vm635_vm2, %v8415_v49  ;;  %v8420_v49 = vld [vmem:[%s8559_s21 + $0x4a0] sm:$0xff]  }
 0x158   : > { %8017 = vmatprep.mubr.msk.bf16.mxu0 %vm635_vm2, %v8416_v43  ;;  %8149 = vmatprep.mubr.msk.bf16.mxu1 %vm635_vm2, %v8417_v1 }
 0x15a   : > { %v9229_v13 = vpop.f32.mrb[56].mxu0  ;;  %v9231_v16 = vpop.f32.mrb[56].mxu1 }
 0x15b   : > { %10909 = vst [vmem:[#allocation69_spill] sm:$0xff] %v9229_v13  ;;  %10910 = vst [vmem:[#allocation70_spill] sm:$0xff] %v9231_v16  ;;  %v9233_v29 = vpop.f32.mrb[57].mxu0  ;;  %v9238_v45 = vpop.f32.mrb[57].mxu1 }
 0x15c   : > { %10911 = vst [vmem:[#allocation71_spill] sm:$0xff] %v9233_v29  ;;  %10912 = vst [vmem:[#allocation72_spill] sm:$0xff] %v9238_v45  ;;  %v9240_v61 = vpop.f32.mrb[58].mxu0  ;;  %v9246_v43 = vpop.f32.mrb[58].mxu1 }
 0x15d   : > { %10913 = vst [vmem:[#allocation73_spill] sm:$0xff] %v9240_v61  ;;  %10914 = vst [vmem:[#allocation74_spill] sm:$0xff] %v9246_v43  ;;  %v9248_v10 = vpop.f32.mrb[59].mxu0  ;;  %v9253_v16 = vpop.f32.mrb[59].mxu1  ;;  %v8425_v61 = vld [vmem:[%s8559_s21 + $0x6b0] sm:$0xff]   ;;  %v8426_v43 = vld [vmem:[%s8559_s21 + $0x4b8] sm:$0xff]  }
 0x15e   : > { %10915 = vst [vmem:[#allocation75_spill] sm:$0xff] %v9248_v10  ;;  %10916 = vst [vmem:[#allocation76_spill] sm:$0xff] %v9253_v16  ;;  %v8423_v16 = vld [vmem:[%s8559_s21 + $0x6a8] sm:$0xff]  }
 0x15f   : > { %8018 = vmatmul.mubr.msk.bf16.gmra.mrb[164].mxu0 %vm635_vm2, %v8418_v35  ;;  %8150 = vmatmul.mubr.msk.bf16.gmra.mrb[164].mxu1 %vm635_vm2, %v8419_v17  ;;  %v8424_v17 = vld [vmem:[%s8559_s21 + $0x4b0] sm:$0xff]  }
 0x160   : > { %8021 = vmatprep.mubr.msk.bf16.mxu0 %vm635_vm2, %v8420_v49  ;;  %8153 = vmatprep.mubr.msk.bf16.mxu1 %vm635_vm2, %v8421_v58 }
 0x162   : > { %v9261_v1 = vpop.f32.mrb[60].mxu0  ;;  %v9263_v45 = vpop.f32.mrb[60].mxu1 }
 0x163   : > { %10917 = vst [vmem:[#allocation77_spill] sm:$0xff] %v9261_v1  ;;  %10918 = vst [vmem:[#allocation78_spill] sm:$0xff] %v9263_v45  ;;  %v9265_v29 = vpop.f32.mrb[61].mxu0  ;;  %v9270_v13 = vpop.f32.mrb[61].mxu1 }
 0x164   : > { %10919 = vst [vmem:[#allocation79_spill] sm:$0xff] %v9265_v29  ;;  %10920 = vst [vmem:[#allocation80_spill] sm:$0xff] %v9270_v13  ;;  %v9272_v35 = vpop.f32.mrb[62].mxu0  ;;  %v9278_v49 = vpop.f32.mrb[62].mxu1 }
 0x165   : > { %10921 = vst [vmem:[#allocation81_spill] sm:$0xff] %v9272_v35  ;;  %10922 = vst [vmem:[#allocation82_spill] sm:$0xff] %v9278_v49  ;;  %v9280_v10 = vpop.f32.mrb[63].mxu0  ;;  %v9285_v45 = vpop.f32.mrb[63].mxu1  ;;  %v8429_v35 = vld [vmem:[%s8559_s21 + $0x6c0] sm:$0xff]   ;;  %v8430_v49 = vld [vmem:[%s8559_s21 + $0x4c8] sm:$0xff]  }
 0x166   : > { %10923 = vst [vmem:[#allocation83_spill] sm:$0xff] %v9280_v10  ;;  %10924 = vst [vmem:[#allocation84_spill] sm:$0xff] %v9285_v45  ;;  %v8427_v45 = vld [vmem:[%s8559_s21 + $0x6b8] sm:$0xff]  }
 0x167   : > { %8022 = vmatmul.mubr.msk.bf16.gmra.mrb[168].mxu0 %vm635_vm2, %v8422_v3  ;;  %8154 = vmatmul.mubr.msk.bf16.gmra.mrb[168].mxu1 %vm635_vm2, %v8423_v16  ;;  %v8428_v16 = vld [vmem:[%s8559_s21 + $0x4c0] sm:$0xff]  }
 0x168   : > { %8025 = vmatprep.mubr.msk.bf16.mxu0 %vm635_vm2, %v8424_v17  ;;  %8157 = vmatprep.mubr.msk.bf16.mxu1 %vm635_vm2, %v8425_v61 }
 0x16a   : > { %v9293_v58 = vpop.f32.mrb[64].mxu0  ;;  %v9295_v13 = vpop.f32.mrb[64].mxu1 }
 0x16b   : > { %10925 = vst [vmem:[#allocation85_spill] sm:$0xff] %v9293_v58  ;;  %10926 = vst [vmem:[#allocation86_spill] sm:$0xff] %v9295_v13  ;;  %v9297_v29 = vpop.f32.mrb[65].mxu0  ;;  %v9302_v1 = vpop.f32.mrb[65].mxu1 }
 0x16c   : > { %10927 = vst [vmem:[#allocation87_spill] sm:$0xff] %v9297_v29  ;;  %10928 = vst [vmem:[#allocation88_spill] sm:$0xff] %v9302_v1  ;;  %v9304_v3 = vpop.f32.mrb[66].mxu0  ;;  %v9310_v17 = vpop.f32.mrb[66].mxu1 }
 0x16d   : > { %10929 = vst [vmem:[#allocation89_spill] sm:$0xff] %v9304_v3  ;;  %10930 = vst [vmem:[#allocation90_spill] sm:$0xff] %v9310_v17  ;;  %v9312_v10 = vpop.f32.mrb[67].mxu0  ;;  %v9317_v13 = vpop.f32.mrb[67].mxu1  ;;  %v8433_v3 = vld [vmem:[%s8559_s21 + $0x6d0] sm:$0xff]   ;;  %v8434_v17 = vld [vmem:[%s8559_s21 + $0x4d8] sm:$0xff]  }
 0x16e   : > { %10931 = vst [vmem:[#allocation91_spill] sm:$0xff] %v9312_v10  ;;  %10932 = vst [vmem:[#allocation92_spill] sm:$0xff] %v9317_v13  ;;  %v8431_v13 = vld [vmem:[%s8559_s21 + $0x6c8] sm:$0xff]  }
 0x16f   : > { %8026 = vmatmul.mubr.msk.bf16.gmra.mrb[172].mxu0 %vm635_vm2, %v8426_v43  ;;  %8158 = vmatmul.mubr.msk.bf16.gmra.mrb[172].mxu1 %vm635_vm2, %v8427_v45  ;;  %v8432_v45 = vld [vmem:[%s8559_s21 + $0x4d0] sm:$0xff]  }
 0x170   : > { %8029 = vmatprep.mubr.msk.bf16.mxu0 %vm635_vm2, %v8428_v16  ;;  %8161 = vmatprep.mubr.msk.bf16.mxu1 %vm635_vm2, %v8429_v35 }
 0x172   : > { %v9325_v61 = vpop.f32.mrb[68].mxu0  ;;  %v9327_v1 = vpop.f32.mrb[68].mxu1 }
 0x173   : > { %10933 = vst [vmem:[#allocation93_spill] sm:$0xff] %v9325_v61  ;;  %10934 = vst [vmem:[#allocation94_spill] sm:$0xff] %v9327_v1  ;;  %v9329_v29 = vpop.f32.mrb[69].mxu0  ;;  %v9334_v58 = vpop.f32.mrb[69].mxu1 }
 0x174   : > { %10935 = vst [vmem:[#allocation95_spill] sm:$0xff] %v9329_v29  ;;  %10936 = vst [vmem:[#allocation96_spill] sm:$0xff] %v9334_v58  ;;  %v9336_v43 = vpop.f32.mrb[70].mxu0  ;;  %v9342_v16 = vpop.f32.mrb[70].mxu1 }
 0x175   : > { %10937 = vst [vmem:[#allocation97_spill] sm:$0xff] %v9336_v43  ;;  %10938 = vst [vmem:[#allocation98_spill] sm:$0xff] %v9342_v16  ;;  %v9344_v10 = vpop.f32.mrb[71].mxu0  ;;  %v9349_v1 = vpop.f32.mrb[71].mxu1  ;;  %v8437_v43 = vld [vmem:[%s8559_s21 + $0x6e0] sm:$0xff]   ;;  %v8438_v16 = vld [vmem:[%s8559_s21 + $0x4e8] sm:$0xff]  }
 0x176   : > { %10939 = vst [vmem:[#allocation99_spill] sm:$0xff] %v9344_v10  ;;  %10940 = vst [vmem:[#allocation100_spill] sm:$0xff] %v9349_v1  ;;  %v8435_v1 = vld [vmem:[%s8559_s21 + $0x6d8] sm:$0xff]  }
 0x177   : > { %8030 = vmatmul.mubr.msk.bf16.gmra.mrb[176].mxu0 %vm635_vm2, %v8430_v49  ;;  %8162 = vmatmul.mubr.msk.bf16.gmra.mrb[176].mxu1 %vm635_vm2, %v8431_v13  ;;  %v8436_v13 = vld [vmem:[%s8559_s21 + $0x4e0] sm:$0xff]  }
 0x178   : > { %8033 = vmatprep.mubr.msk.bf16.mxu0 %vm635_vm2, %v8432_v45  ;;  %8165 = vmatprep.mubr.msk.bf16.mxu1 %vm635_vm2, %v8433_v3 }
 0x17a   : > { %v9357_v35 = vpop.f32.mrb[72].mxu0  ;;  %v9359_v58 = vpop.f32.mrb[72].mxu1 }
 0x17b   : > { %10941 = vst [vmem:[#allocation101_spill] sm:$0xff] %v9357_v35  ;;  %10942 = vst [vmem:[#allocation102_spill] sm:$0xff] %v9359_v58  ;;  %v9361_v29 = vpop.f32.mrb[73].mxu0  ;;  %v9366_v61 = vpop.f32.mrb[73].mxu1 }
 0x17c   : > { %10943 = vst [vmem:[#allocation103_spill] sm:$0xff] %v9361_v29  ;;  %10944 = vst [vmem:[#allocation104_spill] sm:$0xff] %v9366_v61  ;;  %v9368_v49 = vpop.f32.mrb[74].mxu0  ;;  %v9374_v45 = vpop.f32.mrb[74].mxu1 }
 0x17d   : > { %10945 = vst [vmem:[#allocation105_spill] sm:$0xff] %v9368_v49  ;;  %10946 = vst [vmem:[#allocation106_spill] sm:$0xff] %v9374_v45  ;;  %v9376_v10 = vpop.f32.mrb[75].mxu0  ;;  %v9381_v58 = vpop.f32.mrb[75].mxu1  ;;  %v8441_v49 = vld [vmem:[%s8559_s21 + $0x6f0] sm:$0xff]   ;;  %v8442_v45 = vld [vmem:[%s8559_s21 + $0x4f8] sm:$0xff]  }
 0x17e   : > { %10947 = vst [vmem:[#allocation107_spill] sm:$0xff] %v9376_v10  ;;  %10948 = vst [vmem:[#allocation108_spill] sm:$0xff] %v9381_v58  ;;  %v8439_v58 = vld [vmem:[%s8559_s21 + $0x6e8] sm:$0xff]  }
 0x17f   : > { %8034 = vmatmul.mubr.msk.bf16.gmra.mrb[180].mxu0 %vm635_vm2, %v8434_v17  ;;  %8166 = vmatmul.mubr.msk.bf16.gmra.mrb[180].mxu1 %vm635_vm2, %v8435_v1  ;;  %v8440_v1 = vld [vmem:[%s8559_s21 + $0x4f0] sm:$0xff]  }
 0x180   : > { %8037 = vmatprep.mubr.msk.bf16.mxu0 %vm635_vm2, %v8436_v13  ;;  %8169 = vmatprep.mubr.msk.bf16.mxu1 %vm635_vm2, %v8437_v43 }
 0x182   : > { %v9389_v3 = vpop.f32.mrb[76].mxu0  ;;  %v9391_v61 = vpop.f32.mrb[76].mxu1 }
 0x183   : > { %10949 = vst [vmem:[#allocation109_spill] sm:$0xff] %v9389_v3  ;;  %10950 = vst [vmem:[#allocation110_spill] sm:$0xff] %v9391_v61  ;;  %v9393_v29 = vpop.f32.mrb[77].mxu0  ;;  %v9398_v35 = vpop.f32.mrb[77].mxu1 }
 0x184   : > { %10951 = vst [vmem:[#allocation111_spill] sm:$0xff] %v9393_v29  ;;  %10952 = vst [vmem:[#allocation112_spill] sm:$0xff] %v9398_v35  ;;  %v9400_v17 = vpop.f32.mrb[78].mxu0  ;;  %v9406_v13 = vpop.f32.mrb[78].mxu1 }
 0x185   : > { %10953 = vst [vmem:[#allocation113_spill] sm:$0xff] %v9400_v17  ;;  %10954 = vst [vmem:[#allocation114_spill] sm:$0xff] %v9406_v13  ;;  %v9408_v10 = vpop.f32.mrb[79].mxu0  ;;  %v9413_v61 = vpop.f32.mrb[79].mxu1  ;;  %v8445_v17 = vld [vmem:[%s8559_s21 + $0x700] sm:$0xff]   ;;  %v8446_v13 = vld [vmem:[%s8559_s21 + $0x508] sm:$0xff]  }
 0x186   : > { %10955 = vst [vmem:[#allocation115_spill] sm:$0xff] %v9408_v10  ;;  %10956 = vst [vmem:[#allocation116_spill] sm:$0xff] %v9413_v61  ;;  %v8443_v61 = vld [vmem:[%s8559_s21 + $0x6f8] sm:$0xff]  }
 0x187   : > { %8038 = vmatmul.mubr.msk.bf16.gmra.mrb[184].mxu0 %vm635_vm2, %v8438_v16  ;;  %8170 = vmatmul.mubr.msk.bf16.gmra.mrb[184].mxu1 %vm635_vm2, %v8439_v58  ;;  %v8444_v58 = vld [vmem:[%s8559_s21 + $0x500] sm:$0xff]  }
 0x188   : > { %8041 = vmatprep.mubr.msk.bf16.mxu0 %vm635_vm2, %v8440_v1  ;;  %8173 = vmatprep.mubr.msk.bf16.mxu1 %vm635_vm2, %v8441_v49 }
 0x18a   : > { %v9421_v43 = vpop.f32.mrb[80].mxu0  ;;  %v9423_v35 = vpop.f32.mrb[80].mxu1 }
 0x18b   : > { %10957 = vst [vmem:[#allocation117_spill] sm:$0xff] %v9421_v43  ;;  %10958 = vst [vmem:[#allocation118_spill] sm:$0xff] %v9423_v35  ;;  %v9425_v29 = vpop.f32.mrb[81].mxu0  ;;  %v9430_v3 = vpop.f32.mrb[81].mxu1 }
 0x18c   : > { %10959 = vst [vmem:[#allocation119_spill] sm:$0xff] %v9425_v29  ;;  %10960 = vst [vmem:[#allocation120_spill] sm:$0xff] %v9430_v3  ;;  %v9432_v16 = vpop.f32.mrb[82].mxu0  ;;  %v9438_v1 = vpop.f32.mrb[82].mxu1 }
 0x18d   : > { %10961 = vst [vmem:[#allocation121_spill] sm:$0xff] %v9432_v16  ;;  %10962 = vst [vmem:[#allocation122_spill] sm:$0xff] %v9438_v1  ;;  %v9440_v10 = vpop.f32.mrb[83].mxu0  ;;  %v9445_v35 = vpop.f32.mrb[83].mxu1  ;;  %v8449_v16 = vld [vmem:[%s8559_s21 + $0x710] sm:$0xff]   ;;  %v8450_v1 = vld [vmem:[%s8559_s21 + $0x518] sm:$0xff]  }
 0x18e   : > { %10963 = vst [vmem:[#allocation123_spill] sm:$0xff] %v9440_v10  ;;  %10964 = vst [vmem:[#allocation124_spill] sm:$0xff] %v9445_v35  ;;  %v8447_v35 = vld [vmem:[%s8559_s21 + $0x708] sm:$0xff]  }
 0x18f   : > { %8042 = vmatmul.mubr.msk.bf16.gmra.mrb[188].mxu0 %vm635_vm2, %v8442_v45  ;;  %8174 = vmatmul.mubr.msk.bf16.gmra.mrb[188].mxu1 %vm635_vm2, %v8443_v61  ;;  %v8448_v61 = vld [vmem:[%s8559_s21 + $0x510] sm:$0xff]  }
 0x190   : > { %8045 = vmatprep.mubr.msk.bf16.mxu0 %vm635_vm2, %v8444_v58  ;;  %8177 = vmatprep.mubr.msk.bf16.mxu1 %vm635_vm2, %v8445_v17 }
 0x192   : > { %v9453_v49 = vpop.f32.mrb[84].mxu0  ;;  %v9455_v3 = vpop.f32.mrb[84].mxu1 }
 0x193   : > { %10965 = vst [vmem:[#allocation125_spill] sm:$0xff] %v9453_v49  ;;  %10966 = vst [vmem:[#allocation126_spill] sm:$0xff] %v9455_v3  ;;  %v9457_v29 = vpop.f32.mrb[85].mxu0  ;;  %v9462_v43 = vpop.f32.mrb[85].mxu1 }
 0x194   : > { %10967 = vst [vmem:[#allocation127_spill] sm:$0xff] %v9457_v29  ;;  %10968 = vst [vmem:[#allocation128_spill] sm:$0xff] %v9462_v43  ;;  %v9464_v45 = vpop.f32.mrb[86].mxu0  ;;  %v9470_v58 = vpop.f32.mrb[86].mxu1 }
 0x195   : > { %10969 = vst [vmem:[#allocation129_spill] sm:$0xff] %v9464_v45  ;;  %10970 = vst [vmem:[#allocation130_spill] sm:$0xff] %v9470_v58  ;;  %v9472_v10 = vpop.f32.mrb[87].mxu0  ;;  %v9477_v3 = vpop.f32.mrb[87].mxu1  ;;  %v8453_v45 = vld [vmem:[%s8559_s21 + $0x720] sm:$0xff]   ;;  %v8454_v58 = vld [vmem:[%s8559_s21 + $0x528] sm:$0xff]  }
 0x196   : > { %10971 = vst [vmem:[#allocation131_spill] sm:$0xff] %v9472_v10  ;;  %10972 = vst [vmem:[#allocation132_spill] sm:$0xff] %v9477_v3  ;;  %v8451_v3 = vld [vmem:[%s8559_s21 + $0x718] sm:$0xff]  }
 0x197   : > { %8046 = vmatmul.mubr.msk.bf16.gmra.mrb[192].mxu0 %vm635_vm2, %v8446_v13  ;;  %8178 = vmatmul.mubr.msk.bf16.gmra.mrb[192].mxu1 %vm635_vm2, %v8447_v35  ;;  %v8452_v35 = vld [vmem:[%s8559_s21 + $0x520] sm:$0xff]  }
 0x198   : > { %8049 = vmatprep.mubr.msk.bf16.mxu0 %vm635_vm2, %v8448_v61  ;;  %8181 = vmatprep.mubr.msk.bf16.mxu1 %vm635_vm2, %v8449_v16 }
 0x19a   : > { %v9485_v17 = vpop.f32.mrb[88].mxu0  ;;  %v9487_v43 = vpop.f32.mrb[88].mxu1 }
 0x19b   : > { %10973 = vst [vmem:[#allocation133_spill] sm:$0xff] %v9485_v17  ;;  %10974 = vst [vmem:[#allocation134_spill] sm:$0xff] %v9487_v43  ;;  %v9489_v29 = vpop.f32.mrb[89].mxu0  ;;  %v9494_v49 = vpop.f32.mrb[89].mxu1 }
 0x19c   : > { %10975 = vst [vmem:[#allocation135_spill] sm:$0xff] %v9489_v29  ;;  %10976 = vst [vmem:[#allocation136_spill] sm:$0xff] %v9494_v49  ;;  %v9496_v13 = vpop.f32.mrb[90].mxu0  ;;  %v9502_v61 = vpop.f32.mrb[90].mxu1 }
 0x19d   : > { %10977 = vst [vmem:[#allocation137_spill] sm:$0xff] %v9496_v13  ;;  %10978 = vst [vmem:[#allocation138_spill] sm:$0xff] %v9502_v61  ;;  %v9504_v10 = vpop.f32.mrb[91].mxu0  ;;  %v9509_v43 = vpop.f32.mrb[91].mxu1  ;;  %v8457_v13 = vld [vmem:[%s8559_s21 + $0x730] sm:$0xff]   ;;  %v8458_v61 = vld [vmem:[%s8559_s21 + $0x538] sm:$0xff]  }
 0x19e   : > { %10979 = vst [vmem:[#allocation139_spill] sm:$0xff] %v9504_v10  ;;  %10980 = vst [vmem:[#allocation140_spill] sm:$0xff] %v9509_v43  ;;  %v8455_v43 = vld [vmem:[%s8559_s21 + $0x728] sm:$0xff]  }
 0x19f   : > { %8050 = vmatmul.mubr.msk.bf16.gmra.mrb[196].mxu0 %vm635_vm2, %v8450_v1  ;;  %8182 = vmatmul.mubr.msk.bf16.gmra.mrb[196].mxu1 %vm635_vm2, %v8451_v3  ;;  %v8456_v3 = vld [vmem:[%s8559_s21 + $0x530] sm:$0xff]  }
 0x1a0   : > { %8053 = vmatprep.mubr.msk.bf16.mxu0 %vm635_vm2, %v8452_v35  ;;  %8185 = vmatprep.mubr.msk.bf16.mxu1 %vm635_vm2, %v8453_v45 }
 0x1a2   : > { %v9517_v16 = vpop.f32.mrb[92].mxu0  ;;  %v9519_v49 = vpop.f32.mrb[92].mxu1 }
 0x1a3   : > { %10981 = vst [vmem:[#allocation141_spill] sm:$0xff] %v9517_v16  ;;  %10982 = vst [vmem:[#allocation142_spill] sm:$0xff] %v9519_v49  ;;  %v9521_v29 = vpop.f32.mrb[93].mxu0  ;;  %v9526_v17 = vpop.f32.mrb[93].mxu1 }
 0x1a4   : > { %10983 = vst [vmem:[#allocation143_spill] sm:$0xff] %v9521_v29  ;;  %10984 = vst [vmem:[#allocation144_spill] sm:$0xff] %v9526_v17  ;;  %v9528_v1 = vpop.f32.mrb[94].mxu0  ;;  %v9534_v35 = vpop.f32.mrb[94].mxu1 }
 0x1a5   : > { %10985 = vst [vmem:[#allocation145_spill] sm:$0xff] %v9528_v1  ;;  %10986 = vst [vmem:[#allocation146_spill] sm:$0xff] %v9534_v35  ;;  %v9536_v10 = vpop.f32.mrb[95].mxu0  ;;  %v9541_v49 = vpop.f32.mrb[95].mxu1  ;;  %v8461_v1 = vld [vmem:[%s8559_s21 + $0x740] sm:$0xff]   ;;  %v8462_v35 = vld [vmem:[%s8559_s21 + $0x548] sm:$0xff]  }
 0x1a6   : > { %10987 = vst [vmem:[#allocation147_spill] sm:$0xff] %v9536_v10  ;;  %10988 = vst [vmem:[#allocation148_spill] sm:$0xff] %v9541_v49  ;;  %v8459_v49 = vld [vmem:[%s8559_s21 + $0x738] sm:$0xff]  }
 0x1a7   : > { %8054 = vmatmul.mubr.msk.bf16.gmra.mrb[200].mxu0 %vm635_vm2, %v8454_v58  ;;  %8186 = vmatmul.mubr.msk.bf16.gmra.mrb[200].mxu1 %vm635_vm2, %v8455_v43  ;;  %v8460_v43 = vld [vmem:[%s8559_s21 + $0x540] sm:$0xff]  }
 0x1a8   : > { %8057 = vmatprep.mubr.msk.bf16.mxu0 %vm635_vm2, %v8456_v3  ;;  %8189 = vmatprep.mubr.msk.bf16.mxu1 %vm635_vm2, %v8457_v13 }
 0x1aa   : > { %v9549_v45 = vpop.f32.mrb[96].mxu0  ;;  %v9551_v17 = vpop.f32.mrb[96].mxu1 }
 0x1ab   : > { %10989 = vst [vmem:[#allocation149_spill] sm:$0xff] %v9549_v45  ;;  %10990 = vst [vmem:[#allocation150_spill] sm:$0xff] %v9551_v17  ;;  %v9553_v29 = vpop.f32.mrb[97].mxu0  ;;  %v9558_v16 = vpop.f32.mrb[97].mxu1 }
 0x1ac   : > { %10991 = vst [vmem:[#allocation151_spill] sm:$0xff] %v9553_v29  ;;  %10992 = vst [vmem:[#allocation152_spill] sm:$0xff] %v9558_v16  ;;  %v9560_v58 = vpop.f32.mrb[98].mxu0  ;;  %v9566_v3 = vpop.f32.mrb[98].mxu1 }
 0x1ad   : > { %10993 = vst [vmem:[#allocation153_spill] sm:$0xff] %v9560_v58  ;;  %10994 = vst [vmem:[#allocation154_spill] sm:$0xff] %v9566_v3  ;;  %v9568_v10 = vpop.f32.mrb[99].mxu0  ;;  %v9573_v17 = vpop.f32.mrb[99].mxu1  ;;  %v8465_v58 = vld [vmem:[%s8559_s21 + $0x750] sm:$0xff]   ;;  %v8466_v3 = vld [vmem:[%s8559_s21 + $0x558] sm:$0xff]  }
 0x1ae   : > { %10995 = vst [vmem:[#allocation155_spill] sm:$0xff] %v9568_v10  ;;  %10996 = vst [vmem:[#allocation156_spill] sm:$0xff] %v9573_v17  ;;  %v8463_v17 = vld [vmem:[%s8559_s21 + $0x748] sm:$0xff]  }
 0x1af   : > { %8058 = vmatmul.mubr.msk.bf16.gmra.mrb[204].mxu0 %vm635_vm2, %v8458_v61  ;;  %8190 = vmatmul.mubr.msk.bf16.gmra.mrb[204].mxu1 %vm635_vm2, %v8459_v49  ;;  %v8464_v49 = vld [vmem:[%s8559_s21 + $0x550] sm:$0xff]  }
 0x1b0   : > { %8061 = vmatprep.mubr.msk.bf16.mxu0 %vm635_vm2, %v8460_v43  ;;  %8193 = vmatprep.mubr.msk.bf16.mxu1 %vm635_vm2, %v8461_v1 }
 0x1b2   : > { %v9581_v13 = vpop.f32.mrb[100].mxu0  ;;  %v9583_v16 = vpop.f32.mrb[100].mxu1 }
 0x1b3   : > { %10997 = vst [vmem:[#allocation157_spill] sm:$0xff] %v9581_v13  ;;  %10998 = vst [vmem:[#allocation158_spill] sm:$0xff] %v9583_v16  ;;  %v9585_v29 = vpop.f32.mrb[101].mxu0  ;;  %v9590_v45 = vpop.f32.mrb[101].mxu1 }
 0x1b4   : > { %10999 = vst [vmem:[#allocation159_spill] sm:$0xff] %v9585_v29  ;;  %11000 = vst [vmem:[#allocation160_spill] sm:$0xff] %v9590_v45  ;;  %v9592_v61 = vpop.f32.mrb[102].mxu0  ;;  %v9598_v43 = vpop.f32.mrb[102].mxu1 }
 0x1b5   : > { %11001 = vst [vmem:[#allocation161_spill] sm:$0xff] %v9592_v61  ;;  %11002 = vst [vmem:[#allocation162_spill] sm:$0xff] %v9598_v43  ;;  %v9600_v10 = vpop.f32.mrb[103].mxu0  ;;  %v9605_v16 = vpop.f32.mrb[103].mxu1  ;;  %v8469_v61 = vld [vmem:[%s8559_s21 + $0x760] sm:$0xff]   ;;  %v8470_v43 = vld [vmem:[%s8559_s21 + $0x568] sm:$0xff]  }
 0x1b6   : > { %11003 = vst [vmem:[#allocation163_spill] sm:$0xff] %v9600_v10  ;;  %11004 = vst [vmem:[#allocation164_spill] sm:$0xff] %v9605_v16  ;;  %v8467_v16 = vld [vmem:[%s8559_s21 + $0x758] sm:$0xff]  }
 0x1b7   : > { %8062 = vmatmul.mubr.msk.bf16.gmra.mrb[208].mxu0 %vm635_vm2, %v8462_v35  ;;  %8194 = vmatmul.mubr.msk.bf16.gmra.mrb[208].mxu1 %vm635_vm2, %v8463_v17  ;;  %v8468_v17 = vld [vmem:[%s8559_s21 + $0x560] sm:$0xff]  }
 0x1b8   : > { %8065 = vmatprep.mubr.msk.bf16.mxu0 %vm635_vm2, %v8464_v49  ;;  %8197 = vmatprep.mubr.msk.bf16.mxu1 %vm635_vm2, %v8465_v58 }
 0x1ba   : > { %v9613_v1 = vpop.f32.mrb[104].mxu0  ;;  %v9615_v45 = vpop.f32.mrb[104].mxu1 }
 0x1bb   : > { %11005 = vst [vmem:[#allocation165_spill] sm:$0xff] %v9613_v1  ;;  %11006 = vst [vmem:[#allocation166_spill] sm:$0xff] %v9615_v45  ;;  %v9617_v29 = vpop.f32.mrb[105].mxu0  ;;  %v9622_v13 = vpop.f32.mrb[105].mxu1 }
 0x1bc   : > { %11007 = vst [vmem:[#allocation167_spill] sm:$0xff] %v9617_v29  ;;  %11008 = vst [vmem:[#allocation168_spill] sm:$0xff] %v9622_v13  ;;  %v9624_v35 = vpop.f32.mrb[106].mxu0  ;;  %v9630_v49 = vpop.f32.mrb[106].mxu1 }
 0x1bd   : > { %11009 = vst [vmem:[#allocation169_spill] sm:$0xff] %v9624_v35  ;;  %11010 = vst [vmem:[#allocation170_spill] sm:$0xff] %v9630_v49  ;;  %v9632_v10 = vpop.f32.mrb[107].mxu0  ;;  %v9637_v45 = vpop.f32.mrb[107].mxu1  ;;  %v8473_v35 = vld [vmem:[%s8559_s21 + $0x770] sm:$0xff]   ;;  %v8474_v49 = vld [vmem:[%s8559_s21 + $0x578] sm:$0xff]  }
 0x1be   : > { %11011 = vst [vmem:[#allocation171_spill] sm:$0xff] %v9632_v10  ;;  %11012 = vst [vmem:[#allocation172_spill] sm:$0xff] %v9637_v45  ;;  %v8471_v45 = vld [vmem:[%s8559_s21 + $0x768] sm:$0xff]  }
 0x1bf   : > { %8066 = vmatmul.mubr.msk.bf16.gmra.mrb[212].mxu0 %vm635_vm2, %v8466_v3  ;;  %8198 = vmatmul.mubr.msk.bf16.gmra.mrb[212].mxu1 %vm635_vm2, %v8467_v16  ;;  %v8472_v16 = vld [vmem:[%s8559_s21 + $0x570] sm:$0xff]  }
 0x1c0   : > { %8069 = vmatprep.mubr.msk.bf16.mxu0 %vm635_vm2, %v8468_v17  ;;  %8201 = vmatprep.mubr.msk.bf16.mxu1 %vm635_vm2, %v8469_v61 }
 0x1c2   : > { %v9645_v58 = vpop.f32.mrb[108].mxu0  ;;  %v9647_v13 = vpop.f32.mrb[108].mxu1 }
 0x1c3   : > { %11013 = vst [vmem:[#allocation173_spill] sm:$0xff] %v9645_v58  ;;  %11014 = vst [vmem:[#allocation174_spill] sm:$0xff] %v9647_v13  ;;  %v9649_v29 = vpop.f32.mrb[109].mxu0  ;;  %v9654_v1 = vpop.f32.mrb[109].mxu1 }
 0x1c4   : > { %11015 = vst [vmem:[#allocation175_spill] sm:$0xff] %v9649_v29  ;;  %11016 = vst [vmem:[#allocation176_spill] sm:$0xff] %v9654_v1  ;;  %v9656_v3 = vpop.f32.mrb[110].mxu0  ;;  %v9662_v17 = vpop.f32.mrb[110].mxu1 }
 0x1c5   : > { %11017 = vst [vmem:[#allocation177_spill] sm:$0xff] %v9656_v3  ;;  %11018 = vst [vmem:[#allocation178_spill] sm:$0xff] %v9662_v17  ;;  %v9664_v10 = vpop.f32.mrb[111].mxu0  ;;  %v9669_v13 = vpop.f32.mrb[111].mxu1  ;;  %v8477_v3 = vld [vmem:[%s8559_s21 + $0x780] sm:$0xff]   ;;  %v8478_v17 = vld [vmem:[%s8559_s21 + $0x588] sm:$0xff]  }
 0x1c6   : > { %11019 = vst [vmem:[#allocation179_spill] sm:$0xff] %v9664_v10  ;;  %11020 = vst [vmem:[#allocation180_spill] sm:$0xff] %v9669_v13  ;;  %v8475_v13 = vld [vmem:[%s8559_s21 + $0x778] sm:$0xff]  }
 0x1c7   : > { %8070 = vmatmul.mubr.msk.bf16.gmra.mrb[216].mxu0 %vm635_vm2, %v8470_v43  ;;  %8202 = vmatmul.mubr.msk.bf16.gmra.mrb[216].mxu1 %vm635_vm2, %v8471_v45  ;;  %v8476_v45 = vld [vmem:[%s8559_s21 + $0x580] sm:$0xff]  }
 0x1c8   : > { %8073 = vmatprep.mubr.msk.bf16.mxu0 %vm635_vm2, %v8472_v16  ;;  %8205 = vmatprep.mubr.msk.bf16.mxu1 %vm635_vm2, %v8473_v35 }
 0x1ca   : > { %v9677_v61 = vpop.f32.mrb[112].mxu0  ;;  %v9679_v1 = vpop.f32.mrb[112].mxu1 }
 0x1cb   : > { %11021 = vst [vmem:[#allocation181_spill] sm:$0xff] %v9677_v61  ;;  %11022 = vst [vmem:[#allocation182_spill] sm:$0xff] %v9679_v1  ;;  %v9681_v29 = vpop.f32.mrb[113].mxu0  ;;  %v9686_v58 = vpop.f32.mrb[113].mxu1 }
 0x1cc   : > { %11023 = vst [vmem:[#allocation183_spill] sm:$0xff] %v9681_v29  ;;  %11024 = vst [vmem:[#allocation184_spill] sm:$0xff] %v9686_v58  ;;  %v9688_v43 = vpop.f32.mrb[114].mxu0  ;;  %v9694_v16 = vpop.f32.mrb[114].mxu1 }
 0x1cd   : > { %11025 = vst [vmem:[#allocation185_spill] sm:$0xff] %v9688_v43  ;;  %11026 = vst [vmem:[#allocation186_spill] sm:$0xff] %v9694_v16  ;;  %v9696_v10 = vpop.f32.mrb[115].mxu0  ;;  %v9701_v1 = vpop.f32.mrb[115].mxu1  ;;  %v8481_v43 = vld [vmem:[%s8559_s21 + $0x790] sm:$0xff]   ;;  %v8482_v16 = vld [vmem:[%s8559_s21 + $0x598] sm:$0xff]  }
 0x1ce   : > { %11027 = vst [vmem:[#allocation187_spill] sm:$0xff] %v9696_v10  ;;  %11028 = vst [vmem:[#allocation188_spill] sm:$0xff] %v9701_v1  ;;  %v8479_v1 = vld [vmem:[%s8559_s21 + $0x788] sm:$0xff]  }
 0x1cf   : > { %8074 = vmatmul.mubr.msk.bf16.gmra.mrb[220].mxu0 %vm635_vm2, %v8474_v49  ;;  %8206 = vmatmul.mubr.msk.bf16.gmra.mrb[220].mxu1 %vm635_vm2, %v8475_v13  ;;  %v8480_v13 = vld [vmem:[%s8559_s21 + $0x590] sm:$0xff]  }
 0x1d0   : > { %8077 = vmatprep.mubr.msk.bf16.mxu0 %vm635_vm2, %v8476_v45  ;;  %8209 = vmatprep.mubr.msk.bf16.mxu1 %vm635_vm2, %v8477_v3 }
 0x1d2   : > { %v9709_v35 = vpop.f32.mrb[116].mxu0  ;;  %v9711_v58 = vpop.f32.mrb[116].mxu1 }
 0x1d3   : > { %11029 = vst [vmem:[#allocation189_spill] sm:$0xff] %v9709_v35  ;;  %11030 = vst [vmem:[#allocation190_spill] sm:$0xff] %v9711_v58  ;;  %v9713_v29 = vpop.f32.mrb[117].mxu0  ;;  %v9718_v61 = vpop.f32.mrb[117].mxu1 }
 0x1d4   : > { %11031 = vst [vmem:[#allocation191_spill] sm:$0xff] %v9713_v29  ;;  %11032 = vst [vmem:[#allocation192_spill] sm:$0xff] %v9718_v61  ;;  %v9720_v49 = vpop.f32.mrb[118].mxu0  ;;  %v9726_v45 = vpop.f32.mrb[118].mxu1 }
 0x1d5   : > { %11033 = vst [vmem:[#allocation193_spill] sm:$0xff] %v9720_v49  ;;  %11034 = vst [vmem:[#allocation194_spill] sm:$0xff] %v9726_v45  ;;  %v9728_v10 = vpop.f32.mrb[119].mxu0  ;;  %v9733_v58 = vpop.f32.mrb[119].mxu1  ;;  %v8485_v49 = vld [vmem:[%s8559_s21 + $0x7a0] sm:$0xff]   ;;  %v8486_v45 = vld [vmem:[%s8559_s21 + $0x5a8] sm:$0xff]  }
 0x1d6   : > { %11035 = vst [vmem:[#allocation195_spill] sm:$0xff] %v9728_v10  ;;  %11036 = vst [vmem:[#allocation196_spill] sm:$0xff] %v9733_v58  ;;  %v8483_v58 = vld [vmem:[%s8559_s21 + $0x798] sm:$0xff]  }
 0x1d7   : > { %8078 = vmatmul.mubr.msk.bf16.gmra.mrb[224].mxu0 %vm635_vm2, %v8478_v17  ;;  %8210 = vmatmul.mubr.msk.bf16.gmra.mrb[224].mxu1 %vm635_vm2, %v8479_v1  ;;  %v8484_v1 = vld [vmem:[%s8559_s21 + $0x5a0] sm:$0xff]  }
 0x1d8   : > { %8081 = vmatprep.mubr.msk.bf16.mxu0 %vm635_vm2, %v8480_v13  ;;  %8213 = vmatprep.mubr.msk.bf16.mxu1 %vm635_vm2, %v8481_v43 }
 0x1da   : > { %v9741_v3 = vpop.f32.mrb[120].mxu0  ;;  %v9743_v61 = vpop.f32.mrb[120].mxu1 }
 0x1db   : > { %11037 = vst [vmem:[#allocation197_spill] sm:$0xff] %v9741_v3  ;;  %11038 = vst [vmem:[#allocation198_spill] sm:$0xff] %v9743_v61  ;;  %v9745_v29 = vpop.f32.mrb[121].mxu0  ;;  %v9750_v35 = vpop.f32.mrb[121].mxu1 }
 0x1dc   : > { %11039 = vst [vmem:[#allocation199_spill] sm:$0xff] %v9745_v29  ;;  %11040 = vst [vmem:[#allocation200_spill] sm:$0xff] %v9750_v35  ;;  %v9752_v17 = vpop.f32.mrb[122].mxu0  ;;  %v9758_v13 = vpop.f32.mrb[122].mxu1 }
 0x1dd   : > { %11041 = vst [vmem:[#allocation201_spill] sm:$0xff] %v9752_v17  ;;  %11042 = vst [vmem:[#allocation202_spill] sm:$0xff] %v9758_v13  ;;  %v9760_v10 = vpop.f32.mrb[123].mxu0  ;;  %v9765_v61 = vpop.f32.mrb[123].mxu1  ;;  %v8489_v17 = vld [vmem:[%s8559_s21 + $0x7b0] sm:$0xff]  }
 0x1de   : > { %11043 = vst [vmem:[#allocation203_spill] sm:$0xff] %v9760_v10  ;;  %11044 = vst [vmem:[#allocation204_spill] sm:$0xff] %v9765_v61  ;;  %v8487_v61 = vld [vmem:[%s8559_s21 + $0x7a8] sm:$0xff]  }
 0x1df   : > { %8082 = vmatmul.mubr.msk.bf16.gmra.mrb[228].mxu0 %vm635_vm2, %v8482_v16  ;;  %8214 = vmatmul.mubr.msk.bf16.gmra.mrb[228].mxu1 %vm635_vm2, %v8483_v58  ;;  %v8488_v58 = vld [vmem:[%s8559_s21 + $0x5b0] sm:$0xff]  }
 0x1e0   : > { %8085 = vmatprep.mubr.msk.bf16.mxu0 %vm635_vm2, %v8484_v1  ;;  %8217 = vmatprep.mubr.msk.bf16.mxu1 %vm635_vm2, %v8485_v49 }
 0x1e2   : > { %v9773_v43 = vpop.f32.mrb[124].mxu0  ;;  %v9775_v35 = vpop.f32.mrb[124].mxu1 }
 0x1e3   : > { %11045 = vst [vmem:[#allocation205_spill] sm:$0xff] %v9773_v43  ;;  %11046 = vst [vmem:[#allocation206_spill] sm:$0xff] %v9775_v35  ;;  %v9777_v29 = vpop.f32.mrb[125].mxu0  ;;  %v9782_v3 = vpop.f32.mrb[125].mxu1 }
 0x1e4   : > { %11047 = vst [vmem:[#allocation207_spill] sm:$0xff] %v9777_v29  ;;  %11048 = vst [vmem:[#allocation208_spill] sm:$0xff] %v9782_v3  ;;  %v9784_v16 = vpop.f32.mrb[126].mxu0  ;;  %v9790_v1 = vpop.f32.mrb[126].mxu1  ;;  %v8490_v29 = vld [vmem:[%s8559_s21 + $0x5b8] sm:$0xff]  }
 0x1e5   : > { %11049 = vst [vmem:[#allocation209_spill] sm:$0xff] %v9784_v16  ;;  %11050 = vst [vmem:[#allocation210_spill] sm:$0xff] %v9790_v1  ;;  %v9792_v10 = vpop.f32.mrb[127].mxu0  ;;  %v9797_v13 = vpop.f32.mrb[127].mxu1 }
 0x1e6   : > { %11051 = vst [vmem:[#allocation211_spill] sm:$0xff] %v9792_v10  ;;  %11052 = vst [vmem:[#allocation212_spill] sm:$0xff] %v9797_v13  ;;  %v8491_v13 = vld [vmem:[%s8559_s21 + $0x7b8] sm:$0xff]   ;;  %v8492_v10 = vld [vmem:[%s8559_s21 + $0x5c0] sm:$0xff]  }
 0x1e7   : > { %8086 = vmatmul.mubr.msk.bf16.gmra.mrb[232].mxu0 %vm635_vm2, %v8486_v45  ;;  %8218 = vmatmul.mubr.msk.bf16.gmra.mrb[232].mxu1 %vm635_vm2, %v8487_v61  ;;  %v9812_v45 = vld [vmem:[%s10629_s2] ss:$0 sm:$0xff]  ;;  %v11054_v61 = vmax.f32 %v8788_v57, %v8792_v59 }
 0x1e8   : > { %8089 = vmatprep.mubr.msk.bf16.mxu0 %vm635_vm2, %v8488_v58  ;;  %8221 = vmatprep.mubr.msk.bf16.mxu1 %vm635_vm2, %v8489_v17 }
 0x1ea   : > { %v7983_v49 = vpop.f32.mrb[128].mxu0  ;;  %v8115_v16 = vpop.f32.mrb[128].mxu1 }
 0x1eb   : > { %v3882_v1 = vmax.f32 %v11053_v19, %v7983_v49  ;;  %v3369_v3 = vpop.f32.mrb[129].mxu0  ;;  %v4683_v17 = vpop.f32.mrb[129].mxu1 }
 0x1ec   : > { %v3880_v58 = vmax.f32 %v11054_v61, %v3369_v3  ;;  %v7984_v35 = vpop.f32.mrb[130].mxu0  ;;  %v8116_v19 = vpop.f32.mrb[130].mxu1 }
 0x1ed   : > { %v5196_v43 = vmax.f32 %v3882_v1, %v8115_v16  ;;  %v3883_v56 = vmax.f32 %v11055_v53, %v7984_v35  ;;  %v3372_v49 = vpop.f32.mrb[131].mxu0  ;;  %v4686_v39 = vpop.f32.mrb[131].mxu1  ;;  %v8494_v35 = vld [vmem:[%s8559_s21 + $0x5c8] sm:$0xff]   ;;  %v11058_v1 = vmax.f32 %v8820_v9, %v8824_v11 }
 0x1ee   : > { %v5194_v21 = vmax.f32 %v3880_v58, %v4683_v17  ;;  %v3881_v40 = vmax.f32 %v11056_v33, %v3372_v49  ;;  %v8495_v53 = vld [vmem:[%s8559_s21 + $0x7c8] sm:$0xff]  }
 0x1ef   : > { %v5331_v57 = vadd.f32 %v9812_v45, %v5196_v43  ;;  %v5197_v59 = vmax.f32 %v3883_v56, %v8116_v19  ;;  %8090 = vmatmul.mubr.msk.bf16.gmra.mrb[236].mxu0 %vm635_vm2, %v8490_v29  ;;  %8222 = vmatmul.mubr.msk.bf16.gmra.mrb[236].mxu1 %vm635_vm2, %v8491_v13  ;;  %v8496_v56 = vld [vmem:[%s8559_s21 + $0x5d0] sm:$0xff]   ;;  %v11059_v19 = vmax.f32 %v8826_v12, %v8830_v14 }
 0x1f0   : > { %v5329_v3 = vadd.f32 %v9812_v45, %v5194_v21  ;;  %v5195_v16 = vmax.f32 %v3881_v40, %v4686_v39  ;;  %8093 = vmatprep.mubr.msk.bf16.mxu0 %vm635_vm2, %v8492_v10  ;;  %8225 = vmatprep.mubr.msk.bf16.mxu1 %vm635_vm2, %v8493_v24  ;;  %v11057_v40 = vmax.f32 %v8814_v5, %v8818_v8 }
 0x1f1   : > { %v5459_v60 = vmax.f32 %v5331_v57, 0.0  ;;  %v5332_v62 = vadd.f32 %v9812_v45, %v5197_v59 }
 0x1f2   : > { %v5457_v63 = vmax.f32 %v5329_v3, 0.0  ;;  %v5330_v2 = vadd.f32 %v9812_v45, %v5195_v16  ;;  %v7987_v29 = vpop.f32.mrb[132].mxu0  ;;  %v8119_v24 = vpop.f32.mrb[132].mxu1  ;;  %v8497_v3 = vld [vmem:[%s8559_s21 + $0x7d0] sm:$0xff]   ;;  %v11060_v16 = vmax.f32 %v8832_v15, %v8837_v18 }
 0x1f3   : > { %v7323_v33 = vpack.c.bf16 %v5459_v60, %v5459_v60  ;;  %v5460_v10 = vmax.f32 %v5332_v62, 0.0  ;;  %v3886_v21 = vmax.f32 %v11057_v40, %v7987_v29  ;;  %v3385_v39 = vpop.f32.mrb[133].mxu0  ;;  %v4699_v58 = vpop.f32.mrb[133].mxu1 }
 0x1f4   : > { %v7321_v43 = vpack.c.bf16 %v5457_v63, %v5457_v63  ;;  %v5458_v13 = vmax.f32 %v5330_v2, 0.0  ;;  %v3884_v61 = vmax.f32 %v11058_v1, %v3385_v39  ;;  %v7988_v17 = vpop.f32.mrb[134].mxu0  ;;  %v8120_v57 = vpop.f32.mrb[134].mxu1 }
 0x1f5   : > { %6100 = vst.msk [vmem:[%s9837_s27 + $0x8] sm:$0xf] %vm6097_vm3, %v7323_v33  ;;  %v7324_v5 = vpack.c.bf16 %v5460_v10, %v5460_v10  ;;  %v5200_v8 = vmax.f32 %v3886_v21, %v8119_v24  ;;  %v3887_v49 = vmax.f32 %v11059_v19, %v7988_v17  ;;  %v3388_v59 = vpop.f32.mrb[135].mxu0  ;;  %v4702_v62 = vpop.f32.mrb[135].mxu1  ;;  %v11061_v24 = vmax.f32 %v8845_v20, %v8848_v22 }
 0x1f6   : > { %6098 = vst.msk [vmem:[%s9837_s27] sm:$0xf] %vm6097_vm3, %v7321_v43  ;;  %v7322_v9 = vpack.c.bf16 %v5458_v13, %v5458_v13  ;;  %v5198_v11 = vmax.f32 %v3884_v61, %v4699_v58  ;;  %v3885_v60 = vmax.f32 %v11060_v16, %v3388_v59  ;;  %v8498_v13 = vld [vmem:[%s8559_s21 + $0x5d8] sm:$0xff]   ;;  %v11062_v58 = vmax.f32 %v8850_v23, %v8854_v25 }
 0x1f7   : > { %6101 = vst.msk [vmem:[%s9837_s27 + $0xc] sm:$0xf] %vm6097_vm3, %v7324_v5  ;;  %v5335_v63 = vadd.f32 %v9812_v45, %v5200_v8  ;;  %v5201_v2 = vmax.f32 %v3887_v49, %v8120_v57  ;;  %8094 = vmatmul.mubr.msk.bf16.gmra.mrb[240].mxu0 %vm635_vm2, %v8494_v35  ;;  %8226 = vmatmul.mubr.msk.bf16.gmra.mrb[240].mxu1 %vm635_vm2, %v8495_v53  ;;  %v8499_v5 = vld [vmem:[%s8559_s21 + $0x7d8] sm:$0xff]   ;;  %v8500_v8 = vld [vmem:[%s8559_s21 + $0x5e0] sm:$0xff]  }
 0x1f8   : > { %6099 = vst.msk [vmem:[%s9837_s27 + $0x4] sm:$0xf] %vm6097_vm3, %v7322_v9  ;;  %v5333_v12 = vadd.f32 %v9812_v45, %v5198_v11  ;;  %v5199_v14 = vmax.f32 %v3885_v60, %v4702_v62  ;;  %8097 = vmatprep.mubr.msk.bf16.mxu0 %vm635_vm2, %v8496_v56  ;;  %8229 = vmatprep.mubr.msk.bf16.mxu1 %vm635_vm2, %v8497_v3  ;;  %v8501_v3 = vld [vmem:[%s8559_s21 + $0x7e0] sm:$0xff]  }
 0x1f9   : > { %v5463_v15 = vmax.f32 %v5335_v63, 0.0  ;;  %v5336_v18 = vadd.f32 %v9812_v45, %v5201_v2  ;;  %v11063_v19 = vmax.f32 %v8856_v26, %v8862_v30  ;;  %v11064_v9 = vmax.f32 %v8864_v31, %v8869_v34 }
 0x1fa   : > { %v5461_v29 = vmax.f32 %v5333_v12, 0.0  ;;  %v5334_v33 = vadd.f32 %v9812_v45, %v5199_v14  ;;  %v7991_v10 = vpop.f32.mrb[136].mxu0  ;;  %v8123_v35 = vpop.f32.mrb[136].mxu1 }
 0x1fb   : > { %v7327_v40 = vpack.c.bf16 %v5463_v15, %v5463_v15  ;;  %v5464_v21 = vmax.f32 %v5336_v18, 0.0  ;;  %v3890_v39 = vmax.f32 %v11061_v24, %v7991_v10  ;;  %v3401_v43 = vpop.f32.mrb[137].mxu0  ;;  %v4715_v53 = vpop.f32.mrb[137].mxu1  ;;  %v11065_v18 = vmax.f32 %v8877_v36, %v8879_v37 }
 0x1fc   : > { %v7325_v1 = vpack.c.bf16 %v5461_v29, %v5461_v29  ;;  %v5462_v61 = vmax.f32 %v5334_v33, 0.0  ;;  %v3888_v17 = vmax.f32 %v11062_v58, %v3401_v43  ;;  %v7992_v56 = vpop.f32.mrb[138].mxu0  ;;  %v8124_v57 = vpop.f32.mrb[138].mxu1  ;;  %v11067_v58 = vmax.f32 %v8888_v42, %v8894_v46 }
 0x1fd   : > { %6104 = vst.msk [vmem:[%s9837_s27 + $0x18] sm:$0xf] %vm6097_vm3, %v7327_v40  ;;  %v7328_v20 = vpack.c.bf16 %v5464_v21, %v5464_v21  ;;  %v5204_v22 = vmax.f32 %v3890_v39, %v8123_v35  ;;  %v3891_v49 = vmax.f32 %v11063_v19, %v7992_v56  ;;  %v3404_v59 = vpop.f32.mrb[139].mxu0  ;;  %v4718_v16 = vpop.f32.mrb[139].mxu1  ;;  %v8502_v40 = vld [vmem:[%s8559_s21 + $0x5e8] sm:$0xff]   ;;  %v11066_v39 = vmax.f32 %v8881_v38, %v8886_v41 }
 0x1fe   : > { %6102 = vst.msk [vmem:[%s9837_s27 + $0x10] sm:$0xf] %vm6097_vm3, %v7325_v1  ;;  %v7326_v23 = vpack.c.bf16 %v5462_v61, %v5462_v61  ;;  %v5202_v25 = vmax.f32 %v3888_v17, %v4715_v53  ;;  %v3889_v11 = vmax.f32 %v11064_v9, %v3404_v59  ;;  %v8503_v1 = vld [vmem:[%s8559_s21 + $0x7e8] sm:$0xff]   ;;  %v8504_v61 = vld [vmem:[%s8559_s21 + $0x5f0] sm:$0xff]   ;;  %v11069_v9 = vmax.f32 %v8909_v52, %v8911_v54 }
 0x1ff   : > { %6105 = vst.msk [vmem:[%s9837_s27 + $0x1c] sm:$0xf] %vm6097_vm3, %v7328_v20  ;;  %v5339_v60 = vadd.f32 %v9812_v45, %v5204_v22  ;;  %v5205_v62 = vmax.f32 %v3891_v49, %v8124_v57  ;;  %8098 = vmatmul.mubr.msk.bf16.gmra.mrb[244].mxu0 %vm635_vm2, %v8498_v13  ;;  %8230 = vmatmul.mubr.msk.bf16.gmra.mrb[244].mxu1 %vm635_vm2, %v8499_v5  ;;  %v8505_v5 = vld [vmem:[%s8559_s21 + $0x7f0] sm:$0xff]  }
 0x200   : > { %6103 = vst.msk [vmem:[%s9837_s27 + $0x14] sm:$0xf] %vm6097_vm3, %v7326_v23  ;;  %v5337_v26 = vadd.f32 %v9812_v45, %v5202_v25  ;;  %v5203_v30 = vmax.f32 %v3889_v11, %v4718_v16  ;;  %8101 = vmatprep.mubr.msk.bf16.mxu0 %vm635_vm2, %v8500_v8  ;;  %8233 = vmatprep.mubr.msk.bf16.mxu1 %vm635_vm2, %v8501_v3 }
 0x201   : > { %v5467_v31 = vmax.f32 %v5339_v60, 0.0  ;;  %v5340_v34 = vadd.f32 %v9812_v45, %v5205_v62  ;;  %v11068_v8 = vmax.f32 %v8896_v47, %v8901_v50  ;;  %v8506_v62 = vld [vmem:[%s8559_s21 + $0x5f8] sm:$0xff]   ;;  %v11071_v54 = vmax.f32 %v8920_v7, %v8926_v28 }
 0x202   : > { %v5465_v63 = vmax.f32 %v5337_v26, 0.0  ;;  %v5338_v2 = vadd.f32 %v9812_v45, %v5203_v30  ;;  %v7995_v12 = vpop.f32.mrb[140].mxu0  ;;  %v8127_v33 = vpop.f32.mrb[140].mxu1 }
 0x203   : > { %v7331_v14 = vpack.c.bf16 %v5467_v31, %v5467_v31  ;;  %v5468_v15 = vmax.f32 %v5340_v34, 0.0  ;;  %v3894_v29 = vmax.f32 %v11065_v18, %v7995_v12  ;;  %v3417_v10 = vpop.f32.mrb[141].mxu0  ;;  %v4731_v43 = vpop.f32.mrb[141].mxu1  ;;  %v11070_v31 = vmax.f32 %v8913_v55, %v8918_v6  ;;  %v8507_v12 = vld [vmem:[%s8559_s21 + $0x7f8] sm:$0xff]  }
 0x204   : > { %v7329_v21 = vpack.c.bf16 %v5465_v63, %v5465_v63  ;;  %v5466_v24 = vmax.f32 %v5338_v2, 0.0  ;;  %v3892_v35 = vmax.f32 %v11066_v39, %v3417_v10  ;;  %v7996_v13 = vpop.f32.mrb[142].mxu0  ;;  %v8128_v53 = vpop.f32.mrb[142].mxu1  ;;  %v11072_v6 = vmax.f32 %v8928_v32, %v8933_v44 }
 0x205   : > { %6108 = vst.msk [vmem:[%s9837_s27 + $0x28] sm:$0xf] %vm6097_vm3, %v7331_v14  ;;  %v7332_v36 = vpack.c.bf16 %v5468_v15, %v5468_v15  ;;  %v5208_v37 = vmax.f32 %v3894_v29, %v8127_v33  ;;  %v3895_v17 = vmax.f32 %v11067_v58, %v7996_v13  ;;  %v3420_v56 = vpop.f32.mrb[143].mxu0  ;;  %v4734_v22 = vpop.f32.mrb[143].mxu1 }
 0x206   : > { %6106 = vst.msk [vmem:[%s9837_s27 + $0x20] sm:$0xf] %vm6097_vm3, %v7329_v21  ;;  %v7330_v38 = vpack.c.bf16 %v5466_v24, %v5466_v24  ;;  %v5206_v41 = vmax.f32 %v3892_v35, %v4731_v43  ;;  %v3893_v20 = vmax.f32 %v11068_v8, %v3420_v56  ;;  %v11074_v56 = vmax.f32 %v8945_v51, %v8950_v48  ;;  %v11078_v51 = vld [vmem:[#allocation4_spill] sm:$0xff] }
 0x207   : > { %6109 = vst.msk [vmem:[%s9837_s27 + $0x2c] sm:$0xf] %vm6097_vm3, %v7332_v36  ;;  %v5343_v19 = vadd.f32 %v9812_v45, %v5208_v37  ;;  %v5209_v49 = vmax.f32 %v3895_v17, %v8128_v53  ;;  %8102 = vmatmul.mubr.msk.bf16.gmra.mrb[248].mxu0 %vm635_vm2, %v8502_v40  ;;  %8234 = vmatmul.mubr.msk.bf16.gmra.mrb[248].mxu1 %vm635_vm2, %v8503_v1 }
 0x208   : > { %6107 = vst.msk [vmem:[%s9837_s27 + $0x24] sm:$0xf] %vm6097_vm3, %v7330_v38  ;;  %v5341_v42 = vadd.f32 %v9812_v45, %v5206_v41  ;;  %v5207_v46 = vmax.f32 %v3893_v20, %v4734_v22  ;;  %8105 = vmatprep.mubr.msk.bf16.mxu0 %vm635_vm2, %v8504_v61  ;;  %8237 = vmatprep.mubr.msk.bf16.mxu1 %vm635_vm2, %v8505_v5  ;;  %v11075_v22 = vld [vmem:[#allocation2_spill] sm:$0xff] }
 0x209   : > { %v5471_v47 = vmax.f32 %v5343_v19, 0.0  ;;  %v5344_v50 = vadd.f32 %v9812_v45, %v5209_v49  ;;  %v11073_v61 = vmax.f32 %v8941_v27, %v8943_v4  ;;  %v11076_v4 = vmax.f32 %v8952_v0, %v11075_v22  ;;  %v11092_v22 = vld [vmem:[#allocation13_spill] sm:$0xff] }
 0x20a   : > { %v5469_v57 = vmax.f32 %v5341_v42, 0.0  ;;  %v5342_v59 = vadd.f32 %v9812_v45, %v5207_v46  ;;  %v7999_v3 = vpop.f32.mrb[144].mxu0  ;;  %v8131_v16 = vpop.f32.mrb[144].mxu1 }
 0x20b   : > { %v7335_v23 = vpack.c.bf16 %v5471_v47, %v5471_v47  ;;  %v5472_v25 = vmax.f32 %v5344_v50, 0.0  ;;  %v3898_v11 = vmax.f32 %v11069_v9, %v7999_v3  ;;  %v3433_v60 = vpop.f32.mrb[145].mxu0  ;;  %v4747_v63 = vpop.f32.mrb[145].mxu1  ;;  %v11077_v47 = vld [vmem:[#allocation3_spill] sm:$0xff] }
 0x20c   : > { %v7333_v26 = vpack.c.bf16 %v5469_v57, %v5469_v57  ;;  %v5470_v30 = vmax.f32 %v5342_v59, 0.0  ;;  %v3896_v34 = vmax.f32 %v11070_v31, %v3433_v60  ;;  %v8000_v2 = vpop.f32.mrb[146].mxu0  ;;  %v8132_v18 = vpop.f32.mrb[146].mxu1  ;;  %v11079_v48 = vmax.f32 %v11077_v47, %v11078_v51  ;;  %v11081_v31 = vld [vmem:[#allocation6_spill] sm:$0xff]  ;;  %v11095_v51 = vld [vmem:[#allocation15_spill] sm:$0xff] }
 0x20d   : > { %6112 = vst.msk [vmem:[%s9837_s27 + $0x38] sm:$0xf] %vm6097_vm3, %v7335_v23  ;;  %v7336_v14 = vpack.c.bf16 %v5472_v25, %v5472_v25  ;;  %v5212_v52 = vmax.f32 %v3898_v11, %v8131_v16  ;;  %v3899_v15 = vmax.f32 %v11071_v54, %v8000_v2  ;;  %v3436_v29 = vpop.f32.mrb[147].mxu0  ;;  %v4750_v40 = vpop.f32.mrb[147].mxu1  ;;  %v11083_v54 = vld [vmem:[#allocation7_spill] sm:$0xff] }
 0x20e   : > { %6110 = vst.msk [vmem:[%s9837_s27 + $0x30] sm:$0xf] %vm6097_vm3, %v7333_v26  ;;  %v7334_v33 = vpack.c.bf16 %v5470_v30, %v5470_v30  ;;  %v5210_v55 = vmax.f32 %v3896_v34, %v4747_v63  ;;  %v3897_v10 = vmax.f32 %v11072_v6, %v3436_v29  ;;  %v11080_v30 = vld [vmem:[#allocation5_spill] sm:$0xff] }
 0x20f   : > { %6113 = vst.msk [vmem:[%s9837_s27 + $0x3c] sm:$0xf] %vm6097_vm3, %v7336_v14  ;;  %v5347_v21 = vadd.f32 %v9812_v45, %v5212_v52  ;;  %v5213_v24 = vmax.f32 %v3899_v15, %v8132_v18  ;;  %8106 = vmatmul.mubr.msk.bf16.gmra.mrb[252].mxu0 %vm635_vm2, %v8506_v62  ;;  %8238 = vmatmul.mubr.msk.bf16.gmra.mrb[252].mxu1 %vm635_vm2, %v8507_v12  ;;  %v11084_v15 = vld [vmem:[#allocation8_spill] sm:$0xff] }
 0x210   : > { %6111 = vst.msk [vmem:[%s9837_s27 + $0x34] sm:$0xf] %vm6097_vm3, %v7334_v33  ;;  %v5345_v7 = vadd.f32 %v9812_v45, %v5210_v55  ;;  %v5211_v28 = vmax.f32 %v3897_v10, %v4750_v40  ;;  %v11082_v34 = vmax.f32 %v11080_v30, %v11081_v31  ;;  %v11085_v18 = vmax.f32 %v11083_v54, %v11084_v15  ;;  %v11086_v40 = vld [vmem:[#allocation9_spill] sm:$0xff]  ;;  %v11101_v31 = vld [vmem:[#allocation19_spill] sm:$0xff] }
 0x211   : > { %v5475_v39 = vmax.f32 %v5347_v21, 0.0  ;;  %v5348_v32 = vadd.f32 %v9812_v45, %v5213_v24  ;;  %v11087_v21 = vld [vmem:[#allocation10_spill] sm:$0xff] }
 0x212   : > { %v5473_v44 = vmax.f32 %v5345_v7, 0.0  ;;  %v5346_v35 = vadd.f32 %v9812_v45, %v5211_v28  ;;  %v8003_v43 = vpop.f32.mrb[148].mxu0  ;;  %v8135_v37 = vpop.f32.mrb[148].mxu1  ;;  %v11088_v24 = vmax.f32 %v11086_v40, %v11087_v21  ;;  %v11104_v21 = vld [vmem:[#allocation21_spill] sm:$0xff] }
 0x213   : > { %v7339_v13 = vpack.c.bf16 %v5475_v39, %v5475_v39  ;;  %v5476_v1 = vmax.f32 %v5348_v32, 0.0  ;;  %v3902_v36 = vmax.f32 %v11073_v61, %v8003_v43  ;;  %v3449_v58 = vpop.f32.mrb[149].mxu0  ;;  %v4763_v38 = vpop.f32.mrb[149].mxu1  ;;  %v11090_v43 = vld [vmem:[#allocation12_spill] sm:$0xff] }
 0x214   : > { %v7337_v17 = vpack.c.bf16 %v5473_v44, %v5473_v44  ;;  %v5474_v53 = vmax.f32 %v5346_v35, 0.0  ;;  %v3900_v5 = vmax.f32 %v11074_v56, %v3449_v58  ;;  %v8004_v41 = vpop.f32.mrb[150].mxu0  ;;  %v8136_v19 = vpop.f32.mrb[150].mxu1  ;;  %v11089_v35 = vld [vmem:[#allocation11_spill] sm:$0xff] }
 0x215   : > { %6116 = vst.msk [vmem:[%s9837_s27 + $0x48] sm:$0xf] %vm6097_vm3, %v7339_v13  ;;  %v7340_v8 = vpack.c.bf16 %v5476_v1, %v5476_v1  ;;  %v5216_v20 = vmax.f32 %v3902_v36, %v8135_v37  ;;  %v3903_v27 = vmax.f32 %v11076_v4, %v8004_v41  ;;  %v3452_v49 = vpop.f32.mrb[151].mxu0  ;;  %v4766_v57 = vpop.f32.mrb[151].mxu1  ;;  %v11091_v13 = vmax.f32 %v11089_v35, %v11090_v43  ;;  %v11093_v4 = vld [vmem:[#allocation14_spill] sm:$0xff]  ;;  %v11107_v43 = vld [vmem:[#allocation23_spill] sm:$0xff] }
 0x216   : > { %6114 = vst.msk [vmem:[%s9837_s27 + $0x40] sm:$0xf] %vm6097_vm3, %v7337_v17  ;;  %v7338_v42 = vpack.c.bf16 %v5474_v53, %v5474_v53  ;;  %v5214_v46 = vmax.f32 %v3900_v5, %v4763_v38  ;;  %v3901_v50 = vmax.f32 %v11079_v48, %v3452_v49  ;;  %v11096_v48 = vld [vmem:[#allocation16_spill] sm:$0xff] }
 0x217   : > { %6117 = vst.msk [vmem:[%s9837_s27 + $0x4c] sm:$0xf] %vm6097_vm3, %v7340_v8  ;;  %v5351_v59 = vadd.f32 %v9812_v45, %v5216_v20  ;;  %v5217_v3 = vmax.f32 %v3903_v27, %v8136_v19  ;;  %v11094_v27 = vmax.f32 %v11092_v22, %v11093_v4  ;;  %v11113_v4 = vld [vmem:[#allocation27_spill] sm:$0xff] }
 0x218   : > { %6115 = vst.msk [vmem:[%s9837_s27 + $0x44] sm:$0xf] %vm6097_vm3, %v7338_v42  ;;  %v5349_v0 = vadd.f32 %v9812_v45, %v5214_v46  ;;  %v5215_v23 = vmax.f32 %v3901_v50, %v4766_v57  ;;  %v11097_v50 = vmax.f32 %v11095_v51, %v11096_v48 }
 0x219   : > { %v5479_v25 = vmax.f32 %v5351_v59, 0.0  ;;  %v5352_v9 = vadd.f32 %v9812_v45, %v5217_v3 }
 0x21a   : > { %v5477_v11 = vmax.f32 %v5349_v0, 0.0  ;;  %v5350_v16 = vadd.f32 %v9812_v45, %v5215_v23  ;;  %v8007_v60 = vpop.f32.mrb[152].mxu0  ;;  %v8139_v2 = vpop.f32.mrb[152].mxu1 }
 0x21b   : > { %v7343_v62 = vpack.c.bf16 %v5479_v25, %v5479_v25  ;;  %v5480_v26 = vmax.f32 %v5352_v9, 0.0  ;;  %v3906_v63 = vmax.f32 %v11082_v34, %v8007_v60  ;;  %v3465_v12 = vpop.f32.mrb[153].mxu0  ;;  %v4779_v33 = vpop.f32.mrb[153].mxu1  ;;  %v11098_v25 = vld [vmem:[#allocation17_spill] sm:$0xff]  ;;  %v11099_v9 = vld [vmem:[#allocation18_spill] sm:$0xff]  ;;  %v11102_v34 = vld [vmem:[#allocation20_spill] sm:$0xff] }
 0x21c   : > { %v7341_v14 = vpack.c.bf16 %v5477_v11, %v5477_v11  ;;  %v5478_v52 = vmax.f32 %v5350_v16, 0.0  ;;  %v3904_v29 = vmax.f32 %v11085_v18, %v3465_v12  ;;  %v8008_v55 = vpop.f32.mrb[154].mxu0  ;;  %v8140_v28 = vpop.f32.mrb[154].mxu1  ;;  %v11100_v11 = vmax.f32 %v11098_v25, %v11099_v9  ;;  %v11116_v9 = vld [vmem:[#allocation29_spill] sm:$0xff] }
 0x21d   : > { %6120 = vst.msk [vmem:[%s9837_s27 + $0x58] sm:$0xf] %vm6097_vm3, %v7343_v62  ;;  %v7344_v6 = vpack.c.bf16 %v5480_v26, %v5480_v26  ;;  %v5220_v10 = vmax.f32 %v3906_v63, %v8139_v2  ;;  %v3907_v7 = vmax.f32 %v11088_v24, %v8008_v55  ;;  %v3468_v39 = vpop.f32.mrb[155].mxu0  ;;  %v4782_v61 = vpop.f32.mrb[155].mxu1  ;;  %v11103_v63 = vmax.f32 %v11101_v31, %v11102_v34  ;;  %v11105_v24 = vld [vmem:[#allocation22_spill] sm:$0xff]  ;;  %v11119_v34 = vld [vmem:[#allocation31_spill] sm:$0xff] }
 0x21e   : > { %6118 = vst.msk [vmem:[%s9837_s27 + $0x50] sm:$0xf] %vm6097_vm3, %v7341_v14  ;;  %v7342_v32 = vpack.c.bf16 %v5478_v52, %v5478_v52  ;;  %v5218_v44 = vmax.f32 %v3904_v29, %v4779_v33  ;;  %v3905_v1 = vmax.f32 %v11091_v13, %v3468_v39  ;;  %v11108_v13 = vld [vmem:[#allocation24_spill] sm:$0xff] }
 0x21f   : > { %6121 = vst.msk [vmem:[%s9837_s27 + $0x5c] sm:$0xf] %vm6097_vm3, %v7344_v6  ;;  %v5355_v36 = vadd.f32 %v9812_v45, %v5220_v10  ;;  %v5221_v37 = vmax.f32 %v3907_v7, %v8140_v28  ;;  %v11106_v7 = vmax.f32 %v11104_v21, %v11105_v24  ;;  %v11125_v24 = vld [vmem:[#allocation35_spill] sm:$0xff] }
 0x220   : > { %6119 = vst.msk [vmem:[%s9837_s27 + $0x54] sm:$0xf] %vm6097_vm3, %v7342_v32  ;;  %v5353_v58 = vadd.f32 %v9812_v45, %v5218_v44  ;;  %v5219_v17 = vmax.f32 %v3905_v1, %v4782_v61  ;;  %v11109_v1 = vmax.f32 %v11107_v43, %v11108_v13 }
 0x221   : > { %v5483_v53 = vmax.f32 %v5355_v36, 0.0  ;;  %v5356_v56 = vadd.f32 %v9812_v45, %v5221_v37 }
 0x222   : > { %v5481_v5 = vmax.f32 %v5353_v58, 0.0  ;;  %v5354_v38 = vadd.f32 %v9812_v45, %v5219_v17  ;;  %v8011_v41 = vpop.f32.mrb[156].mxu0  ;;  %v8143_v49 = vpop.f32.mrb[156].mxu1 }
 0x223   : > { %v7347_v8 = vpack.c.bf16 %v5483_v53, %v5483_v53  ;;  %v5484_v20 = vmax.f32 %v5356_v56, 0.0  ;;  %v3910_v19 = vmax.f32 %v11094_v27, %v8011_v41  ;;  %v3481_v42 = vpop.f32.mrb[157].mxu0  ;;  %v4795_v59 = vpop.f32.mrb[157].mxu1  ;;  %v11110_v53 = vld [vmem:[#allocation25_spill] sm:$0xff]  ;;  %v11111_v56 = vld [vmem:[#allocation26_spill] sm:$0xff]  ;;  %v11114_v27 = vld [vmem:[#allocation28_spill] sm:$0xff] }
 0x224   : > { %v7345_v46 = vpack.c.bf16 %v5481_v5, %v5481_v5  ;;  %v5482_v47 = vmax.f32 %v5354_v38, 0.0  ;;  %v3908_v57 = vmax.f32 %v11097_v50, %v3481_v42  ;;  %v8012_v3 = vpop.f32.mrb[158].mxu0  ;;  %v8144_v60 = vpop.f32.mrb[158].mxu1  ;;  %v11112_v5 = vmax.f32 %v11110_v53, %v11111_v56  ;;  %v11128_v56 = vld [vmem:[#allocation37_spill] sm:$0xff] }
 0x225   : > { %6124 = vst.msk [vmem:[%s9837_s27 + $0x68] sm:$0xf] %vm6097_vm3, %v7347_v8  ;;  %v7348_v0 = vpack.c.bf16 %v5484_v20, %v5484_v20  ;;  %v5224_v23 = vmax.f32 %v3910_v19, %v8143_v49  ;;  %v3911_v16 = vmax.f32 %v11100_v11, %v8012_v3  ;;  %v3484_v62 = vpop.f32.mrb[159].mxu0  ;;  %v4798_v12 = vpop.f32.mrb[159].mxu1  ;;  %v11115_v19 = vmax.f32 %v11113_v4, %v11114_v27  ;;  %v11117_v11 = vld [vmem:[#allocation30_spill] sm:$0xff]  ;;  %v11131_v27 = vld [vmem:[#allocation39_spill] sm:$0xff] }
 0x226   : > { %6122 = vst.msk [vmem:[%s9837_s27 + $0x60] sm:$0xf] %vm6097_vm3, %v7345_v46  ;;  %v7346_v26 = vpack.c.bf16 %v5482_v47, %v5482_v47  ;;  %v5222_v30 = vmax.f32 %v3908_v57, %v4795_v59  ;;  %v3909_v2 = vmax.f32 %v11103_v63, %v3484_v62  ;;  %v11120_v63 = vld [vmem:[#allocation32_spill] sm:$0xff] }
 0x227   : > { %6125 = vst.msk [vmem:[%s9837_s27 + $0x6c] sm:$0xf] %vm6097_vm3, %v7348_v0  ;;  %v5359_v14 = vadd.f32 %v9812_v45, %v5224_v23  ;;  %v5225_v52 = vmax.f32 %v3911_v16, %v8144_v60  ;;  %v11118_v16 = vmax.f32 %v11116_v9, %v11117_v11  ;;  %v11137_v11 = vld [vmem:[#allocation43_spill] sm:$0xff] }
 0x228   : > { %6123 = vst.msk [vmem:[%s9837_s27 + $0x64] sm:$0xf] %vm6097_vm3, %v7346_v26  ;;  %v5357_v54 = vadd.f32 %v9812_v45, %v5222_v30  ;;  %v5223_v15 = vmax.f32 %v3909_v2, %v4798_v12  ;;  %v11121_v2 = vmax.f32 %v11119_v34, %v11120_v63 }
 0x229   : > { %v5487_v18 = vmax.f32 %v5359_v14, 0.0  ;;  %v5360_v29 = vadd.f32 %v9812_v45, %v5225_v52 }
 0x22a   : > { %v5485_v33 = vmax.f32 %v5357_v54, 0.0  ;;  %v5358_v55 = vadd.f32 %v9812_v45, %v5223_v15  ;;  %v8015_v6 = vpop.f32.mrb[160].mxu0  ;;  %v8147_v39 = vpop.f32.mrb[160].mxu1 }
 0x22b   : > { %v7351_v10 = vpack.c.bf16 %v5487_v18, %v5487_v18  ;;  %v5488_v40 = vmax.f32 %v5360_v29, 0.0  ;;  %v3914_v28 = vmax.f32 %v11106_v7, %v8015_v6  ;;  %v3497_v32 = vpop.f32.mrb[161].mxu0  ;;  %v4811_v36 = vpop.f32.mrb[161].mxu1  ;;  %v11122_v18 = vld [vmem:[#allocation33_spill] sm:$0xff]  ;;  %v11123_v29 = vld [vmem:[#allocation34_spill] sm:$0xff]  ;;  %v11126_v7 = vld [vmem:[#allocation36_spill] sm:$0xff] }
 0x22c   : > { %v7349_v44 = vpack.c.bf16 %v5485_v33, %v5485_v33  ;;  %v5486_v35 = vmax.f32 %v5358_v55, 0.0  ;;  %v3912_v61 = vmax.f32 %v11109_v1, %v3497_v32  ;;  %v8016_v37 = vpop.f32.mrb[162].mxu0  ;;  %v8148_v41 = vpop.f32.mrb[162].mxu1  ;;  %v11124_v33 = vmax.f32 %v11122_v18, %v11123_v29  ;;  %v11140_v29 = vld [vmem:[#allocation45_spill] sm:$0xff] }
 0x22d   : > { %6128 = vst.msk [vmem:[%s9837_s27 + $0x78] sm:$0xf] %vm6097_vm3, %v7351_v10  ;;  %v7352_v58 = vpack.c.bf16 %v5488_v40, %v5488_v40  ;;  %v5228_v17 = vmax.f32 %v3914_v28, %v8147_v39  ;;  %v3915_v38 = vmax.f32 %v11112_v5, %v8016_v37  ;;  %v3500_v8 = vpop.f32.mrb[163].mxu0  ;;  %v4814_v42 = vpop.f32.mrb[163].mxu1  ;;  %v11127_v28 = vmax.f32 %v11125_v24, %v11126_v7  ;;  %v11129_v5 = vld [vmem:[#allocation38_spill] sm:$0xff]  ;;  %v11143_v7 = vld [vmem:[#allocation47_spill] sm:$0xff] }
 0x22e   : > { %6126 = vst.msk [vmem:[%s9837_s27 + $0x70] sm:$0xf] %vm6097_vm3, %v7349_v44  ;;  %v7350_v20 = vpack.c.bf16 %v5486_v35, %v5486_v35  ;;  %v5226_v22 = vmax.f32 %v3912_v61, %v4811_v36  ;;  %v3913_v49 = vmax.f32 %v11115_v19, %v3500_v8  ;;  %v11132_v19 = vld [vmem:[#allocation40_spill] sm:$0xff] }
 0x22f   : > { %6129 = vst.msk [vmem:[%s9837_s27 + $0x7c] sm:$0xf] %vm6097_vm3, %v7352_v58  ;;  %v5363_v46 = vadd.f32 %v9812_v45, %v5228_v17  ;;  %v5229_v47 = vmax.f32 %v3915_v38, %v8148_v41  ;;  %v11130_v38 = vmax.f32 %v11128_v56, %v11129_v5  ;;  %v11149_v5 = vld [vmem:[#allocation51_spill] sm:$0xff] }
 0x230   : > { %6127 = vst.msk [vmem:[%s9837_s27 + $0x74] sm:$0xf] %vm6097_vm3, %v7350_v20  ;;  %v5361_v51 = vadd.f32 %v9812_v45, %v5226_v22  ;;  %v5227_v48 = vmax.f32 %v3913_v49, %v4814_v42  ;;  %v11133_v49 = vmax.f32 %v11131_v27, %v11132_v19 }
 0x231   : > { %v5491_v50 = vmax.f32 %v5363_v46, 0.0  ;;  %v5364_v57 = vadd.f32 %v9812_v45, %v5229_v47 }
 0x232   : > { %v5489_v59 = vmax.f32 %v5361_v51, 0.0  ;;  %v5362_v3 = vadd.f32 %v9812_v45, %v5227_v48  ;;  %v8019_v0 = vpop.f32.mrb[164].mxu0  ;;  %v8151_v62 = vpop.f32.mrb[164].mxu1 }
 0x233   : > { %v7355_v23 = vpack.c.bf16 %v5491_v50, %v5491_v50  ;;  %v5492_v25 = vmax.f32 %v5364_v57, 0.0  ;;  %v3918_v60 = vmax.f32 %v11118_v16, %v8019_v0  ;;  %v3513_v26 = vpop.f32.mrb[165].mxu0  ;;  %v4827_v14 = vpop.f32.mrb[165].mxu1  ;;  %v11134_v50 = vld [vmem:[#allocation41_spill] sm:$0xff]  ;;  %v11135_v57 = vld [vmem:[#allocation42_spill] sm:$0xff]  ;;  %v11138_v16 = vld [vmem:[#allocation44_spill] sm:$0xff] }
 0x234   : > { %v7353_v30 = vpack.c.bf16 %v5489_v59, %v5489_v59  ;;  %v5490_v31 = vmax.f32 %v5362_v3, 0.0  ;;  %v3916_v12 = vmax.f32 %v11121_v2, %v3513_v26  ;;  %v8020_v52 = vpop.f32.mrb[166].mxu0  ;;  %v8152_v6 = vpop.f32.mrb[166].mxu1  ;;  %v11136_v59 = vmax.f32 %v11134_v50, %v11135_v57  ;;  %v11152_v57 = vld [vmem:[#allocation53_spill] sm:$0xff] }
 0x235   : > { %6132 = vst.msk [vmem:[%s9837_s27 + $0x88] sm:$0xf] %vm6097_vm3, %v7355_v23  ;;  %v7356_v54 = vpack.c.bf16 %v5492_v25, %v5492_v25  ;;  %v5232_v15 = vmax.f32 %v3918_v60, %v8151_v62  ;;  %v3919_v55 = vmax.f32 %v11124_v33, %v8020_v52  ;;  %v3516_v10 = vpop.f32.mrb[167].mxu0  ;;  %v4830_v32 = vpop.f32.mrb[167].mxu1  ;;  %v11139_v60 = vmax.f32 %v11137_v11, %v11138_v16  ;;  %v11141_v33 = vld [vmem:[#allocation46_spill] sm:$0xff]  ;;  %v11155_v16 = vld [vmem:[#allocation55_spill] sm:$0xff] }
 0x236   : > { %6130 = vst.msk [vmem:[%s9837_s27 + $0x80] sm:$0xf] %vm6097_vm3, %v7353_v30  ;;  %v7354_v40 = vpack.c.bf16 %v5490_v31, %v5490_v31  ;;  %v5230_v21 = vmax.f32 %v3916_v12, %v4827_v14  ;;  %v3917_v39 = vmax.f32 %v11127_v28, %v3516_v10  ;;  %v11144_v28 = vld [vmem:[#allocation48_spill] sm:$0xff] }
 0x237   : > { %6133 = vst.msk [vmem:[%s9837_s27 + $0x8c] sm:$0xf] %vm6097_vm3, %v7356_v54  ;;  %v5367_v44 = vadd.f32 %v9812_v45, %v5232_v15  ;;  %v5233_v35 = vmax.f32 %v3919_v55, %v8152_v6  ;;  %v11142_v55 = vmax.f32 %v11140_v29, %v11141_v33  ;;  %v11161_v33 = vld [vmem:[#allocation59_spill] sm:$0xff] }
 0x238   : > { %6131 = vst.msk [vmem:[%s9837_s27 + $0x84] sm:$0xf] %vm6097_vm3, %v7354_v40  ;;  %v5365_v43 = vadd.f32 %v9812_v45, %v5230_v21  ;;  %v5231_v13 = vmax.f32 %v3917_v39, %v4830_v32  ;;  %v11145_v39 = vmax.f32 %v11143_v7, %v11144_v28 }
 0x239   : > { %v5495_v1 = vmax.f32 %v5367_v44, 0.0  ;;  %v5368_v61 = vadd.f32 %v9812_v45, %v5233_v35 }
 0x23a   : > { %v5493_v36 = vmax.f32 %v5365_v43, 0.0  ;;  %v5366_v37 = vadd.f32 %v9812_v45, %v5231_v13  ;;  %v8023_v58 = vpop.f32.mrb[168].mxu0  ;;  %v8155_v8 = vpop.f32.mrb[168].mxu1 }
 0x23b   : > { %v7359_v17 = vpack.c.bf16 %v5495_v1, %v5495_v1  ;;  %v5496_v53 = vmax.f32 %v5368_v61, 0.0  ;;  %v3922_v41 = vmax.f32 %v11130_v38, %v8023_v58  ;;  %v3529_v20 = vpop.f32.mrb[169].mxu0  ;;  %v4843_v46 = vpop.f32.mrb[169].mxu1  ;;  %v11146_v1 = vld [vmem:[#allocation49_spill] sm:$0xff]  ;;  %v11147_v61 = vld [vmem:[#allocation50_spill] sm:$0xff]  ;;  %v11150_v38 = vld [vmem:[#allocation52_spill] sm:$0xff] }
 0x23c   : > { %v7357_v22 = vpack.c.bf16 %v5493_v36, %v5493_v36  ;;  %v5494_v4 = vmax.f32 %v5366_v37, 0.0  ;;  %v3920_v42 = vmax.f32 %v11133_v49, %v3529_v20  ;;  %v8024_v47 = vpop.f32.mrb[170].mxu0  ;;  %v8156_v0 = vpop.f32.mrb[170].mxu1  ;;  %v11148_v36 = vmax.f32 %v11146_v1, %v11147_v61  ;;  %v11164_v61 = vld [vmem:[#allocation61_spill] sm:$0xff] }
 0x23d   : > { %6136 = vst.msk [vmem:[%s9837_s27 + $0x98] sm:$0xf] %vm6097_vm3, %v7359_v17  ;;  %v7360_v51 = vpack.c.bf16 %v5496_v53, %v5496_v53  ;;  %v5236_v48 = vmax.f32 %v3922_v41, %v8155_v8  ;;  %v3923_v3 = vmax.f32 %v11136_v59, %v8024_v47  ;;  %v3532_v23 = vpop.f32.mrb[171].mxu0  ;;  %v4846_v26 = vpop.f32.mrb[171].mxu1  ;;  %v11151_v41 = vmax.f32 %v11149_v5, %v11150_v38  ;;  %v11153_v59 = vld [vmem:[#allocation54_spill] sm:$0xff]  ;;  %v11167_v38 = vld [vmem:[#allocation63_spill] sm:$0xff] }
 0x23e   : > { %6134 = vst.msk [vmem:[%s9837_s27 + $0x90] sm:$0xf] %vm6097_vm3, %v7357_v22  ;;  %v7358_v25 = vpack.c.bf16 %v5494_v4, %v5494_v4  ;;  %v5234_v9 = vmax.f32 %v3920_v42, %v4843_v46  ;;  %v3921_v62 = vmax.f32 %v11139_v60, %v3532_v23  ;;  %v11156_v60 = vld [vmem:[#allocation56_spill] sm:$0xff] }
 0x23f   : > { %6137 = vst.msk [vmem:[%s9837_s27 + $0x9c] sm:$0xf] %vm6097_vm3, %v7360_v51  ;;  %v5371_v30 = vadd.f32 %v9812_v45, %v5236_v48  ;;  %v5237_v31 = vmax.f32 %v3923_v3, %v8156_v0  ;;  %v11154_v3 = vmax.f32 %v11152_v57, %v11153_v59  ;;  %v11173_v59 = vld [vmem:[#allocation67_spill] sm:$0xff] }
 0x240   : > { %6135 = vst.msk [vmem:[%s9837_s27 + $0x94] sm:$0xf] %vm6097_vm3, %v7358_v25  ;;  %v5369_v34 = vadd.f32 %v9812_v45, %v5234_v9  ;;  %v5235_v63 = vmax.f32 %v3921_v62, %v4846_v26  ;;  %v11157_v62 = vmax.f32 %v11155_v16, %v11156_v60 }
 0x241   : > { %v5499_v2 = vmax.f32 %v5371_v30, 0.0  ;;  %v5372_v12 = vadd.f32 %v9812_v45, %v5237_v31 }
 0x242   : > { %v5497_v14 = vmax.f32 %v5369_v34, 0.0  ;;  %v5370_v52 = vadd.f32 %v9812_v45, %v5235_v63  ;;  %v8027_v54 = vpop.f32.mrb[172].mxu0  ;;  %v8159_v10 = vpop.f32.mrb[172].mxu1 }
 0x243   : > { %v7363_v15 = vpack.c.bf16 %v5499_v2, %v5499_v2  ;;  %v5500_v18 = vmax.f32 %v5372_v12, 0.0  ;;  %v3926_v6 = vmax.f32 %v11142_v55, %v8027_v54  ;;  %v3545_v40 = vpop.f32.mrb[173].mxu0  ;;  %v4859_v44 = vpop.f32.mrb[173].mxu1  ;;  %v11158_v2 = vld [vmem:[#allocation57_spill] sm:$0xff]  ;;  %v11159_v12 = vld [vmem:[#allocation58_spill] sm:$0xff]  ;;  %v11162_v55 = vld [vmem:[#allocation60_spill] sm:$0xff] }
 0x244   : > { %v7361_v21 = vpack.c.bf16 %v5497_v14, %v5497_v14  ;;  %v5498_v24 = vmax.f32 %v5370_v52, 0.0  ;;  %v3924_v32 = vmax.f32 %v11145_v39, %v3545_v40  ;;  %v8028_v35 = vpop.f32.mrb[174].mxu0  ;;  %v8160_v58 = vpop.f32.mrb[174].mxu1  ;;  %v11160_v14 = vmax.f32 %v11158_v2, %v11159_v12  ;;  %v11176_v12 = vld [vmem:[#allocation69_spill] sm:$0xff] }
 0x245   : > { %6140 = vst.msk [vmem:[%s9837_s27 + $0xa8] sm:$0xf] %vm6097_vm3, %v7363_v15  ;;  %v7364_v43 = vpack.c.bf16 %v5500_v18, %v5500_v18  ;;  %v5240_v13 = vmax.f32 %v3926_v6, %v8159_v10  ;;  %v3927_v37 = vmax.f32 %v11148_v36, %v8028_v35  ;;  %v3548_v17 = vpop.f32.mrb[175].mxu0  ;;  %v4862_v20 = vpop.f32.mrb[175].mxu1  ;;  %v11163_v6 = vmax.f32 %v11161_v33, %v11162_v55  ;;  %v11165_v36 = vld [vmem:[#allocation62_spill] sm:$0xff]  ;;  %v11179_v55 = vld [vmem:[#allocation71_spill] sm:$0xff] }
 0x246   : > { %6138 = vst.msk [vmem:[%s9837_s27 + $0xa0] sm:$0xf] %vm6097_vm3, %v7361_v21  ;;  %v7362_v53 = vpack.c.bf16 %v5498_v24, %v5498_v24  ;;  %v5238_v56 = vmax.f32 %v3924_v32, %v4859_v44  ;;  %v3925_v8 = vmax.f32 %v11151_v41, %v3548_v17  ;;  %v11168_v41 = vld [vmem:[#allocation64_spill] sm:$0xff] }
 0x247   : > { %6141 = vst.msk [vmem:[%s9837_s27 + $0xac] sm:$0xf] %vm6097_vm3, %v7364_v43  ;;  %v5375_v22 = vadd.f32 %v9812_v45, %v5240_v13  ;;  %v5241_v4 = vmax.f32 %v3927_v37, %v8160_v58  ;;  %v11166_v37 = vmax.f32 %v11164_v61, %v11165_v36  ;;  %v11185_v36 = vld [vmem:[#allocation75_spill] sm:$0xff] }
 0x248   : > { %6139 = vst.msk [vmem:[%s9837_s27 + $0xa4] sm:$0xf] %vm6097_vm3, %v7362_v53  ;;  %v5373_v27 = vadd.f32 %v9812_v45, %v5238_v56  ;;  %v5239_v19 = vmax.f32 %v3925_v8, %v4862_v20  ;;  %v11169_v8 = vmax.f32 %v11167_v38, %v11168_v41 }
 0x249   : > { %v5503_v49 = vmax.f32 %v5375_v22, 0.0  ;;  %v5376_v42 = vadd.f32 %v9812_v45, %v5241_v4 }
 0x24a   : > { %v5501_v46 = vmax.f32 %v5373_v27, 0.0  ;;  %v5374_v47 = vadd.f32 %v9812_v45, %v5239_v19  ;;  %v8031_v51 = vpop.f32.mrb[176].mxu0  ;;  %v8163_v23 = vpop.f32.mrb[176].mxu1 }
 0x24b   : > { %v7367_v48 = vpack.c.bf16 %v5503_v49, %v5503_v49  ;;  %v5504_v50 = vmax.f32 %v5376_v42, 0.0  ;;  %v3930_v0 = vmax.f32 %v11154_v3, %v8031_v51  ;;  %v3561_v25 = vpop.f32.mrb[177].mxu0  ;;  %v4875_v30 = vpop.f32.mrb[177].mxu1  ;;  %v11170_v49 = vld [vmem:[#allocation65_spill] sm:$0xff]  ;;  %v11171_v42 = vld [vmem:[#allocation66_spill] sm:$0xff]  ;;  %v11174_v3 = vld [vmem:[#allocation68_spill] sm:$0xff] }
 0x24c   : > { %v7365_v9 = vpack.c.bf16 %v5501_v46, %v5501_v46  ;;  %v5502_v11 = vmax.f32 %v5374_v47, 0.0  ;;  %v3928_v26 = vmax.f32 %v11157_v62, %v3561_v25  ;;  %v8032_v31 = vpop.f32.mrb[178].mxu0  ;;  %v8164_v54 = vpop.f32.mrb[178].mxu1  ;;  %v11172_v46 = vmax.f32 %v11170_v49, %v11171_v42  ;;  %v11188_v42 = vld [vmem:[#allocation77_spill] sm:$0xff] }
 0x24d   : > { %6144 = vst.msk [vmem:[%s9837_s27 + $0xb8] sm:$0xf] %vm6097_vm3, %v7367_v48  ;;  %v7368_v34 = vpack.c.bf16 %v5504_v50, %v5504_v50  ;;  %v5244_v63 = vmax.f32 %v3930_v0, %v8163_v23  ;;  %v3931_v52 = vmax.f32 %v11160_v14, %v8032_v31  ;;  %v3564_v15 = vpop.f32.mrb[179].mxu0  ;;  %v4878_v40 = vpop.f32.mrb[179].mxu1  ;;  %v11175_v0 = vmax.f32 %v11173_v59, %v11174_v3  ;;  %v11177_v14 = vld [vmem:[#allocation70_spill] sm:$0xff]  ;;  %v11191_v3 = vld [vmem:[#allocation79_spill] sm:$0xff] }
 0x24e   : > { %6142 = vst.msk [vmem:[%s9837_s27 + $0xb0] sm:$0xf] %vm6097_vm3, %v7365_v9  ;;  %v7366_v18 = vpack.c.bf16 %v5502_v11, %v5502_v11  ;;  %v5242_v29 = vmax.f32 %v3928_v26, %v4875_v30  ;;  %v3929_v10 = vmax.f32 %v11163_v6, %v3564_v15  ;;  %v11180_v6 = vld [vmem:[#allocation72_spill] sm:$0xff] }
 0x24f   : > { %6145 = vst.msk [vmem:[%s9837_s27 + $0xbc] sm:$0xf] %vm6097_vm3, %v7368_v34  ;;  %v5379_v21 = vadd.f32 %v9812_v45, %v5244_v63  ;;  %v5245_v24 = vmax.f32 %v3931_v52, %v8164_v54  ;;  %v11178_v52 = vmax.f32 %v11176_v12, %v11177_v14  ;;  %v11197_v12 = vld [vmem:[#allocation83_spill] sm:$0xff]  ;;  %v11198_v14 = vld [vmem:[#allocation84_spill] sm:$0xff] }
 0x250   : > { %6143 = vst.msk [vmem:[%s9837_s27 + $0xb4] sm:$0xf] %vm6097_vm3, %v7366_v18  ;;  %v5377_v7 = vadd.f32 %v9812_v45, %v5242_v29  ;;  %v5243_v28 = vmax.f32 %v3929_v10, %v4878_v40  ;;  %v11181_v10 = vmax.f32 %v11179_v55, %v11180_v6 }
 0x251   : > { %v5507_v39 = vmax.f32 %v5379_v21, 0.0  ;;  %v5380_v32 = vadd.f32 %v9812_v45, %v5245_v24 }
 0x252   : > { %v5505_v44 = vmax.f32 %v5377_v7, 0.0  ;;  %v5378_v35 = vadd.f32 %v9812_v45, %v5243_v28  ;;  %v8035_v43 = vpop.f32.mrb[180].mxu0  ;;  %v8167_v17 = vpop.f32.mrb[180].mxu1 }
 0x253   : > { %v7371_v13 = vpack.c.bf16 %v5507_v39, %v5507_v39  ;;  %v5508_v1 = vmax.f32 %v5380_v32, 0.0  ;;  %v3934_v58 = vmax.f32 %v11166_v37, %v8035_v43  ;;  %v3577_v53 = vpop.f32.mrb[181].mxu0  ;;  %v4891_v22 = vpop.f32.mrb[181].mxu1  ;;  %v11182_v39 = vld [vmem:[#allocation73_spill] sm:$0xff]  ;;  %v11183_v32 = vld [vmem:[#allocation74_spill] sm:$0xff]  ;;  %v11186_v37 = vld [vmem:[#allocation76_spill] sm:$0xff] }
 0x254   : > { %v7369_v56 = vpack.c.bf16 %v5505_v44, %v5505_v44  ;;  %v5506_v5 = vmax.f32 %v5378_v35, 0.0  ;;  %v3932_v20 = vmax.f32 %v11169_v8, %v3577_v53  ;;  %v8036_v4 = vpop.f32.mrb[182].mxu0  ;;  %v8168_v51 = vpop.f32.mrb[182].mxu1  ;;  %v11184_v44 = vmax.f32 %v11182_v39, %v11183_v32  ;;  %v11200_v32 = vld [vmem:[#allocation85_spill] sm:$0xff] }
 0x255   : > { %6148 = vst.msk [vmem:[%s9837_s27 + $0xc8] sm:$0xf] %vm6097_vm3, %v7371_v13  ;;  %v7372_v27 = vpack.c.bf16 %v5508_v1, %v5508_v1  ;;  %v5248_v19 = vmax.f32 %v3934_v58, %v8167_v17  ;;  %v3935_v47 = vmax.f32 %v11172_v46, %v8036_v4  ;;  %v3580_v48 = vpop.f32.mrb[183].mxu0  ;;  %v4894_v25 = vpop.f32.mrb[183].mxu1  ;;  %v11187_v58 = vmax.f32 %v11185_v36, %v11186_v37  ;;  %v11189_v46 = vld [vmem:[#allocation78_spill] sm:$0xff]  ;;  %v11203_v37 = vld [vmem:[#allocation87_spill] sm:$0xff] }
 0x256   : > { %6146 = vst.msk [vmem:[%s9837_s27 + $0xc0] sm:$0xf] %vm6097_vm3, %v7369_v56  ;;  %v7370_v50 = vpack.c.bf16 %v5506_v5, %v5506_v5  ;;  %v5246_v57 = vmax.f32 %v3932_v20, %v4891_v22  ;;  %v3933_v23 = vmax.f32 %v11175_v0, %v3580_v48  ;;  %v11192_v0 = vld [vmem:[#allocation80_spill] sm:$0xff] }
 0x257   : > { %6149 = vst.msk [vmem:[%s9837_s27 + $0xcc] sm:$0xf] %vm6097_vm3, %v7372_v27  ;;  %v5383_v9 = vadd.f32 %v9812_v45, %v5248_v19  ;;  %v5249_v11 = vmax.f32 %v3935_v47, %v8168_v51  ;;  %v11190_v47 = vmax.f32 %v11188_v42, %v11189_v46  ;;  %v11209_v46 = vld [vmem:[#allocation91_spill] sm:$0xff] }
 0x258   : > { %6147 = vst.msk [vmem:[%s9837_s27 + $0xc4] sm:$0xf] %vm6097_vm3, %v7370_v50  ;;  %v5381_v16 = vadd.f32 %v9812_v45, %v5246_v57  ;;  %v5247_v60 = vmax.f32 %v3933_v23, %v4894_v25  ;;  %v11193_v23 = vmax.f32 %v11191_v3, %v11192_v0 }
 0x259   : > { %v5511_v62 = vmax.f32 %v5383_v9, 0.0  ;;  %v5384_v26 = vadd.f32 %v9812_v45, %v5249_v11 }
 0x25a   : > { %v5509_v30 = vmax.f32 %v5381_v16, 0.0  ;;  %v5382_v31 = vadd.f32 %v9812_v45, %v5247_v60  ;;  %v8039_v34 = vpop.f32.mrb[184].mxu0  ;;  %v8171_v15 = vpop.f32.mrb[184].mxu1  ;;  %v11194_v60 = vld [vmem:[#allocation81_spill] sm:$0xff] }
 0x25b   : > { %v7375_v63 = vpack.c.bf16 %v5511_v62, %v5511_v62  ;;  %v5512_v2 = vmax.f32 %v5384_v26, 0.0  ;;  %v3938_v54 = vmax.f32 %v11178_v52, %v8039_v34  ;;  %v3593_v18 = vpop.f32.mrb[185].mxu0  ;;  %v4907_v21 = vpop.f32.mrb[185].mxu1  ;;  %v11195_v62 = vld [vmem:[#allocation82_spill] sm:$0xff]  ;;  %v11199_v52 = vmax.f32 %v11197_v12, %v11198_v14  ;;  %v11215_v14 = vld [vmem:[#allocation95_spill] sm:$0xff] }
 0x25c   : > { %v7373_v29 = vpack.c.bf16 %v5509_v30, %v5509_v30  ;;  %v5510_v33 = vmax.f32 %v5382_v31, 0.0  ;;  %v3936_v40 = vmax.f32 %v11181_v10, %v3593_v18  ;;  %v8040_v24 = vpop.f32.mrb[186].mxu0  ;;  %v8172_v43 = vpop.f32.mrb[186].mxu1  ;;  %v11196_v26 = vmax.f32 %v11194_v60, %v11195_v62  ;;  %v10225_v18 = vld [vmem:[%s10629_s2] ss:$0 sm:$0xff]  ;;  %v11212_v62 = vld [vmem:[#allocation93_spill] sm:$0xff] }
 0x25d   : > { %6152 = vst.msk [vmem:[%s9837_s27 + $0xd8] sm:$0xf] %vm6097_vm3, %v7375_v63  ;;  %v7376_v7 = vpack.c.bf16 %v5512_v2, %v5512_v2  ;;  %v5252_v28 = vmax.f32 %v3938_v54, %v8171_v15  ;;  %v3939_v35 = vmax.f32 %v11184_v44, %v8040_v24  ;;  %v3596_v13 = vpop.f32.mrb[187].mxu0  ;;  %v4910_v53 = vpop.f32.mrb[187].mxu1  ;;  %v11201_v44 = vld [vmem:[#allocation86_spill] sm:$0xff] }
 0x25e   : > { %6150 = vst.msk [vmem:[%s9837_s27 + $0xd0] sm:$0xf] %vm6097_vm3, %v7373_v29  ;;  %v7374_v1 = vpack.c.bf16 %v5510_v33, %v5510_v33  ;;  %v5250_v61 = vmax.f32 %v3936_v40, %v4907_v21  ;;  %v3937_v17 = vmax.f32 %v11187_v58, %v3596_v13  ;;  %v11204_v58 = vld [vmem:[#allocation88_spill] sm:$0xff] }
 0x25f   : > { %6153 = vst.msk [vmem:[%s9837_s27 + $0xdc] sm:$0xf] %vm6097_vm3, %v7376_v7  ;;  %v5387_v56 = vadd.f32 %v9812_v45, %v5252_v28  ;;  %v5253_v5 = vmax.f32 %v3939_v35, %v8172_v43  ;;  %v11202_v35 = vmax.f32 %v11200_v32, %v11201_v44  ;;  %v11221_v44 = vld [vmem:[#allocation99_spill] sm:$0xff] }
 0x260   : > { %6151 = vst.msk [vmem:[%s9837_s27 + $0xd4] sm:$0xf] %vm6097_vm3, %v7374_v1  ;;  %v5385_v38 = vadd.f32 %v9812_v45, %v5250_v61  ;;  %v5251_v41 = vmax.f32 %v3937_v17, %v4910_v53  ;;  %v11205_v17 = vmax.f32 %v11203_v37, %v11204_v58 }
 0x261   : > { %v5515_v8 = vmax.f32 %v5387_v56, 0.0  ;;  %v5388_v20 = vadd.f32 %v9812_v45, %v5253_v5 }
 0x262   : > { %v5513_v22 = vmax.f32 %v5385_v38, 0.0  ;;  %v5386_v4 = vadd.f32 %v9812_v45, %v5251_v41  ;;  %v8043_v27 = vpop.f32.mrb[188].mxu0  ;;  %v8175_v48 = vpop.f32.mrb[188].mxu1 }
 0x263   : > { %v7379_v19 = vpack.c.bf16 %v5515_v8, %v5515_v8  ;;  %v5516_v49 = vmax.f32 %v5388_v20, 0.0  ;;  %v3942_v51 = vmax.f32 %v11190_v47, %v8043_v27  ;;  %v3609_v50 = vpop.f32.mrb[189].mxu0  ;;  %v4923_v9 = vpop.f32.mrb[189].mxu1  ;;  %v11206_v8 = vld [vmem:[#allocation89_spill] sm:$0xff]  ;;  %v11207_v20 = vld [vmem:[#allocation90_spill] sm:$0xff]  ;;  %v11210_v47 = vld [vmem:[#allocation92_spill] sm:$0xff] }
 0x264   : > { %v7377_v57 = vpack.c.bf16 %v5513_v22, %v5513_v22  ;;  %v5514_v59 = vmax.f32 %v5386_v4, 0.0  ;;  %v3940_v25 = vmax.f32 %v11193_v23, %v3609_v50  ;;  %v8044_v11 = vpop.f32.mrb[190].mxu0  ;;  %v8176_v31 = vpop.f32.mrb[190].mxu1  ;;  %v11208_v22 = vmax.f32 %v11206_v8, %v11207_v20  ;;  %v11224_v20 = vld [vmem:[#allocation101_spill] sm:$0xff] }
 0x265   : > { %6156 = vst.msk [vmem:[%s9837_s27 + $0xe8] sm:$0xf] %vm6097_vm3, %v7379_v19  ;;  %v7380_v45 = vpack.c.bf16 %v5516_v49, %v5516_v49  ;;  %v5256_v16 = vmax.f32 %v3942_v51, %v8175_v48  ;;  %v3943_v30 = vmax.f32 %v11196_v26, %v8044_v11  ;;  %v3612_v34 = vpop.f32.mrb[191].mxu0  ;;  %v4926_v15 = vpop.f32.mrb[191].mxu1  ;;  %v11211_v51 = vmax.f32 %v11209_v46, %v11210_v47  ;;  %v11213_v26 = vld [vmem:[#allocation94_spill] sm:$0xff]  ;;  %v11227_v47 = vld [vmem:[#allocation103_spill] sm:$0xff] }
 0x266   : > { %6154 = vst.msk [vmem:[%s9837_s27 + $0xe0] sm:$0xf] %vm6097_vm3, %v7377_v57  ;;  %v7378_v63 = vpack.c.bf16 %v5514_v59, %v5514_v59  ;;  %v5254_v2 = vmax.f32 %v3940_v25, %v4923_v9  ;;  %v3941_v54 = vmax.f32 %v11199_v52, %v3612_v34  ;;  %v11216_v52 = vld [vmem:[#allocation96_spill] sm:$0xff] }
 0x267   : > { %6157 = vst.msk [vmem:[%s9837_s27 + $0xec] sm:$0xf] %vm6097_vm3, %v7380_v45  ;;  %v5391_v29 = vadd.f32 %v10225_v18, %v5256_v16  ;;  %v5257_v33 = vmax.f32 %v3943_v30, %v8176_v31  ;;  %v11214_v30 = vmax.f32 %v11212_v62, %v11213_v26  ;;  %v11233_v26 = vld [vmem:[#allocation107_spill] sm:$0xff] }
 0x268   : > { %6155 = vst.msk [vmem:[%s9837_s27 + $0xe4] sm:$0xf] %vm6097_vm3, %v7378_v63  ;;  %v5389_v55 = vadd.f32 %v10225_v18, %v5254_v2  ;;  %v5255_v6 = vmax.f32 %v3941_v54, %v4926_v15  ;;  %v11217_v54 = vmax.f32 %v11215_v14, %v11216_v52 }
 0x269   : > { %v5519_v10 = vmax.f32 %v5391_v29, 0.0  ;;  %v5392_v40 = vadd.f32 %v10225_v18, %v5257_v33 }
 0x26a   : > { %v5517_v21 = vmax.f32 %v5389_v55, 0.0  ;;  %v5390_v24 = vadd.f32 %v10225_v18, %v5255_v6  ;;  %v8047_v7 = vpop.f32.mrb[192].mxu0  ;;  %v8179_v13 = vpop.f32.mrb[192].mxu1 }
 0x26b   : > { %v7383_v28 = vpack.c.bf16 %v5519_v10, %v5519_v10  ;;  %v5520_v39 = vmax.f32 %v5392_v40, 0.0  ;;  %v3946_v43 = vmax.f32 %v11202_v35, %v8047_v7  ;;  %v3625_v1 = vpop.f32.mrb[193].mxu0  ;;  %v4939_v56 = vpop.f32.mrb[193].mxu1  ;;  %v11218_v10 = vld [vmem:[#allocation97_spill] sm:$0xff]  ;;  %v11219_v40 = vld [vmem:[#allocation98_spill] sm:$0xff]  ;;  %v11222_v35 = vld [vmem:[#allocation100_spill] sm:$0xff] }
 0x26c   : > { %v7381_v61 = vpack.c.bf16 %v5517_v21, %v5517_v21  ;;  %v5518_v36 = vmax.f32 %v5390_v24, 0.0  ;;  %v3944_v53 = vmax.f32 %v11205_v17, %v3625_v1  ;;  %v8048_v5 = vpop.f32.mrb[194].mxu0  ;;  %v8180_v27 = vpop.f32.mrb[194].mxu1  ;;  %v11220_v21 = vmax.f32 %v11218_v10, %v11219_v40  ;;  %v11236_v40 = vld [vmem:[#allocation109_spill] sm:$0xff] }
 0x26d   : > { %6160 = vst.msk [vmem:[%s9837_s27 + $0xf8] sm:$0xf] %vm6097_vm3, %v7383_v28  ;;  %v7384_v38 = vpack.c.bf16 %v5520_v39, %v5520_v39  ;;  %v5260_v41 = vmax.f32 %v3946_v43, %v8179_v13  ;;  %v3947_v4 = vmax.f32 %v11208_v22, %v8048_v5  ;;  %v3628_v19 = vpop.f32.mrb[195].mxu0  ;;  %v4942_v50 = vpop.f32.mrb[195].mxu1  ;;  %v11223_v43 = vmax.f32 %v11221_v44, %v11222_v35  ;;  %v11225_v22 = vld [vmem:[#allocation102_spill] sm:$0xff]  ;;  %v11239_v35 = vld [vmem:[#allocation111_spill] sm:$0xff] }
 0x26e   : > { %6158 = vst.msk [vmem:[%s9837_s27 + $0xf0] sm:$0xf] %vm6097_vm3, %v7381_v61  ;;  %v7382_v49 = vpack.c.bf16 %v5518_v36, %v5518_v36  ;;  %v5258_v42 = vmax.f32 %v3944_v53, %v4939_v56  ;;  %v3945_v48 = vmax.f32 %v11211_v51, %v3628_v19  ;;  %v11228_v51 = vld [vmem:[#allocation104_spill] sm:$0xff] }
 0x26f   : > { %6161 = vst.msk [vmem:[%s9837_s27 + $0xfc] sm:$0xf] %vm6097_vm3, %v7384_v38  ;;  %v5395_v57 = vadd.f32 %v10225_v18, %v5260_v41  ;;  %v5261_v59 = vmax.f32 %v3947_v4, %v8180_v27  ;;  %v11226_v4 = vmax.f32 %v11224_v20, %v11225_v22  ;;  %v11245_v22 = vld [vmem:[#allocation115_spill] sm:$0xff] }
 0x270   : > { %6159 = vst.msk [vmem:[%s9837_s27 + $0xf4] sm:$0xf] %vm6097_vm3, %v7382_v49  ;;  %v5393_v3 = vadd.f32 %v10225_v18, %v5258_v42  ;;  %v5259_v0 = vmax.f32 %v3945_v48, %v4942_v50  ;;  %v11229_v48 = vmax.f32 %v11227_v47, %v11228_v51 }
 0x271   : > { %v5523_v23 = vmax.f32 %v5395_v57, 0.0  ;;  %v5396_v25 = vadd.f32 %v10225_v18, %v5261_v59 }
 0x272   : > { %v5521_v9 = vmax.f32 %v5393_v3, 0.0  ;;  %v5394_v11 = vadd.f32 %v10225_v18, %v5259_v0  ;;  %v8051_v45 = vpop.f32.mrb[196].mxu0  ;;  %v8183_v34 = vpop.f32.mrb[196].mxu1 }
 0x273   : > { %v7387_v16 = vpack.c.bf16 %v5523_v23, %v5523_v23  ;;  %v5524_v60 = vmax.f32 %v5396_v25, 0.0  ;;  %v3950_v31 = vmax.f32 %v11214_v30, %v8051_v45  ;;  %v3641_v63 = vpop.f32.mrb[197].mxu0  ;;  %v4955_v29 = vpop.f32.mrb[197].mxu1  ;;  %v11230_v23 = vld [vmem:[#allocation105_spill] sm:$0xff]  ;;  %v11231_v25 = vld [vmem:[#allocation106_spill] sm:$0xff]  ;;  %v11234_v30 = vld [vmem:[#allocation108_spill] sm:$0xff] }
 0x274   : > { %v7385_v2 = vpack.c.bf16 %v5521_v9, %v5521_v9  ;;  %v5522_v12 = vmax.f32 %v5394_v11, 0.0  ;;  %v3948_v15 = vmax.f32 %v11217_v54, %v3641_v63  ;;  %v8052_v33 = vpop.f32.mrb[198].mxu0  ;;  %v8184_v7 = vpop.f32.mrb[198].mxu1  ;;  %v11232_v9 = vmax.f32 %v11230_v23, %v11231_v25  ;;  %v11248_v25 = vld [vmem:[#allocation117_spill] sm:$0xff] }
 0x275   : > { %6164 = vst.msk [vmem:[%s9837_s27 + $0x108] sm:$0xf] %vm6097_vm3, %v7387_v16  ;;  %v7388_v55 = vpack.c.bf16 %v5524_v60, %v5524_v60  ;;  %v5264_v6 = vmax.f32 %v3950_v31, %v8183_v34  ;;  %v3951_v24 = vmax.f32 %v11220_v21, %v8052_v33  ;;  %v3644_v28 = vpop.f32.mrb[199].mxu0  ;;  %v4958_v1 = vpop.f32.mrb[199].mxu1  ;;  %v11235_v31 = vmax.f32 %v11233_v26, %v11234_v30  ;;  %v11237_v21 = vld [vmem:[#allocation110_spill] sm:$0xff]  ;;  %v11251_v30 = vld [vmem:[#allocation119_spill] sm:$0xff] }
 0x276   : > { %6162 = vst.msk [vmem:[%s9837_s27 + $0x100] sm:$0xf] %vm6097_vm3, %v7385_v2  ;;  %v7386_v39 = vpack.c.bf16 %v5522_v12, %v5522_v12  ;;  %v5262_v32 = vmax.f32 %v3948_v15, %v4955_v29  ;;  %v3949_v13 = vmax.f32 %v11223_v43, %v3644_v28  ;;  %v11240_v43 = vld [vmem:[#allocation112_spill] sm:$0xff] }
 0x277   : > { %6165 = vst.msk [vmem:[%s9837_s27 + $0x10c] sm:$0xf] %vm6097_vm3, %v7388_v55  ;;  %v5399_v61 = vadd.f32 %v10225_v18, %v5264_v6  ;;  %v5265_v36 = vmax.f32 %v3951_v24, %v8184_v7  ;;  %v11238_v24 = vmax.f32 %v11236_v40, %v11237_v21  ;;  %v11257_v21 = vld [vmem:[#allocation123_spill] sm:$0xff] }
 0x278   : > { %6163 = vst.msk [vmem:[%s9837_s27 + $0x104] sm:$0xf] %vm6097_vm3, %v7386_v39  ;;  %v5397_v37 = vadd.f32 %v10225_v18, %v5262_v32  ;;  %v5263_v58 = vmax.f32 %v3949_v13, %v4958_v1  ;;  %v11241_v13 = vmax.f32 %v11239_v35, %v11240_v43 }
 0x279   : > { %v5527_v17 = vmax.f32 %v5399_v61, 0.0  ;;  %v5400_v53 = vadd.f32 %v10225_v18, %v5265_v36 }
 0x27a   : > { %v5525_v56 = vmax.f32 %v5397_v37, 0.0  ;;  %v5398_v5 = vadd.f32 %v10225_v18, %v5263_v58  ;;  %v8055_v38 = vpop.f32.mrb[200].mxu0  ;;  %v8187_v19 = vpop.f32.mrb[200].mxu1 }
 0x27b   : > { %v7391_v41 = vpack.c.bf16 %v5527_v17, %v5527_v17  ;;  %v5528_v8 = vmax.f32 %v5400_v53, 0.0  ;;  %v3954_v27 = vmax.f32 %v11226_v4, %v8055_v38  ;;  %v3657_v49 = vpop.f32.mrb[201].mxu0  ;;  %v4971_v57 = vpop.f32.mrb[201].mxu1  ;;  %v11242_v17 = vld [vmem:[#allocation113_spill] sm:$0xff]  ;;  %v11243_v53 = vld [vmem:[#allocation114_spill] sm:$0xff]  ;;  %v11246_v4 = vld [vmem:[#allocation116_spill] sm:$0xff] }
 0x27c   : > { %v7389_v42 = vpack.c.bf16 %v5525_v56, %v5525_v56  ;;  %v5526_v46 = vmax.f32 %v5398_v5, 0.0  ;;  %v3952_v50 = vmax.f32 %v11229_v48, %v3657_v49  ;;  %v8056_v59 = vpop.f32.mrb[202].mxu0  ;;  %v8188_v45 = vpop.f32.mrb[202].mxu1  ;;  %v11244_v56 = vmax.f32 %v11242_v17, %v11243_v53  ;;  %v11260_v53 = vld [vmem:[#allocation125_spill] sm:$0xff] }
 0x27d   : > { %6168 = vst.msk [vmem:[%s9837_s27 + $0x118] sm:$0xf] %vm6097_vm3, %v7391_v41  ;;  %v7392_v3 = vpack.c.bf16 %v5528_v8, %v5528_v8  ;;  %v5268_v0 = vmax.f32 %v3954_v27, %v8187_v19  ;;  %v3955_v11 = vmax.f32 %v11232_v9, %v8056_v59  ;;  %v3660_v16 = vpop.f32.mrb[203].mxu0  ;;  %v4974_v63 = vpop.f32.mrb[203].mxu1  ;;  %v11247_v27 = vmax.f32 %v11245_v22, %v11246_v4  ;;  %v11249_v9 = vld [vmem:[#allocation118_spill] sm:$0xff]  ;;  %v11263_v4 = vld [vmem:[#allocation127_spill] sm:$0xff] }
 0x27e   : > { %6166 = vst.msk [vmem:[%s9837_s27 + $0x110] sm:$0xf] %vm6097_vm3, %v7389_v42  ;;  %v7390_v60 = vpack.c.bf16 %v5526_v46, %v5526_v46  ;;  %v5266_v62 = vmax.f32 %v3952_v50, %v4971_v57  ;;  %v3953_v34 = vmax.f32 %v11235_v31, %v3660_v16  ;;  %v11252_v31 = vld [vmem:[#allocation120_spill] sm:$0xff] }
 0x27f   : > { %6169 = vst.msk [vmem:[%s9837_s27 + $0x11c] sm:$0xf] %vm6097_vm3, %v7392_v3  ;;  %v5403_v2 = vadd.f32 %v10225_v18, %v5268_v0  ;;  %v5269_v12 = vmax.f32 %v3955_v11, %v8188_v45  ;;  %v11250_v11 = vmax.f32 %v11248_v25, %v11249_v9  ;;  %v11269_v9 = vld [vmem:[#allocation131_spill] sm:$0xff] }
 0x280   : > { %6167 = vst.msk [vmem:[%s9837_s27 + $0x114] sm:$0xf] %vm6097_vm3, %v7390_v60  ;;  %v5401_v14 = vadd.f32 %v10225_v18, %v5266_v62  ;;  %v5267_v52 = vmax.f32 %v3953_v34, %v4974_v63  ;;  %v11253_v34 = vmax.f32 %v11251_v30, %v11252_v31 }
 0x281   : > { %v5531_v54 = vmax.f32 %v5403_v2, 0.0  ;;  %v5404_v15 = vadd.f32 %v10225_v18, %v5269_v12 }
 0x282   : > { %v5529_v29 = vmax.f32 %v5401_v14, 0.0  ;;  %v5402_v33 = vadd.f32 %v10225_v18, %v5267_v52  ;;  %v8059_v55 = vpop.f32.mrb[204].mxu0  ;;  %v8191_v28 = vpop.f32.mrb[204].mxu1 }
 0x283   : > { %v7395_v6 = vpack.c.bf16 %v5531_v54, %v5531_v54  ;;  %v5532_v10 = vmax.f32 %v5404_v15, 0.0  ;;  %v3958_v7 = vmax.f32 %v11238_v24, %v8059_v55  ;;  %v3673_v39 = vpop.f32.mrb[205].mxu0  ;;  %v4987_v61 = vpop.f32.mrb[205].mxu1  ;;  %v11254_v54 = vld [vmem:[#allocation121_spill] sm:$0xff]  ;;  %v11255_v15 = vld [vmem:[#allocation122_spill] sm:$0xff]  ;;  %v11258_v24 = vld [vmem:[#allocation124_spill] sm:$0xff] }
 0x284   : > { %v7393_v32 = vpack.c.bf16 %v5529_v29, %v5529_v29  ;;  %v5530_v44 = vmax.f32 %v5402_v33, 0.0  ;;  %v3956_v1 = vmax.f32 %v11241_v13, %v3673_v39  ;;  %v8060_v36 = vpop.f32.mrb[206].mxu0  ;;  %v8192_v38 = vpop.f32.mrb[206].mxu1  ;;  %v11256_v29 = vmax.f32 %v11254_v54, %v11255_v15  ;;  %v11272_v15 = vld [vmem:[#allocation133_spill] sm:$0xff] }
 0x285   : > { %6172 = vst.msk [vmem:[%s9837_s27 + $0x128] sm:$0xf] %vm6097_vm3, %v7395_v6  ;;  %v7396_v37 = vpack.c.bf16 %v5532_v10, %v5532_v10  ;;  %v5272_v58 = vmax.f32 %v3958_v7, %v8191_v28  ;;  %v3959_v5 = vmax.f32 %v11244_v56, %v8060_v36  ;;  %v3676_v41 = vpop.f32.mrb[207].mxu0  ;;  %v4990_v49 = vpop.f32.mrb[207].mxu1  ;;  %v11259_v7 = vmax.f32 %v11257_v21, %v11258_v24  ;;  %v11261_v56 = vld [vmem:[#allocation126_spill] sm:$0xff]  ;;  %v11275_v24 = vld [vmem:[#allocation135_spill] sm:$0xff] }
 0x286   : > { %6170 = vst.msk [vmem:[%s9837_s27 + $0x120] sm:$0xf] %vm6097_vm3, %v7393_v32  ;;  %v7394_v8 = vpack.c.bf16 %v5530_v44, %v5530_v44  ;;  %v5270_v20 = vmax.f32 %v3956_v1, %v4987_v61  ;;  %v3957_v19 = vmax.f32 %v11247_v27, %v3676_v41  ;;  %v11264_v27 = vld [vmem:[#allocation128_spill] sm:$0xff] }
 0x287   : > { %6173 = vst.msk [vmem:[%s9837_s27 + $0x12c] sm:$0xf] %vm6097_vm3, %v7396_v37  ;;  %v5407_v42 = vadd.f32 %v10225_v18, %v5272_v58  ;;  %v5273_v46 = vmax.f32 %v3959_v5, %v8192_v38  ;;  %v11262_v5 = vmax.f32 %v11260_v53, %v11261_v56  ;;  %v11281_v56 = vld [vmem:[#allocation139_spill] sm:$0xff] }
 0x288   : > { %6171 = vst.msk [vmem:[%s9837_s27 + $0x124] sm:$0xf] %vm6097_vm3, %v7394_v8  ;;  %v5405_v47 = vadd.f32 %v10225_v18, %v5270_v20  ;;  %v5271_v51 = vmax.f32 %v3957_v19, %v4990_v49  ;;  %v11265_v19 = vmax.f32 %v11263_v4, %v11264_v27 }
 0x289   : > { %v5535_v48 = vmax.f32 %v5407_v42, 0.0  ;;  %v5408_v50 = vadd.f32 %v10225_v18, %v5273_v46 }
 0x28a   : > { %v5533_v57 = vmax.f32 %v5405_v47, 0.0  ;;  %v5406_v59 = vadd.f32 %v10225_v18, %v5271_v51  ;;  %v8063_v3 = vpop.f32.mrb[208].mxu0  ;;  %v8195_v16 = vpop.f32.mrb[208].mxu1 }
 0x28b   : > { %v7399_v0 = vpack.c.bf16 %v5535_v48, %v5535_v48  ;;  %v5536_v23 = vmax.f32 %v5408_v50, 0.0  ;;  %v3962_v45 = vmax.f32 %v11250_v11, %v8063_v3  ;;  %v3689_v60 = vpop.f32.mrb[209].mxu0  ;;  %v5003_v2 = vpop.f32.mrb[209].mxu1  ;;  %v11266_v48 = vld [vmem:[#allocation129_spill] sm:$0xff]  ;;  %v11267_v50 = vld [vmem:[#allocation130_spill] sm:$0xff]  ;;  %v11270_v11 = vld [vmem:[#allocation132_spill] sm:$0xff] }
 0x28c   : > { %v7397_v62 = vpack.c.bf16 %v5533_v57, %v5533_v57  ;;  %v5534_v26 = vmax.f32 %v5406_v59, 0.0  ;;  %v3960_v63 = vmax.f32 %v11253_v34, %v3689_v60  ;;  %v8064_v12 = vpop.f32.mrb[210].mxu0  ;;  %v8196_v55 = vpop.f32.mrb[210].mxu1  ;;  %v11268_v57 = vmax.f32 %v11266_v48, %v11267_v50  ;;  %v11284_v50 = vld [vmem:[#allocation141_spill] sm:$0xff] }
 0x28d   : > { %6176 = vst.msk [vmem:[%s9837_s27 + $0x138] sm:$0xf] %vm6097_vm3, %v7399_v0  ;;  %v7400_v14 = vpack.c.bf16 %v5536_v23, %v5536_v23  ;;  %v5276_v52 = vmax.f32 %v3962_v45, %v8195_v16  ;;  %v3963_v33 = vmax.f32 %v11256_v29, %v8064_v12  ;;  %v3692_v6 = vpop.f32.mrb[211].mxu0  ;;  %v5006_v39 = vpop.f32.mrb[211].mxu1  ;;  %v11271_v45 = vmax.f32 %v11269_v9, %v11270_v11  ;;  %v11273_v29 = vld [vmem:[#allocation134_spill] sm:$0xff]  ;;  %v11287_v11 = vld [vmem:[#allocation143_spill] sm:$0xff] }
 0x28e   : > { %6174 = vst.msk [vmem:[%s9837_s27 + $0x130] sm:$0xf] %vm6097_vm3, %v7397_v62  ;;  %v7398_v10 = vpack.c.bf16 %v5534_v26, %v5534_v26  ;;  %v5274_v40 = vmax.f32 %v3960_v63, %v5003_v2  ;;  %v3961_v28 = vmax.f32 %v11259_v7, %v3692_v6  ;;  %v11276_v7 = vld [vmem:[#allocation136_spill] sm:$0xff] }
 0x28f   : > { %6177 = vst.msk [vmem:[%s9837_s27 + $0x13c] sm:$0xf] %vm6097_vm3, %v7400_v14  ;;  %v5411_v32 = vadd.f32 %v10225_v18, %v5276_v52  ;;  %v5277_v44 = vmax.f32 %v3963_v33, %v8196_v55  ;;  %v11274_v33 = vmax.f32 %v11272_v15, %v11273_v29  ;;  %v11293_v29 = vld [vmem:[#allocation147_spill] sm:$0xff] }
 0x290   : > { %6175 = vst.msk [vmem:[%s9837_s27 + $0x134] sm:$0xf] %vm6097_vm3, %v7398_v10  ;;  %v5409_v35 = vadd.f32 %v10225_v18, %v5274_v40  ;;  %v5275_v43 = vmax.f32 %v3961_v28, %v5006_v39  ;;  %v11277_v28 = vmax.f32 %v11275_v24, %v11276_v7 }
 0x291   : > { %v5539_v13 = vmax.f32 %v5411_v32, 0.0  ;;  %v5412_v1 = vadd.f32 %v10225_v18, %v5277_v44 }
 0x292   : > { %v5537_v61 = vmax.f32 %v5409_v35, 0.0  ;;  %v5410_v36 = vadd.f32 %v10225_v18, %v5275_v43  ;;  %v8067_v37 = vpop.f32.mrb[212].mxu0  ;;  %v8199_v41 = vpop.f32.mrb[212].mxu1 }
 0x293   : > { %v7403_v58 = vpack.c.bf16 %v5539_v13, %v5539_v13  ;;  %v5540_v17 = vmax.f32 %v5412_v1, 0.0  ;;  %v3966_v38 = vmax.f32 %v11262_v5, %v8067_v37  ;;  %v3705_v8 = vpop.f32.mrb[213].mxu0  ;;  %v5019_v42 = vpop.f32.mrb[213].mxu1  ;;  %v11278_v13 = vld [vmem:[#allocation137_spill] sm:$0xff]  ;;  %v11279_v1 = vld [vmem:[#allocation138_spill] sm:$0xff]  ;;  %v11282_v5 = vld [vmem:[#allocation140_spill] sm:$0xff] }
 0x294   : > { %v7401_v20 = vpack.c.bf16 %v5537_v61, %v5537_v61  ;;  %v5538_v22 = vmax.f32 %v5410_v36, 0.0  ;;  %v3964_v49 = vmax.f32 %v11265_v19, %v3705_v8  ;;  %v8068_v46 = vpop.f32.mrb[214].mxu0  ;;  %v8200_v3 = vpop.f32.mrb[214].mxu1  ;;  %v11280_v61 = vmax.f32 %v11278_v13, %v11279_v1  ;;  %v11296_v1 = vld [vmem:[#allocation149_spill] sm:$0xff] }
 0x295   : > { %6180 = vst.msk [vmem:[%s9837_s27 + $0x148] sm:$0xf] %vm6097_vm3, %v7403_v58  ;;  %v7404_v47 = vpack.c.bf16 %v5540_v17, %v5540_v17  ;;  %v5280_v51 = vmax.f32 %v3966_v38, %v8199_v41  ;;  %v3967_v59 = vmax.f32 %v11268_v57, %v8068_v46  ;;  %v3708_v0 = vpop.f32.mrb[215].mxu0  ;;  %v5022_v60 = vpop.f32.mrb[215].mxu1  ;;  %v11283_v38 = vmax.f32 %v11281_v56, %v11282_v5  ;;  %v11285_v57 = vld [vmem:[#allocation142_spill] sm:$0xff]  ;;  %v11299_v5 = vld [vmem:[#allocation151_spill] sm:$0xff] }
 0x296   : > { %6178 = vst.msk [vmem:[%s9837_s27 + $0x140] sm:$0xf] %vm6097_vm3, %v7401_v20  ;;  %v7402_v23 = vpack.c.bf16 %v5538_v22, %v5538_v22  ;;  %v5278_v25 = vmax.f32 %v3964_v49, %v5019_v42  ;;  %v3965_v16 = vmax.f32 %v11271_v45, %v3708_v0  ;;  %v11288_v45 = vld [vmem:[#allocation144_spill] sm:$0xff] }
 0x297   : > { %6181 = vst.msk [vmem:[%s9837_s27 + $0x14c] sm:$0xf] %vm6097_vm3, %v7404_v47  ;;  %v5415_v62 = vadd.f32 %v10225_v18, %v5280_v51  ;;  %v5281_v26 = vmax.f32 %v3967_v59, %v8200_v3  ;;  %v11286_v59 = vmax.f32 %v11284_v50, %v11285_v57  ;;  %v11305_v57 = vld [vmem:[#allocation155_spill] sm:$0xff] }
 0x298   : > { %6179 = vst.msk [vmem:[%s9837_s27 + $0x144] sm:$0xf] %vm6097_vm3, %v7402_v23  ;;  %v5413_v30 = vadd.f32 %v10225_v18, %v5278_v25  ;;  %v5279_v31 = vmax.f32 %v3965_v16, %v5022_v60  ;;  %v11289_v16 = vmax.f32 %v11287_v11, %v11288_v45 }
 0x299   : > { %v5543_v34 = vmax.f32 %v5415_v62, 0.0  ;;  %v5416_v63 = vadd.f32 %v10225_v18, %v5281_v26 }
 0x29a   : > { %v5541_v2 = vmax.f32 %v5413_v30, 0.0  ;;  %v5414_v12 = vadd.f32 %v10225_v18, %v5279_v31  ;;  %v8071_v14 = vpop.f32.mrb[216].mxu0  ;;  %v8203_v6 = vpop.f32.mrb[216].mxu1 }
 0x29b   : > { %v7407_v52 = vpack.c.bf16 %v5543_v34, %v5543_v34  ;;  %v5544_v54 = vmax.f32 %v5416_v63, 0.0  ;;  %v3970_v55 = vmax.f32 %v11274_v33, %v8071_v14  ;;  %v3721_v10 = vpop.f32.mrb[217].mxu0  ;;  %v5035_v32 = vpop.f32.mrb[217].mxu1  ;;  %v11290_v34 = vld [vmem:[#allocation145_spill] sm:$0xff]  ;;  %v11291_v63 = vld [vmem:[#allocation146_spill] sm:$0xff]  ;;  %v11294_v33 = vld [vmem:[#allocation148_spill] sm:$0xff] }
 0x29c   : > { %v7405_v40 = vpack.c.bf16 %v5541_v2, %v5541_v2  ;;  %v5542_v21 = vmax.f32 %v5414_v12, 0.0  ;;  %v3968_v39 = vmax.f32 %v11277_v28, %v3721_v10  ;;  %v8072_v44 = vpop.f32.mrb[218].mxu0  ;;  %v8204_v37 = vpop.f32.mrb[218].mxu1  ;;  %v11292_v2 = vmax.f32 %v11290_v34, %v11291_v63  ;;  %v11308_v63 = vld [vmem:[#allocation157_spill] sm:$0xff] }
 0x29d   : > { %6184 = vst.msk [vmem:[%s9837_s27 + $0x158] sm:$0xf] %vm6097_vm3, %v7407_v52  ;;  %v7408_v35 = vpack.c.bf16 %v5544_v54, %v5544_v54  ;;  %v5284_v43 = vmax.f32 %v3970_v55, %v8203_v6  ;;  %v3971_v36 = vmax.f32 %v11280_v61, %v8072_v44  ;;  %v3724_v58 = vpop.f32.mrb[219].mxu0  ;;  %v5038_v8 = vpop.f32.mrb[219].mxu1  ;;  %v11295_v55 = vmax.f32 %v11293_v29, %v11294_v33  ;;  %v11297_v61 = vld [vmem:[#allocation150_spill] sm:$0xff]  ;;  %v11311_v33 = vld [vmem:[#allocation159_spill] sm:$0xff] }
 0x29e   : > { %6182 = vst.msk [vmem:[%s9837_s27 + $0x150] sm:$0xf] %vm6097_vm3, %v7405_v40  ;;  %v7406_v17 = vpack.c.bf16 %v5542_v21, %v5542_v21  ;;  %v5282_v53 = vmax.f32 %v3968_v39, %v5035_v32  ;;  %v3969_v41 = vmax.f32 %v11283_v38, %v3724_v58  ;;  %v11300_v38 = vld [vmem:[#allocation152_spill] sm:$0xff] }
 0x29f   : > { %6185 = vst.msk [vmem:[%s9837_s27 + $0x15c] sm:$0xf] %vm6097_vm3, %v7408_v35  ;;  %v5419_v20 = vadd.f32 %v10225_v18, %v5284_v43  ;;  %v5285_v22 = vmax.f32 %v3971_v36, %v8204_v37  ;;  %v11298_v36 = vmax.f32 %v11296_v1, %v11297_v61  ;;  %v11317_v61 = vld [vmem:[#allocation163_spill] sm:$0xff] }
 0x2a0   : > { %6183 = vst.msk [vmem:[%s9837_s27 + $0x154] sm:$0xf] %vm6097_vm3, %v7406_v17  ;;  %v5417_v4 = vadd.f32 %v10225_v18, %v5282_v53  ;;  %v5283_v27 = vmax.f32 %v3969_v41, %v5038_v8  ;;  %v11301_v41 = vmax.f32 %v11299_v5, %v11300_v38 }
 0x2a1   : > { %v5547_v19 = vmax.f32 %v5419_v20, 0.0  ;;  %v5420_v49 = vadd.f32 %v10225_v18, %v5285_v22 }
 0x2a2   : > { %v5545_v42 = vmax.f32 %v5417_v4, 0.0  ;;  %v5418_v46 = vadd.f32 %v10225_v18, %v5283_v27  ;;  %v8075_v47 = vpop.f32.mrb[220].mxu0  ;;  %v8207_v0 = vpop.f32.mrb[220].mxu1 }
 0x2a3   : > { %v7411_v51 = vpack.c.bf16 %v5547_v19, %v5547_v19  ;;  %v5548_v48 = vmax.f32 %v5420_v49, 0.0  ;;  %v3974_v3 = vmax.f32 %v11286_v59, %v8075_v47  ;;  %v3737_v23 = vpop.f32.mrb[221].mxu0  ;;  %v5051_v62 = vpop.f32.mrb[221].mxu1  ;;  %v11302_v19 = vld [vmem:[#allocation153_spill] sm:$0xff]  ;;  %v11303_v49 = vld [vmem:[#allocation154_spill] sm:$0xff]  ;;  %v11306_v59 = vld [vmem:[#allocation156_spill] sm:$0xff] }
 0x2a4   : > { %v7409_v25 = vpack.c.bf16 %v5545_v42, %v5545_v42  ;;  %v5546_v9 = vmax.f32 %v5418_v46, 0.0  ;;  %v3972_v60 = vmax.f32 %v11289_v16, %v3737_v23  ;;  %v8076_v26 = vpop.f32.mrb[222].mxu0  ;;  %v8208_v14 = vpop.f32.mrb[222].mxu1  ;;  %v11304_v42 = vmax.f32 %v11302_v19, %v11303_v49  ;;  %v11320_v49 = vld [vmem:[#allocation165_spill] sm:$0xff] }
 0x2a5   : > { %6188 = vst.msk [vmem:[%s9837_s27 + $0x168] sm:$0xf] %vm6097_vm3, %v7411_v51  ;;  %v7412_v30 = vpack.c.bf16 %v5548_v48, %v5548_v48  ;;  %v5288_v31 = vmax.f32 %v3974_v3, %v8207_v0  ;;  %v3975_v12 = vmax.f32 %v11292_v2, %v8076_v26  ;;  %v3740_v52 = vpop.f32.mrb[223].mxu0  ;;  %v5054_v10 = vpop.f32.mrb[223].mxu1  ;;  %v11307_v3 = vmax.f32 %v11305_v57, %v11306_v59  ;;  %v11309_v2 = vld [vmem:[#allocation158_spill] sm:$0xff]  ;;  %v11323_v59 = vld [vmem:[#allocation167_spill] sm:$0xff] }
 0x2a6   : > { %6186 = vst.msk [vmem:[%s9837_s27 + $0x160] sm:$0xf] %vm6097_vm3, %v7409_v25  ;;  %v7410_v54 = vpack.c.bf16 %v5546_v9, %v5546_v9  ;;  %v5286_v15 = vmax.f32 %v3972_v60, %v5051_v62  ;;  %v3973_v6 = vmax.f32 %v11295_v55, %v3740_v52  ;;  %v11312_v55 = vld [vmem:[#allocation160_spill] sm:$0xff] }
 0x2a7   : > { %6189 = vst.msk [vmem:[%s9837_s27 + $0x16c] sm:$0xf] %vm6097_vm3, %v7412_v30  ;;  %v5423_v40 = vadd.f32 %v10225_v18, %v5288_v31  ;;  %v5289_v21 = vmax.f32 %v3975_v12, %v8208_v14  ;;  %v11310_v12 = vmax.f32 %v11308_v63, %v11309_v2  ;;  %v11329_v2 = vld [vmem:[#allocation171_spill] sm:$0xff] }
 0x2a8   : > { %6187 = vst.msk [vmem:[%s9837_s27 + $0x164] sm:$0xf] %vm6097_vm3, %v7410_v54  ;;  %v5421_v24 = vadd.f32 %v10225_v18, %v5286_v15  ;;  %v5287_v7 = vmax.f32 %v3973_v6, %v5054_v10  ;;  %v11313_v6 = vmax.f32 %v11311_v33, %v11312_v55 }
 0x2a9   : > { %v5551_v28 = vmax.f32 %v5423_v40, 0.0  ;;  %v5424_v39 = vadd.f32 %v10225_v18, %v5289_v21 }
 0x2aa   : > { %v5549_v32 = vmax.f32 %v5421_v24, 0.0  ;;  %v5422_v44 = vadd.f32 %v10225_v18, %v5287_v7  ;;  %v8079_v35 = vpop.f32.mrb[224].mxu0  ;;  %v8211_v58 = vpop.f32.mrb[224].mxu1 }
 0x2ab   : > { %v7415_v43 = vpack.c.bf16 %v5551_v28, %v5551_v28  ;;  %v5552_v13 = vmax.f32 %v5424_v39, 0.0  ;;  %v3978_v37 = vmax.f32 %v11298_v36, %v8079_v35  ;;  %v3753_v17 = vpop.f32.mrb[225].mxu0  ;;  %v5067_v20 = vpop.f32.mrb[225].mxu1  ;;  %v11314_v28 = vld [vmem:[#allocation161_spill] sm:$0xff]  ;;  %v11315_v39 = vld [vmem:[#allocation162_spill] sm:$0xff]  ;;  %v11318_v36 = vld [vmem:[#allocation164_spill] sm:$0xff] }
 0x2ac   : > { %v7413_v53 = vpack.c.bf16 %v5549_v32, %v5549_v32  ;;  %v5550_v56 = vmax.f32 %v5422_v44, 0.0  ;;  %v3976_v8 = vmax.f32 %v11301_v41, %v3753_v17  ;;  %v8080_v22 = vpop.f32.mrb[226].mxu0  ;;  %v8212_v47 = vpop.f32.mrb[226].mxu1  ;;  %v11316_v32 = vmax.f32 %v11314_v28, %v11315_v39  ;;  %v11332_v39 = vld [vmem:[#allocation173_spill] sm:$0xff] }
 0x2ad   : > { %6192 = vst.msk [vmem:[%s9837_s27 + $0x178] sm:$0xf] %vm6097_vm3, %v7415_v43  ;;  %v7416_v4 = vpack.c.bf16 %v5552_v13, %v5552_v13  ;;  %v5292_v27 = vmax.f32 %v3978_v37, %v8211_v58  ;;  %v3979_v46 = vmax.f32 %v11304_v42, %v8080_v22  ;;  %v3756_v51 = vpop.f32.mrb[227].mxu0  ;;  %v5070_v23 = vpop.f32.mrb[227].mxu1  ;;  %v11319_v37 = vmax.f32 %v11317_v61, %v11318_v36  ;;  %v11321_v42 = vld [vmem:[#allocation166_spill] sm:$0xff]  ;;  %v11335_v36 = vld [vmem:[#allocation175_spill] sm:$0xff] }
 0x2ae   : > { %6190 = vst.msk [vmem:[%s9837_s27 + $0x170] sm:$0xf] %vm6097_vm3, %v7413_v53  ;;  %v7414_v48 = vpack.c.bf16 %v5550_v56, %v5550_v56  ;;  %v5290_v50 = vmax.f32 %v3976_v8, %v5067_v20  ;;  %v3977_v0 = vmax.f32 %v11307_v3, %v3756_v51  ;;  %v11324_v3 = vld [vmem:[#allocation168_spill] sm:$0xff] }
 0x2af   : > { %6193 = vst.msk [vmem:[%s9837_s27 + $0x17c] sm:$0xf] %vm6097_vm3, %v7416_v4  ;;  %v5427_v25 = vadd.f32 %v10225_v18, %v5292_v27  ;;  %v5293_v9 = vmax.f32 %v3979_v46, %v8212_v47  ;;  %v11322_v46 = vmax.f32 %v11320_v49, %v11321_v42  ;;  %v11341_v42 = vld [vmem:[#allocation179_spill] sm:$0xff] }
 0x2b0   : > { %6191 = vst.msk [vmem:[%s9837_s27 + $0x174] sm:$0xf] %vm6097_vm3, %v7414_v48  ;;  %v5425_v11 = vadd.f32 %v10225_v18, %v5290_v50  ;;  %v5291_v45 = vmax.f32 %v3977_v0, %v5070_v23  ;;  %v11325_v0 = vmax.f32 %v11323_v59, %v11324_v3 }
 0x2b1   : > { %v5555_v16 = vmax.f32 %v5427_v25, 0.0  ;;  %v5428_v60 = vadd.f32 %v10225_v18, %v5293_v9 }
 0x2b2   : > { %v5553_v62 = vmax.f32 %v5425_v11, 0.0  ;;  %v5426_v26 = vadd.f32 %v10225_v18, %v5291_v45  ;;  %v8083_v30 = vpop.f32.mrb[228].mxu0  ;;  %v8215_v52 = vpop.f32.mrb[228].mxu1 }
 0x2b3   : > { %v7419_v31 = vpack.c.bf16 %v5555_v16, %v5555_v16  ;;  %v5556_v34 = vmax.f32 %v5428_v60, 0.0  ;;  %v3982_v14 = vmax.f32 %v11310_v12, %v8083_v30  ;;  %v3769_v54 = vpop.f32.mrb[229].mxu0  ;;  %v5083_v40 = vpop.f32.mrb[229].mxu1  ;;  %v11326_v16 = vld [vmem:[#allocation169_spill] sm:$0xff]  ;;  %v11327_v60 = vld [vmem:[#allocation170_spill] sm:$0xff]  ;;  %v11330_v12 = vld [vmem:[#allocation172_spill] sm:$0xff] }
 0x2b4   : > { %v7417_v15 = vpack.c.bf16 %v5553_v62, %v5553_v62  ;;  %v5554_v29 = vmax.f32 %v5426_v26, 0.0  ;;  %v3980_v10 = vmax.f32 %v11313_v6, %v3769_v54  ;;  %v8084_v21 = vpop.f32.mrb[230].mxu0  ;;  %v8216_v35 = vpop.f32.mrb[230].mxu1  ;;  %v11328_v62 = vmax.f32 %v11326_v16, %v11327_v60  ;;  %v11344_v60 = vld [vmem:[#allocation181_spill] sm:$0xff] }
 0x2b5   : > { %6196 = vst.msk [vmem:[%s9837_s27 + $0x188] sm:$0xf] %vm6097_vm3, %v7419_v31  ;;  %v7420_v24 = vpack.c.bf16 %v5556_v34, %v5556_v34  ;;  %v5296_v7 = vmax.f32 %v3982_v14, %v8215_v52  ;;  %v3983_v44 = vmax.f32 %v11316_v32, %v8084_v21  ;;  %v3772_v43 = vpop.f32.mrb[231].mxu0  ;;  %v5086_v17 = vpop.f32.mrb[231].mxu1  ;;  %v11331_v14 = vmax.f32 %v11329_v2, %v11330_v12  ;;  %v11333_v32 = vld [vmem:[#allocation174_spill] sm:$0xff]  ;;  %v11347_v12 = vld [vmem:[#allocation183_spill] sm:$0xff] }
 0x2b6   : > { %6194 = vst.msk [vmem:[%s9837_s27 + $0x180] sm:$0xf] %vm6097_vm3, %v7417_v15  ;;  %v7418_v13 = vpack.c.bf16 %v5554_v29, %v5554_v29  ;;  %v5294_v1 = vmax.f32 %v3980_v10, %v5083_v40  ;;  %v3981_v58 = vmax.f32 %v11319_v37, %v3772_v43  ;;  %v11336_v37 = vld [vmem:[#allocation176_spill] sm:$0xff] }
 0x2b7   : > { %6197 = vst.msk [vmem:[%s9837_s27 + $0x18c] sm:$0xf] %vm6097_vm3, %v7420_v24  ;;  %v5431_v53 = vadd.f32 %v10225_v18, %v5296_v7  ;;  %v5297_v56 = vmax.f32 %v3983_v44, %v8216_v35  ;;  %v11334_v44 = vmax.f32 %v11332_v39, %v11333_v32  ;;  %v11353_v32 = vld [vmem:[#allocation187_spill] sm:$0xff] }
 0x2b8   : > { %6195 = vst.msk [vmem:[%s9837_s27 + $0x184] sm:$0xf] %vm6097_vm3, %v7418_v13  ;;  %v5429_v5 = vadd.f32 %v10225_v18, %v5294_v1  ;;  %v5295_v38 = vmax.f32 %v3981_v58, %v5086_v17  ;;  %v11337_v58 = vmax.f32 %v11335_v36, %v11336_v37 }
 0x2b9   : > { %v5559_v41 = vmax.f32 %v5431_v53, 0.0  ;;  %v5432_v8 = vadd.f32 %v10225_v18, %v5297_v56 }
 0x2ba   : > { %v5557_v20 = vmax.f32 %v5429_v5, 0.0  ;;  %v5430_v22 = vadd.f32 %v10225_v18, %v5295_v38  ;;  %v8087_v4 = vpop.f32.mrb[232].mxu0  ;;  %v8219_v51 = vpop.f32.mrb[232].mxu1 }
 0x2bb   : > { %v7423_v27 = vpack.c.bf16 %v5559_v41, %v5559_v41  ;;  %v5560_v19 = vmax.f32 %v5432_v8, 0.0  ;;  %v3986_v47 = vmax.f32 %v11322_v46, %v8087_v4  ;;  %v3785_v48 = vpop.f32.mrb[233].mxu0  ;;  %v5099_v25 = vpop.f32.mrb[233].mxu1  ;;  %v11338_v41 = vld [vmem:[#allocation177_spill] sm:$0xff]  ;;  %v11339_v8 = vld [vmem:[#allocation178_spill] sm:$0xff]  ;;  %v11342_v46 = vld [vmem:[#allocation180_spill] sm:$0xff] }
 0x2bc   : > { %v7421_v50 = vpack.c.bf16 %v5557_v20, %v5557_v20  ;;  %v5558_v57 = vmax.f32 %v5430_v22, 0.0  ;;  %v3984_v23 = vmax.f32 %v11325_v0, %v3785_v48  ;;  %v8088_v9 = vpop.f32.mrb[234].mxu0  ;;  %v8220_v30 = vpop.f32.mrb[234].mxu1  ;;  %v11340_v20 = vmax.f32 %v11338_v41, %v11339_v8  ;;  %v11356_v8 = vld [vmem:[#allocation189_spill] sm:$0xff] }
 0x2bd   : > { %6200 = vst.msk [vmem:[%s9837_s27 + $0x198] sm:$0xf] %vm6097_vm3, %v7423_v27  ;;  %v7424_v11 = vpack.c.bf16 %v5560_v19, %v5560_v19  ;;  %v5300_v45 = vmax.f32 %v3986_v47, %v8219_v51  ;;  %v3987_v26 = vmax.f32 %v11328_v62, %v8088_v9  ;;  %v3788_v31 = vpop.f32.mrb[235].mxu0  ;;  %v5102_v54 = vpop.f32.mrb[235].mxu1  ;;  %v11343_v47 = vmax.f32 %v11341_v42, %v11342_v46  ;;  %v11345_v62 = vld [vmem:[#allocation182_spill] sm:$0xff]  ;;  %v11359_v46 = vld [vmem:[#allocation191_spill] sm:$0xff] }
 0x2be   : > { %6198 = vst.msk [vmem:[%s9837_s27 + $0x190] sm:$0xf] %vm6097_vm3, %v7421_v50  ;;  %v7422_v34 = vpack.c.bf16 %v5558_v57, %v5558_v57  ;;  %v5298_v63 = vmax.f32 %v3984_v23, %v5099_v25  ;;  %v3985_v52 = vmax.f32 %v11331_v14, %v3788_v31  ;;  %v11348_v14 = vld [vmem:[#allocation184_spill] sm:$0xff] }
 0x2bf   : > { %6201 = vst.msk [vmem:[%s9837_s27 + $0x19c] sm:$0xf] %vm6097_vm3, %v7424_v11  ;;  %v5435_v15 = vadd.f32 %v10225_v18, %v5300_v45  ;;  %v5301_v29 = vmax.f32 %v3987_v26, %v8220_v30  ;;  %v11346_v26 = vmax.f32 %v11344_v60, %v11345_v62  ;;  %v11365_v62 = vld [vmem:[#allocation195_spill] sm:$0xff] }
 0x2c0   : > { %6199 = vst.msk [vmem:[%s9837_s27 + $0x194] sm:$0xf] %vm6097_vm3, %v7422_v34  ;;  %v5433_v33 = vadd.f32 %v10225_v18, %v5298_v63  ;;  %v5299_v55 = vmax.f32 %v3985_v52, %v5102_v54  ;;  %v11349_v52 = vmax.f32 %v11347_v12, %v11348_v14 }
 0x2c1   : > { %v5563_v6 = vmax.f32 %v5435_v15, 0.0  ;;  %v5436_v10 = vadd.f32 %v10225_v18, %v5301_v29 }
 0x2c2   : > { %v5561_v40 = vmax.f32 %v5433_v33, 0.0  ;;  %v5434_v21 = vadd.f32 %v10225_v18, %v5299_v55  ;;  %v8091_v24 = vpop.f32.mrb[236].mxu0  ;;  %v8223_v43 = vpop.f32.mrb[236].mxu1 }
 0x2c3   : > { %v7427_v7 = vpack.c.bf16 %v5563_v6, %v5563_v6  ;;  %v5564_v28 = vmax.f32 %v5436_v10, 0.0  ;;  %v3990_v35 = vmax.f32 %v11334_v44, %v8091_v24  ;;  %v3801_v13 = vpop.f32.mrb[237].mxu0  ;;  %v5115_v53 = vpop.f32.mrb[237].mxu1  ;;  %v11350_v6 = vld [vmem:[#allocation185_spill] sm:$0xff]  ;;  %v11351_v10 = vld [vmem:[#allocation186_spill] sm:$0xff]  ;;  %v11354_v44 = vld [vmem:[#allocation188_spill] sm:$0xff] }
 0x2c4   : > { %v7425_v1 = vpack.c.bf16 %v5561_v40, %v5561_v40  ;;  %v5562_v61 = vmax.f32 %v5434_v21, 0.0  ;;  %v3988_v17 = vmax.f32 %v11337_v58, %v3801_v13  ;;  %v8092_v56 = vpop.f32.mrb[238].mxu0  ;;  %v8224_v4 = vpop.f32.mrb[238].mxu1  ;;  %v11352_v40 = vmax.f32 %v11350_v6, %v11351_v10  ;;  %v11368_v10 = vld [vmem:[#allocation197_spill] sm:$0xff] }
 0x2c5   : > { %6204 = vst.msk [vmem:[%s9837_s27 + $0x1a8] sm:$0xf] %vm6097_vm3, %v7427_v7  ;;  %v7428_v5 = vpack.c.bf16 %v5564_v28, %v5564_v28  ;;  %v5304_v38 = vmax.f32 %v3990_v35, %v8223_v43  ;;  %v3991_v22 = vmax.f32 %v11340_v20, %v8092_v56  ;;  %v3804_v27 = vpop.f32.mrb[239].mxu0  ;;  %v5118_v48 = vpop.f32.mrb[239].mxu1  ;;  %v11355_v35 = vmax.f32 %v11353_v32, %v11354_v44  ;;  %v11357_v20 = vld [vmem:[#allocation190_spill] sm:$0xff]  ;;  %v11371_v44 = vld [vmem:[#allocation199_spill] sm:$0xff] }
 0x2c6   : > { %6202 = vst.msk [vmem:[%s9837_s27 + $0x1a0] sm:$0xf] %vm6097_vm3, %v7425_v1  ;;  %v7426_v19 = vpack.c.bf16 %v5562_v61, %v5562_v61  ;;  %v5302_v49 = vmax.f32 %v3988_v17, %v5115_v53  ;;  %v3989_v51 = vmax.f32 %v11343_v47, %v3804_v27  ;;  %v11360_v47 = vld [vmem:[#allocation192_spill] sm:$0xff] }
 0x2c7   : > { %6205 = vst.msk [vmem:[%s9837_s27 + $0x1ac] sm:$0xf] %vm6097_vm3, %v7428_v5  ;;  %v5439_v50 = vadd.f32 %v10225_v18, %v5304_v38  ;;  %v5305_v57 = vmax.f32 %v3991_v22, %v8224_v4  ;;  %v11358_v22 = vmax.f32 %v11356_v8, %v11357_v20  ;;  %v11377_v20 = vld [vmem:[#allocation203_spill] sm:$0xff] }
 0x2c8   : > { %6203 = vst.msk [vmem:[%s9837_s27 + $0x1a4] sm:$0xf] %vm6097_vm3, %v7426_v19  ;;  %v5437_v59 = vadd.f32 %v10225_v18, %v5302_v49  ;;  %v5303_v3 = vmax.f32 %v3989_v51, %v5118_v48  ;;  %v11361_v51 = vmax.f32 %v11359_v46, %v11360_v47 }
 0x2c9   : > { %v5567_v0 = vmax.f32 %v5439_v50, 0.0  ;;  %v5440_v23 = vadd.f32 %v10225_v18, %v5305_v57 }
 0x2ca   : > { %v5565_v25 = vmax.f32 %v5437_v59, 0.0  ;;  %v5438_v9 = vadd.f32 %v10225_v18, %v5303_v3  ;;  %v8095_v11 = vpop.f32.mrb[240].mxu0  ;;  %v8227_v31 = vpop.f32.mrb[240].mxu1 }
 0x2cb   : > { %v7431_v45 = vpack.c.bf16 %v5567_v0, %v5567_v0  ;;  %v5568_v16 = vmax.f32 %v5440_v23, 0.0  ;;  %v3994_v30 = vmax.f32 %v11346_v26, %v8095_v11  ;;  %v3817_v34 = vpop.f32.mrb[241].mxu0  ;;  %v5131_v15 = vpop.f32.mrb[241].mxu1  ;;  %v11362_v0 = vld [vmem:[#allocation193_spill] sm:$0xff]  ;;  %v11363_v23 = vld [vmem:[#allocation194_spill] sm:$0xff]  ;;  %v11366_v26 = vld [vmem:[#allocation196_spill] sm:$0xff] }
 0x2cc   : > { %v7429_v63 = vpack.c.bf16 %v5565_v25, %v5565_v25  ;;  %v5566_v2 = vmax.f32 %v5438_v9, 0.0  ;;  %v3992_v54 = vmax.f32 %v11349_v52, %v3817_v34  ;;  %v8096_v29 = vpop.f32.mrb[242].mxu0  ;;  %v8228_v24 = vpop.f32.mrb[242].mxu1  ;;  %v11364_v25 = vmax.f32 %v11362_v0, %v11363_v23  ;;  %v11380_v23 = vld [vmem:[#allocation205_spill] sm:$0xff] }
 0x2cd   : > { %6208 = vst.msk [vmem:[%s9837_s27 + $0x1b8] sm:$0xf] %vm6097_vm3, %v7431_v45  ;;  %v7432_v33 = vpack.c.bf16 %v5568_v16, %v5568_v16  ;;  %v5308_v55 = vmax.f32 %v3994_v30, %v8227_v31  ;;  %v3995_v21 = vmax.f32 %v11352_v40, %v8096_v29  ;;  %v3820_v7 = vpop.f32.mrb[243].mxu0  ;;  %v5134_v13 = vpop.f32.mrb[243].mxu1  ;;  %v11367_v30 = vmax.f32 %v11365_v62, %v11366_v26  ;;  %v11369_v40 = vld [vmem:[#allocation198_spill] sm:$0xff]  ;;  %v11383_v26 = vld [vmem:[#allocation207_spill] sm:$0xff] }
 0x2ce   : > { %6206 = vst.msk [vmem:[%s9837_s27 + $0x1b0] sm:$0xf] %vm6097_vm3, %v7429_v63  ;;  %v7430_v28 = vpack.c.bf16 %v5566_v2, %v5566_v2  ;;  %v5306_v39 = vmax.f32 %v3992_v54, %v5131_v15  ;;  %v3993_v43 = vmax.f32 %v11355_v35, %v3820_v7  ;;  %v11372_v35 = vld [vmem:[#allocation200_spill] sm:$0xff] }
 0x2cf   : > { %6209 = vst.msk [vmem:[%s9837_s27 + $0x1bc] sm:$0xf] %vm6097_vm3, %v7432_v33  ;;  %v5443_v1 = vadd.f32 %v10225_v18, %v5308_v55  ;;  %v5309_v61 = vmax.f32 %v3995_v21, %v8228_v24  ;;  %v11370_v21 = vmax.f32 %v11368_v10, %v11369_v40  ;;  %v11389_v10 = vld [vmem:[#allocation211_spill] sm:$0xff]  ;;  %v11390_v40 = vld [vmem:[#allocation212_spill] sm:$0xff] }
 0x2d0   : > { %6207 = vst.msk [vmem:[%s9837_s27 + $0x1b4] sm:$0xf] %vm6097_vm3, %v7430_v28  ;;  %v5441_v36 = vadd.f32 %v10225_v18, %v5306_v39  ;;  %v5307_v37 = vmax.f32 %v3993_v43, %v5134_v13  ;;  %v11373_v43 = vmax.f32 %v11371_v44, %v11372_v35 }
 0x2d1   : > { %v5571_v58 = vmax.f32 %v5443_v1, 0.0  ;;  %v5444_v17 = vadd.f32 %v10225_v18, %v5309_v61 }
 0x2d2   : > { %v5569_v53 = vmax.f32 %v5441_v36, 0.0  ;;  %v5442_v56 = vadd.f32 %v10225_v18, %v5307_v37  ;;  %v8099_v5 = vpop.f32.mrb[244].mxu0  ;;  %v8231_v27 = vpop.f32.mrb[244].mxu1 }
 0x2d3   : > { %v7435_v38 = vpack.c.bf16 %v5571_v58, %v5571_v58  ;;  %v5572_v41 = vmax.f32 %v5444_v17, 0.0  ;;  %v3998_v4 = vmax.f32 %v11358_v22, %v8099_v5  ;;  %v3833_v19 = vpop.f32.mrb[245].mxu0  ;;  %v5147_v50 = vpop.f32.mrb[245].mxu1  ;;  %v11374_v58 = vld [vmem:[#allocation201_spill] sm:$0xff]  ;;  %v11375_v17 = vld [vmem:[#allocation202_spill] sm:$0xff]  ;;  %v11378_v22 = vld [vmem:[#allocation204_spill] sm:$0xff] }
 0x2d4   : > { %v7433_v49 = vpack.c.bf16 %v5569_v53, %v5569_v53  ;;  %v5570_v42 = vmax.f32 %v5442_v56, 0.0  ;;  %v3996_v48 = vmax.f32 %v11361_v51, %v3833_v19  ;;  %v8100_v57 = vpop.f32.mrb[246].mxu0  ;;  %v8232_v11 = vpop.f32.mrb[246].mxu1  ;;  %v11376_v53 = vmax.f32 %v11374_v58, %v11375_v17 }
 0x2d5   : > { %6212 = vst.msk [vmem:[%s9837_s27 + $0x1c8] sm:$0xf] %vm6097_vm3, %v7435_v38  ;;  %v7436_v59 = vpack.c.bf16 %v5572_v41, %v5572_v41  ;;  %v5312_v3 = vmax.f32 %v3998_v4, %v8231_v27  ;;  %v3999_v9 = vmax.f32 %v11364_v25, %v8100_v57  ;;  %v3836_v45 = vpop.f32.mrb[247].mxu0  ;;  %v5150_v34 = vpop.f32.mrb[247].mxu1  ;;  %v11379_v4 = vmax.f32 %v11377_v20, %v11378_v22  ;;  %v11381_v25 = vld [vmem:[#allocation206_spill] sm:$0xff] }
 0x2d6   : > { %6210 = vst.msk [vmem:[%s9837_s27 + $0x1c0] sm:$0xf] %vm6097_vm3, %v7433_v49  ;;  %v7434_v16 = vpack.c.bf16 %v5570_v42, %v5570_v42  ;;  %v5310_v60 = vmax.f32 %v3996_v48, %v5147_v50  ;;  %v3997_v31 = vmax.f32 %v11367_v30, %v3836_v45  ;;  %v11384_v30 = vld [vmem:[#allocation208_spill] sm:$0xff] }
 0x2d7   : > { %6213 = vst.msk [vmem:[%s9837_s27 + $0x1cc] sm:$0xf] %vm6097_vm3, %v7436_v59  ;;  %v5447_v63 = vadd.f32 %v10225_v18, %v5312_v3  ;;  %v5313_v2 = vmax.f32 %v3999_v9, %v8232_v11  ;;  %v11382_v9 = vmax.f32 %v11380_v23, %v11381_v25 }
 0x2d8   : > { %6211 = vst.msk [vmem:[%s9837_s27 + $0x1c4] sm:$0xf] %vm6097_vm3, %v7434_v16  ;;  %v5445_v12 = vadd.f32 %v10225_v18, %v5310_v60  ;;  %v5311_v14 = vmax.f32 %v3997_v31, %v5150_v34  ;;  %v11385_v31 = vmax.f32 %v11383_v26, %v11384_v30 }
 0x2d9   : > { %v5575_v52 = vmax.f32 %v5447_v63, 0.0  ;;  %v5448_v54 = vadd.f32 %v10225_v18, %v5313_v2 }
 0x2da   : > { %v5573_v15 = vmax.f32 %v5445_v12, 0.0  ;;  %v5446_v29 = vadd.f32 %v10225_v18, %v5311_v14  ;;  %v8103_v33 = vpop.f32.mrb[248].mxu0  ;;  %v8235_v7 = vpop.f32.mrb[248].mxu1  ;;  %v11386_v14 = vld [vmem:[#allocation209_spill] sm:$0xff] }
 0x2db   : > { %v7439_v55 = vpack.c.bf16 %v5575_v52, %v5575_v52  ;;  %v5576_v6 = vmax.f32 %v5448_v54, 0.0  ;;  %v4002_v24 = vmax.f32 %v11370_v21, %v8103_v33  ;;  %v3849_v28 = vpop.f32.mrb[249].mxu0  ;;  %v5163_v1 = vpop.f32.mrb[249].mxu1  ;;  %v11387_v52 = vld [vmem:[#allocation210_spill] sm:$0xff]  ;;  %v11391_v21 = vmax.f32 %v11389_v10, %v11390_v40 }
 0x2dc   : > { %v7437_v39 = vpack.c.bf16 %v5573_v15, %v5573_v15  ;;  %v5574_v32 = vmax.f32 %v5446_v29, 0.0  ;;  %v4000_v13 = vmax.f32 %v11373_v43, %v3849_v28  ;;  %v8104_v61 = vpop.f32.mrb[250].mxu0  ;;  %v8236_v5 = vpop.f32.mrb[250].mxu1  ;;  %v11388_v54 = vmax.f32 %v11386_v14, %v11387_v52  ;;  %v8509_v28 = vld [vmem:[%s10629_s2] ss:$0 sm:$0xff] }
 0x2dd   : > { %6216 = vst.msk [vmem:[%s9837_s27 + $0x1d8] sm:$0xf] %vm6097_vm3, %v7439_v55  ;;  %v7440_v36 = vpack.c.bf16 %v5576_v6, %v5576_v6  ;;  %v5316_v37 = vmax.f32 %v4002_v24, %v8235_v7  ;;  %v4003_v56 = vmax.f32 %v11376_v53, %v8104_v61  ;;  %v3852_v38 = vpop.f32.mrb[251].mxu0  ;;  %v5166_v19 = vpop.f32.mrb[251].mxu1 }
 0x2de   : > { %6214 = vst.msk [vmem:[%s9837_s27 + $0x1d0] sm:$0xf] %vm6097_vm3, %v7437_v39  ;;  %v7438_v41 = vpack.c.bf16 %v5574_v32, %v5574_v32  ;;  %v5314_v8 = vmax.f32 %v4000_v13, %v5163_v1  ;;  %v4001_v27 = vmax.f32 %v11379_v4, %v3852_v38 }
 0x2df   : > { %6217 = vst.msk [vmem:[%s9837_s27 + $0x1dc] sm:$0xf] %vm6097_vm3, %v7440_v36  ;;  %v5451_v49 = vadd.f32 %v10225_v18, %v5316_v37  ;;  %v5317_v42 = vmax.f32 %v4003_v56, %v8236_v5 }
 0x2e0   : > { %6215 = vst.msk [vmem:[%s9837_s27 + $0x1d4] sm:$0xf] %vm6097_vm3, %v7438_v41  ;;  %v5449_v46 = vadd.f32 %v10225_v18, %v5314_v8  ;;  %v5315_v47 = vmax.f32 %v4001_v27, %v5166_v19 }
 0x2e1   : > { %v5579_v51 = vmax.f32 %v5451_v49, 0.0  ;;  %v5452_v48 = vadd.f32 %v10225_v18, %v5317_v42 }
 0x2e2   : > { %v5577_v50 = vmax.f32 %v5449_v46, 0.0  ;;  %v5450_v57 = vadd.f32 %v10225_v18, %v5315_v47  ;;  %v8107_v59 = vpop.f32.mrb[252].mxu0  ;;  %v8239_v45 = vpop.f32.mrb[252].mxu1 }
 0x2e3   : > { %v7443_v3 = vpack.c.bf16 %v5579_v51, %v5579_v51  ;;  %v5580_v0 = vmax.f32 %v5452_v48, 0.0  ;;  %v4006_v11 = vmax.f32 %v11382_v9, %v8107_v59  ;;  %v3865_v16 = vpop.f32.mrb[253].mxu0  ;;  %v5179_v63 = vpop.f32.mrb[253].mxu1 }
 0x2e4   : > { %v7441_v60 = vpack.c.bf16 %v5577_v50, %v5577_v50  ;;  %v5578_v62 = vmax.f32 %v5450_v57, 0.0  ;;  %v4004_v34 = vmax.f32 %v11385_v31, %v3865_v16  ;;  %v8108_v2 = vpop.f32.mrb[254].mxu0  ;;  %v8240_v29 = vpop.f32.mrb[254].mxu1 }
 0x2e5   : > { %6220 = vst.msk [vmem:[%s9837_s27 + $0x1e8] sm:$0xf] %vm6097_vm3, %v7443_v3  ;;  %v7444_v18 = vpack.c.bf16 %v5580_v0, %v5580_v0  ;;  %v5320_v12 = vmax.f32 %v4006_v11, %v8239_v45  ;;  %v4007_v15 = vmax.f32 %v11388_v54, %v8108_v2  ;;  %v3868_v33 = vpop.f32.mrb[255].mxu0  ;;  %v5182_v7 = vpop.f32.mrb[255].mxu1 }
 0x2e6   : > { %6218 = vst.msk [vmem:[%s9837_s27 + $0x1e0] sm:$0xf] %vm6097_vm3, %v7441_v60  ;;  %v7442_v55 = vpack.c.bf16 %v5578_v62, %v5578_v62  ;;  %v5318_v6 = vmax.f32 %v4004_v34, %v5179_v63  ;;  %v4005_v24 = vmax.f32 %v11391_v21, %v3868_v33 }
 0x2e7   : > { %6221 = vst.msk [vmem:[%s9837_s27 + $0x1ec] sm:$0xf] %vm6097_vm3, %v7444_v18  ;;  %v5455_v39 = vadd.f32 %v8509_v28, %v5320_v12  ;;  %v5321_v32 = vmax.f32 %v4007_v15, %v8240_v29 }
 0x2e8   : > { %6219 = vst.msk [vmem:[%s9837_s27 + $0x1e4] sm:$0xf] %vm6097_vm3, %v7442_v55  ;;  %v5453_v44 = vadd.f32 %v8509_v28, %v5318_v6  ;;  %v5319_v35 = vmax.f32 %v4005_v24, %v5182_v7 }
 0x2e9   : > { %v5583_v43 = vmax.f32 %v5455_v39, 0.0  ;;  %v5456_v13 = vadd.f32 %v8509_v28, %v5321_v32 }
 0x2ea   : > { %v5581_v1 = vmax.f32 %v5453_v44, 0.0  ;;  %v5454_v61 = vadd.f32 %v8509_v28, %v5319_v35 }
 0x2eb   : > { %v7447_v36 = vpack.c.bf16 %v5583_v43, %v5583_v43  ;;  %v5584_v37 = vmax.f32 %v5456_v13, 0.0 }
 0x2ec   : > { %v7445_v58 = vpack.c.bf16 %v5581_v1, %v5581_v1  ;;  %v5582_v17 = vmax.f32 %v5454_v61, 0.0 }
 0x2ed   : > { %6224 = vst.msk [vmem:[%s9837_s27 + $0x1f8] sm:$0xf] %vm6097_vm3, %v7447_v36  ;;  %v7448_v53 = vpack.c.bf16 %v5584_v37, %v5584_v37 }
 0x2ee   : > { %6222 = vst.msk [vmem:[%s9837_s27 + $0x1f0] sm:$0xf] %vm6097_vm3, %v7445_v58  ;;  %v7446_v56 = vpack.c.bf16 %v5582_v17, %v5582_v17 }
 0x2ef   : > { %6225 = vst.msk [vmem:[%s9837_s27 + $0x1fc] sm:$0xf] %vm6097_vm3, %v7448_v53 }
 0x2f0   : > { %6223 = vst.msk [vmem:[%s9837_s27 + $0x1f4] sm:$0xf] %vm6097_vm3, %v7446_v56 }
 0x2f1 PF: > { %s13_s12 = sadd.s32 1, %s8516_s12  }
 0x2f2   : > { %p10_p4 = scmp.ge.s32.totalorder %s13_s12, 4  }
 0x2f4   :  { %12 = sbr.rel (!%p10_p4) target bundleno = 1 (0x1), region = 65 }

// kernel: dddqn_forward.4
= control target key start
LH: loop header
LB: loop body
LE: loop exit
PB: predicated region body
PF: predicated region fallthrough
CT: control target
= control target key end

     0   :  { %s4938_s12 = smov 0   ;;  %s6175_s0 = inlined_call_operand.vmem [shape: bf16[2,4,256,288], index: 0, kind: input, shape index: {}]   ;;  %s6176_s1 = inlined_call_operand.vmem [shape: bf16[288,64], index: 1, kind: input, shape index: {}]   ;;  %s6177_s2 = inlined_call_operand.vmem [shape: f32[1,64], index: 2, kind: input, shape index: {}]   ;;  %s6178_s3 = inlined_call_operand.vmem [shape: bf16[2,256,64], index: 3, kind: output, shape index: {}]  }
   0x1 LB: > { %s3399_s13 = sadd.s32 4294967295, %s4916_s12   ;;  %p3403_p0 = scmp.ge.s32.totalorder %s4916_s12, 1  ;;  %s4916_s12 = sphi %s4938_s12, %s13_s12  }
   0x2   : > { %p137_p1 = scmp.lt.s32.totalorder %s4916_s12, 3 }
   0x4   : > { %p138_p2 = pnand %p3403_p0, %p137_p1 }
   0x6   : > { %141 = sbr.rel (%p138_p2) target bundleno = 643 (0x283), region = 32 }
   0xd   : > { %v4949_v0 = vld [vmem:[%s6176_s1 + $0x40] sm:$0xff]   ;;  %p161_p3 = scmp.lt.s32.totalorder %s3399_s13, 1  ;;  %v4968_v3 = vld [vmem:[%s6176_s1 + $0x48] sm:$0xff]   ;;  %vm620_vm0 = vcmask 261120   ;;  %v4993_v6 = vld [vmem:[%s6176_s1 + $0x50] sm:$0xff]   ;;  %vm3311_vm1 = vcmask 519168  }
   0xe   : > { %v4954_v1 = vld [vmem:[%s6176_s1 + $0x80] sm:$0xff]   ;;  %3941 = vmatprep.subr.bf16.mxu0 %v4949_v0  ;;  %v4975_v4 = vld [vmem:[%s6176_s1 + $0x88] sm:$0xff]   ;;  %v5004_v9 = vld [vmem:[%s6176_s1 + $0x10] sm:$0xff]  }
   0xf   : > { %v4960_v2 = vld [vmem:[%s6176_s1] sm:$0xff]   ;;  %s6299_s13 = smov (!%p161_p3, %s3399_s13), 1  ;;  %4461 = vmatprep.subr.bf16.mxu1 %v4954_v1  ;;  %v4982_v5 = vld [vmem:[%s6176_s1 + $0x8] sm:$0xff]   ;;  %v5009_v10 = vld [vmem:[%s6176_s1 + $0x58] sm:$0xff]  }
  0x10   : > { %3942 = vmatpush3.bf16.msra.mxu0 %v4960_v2  ;;  %4462 = vmatpush3.bf16.msra.mxu1 %v4954_v1  ;;  %s4609_s24 = smul.u32 1536, %s6299_s13  ;;  %v5016_v11 = vld [vmem:[%s6176_s1 + $0x18] sm:$0xff]   ;;  %v5025_v13 = vld [vmem:[%s6176_s1 + $0x60] sm:$0xff]   ;;  %v5041_v16 = vld [vmem:[%s6176_s1 + $0x68] sm:$0xff]   ;;  %s3908_s18 = sshll.u32 %s6299_s13, 7 }
  0x11   : > { %3943 = vmatprep.subr.bf16.mxu0 %v4968_v3  ;;  %4463 = vmatprep.subr.bf16.mxu1 %v4975_v4  ;;  %v5034_v15 = vld [vmem:[%s6176_s1 + $0x20] sm:$0xff]   ;;  %v5050_v18 = vld [vmem:[%s6176_s1 + $0x28] sm:$0xff]   ;;  %v5057_v19 = vld [vmem:[%s6176_s1 + $0x70] sm:$0xff]   ;;  %s6022_s21 = scalar_lea.vmem %s6178_s3, %s3908_s18 }
  0x12   : > { %s4988_s29 = scalar_lea.vmem %s6175_s0, %s4609_s24  ;;  %v5065_v21 = vld [vmem:[%s6176_s1 + $0x30] sm:$0xff]   ;;  %v5071_v22 = vld [vmem:[%s6176_s1 + $0x78] sm:$0xff]  }
  0x13   : > { %v4624_v7 = vld [vmem:[%s4988_s29 + $0x8] ss:$12 sps:$4 sm:$0xff]   ;;  %v4626_v8 = vld [vmem:[%s4988_s29 + $0x20] ss:$12 sps:$4 sm:$0xff]   ;;  %v4630_v12 = vld [vmem:[%s4988_s29 + $0x38] ss:$12 sps:$4 sm:$0xff]  }
  0x14   : > { %3944 = vmatpush3.bf16.msra.mxu0 %v4982_v5  ;;  %4464 = vmatpush3.bf16.msra.mxu1 %v4975_v4  ;;  %v4632_v14 = vld [vmem:[%s4988_s29 + $0x50] ss:$12 sps:$4 sm:$0xff]   ;;  %v4636_v17 = vld [vmem:[%s4988_s29 + $0x68] ss:$12 sps:$4 sm:$0xff]   ;;  %v4638_v20 = vld [vmem:[%s4988_s29 + $0x80] ss:$12 sps:$4 sm:$0xff]  }
  0x15   : > { %4465 = vmatprep.mubr.msk.bf16.mxu1 %vm620_vm0, %v4624_v7  ;;  %3945 = vmatprep.subr.bf16.mxu0 %v4993_v6  ;;  %v4644_v23 = vld [vmem:[%s4988_s29 + $0x4] ss:$12 sps:$4 sm:$0xff]   ;;  %v5083_v25 = vld [vmem:[%s6176_s1 + $0x38] sm:$0xff]   ;;  %v4642_v26 = vld [vmem:[%s4988_s29] ss:$12 sps:$4 sm:$0xff]  }
  0x16   : > { %4071 = vmatprep.subr.bf16.mxu1 %v4949_v0  ;;  %v4645_v24 = vld [vmem:[%s4988_s29 + $0x98] ss:$12 sps:$4 sm:$0xff]   ;;  %701 = vmatprep.mubr.bf16.mxu0 %v4644_v23  ;;  %v4646_v27 = vld [vmem:[%s4988_s29 + $0xb0] ss:$12 sps:$4 sm:$0xff]   ;;  %v4649_v29 = vld [vmem:[%s4988_s29 + $0xc8] ss:$12 sps:$4 sm:$0xff]  }
  0x17   : > { %4466 = vmatmul.mubr.msk.bf16.vlgmr.msra.gmra.mrb[0].mxu1 %vm620_vm0, %v4626_v8  ;;  %v4647_v28 = vld [vmem:[%s4988_s29 + $0x1c] ss:$12 sps:$4 sm:$0xff]   ;;  %v4650_v30 = vld [vmem:[%s4988_s29 + $0x18] ss:$12 sps:$4 sm:$0xff]   ;;  %v4651_v31 = vld [vmem:[%s4988_s29 + $0xe0] ss:$12 sps:$4 sm:$0xff]  }
  0x18   : > { %3946 = vmatpush3.bf16.msra.mxu0 %v5004_v9  ;;  %4072 = vmatpush3.bf16.msra.mxu1 %v4960_v2  ;;  %v4652_v32 = vld [vmem:[%s4988_s29 + $0x34] ss:$12 sps:$4 sm:$0xff]   ;;  %v4654_v33 = vld [vmem:[%s4988_s29 + $0xf8] ss:$12 sps:$4 sm:$0xff]   ;;  %v4655_v34 = vld [vmem:[%s4988_s29 + $0x30] ss:$12 sps:$4 sm:$0xff]  }
  0x19   : > { %3947 = vmatprep.subr.bf16.mxu0 %v5009_v10  ;;  %4073 = vmatprep.subr.bf16.mxu1 %v4968_v3  ;;  %v4656_v35 = vld [vmem:[%s4988_s29 + $0x110] ss:$12 sps:$4 sm:$0xff]   ;;  %v4657_v36 = vld [vmem:[%s4988_s29 + $0x4c] ss:$12 sps:$4 sm:$0xff]   ;;  %v4659_v37 = vld [vmem:[%s4988_s29 + $0x128] ss:$12 sps:$4 sm:$0xff]  }
  0x1a   : > { %4469 = vmatprep.mubr.msk.bf16.mxu1 %vm620_vm0, %v4630_v12  ;;  %v4660_v38 = vld [vmem:[%s4988_s29 + $0x48] ss:$12 sps:$4 sm:$0xff]   ;;  %v4661_v39 = vld [vmem:[%s4988_s29 + $0x140] ss:$12 sps:$4 sm:$0xff]   ;;  %v4662_v40 = vld [vmem:[%s4988_s29 + $0x64] ss:$12 sps:$4 sm:$0xff]  }
  0x1b   : > { %v4664_v41 = vld [vmem:[%s4988_s29 + $0x158] ss:$12 sps:$4 sm:$0xff]   ;;  %v4665_v42 = vld [vmem:[%s4988_s29 + $0x60] ss:$12 sps:$4 sm:$0xff]   ;;  %v4666_v43 = vld [vmem:[%s4988_s29 + $0x170] ss:$12 sps:$4 sm:$0xff]  }
  0x1c   : > { %3948 = vmatpush3.bf16.msra.mxu0 %v5016_v11  ;;  %4074 = vmatpush3.bf16.msra.mxu1 %v4982_v5  ;;  %v4667_v44 = vld [vmem:[%s4988_s29 + $0x7c] ss:$12 sps:$4 sm:$0xff]   ;;  %v4671_v45 = vld [vmem:[%s4988_s29 + $0x184] ss:$12 sps:$4 sm:$0xff]   ;;  %v4669_v46 = vld [vmem:[%s4988_s29 + $0x180] ss:$12 sps:$4 sm:$0xff]  }
  0x1d   : > { %3949 = vmatprep.subr.bf16.mxu0 %v5025_v13  ;;  %4075 = vmatprep.subr.bf16.mxu1 %v4993_v6  ;;  %v4672_v47 = vld [vmem:[%s4988_s29 + $0x78] ss:$12 sps:$4 sm:$0xff]   ;;  %v4673_v48 = vld [vmem:[%s4988_s29 + $0x94] ss:$12 sps:$4 sm:$0xff]   ;;  %v4675_v49 = vld [vmem:[%s4988_s29 + $0x19c] ss:$12 sps:$4 sm:$0xff]  }
  0x1e   : > { %v4677_v50 = vld [vmem:[%s4988_s29 + $0x90] ss:$12 sps:$4 sm:$0xff]   ;;  %v4678_v51 = vld [vmem:[%s4988_s29 + $0x198] ss:$12 sps:$4 sm:$0xff]   ;;  %v4681_v53 = vld [vmem:[%s4988_s29 + $0x1b4] ss:$12 sps:$4 sm:$0xff]  }
  0x1f   : > { %4470 = vmatmul.mubr.msk.bf16.gmra.mrb[4].mxu1 %vm620_vm0, %v4632_v14  ;;  %v4679_v52 = vld [vmem:[%s4988_s29 + $0xac] ss:$12 sps:$4 sm:$0xff]   ;;  %v4683_v54 = vld [vmem:[%s4988_s29 + $0xa8] ss:$12 sps:$4 sm:$0xff]   ;;  %v4684_v55 = vld [vmem:[%s4988_s29 + $0x1b0] ss:$12 sps:$4 sm:$0xff]  }
  0x20   : > { %3950 = vmatpush3.bf16.msra.mxu0 %v5034_v15  ;;  %4473 = vmatprep.mubr.msk.bf16.mxu1 %vm620_vm0, %v4636_v17  ;;  %v4685_v56 = vld [vmem:[%s4988_s29 + $0xc4] ss:$12 sps:$4 sm:$0xff]   ;;  %v4687_v57 = vld [vmem:[%s4988_s29 + $0x1cc] ss:$12 sps:$4 sm:$0xff]   ;;  %v4690_v59 = vld [vmem:[%s4988_s29 + $0x1c8] ss:$12 sps:$4 sm:$0xff]  }
  0x21   : > { %3951 = vmatprep.subr.bf16.mxu0 %v5041_v16  ;;  %4076 = vmatpush3.bf16.msra.mxu1 %v5004_v9  ;;  %v4689_v58 = vld [vmem:[%s4988_s29 + $0xc0] ss:$12 sps:$4 sm:$0xff]   ;;  %v4691_v60 = vld [vmem:[%s4988_s29 + $0xdc] ss:$12 sps:$4 sm:$0xff]   ;;  %v4693_v61 = vld [vmem:[%s4988_s29 + $0x1e4] ss:$12 sps:$4 sm:$0xff]  }
  0x22   : > { %4077 = vmatprep.subr.bf16.mxu1 %v5009_v10  ;;  %v4695_v62 = vld [vmem:[%s4988_s29 + $0xd8] ss:$12 sps:$4 sm:$0xff]   ;;  %v4696_v63 = vld [vmem:[%s4988_s29 + $0x1e0] ss:$12 sps:$4 sm:$0xff]   ;;  %v4707_v8 = vld [vmem:[%s4988_s29 + $0x108] ss:$12 sps:$4 sm:$0xff]  }
  0x23   : > { %v4705_v7 = vld [vmem:[%s4988_s29 + $0x214] ss:$12 sps:$4 sm:$0xff]   ;;  %v4717_v14 = vld [vmem:[%s4988_s29 + $0x244] ss:$12 sps:$4 sm:$0xff]  }
  0x24   : > { %3952 = vmatpush3.bf16.msra.mxu0 %v5050_v18  ;;  %v4714_v12 = vld [vmem:[%s4988_s29 + $0x228] ss:$12 sps:$4 sm:$0xff]  }
  0x25   : > { %3953 = vmatprep.subr.bf16.mxu0 %v5057_v19  ;;  %4078 = vmatpush3.bf16.msra.mxu1 %v5016_v11  ;;  %v4721_v17 = vld [vmem:[%s4988_s29 + $0x154] ss:$12 sps:$4 sm:$0xff]  }
  0x26   : > { %4079 = vmatprep.subr.bf16.mxu1 %v5025_v13  ;;  %v4731_v23 = vld [vmem:[%s4988_s29 + $0x168] ss:$12 sps:$4 sm:$0xff]  }
  0x27   : > { %4474 = vmatmul.mubr.msk.bf16.gmra.mrb[8].mxu1 %vm620_vm0, %v4638_v20  ;;  %v4726_v20 = vld [vmem:[%s4988_s29 + $0x258] ss:$12 sps:$4 sm:$0xff]  }
  0x28   : > { %3954 = vmatpush3.bf16.msra.mxu0 %v5065_v21  ;;  %4477 = vmatprep.mubr.msk.bf16.mxu1 %vm620_vm0, %v4645_v24  ;;  %v4732_v24 = vld [vmem:[%s4988_s29 + $0x270] ss:$12 sps:$4 sm:$0xff]  }
  0x29   : > { %3955 = vmatprep.subr.bf16.mxu0 %v5071_v22  ;;  %4080 = vmatpush3.bf16.msra.mxu1 %v5034_v15 }
  0x2a   : > { %4081 = vmatprep.subr.bf16.mxu1 %v5041_v16 }
  0x2c   : > { %3956 = vmatpush3.bf16.msra.mxu0 %v5083_v25 }
  0x2d   : > { %4497 = vmatprep.subr.bf16.mxu0 %v4954_v1  ;;  %4082 = vmatpush3.bf16.msra.mxu1 %v5050_v18 }
  0x2e   : > { %4083 = vmatprep.subr.bf16.mxu1 %v5057_v19 }
  0x2f   : > { %702 = vmatmul.mubr.bf16.vlgmr.msra.gmra.mrb[0].mxu0 %v4642_v26  ;;  %4478 = vmatmul.mubr.msk.bf16.gmra.mrb[12].mxu1 %vm620_vm0, %v4646_v27  ;;  %v4735_v26 = vld [vmem:[%s4988_s29 + $0x188] ss:$12 sps:$4 sm:$0xff]  }
  0x30   : > { %4498 = vmatpush3.bf16.msra.mxu0 %v4954_v1  ;;  %709 = vmatprep.mubr.bf16.mxu0 %v4647_v28  ;;  %v4736_v27 = vld [vmem:[%s4988_s29 + $0x288] ss:$12 sps:$4 sm:$0xff]   ;;  %v4737_v28 = vld [vmem:[%s4988_s29 + $0x1a0] ss:$12 sps:$4 sm:$0xff]  }
  0x31   : > { %4481 = vmatprep.mubr.msk.bf16.mxu1 %vm620_vm0, %v4649_v29  ;;  %4084 = vmatpush3.bf16.msra.mxu1 %v5065_v21  ;;  %v4738_v29 = vld [vmem:[%s4988_s29 + $0x2a4] ss:$12 sps:$4 sm:$0xff]  }
  0x32   : > { %4085 = vmatprep.subr.bf16.mxu1 %v5071_v22  ;;  %4499 = vmatprep.subr.bf16.mxu0 %v4975_v4 }
  0x34   : > { %4500 = vmatpush3.bf16.msra.mxu0 %v4975_v4 }
  0x35   : > { %4086 = vmatpush3.bf16.msra.mxu1 %v5083_v25  ;;  %4533 = vmatprep.subr.bf16.mxu0 %v4954_v1 }
  0x36   : > { %4201 = vmatprep.subr.bf16.mxu1 %v4949_v0  ;;  %v4697_v0 = vld [vmem:[%s4988_s29 + $0xf4] ss:$12 sps:$4 sm:$0xff]  }
  0x37   : > { %710 = vmatmul.mubr.bf16.gmra.mrb[4].mxu0 %v4650_v30  ;;  %4482 = vmatmul.mubr.msk.bf16.gmra.mrb[16].mxu1 %vm620_vm0, %v4651_v31  ;;  %v4740_v30 = vld [vmem:[%s4988_s29 + $0x1b8] ss:$12 sps:$4 sm:$0xff]  }
  0x38   : > { %717 = vmatprep.mubr.bf16.mxu0 %v4652_v32  ;;  %4485 = vmatprep.mubr.msk.bf16.mxu1 %vm620_vm0, %v4654_v33  ;;  %v5199_v31 = vld [vmem:[%s6176_s1 + $0x80] sm:$0xff]   ;;  %v4742_v33 = vld [vmem:[%s4988_s29 + $0x1d0] ss:$12 sps:$4 sm:$0xff]  }
  0x39   : > { %v4741_v32 = vld [vmem:[%s4988_s29 + $0x2a0] ss:$12 sps:$4 sm:$0xff]  }
  0x3f   : > { %718 = vmatmul.mubr.bf16.gmra.mrb[8].mxu0 %v4655_v34  ;;  %4486 = vmatmul.mubr.msk.bf16.gmra.mrb[20].mxu1 %vm620_vm0, %v4656_v35  ;;  %v4743_v34 = vld [vmem:[%s4988_s29 + $0x2bc] ss:$12 sps:$4 sm:$0xff]  }
  0x40   : > { %725 = vmatprep.mubr.bf16.mxu0 %v4657_v36  ;;  %4489 = vmatprep.mubr.msk.bf16.mxu1 %vm620_vm0, %v4659_v37  ;;  %v4745_v35 = vld [vmem:[%s4988_s29 + $0x1e8] ss:$12 sps:$4 sm:$0xff]   ;;  %v4893_v36 = vld [vmem:[%s6176_s1 + $0x40] sm:$0xff]  }
  0x41   : > { %v4746_v37 = vld [vmem:[%s4988_s29 + $0x2b8] ss:$12 sps:$4 sm:$0xff]  }
  0x47   : > { %726 = vmatmul.mubr.bf16.gmra.mrb[12].mxu0 %v4660_v38  ;;  %4490 = vmatmul.mubr.msk.bf16.gmra.mrb[24].mxu1 %vm620_vm0, %v4661_v39  ;;  %v4747_v38 = vld [vmem:[%s4988_s29 + $0x200] ss:$12 sps:$4 sm:$0xff]  }
  0x48   : > { %733 = vmatprep.mubr.bf16.mxu0 %v4662_v40  ;;  %4493 = vmatprep.mubr.msk.bf16.mxu1 %vm620_vm0, %v4664_v41  ;;  %v4748_v39 = vld [vmem:[%s4988_s29 + $0x2d4] ss:$12 sps:$4 sm:$0xff]   ;;  %v4751_v40 = vld [vmem:[%s4988_s29 + $0x2d0] ss:$12 sps:$4 sm:$0xff]  }
  0x49   : > { %v4752_v41 = vld [vmem:[%s4988_s29 + $0x230] ss:$12 sps:$4 sm:$0xff]  }
  0x4f   : > { %734 = vmatmul.mubr.bf16.gmra.mrb[16].mxu0 %v4665_v42  ;;  %4494 = vmatmul.mubr.msk.bf16.gmra.mrb[28].mxu1 %vm620_vm0, %v4666_v43  ;;  %v4753_v42 = vld [vmem:[%s4988_s29 + $0x2ec] ss:$12 sps:$4 sm:$0xff]   ;;  %v4755_v43 = vld [vmem:[%s4988_s29 + $0x248] ss:$12 sps:$4 sm:$0xff]  }
  0x50   : > { %741 = vmatprep.mubr.bf16.mxu0 %v4667_v44  ;;  %1376 = vmatprep.mubr.bf16.mxu1 %v4671_v45  ;;  %v4756_v44 = vld [vmem:[%s4988_s29 + $0x2e8] ss:$12 sps:$4 sm:$0xff]   ;;  %v4757_v45 = vld [vmem:[%s4988_s29 + $0x260] ss:$12 sps:$4 sm:$0xff]  }
  0x57   : > { %742 = vmatmul.mubr.bf16.gmra.mrb[20].mxu0 %v4672_v47  ;;  %1377 = vmatmul.mubr.bf16.vlgmr.msra.gmra.mrb[32].mxu1 %v4669_v46  ;;  %v4758_v46 = vld [vmem:[%s4988_s29 + $0x278] ss:$12 sps:$4 sm:$0xff]  }
  0x58   : > { %749 = vmatprep.mubr.bf16.mxu0 %v4673_v48  ;;  %1384 = vmatprep.mubr.bf16.mxu1 %v4675_v49  ;;  %v4761_v47 = vld [vmem:[%s4988_s29 + $0x304] ss:$12 sps:$4 sm:$0xff]   ;;  %v4759_v48 = vld [vmem:[%s4988_s29 + $0x300] ss:$12 sps:$4 sm:$0xff]  }
  0x59   : > { %4202 = vmatpush3.bf16.msra.mxu1 %v4960_v2  ;;  %v4699_v2 = vld [vmem:[%s4988_s29 + $0x1fc] ss:$12 sps:$4 sm:$0xff]  }
  0x5a   : > { %4203 = vmatprep.subr.bf16.mxu1 %v4968_v3  ;;  %v4701_v3 = vld [vmem:[%s4988_s29 + $0xf0] ss:$12 sps:$4 sm:$0xff]  }
  0x5b   : > { %v4762_v49 = vld [vmem:[%s4988_s29 + $0x290] ss:$12 sps:$4 sm:$0xff]  }
  0x5d   : > { %4204 = vmatpush3.bf16.msra.mxu1 %v4982_v5  ;;  %v4702_v5 = vld [vmem:[%s4988_s29 + $0x1f8] ss:$12 sps:$4 sm:$0xff]  }
  0x5e   : > { %4205 = vmatprep.subr.bf16.mxu1 %v4993_v6  ;;  %v4703_v6 = vld [vmem:[%s4988_s29 + $0x10c] ss:$12 sps:$4 sm:$0xff]  }
  0x5f   : > { %750 = vmatmul.mubr.bf16.gmra.mrb[24].mxu0 %v4677_v50  ;;  %1385 = vmatmul.mubr.bf16.gmra.mrb[36].mxu1 %v4678_v51  ;;  %v4763_v50 = vld [vmem:[%s4988_s29 + $0x2a8] ss:$12 sps:$4 sm:$0xff]  }
  0x60   : > { %757 = vmatprep.mubr.bf16.mxu0 %v4679_v52  ;;  %1392 = vmatprep.mubr.bf16.mxu1 %v4681_v53  ;;  %v4764_v51 = vld [vmem:[%s4988_s29 + $0x31c] ss:$12 sps:$4 sm:$0xff]   ;;  %v4766_v53 = vld [vmem:[%s4988_s29 + $0x2c0] ss:$12 sps:$4 sm:$0xff]  }
  0x61   : > { %4206 = vmatpush3.bf16.msra.mxu1 %v5004_v9  ;;  %v4709_v9 = vld [vmem:[%s4988_s29 + $0x124] ss:$12 sps:$4 sm:$0xff]   ;;  %v5242_v52 = vld [vmem:[%s6176_s1 + $0x88] sm:$0xff]  }
  0x62   : > { %4207 = vmatprep.subr.bf16.mxu1 %v5009_v10  ;;  %v4711_v10 = vld [vmem:[%s4988_s29 + $0x22c] ss:$12 sps:$4 sm:$0xff]  }
  0x65   : > { %4208 = vmatpush3.bf16.msra.mxu1 %v5016_v11  ;;  %v4713_v11 = vld [vmem:[%s4988_s29 + $0x120] ss:$12 sps:$4 sm:$0xff]  }
  0x66   : > { %4209 = vmatprep.subr.bf16.mxu1 %v5025_v13  ;;  %v4715_v13 = vld [vmem:[%s4988_s29 + $0x13c] ss:$12 sps:$4 sm:$0xff]  }
  0x67   : > { %758 = vmatmul.mubr.bf16.gmra.mrb[28].mxu0 %v4683_v54  ;;  %1393 = vmatmul.mubr.bf16.gmra.mrb[40].mxu1 %v4684_v55  ;;  %v4767_v54 = vld [vmem:[%s4988_s29 + $0x318] ss:$12 sps:$4 sm:$0xff]  }
  0x68   : > { %765 = vmatprep.mubr.bf16.mxu0 %v4685_v56  ;;  %1400 = vmatprep.mubr.bf16.mxu1 %v4687_v57  ;;  %v4768_v55 = vld [vmem:[%s4988_s29 + $0x2d8] ss:$12 sps:$4 sm:$0xff]   ;;  %v4769_v56 = vld [vmem:[%s4988_s29 + $0x334] ss:$12 sps:$4 sm:$0xff]   ;;  %v4771_v57 = vld [vmem:[%s4988_s29 + $0x2f0] ss:$12 sps:$4 sm:$0xff]  }
  0x69   : > { %4210 = vmatpush3.bf16.msra.mxu1 %v5034_v15  ;;  %v4719_v15 = vld [vmem:[%s4988_s29 + $0x138] ss:$12 sps:$4 sm:$0xff]  }
  0x6a   : > { %4211 = vmatprep.subr.bf16.mxu1 %v5041_v16  ;;  %v4720_v16 = vld [vmem:[%s4988_s29 + $0x240] ss:$12 sps:$4 sm:$0xff]  }
  0x6d   : > { %4212 = vmatpush3.bf16.msra.mxu1 %v5050_v18  ;;  %v4723_v18 = vld [vmem:[%s4988_s29 + $0x25c] ss:$12 sps:$4 sm:$0xff]  }
  0x6e   : > { %4213 = vmatprep.subr.bf16.mxu1 %v5057_v19  ;;  %v4725_v19 = vld [vmem:[%s4988_s29 + $0x150] ss:$12 sps:$4 sm:$0xff]  }
  0x6f   : > { %766 = vmatmul.mubr.bf16.gmra.mrb[32].mxu0 %v4689_v58  ;;  %1401 = vmatmul.mubr.bf16.gmra.mrb[44].mxu1 %v4690_v59  ;;  %v4772_v58 = vld [vmem:[%s4988_s29 + $0x330] ss:$12 sps:$4 sm:$0xff]   ;;  %v4773_v59 = vld [vmem:[%s4988_s29 + $0x34c] ss:$12 sps:$4 sm:$0xff]  }
  0x70   : > { %773 = vmatprep.mubr.bf16.mxu0 %v4691_v60  ;;  %1408 = vmatprep.mubr.bf16.mxu1 %v4693_v61  ;;  %v4775_v60 = vld [vmem:[%s4988_s29 + $0x308] ss:$12 sps:$4 sm:$0xff]  }
  0x71   : > { %4214 = vmatpush3.bf16.msra.mxu1 %v5065_v21  ;;  %v4727_v21 = vld [vmem:[%s4988_s29 + $0x16c] ss:$12 sps:$4 sm:$0xff]  }
  0x72   : > { %4215 = vmatprep.subr.bf16.mxu1 %v5071_v22  ;;  %v4729_v22 = vld [vmem:[%s4988_s29 + $0x274] ss:$12 sps:$4 sm:$0xff]  }
  0x75   : > { %4216 = vmatpush3.bf16.msra.mxu1 %v5083_v25  ;;  %v4733_v25 = vld [vmem:[%s4988_s29 + $0x28c] ss:$12 sps:$4 sm:$0xff]  }
  0x76   : > { %4605 = vmatprep.subr.bf16.mxu1 %v4954_v1  ;;  %v4708_v1 = vld [vmem:[%s4988_s29 + $0x210] ss:$12 sps:$4 sm:$0xff]  }
  0x77   : > { %774 = vmatmul.mubr.bf16.gmra.mrb[36].mxu0 %v4695_v62  ;;  %1409 = vmatmul.mubr.bf16.gmra.mrb[48].mxu1 %v4696_v63  ;;  %v4776_v62 = vld [vmem:[%s4988_s29 + $0x348] ss:$12 sps:$4 sm:$0xff]   ;;  %v4777_v63 = vld [vmem:[%s4988_s29 + $0x320] ss:$12 sps:$4 sm:$0xff]  }
  0x78   : > { %781 = vmatprep.mubr.bf16.mxu0 %v4697_v0  ;;  %1416 = vmatprep.mubr.bf16.mxu1 %v4699_v2 }
  0x7f   : > { %782 = vmatmul.mubr.bf16.gmra.mrb[40].mxu0 %v4701_v3  ;;  %1417 = vmatmul.mubr.bf16.gmra.mrb[52].mxu1 %v4702_v5  ;;  %v4778_v3 = vld [vmem:[%s4988_s29 + $0x364] ss:$12 sps:$4 sm:$0xff]  }
  0x80   : > { %789 = vmatprep.mubr.bf16.mxu0 %v4703_v6  ;;  %1424 = vmatprep.mubr.bf16.mxu1 %v4705_v7  ;;  %v4780_v6 = vld [vmem:[%s4988_s29 + $0x338] ss:$12 sps:$4 sm:$0xff]  }
  0x81   : > { %v4895_v7 = vld [vmem:[%s6176_s1] sm:$0xff]  }
  0x87   : > { %790 = vmatmul.mubr.bf16.gmra.mrb[44].mxu0 %v4707_v8  ;;  %1425 = vmatmul.mubr.bf16.gmra.mrb[56].mxu1 %v4708_v1  ;;  %v4896_v8 = vld [vmem:[%s6176_s1 + $0x48] sm:$0xff]  }
  0x88   : > { %797 = vmatprep.mubr.bf16.mxu0 %v4709_v9  ;;  %1432 = vmatprep.mubr.bf16.mxu1 %v4711_v10  ;;  %v4781_v9 = vld [vmem:[%s4988_s29 + $0x360] ss:$12 sps:$4 sm:$0xff]   ;;  %v4782_v10 = vld [vmem:[%s4988_s29 + $0x350] ss:$12 sps:$4 sm:$0xff]  }
  0x8f   : > { %798 = vmatmul.mubr.bf16.gmra.mrb[48].mxu0 %v4713_v11  ;;  %1433 = vmatmul.mubr.bf16.gmra.mrb[60].mxu1 %v4714_v12  ;;  %v4897_v12 = vld [vmem:[%s6176_s1 + $0x8] sm:$0xff]  }
  0x90   : > { %805 = vmatprep.mubr.bf16.mxu0 %v4715_v13  ;;  %1440 = vmatprep.mubr.bf16.mxu1 %v4717_v14  ;;  %v4783_v14 = vld [vmem:[%s4988_s29 + $0x37c] ss:$12 sps:$4 sm:$0xff]  }
  0x97   : > { %806 = vmatmul.mubr.bf16.gmra.mrb[52].mxu0 %v4719_v15  ;;  %1441 = vmatmul.mubr.bf16.gmra.mrb[64].mxu1 %v4720_v16  ;;  %v4785_v15 = vld [vmem:[%s4988_s29 + $0x368] ss:$12 sps:$4 sm:$0xff]  }
  0x98   : > { %813 = vmatprep.mubr.bf16.mxu0 %v4721_v17  ;;  %1448 = vmatprep.mubr.bf16.mxu1 %v4723_v18  ;;  %v4898_v17 = vld [vmem:[%s6176_s1 + $0x50] sm:$0xff]  }
  0x99   : > { %v4899_v18 = vld [vmem:[%s6176_s1 + $0x10] sm:$0xff]  }
  0x9f   : > { %814 = vmatmul.mubr.bf16.gmra.mrb[56].mxu0 %v4725_v19  ;;  %1449 = vmatmul.mubr.bf16.gmra.mrb[68].mxu1 %v4726_v20  ;;  %v4900_v20 = vld [vmem:[%s6176_s1 + $0x58] sm:$0xff]  }
  0xa0   : > { %821 = vmatprep.mubr.bf16.mxu0 %v4727_v21  ;;  %1456 = vmatprep.mubr.bf16.mxu1 %v4729_v22  ;;  %v4786_v21 = vld [vmem:[%s4988_s29 + $0x378] ss:$12 sps:$4 sm:$0xff]   ;;  %v4787_v22 = vld [vmem:[%s4988_s29 + $0x380] ss:$12 sps:$4 sm:$0xff]  }
  0xa7   : > { %822 = vmatmul.mubr.bf16.gmra.mrb[60].mxu0 %v4731_v23  ;;  %1457 = vmatmul.mubr.bf16.gmra.mrb[72].mxu1 %v4732_v24 }
  0xa8   : > { %1464 = vmatprep.mubr.bf16.mxu1 %v4733_v25  ;;  %4501 = vmatprep.mubr.msk.bf16.mxu0 %vm620_vm0, %v4735_v26  ;;  %v4788_v25 = vld [vmem:[%s4988_s29 + $0x394] ss:$12 sps:$4 sm:$0xff]   ;;  %v4790_v26 = vld [vmem:[%s4988_s29 + $0x398] ss:$12 sps:$4 sm:$0xff]  }
  0xaf   : > { %1465 = vmatmul.mubr.bf16.gmra.mrb[76].mxu1 %v4736_v27  ;;  %4502 = vmatmul.mubr.msk.bf16.vlgmr.msra.gmra.mrb[64].mxu0 %vm620_vm0, %v4737_v28  ;;  %v4901_v28 = vld [vmem:[%s6176_s1 + $0x18] sm:$0xff]  }
  0xb0   : > { %4534 = vmatpush3.bf16.msra.mxu0 %v5199_v31  ;;  %1472 = vmatprep.mubr.bf16.mxu1 %v4738_v29  ;;  %v4902_v29 = vld [vmem:[%s6176_s1 + $0x60] sm:$0xff]  }
  0xb1   : > { %4505 = vmatprep.mubr.msk.bf16.mxu0 %vm620_vm0, %v4740_v30  ;;  %4535 = vmatprep.subr.bf16.mxu0 %v4975_v4  ;;  %v4903_v30 = vld [vmem:[%s6176_s1 + $0x20] sm:$0xff]  }
  0xb4   : > { %4536 = vmatpush3.bf16.msra.mxu0 %v4975_v4  ;;  %v4750_v4 = vld [vmem:[%s4988_s29 + $0x218] ss:$12 sps:$4 sm:$0xff]  }
  0xb5   : > { %4331 = vmatprep.subr.bf16.mxu0 %v4893_v36  ;;  %v4791_v36 = vld [vmem:[%s4988_s29 + $0x390] ss:$12 sps:$4 sm:$0xff]  }
  0xb7   : > { %1473 = vmatmul.mubr.bf16.gmra.mrb[80].mxu1 %v4741_v32  ;;  %4506 = vmatmul.mubr.msk.bf16.gmra.mrb[68].mxu0 %vm620_vm0, %v4742_v33 }
  0xb8   : > { %1480 = vmatprep.mubr.bf16.mxu1 %v4743_v34  ;;  %4509 = vmatprep.mubr.msk.bf16.mxu0 %vm620_vm0, %v4745_v35  ;;  %v4904_v34 = vld [vmem:[%s6176_s1 + $0x68] sm:$0xff]  }
  0xbf   : > { %1481 = vmatmul.mubr.bf16.gmra.mrb[84].mxu1 %v4746_v37  ;;  %4510 = vmatmul.mubr.msk.bf16.gmra.mrb[72].mxu0 %vm620_vm0, %v4747_v38  ;;  %v4792_v37 = vld [vmem:[%s4988_s29 + $0x3b0] ss:$12 sps:$4 sm:$0xff]  }
  0xc0   : > { %1488 = vmatprep.mubr.bf16.mxu1 %v4748_v39  ;;  %4513 = vmatprep.mubr.msk.bf16.mxu0 %vm620_vm0, %v4750_v4 }
  0xc7   : > { %1489 = vmatmul.mubr.bf16.gmra.mrb[88].mxu1 %v4751_v40  ;;  %4514 = vmatmul.mubr.msk.bf16.gmra.mrb[76].mxu0 %vm620_vm0, %v4752_v41  ;;  %v4793_v41 = vld [vmem:[%s4988_s29 + $0x3ac] ss:$12 sps:$4 sm:$0xff]  }
  0xc8   : > { %1496 = vmatprep.mubr.bf16.mxu1 %v4753_v42  ;;  %4517 = vmatprep.mubr.msk.bf16.mxu0 %vm620_vm0, %v4755_v43  ;;  %v4795_v42 = vld [vmem:[%s4988_s29 + $0x3c8] ss:$12 sps:$4 sm:$0xff]  }
  0xcf   : > { %1497 = vmatmul.mubr.bf16.gmra.mrb[92].mxu1 %v4756_v44  ;;  %4518 = vmatmul.mubr.msk.bf16.gmra.mrb[80].mxu0 %vm620_vm0, %v4757_v45  ;;  %v4905_v45 = vld [vmem:[%s6176_s1 + $0x28] sm:$0xff]  }
  0xd0   : > { %4521 = vmatprep.mubr.msk.bf16.mxu0 %vm620_vm0, %v4758_v46  ;;  %2083 = vmatprep.mubr.bf16.mxu1 %v4761_v47 }
  0xd7   : > { %4522 = vmatmul.mubr.msk.bf16.gmra.mrb[84].mxu0 %vm620_vm0, %v4762_v49  ;;  %2084 = vmatmul.mubr.bf16.vlgmr.msra.gmra.mrb[96].mxu1 %v4759_v48  ;;  %v4906_v48 = vld [vmem:[%s6176_s1 + $0x70] sm:$0xff]  }
  0xd8   : > { %4525 = vmatprep.mubr.msk.bf16.mxu0 %vm620_vm0, %v4763_v50  ;;  %2091 = vmatprep.mubr.bf16.mxu1 %v4764_v51  ;;  %v4907_v50 = vld [vmem:[%s6176_s1 + $0x30] sm:$0xff]  }
  0xd9   : > { %4607 = vmatpush3.bf16.msra.mxu1 %v5199_v31 }
  0xda   : > { %4606 = vmatprep.subr.bf16.mxu1 %v5242_v52 }
  0xdd   : > { %4608 = vmatpush3.bf16.msra.mxu1 %v5242_v52 }
  0xde   : > { %4569 = vmatprep.subr.bf16.mxu1 %v5199_v31 }
  0xdf   : > { %4526 = vmatmul.mubr.msk.bf16.gmra.mrb[88].mxu0 %vm620_vm0, %v4766_v53  ;;  %2092 = vmatmul.mubr.bf16.gmra.mrb[100].mxu1 %v4767_v54  ;;  %v4908_v54 = vld [vmem:[%s6176_s1 + $0x78] sm:$0xff]  }
  0xe0   : > { %4529 = vmatprep.mubr.msk.bf16.mxu0 %vm620_vm0, %v4768_v55  ;;  %2099 = vmatprep.mubr.bf16.mxu1 %v4769_v56  ;;  %v4796_v56 = vld [vmem:[%s4988_s29 + $0x3a8] ss:$12 sps:$4 sm:$0xff]  }
  0xe7   : > { %4530 = vmatmul.mubr.msk.bf16.gmra.mrb[92].mxu0 %vm620_vm0, %v4771_v57  ;;  %2100 = vmatmul.mubr.bf16.gmra.mrb[104].mxu1 %v4772_v58  ;;  %v4797_v57 = vld [vmem:[%s4988_s29 + $0x3e0] ss:$12 sps:$4 sm:$0xff]  }
  0xe8   : > { %2107 = vmatprep.mubr.bf16.mxu1 %v4773_v59  ;;  %4537 = vmatprep.mubr.msk.bf16.mxu0 %vm620_vm0, %v4775_v60 }
  0xea   : > { %v5259_v61 = vpop.f32.mrb[0].mxu1 }
  0xeb   : > { %v5263_v0 = vpop.f32.mrb[1].mxu1 }
  0xec   : > { %v5265_v2 = vpop.f32.mrb[2].mxu1 }
  0xed   : > { %v5268_v5 = vpop.f32.mrb[3].mxu1 }
  0xef   : > { %2108 = vmatmul.mubr.bf16.gmra.mrb[108].mxu1 %v4776_v62  ;;  %4538 = vmatmul.mubr.msk.bf16.vlgmr.msra.gmra.mrb[96].mxu0 %vm620_vm0, %v4777_v63  ;;  %v4798_v63 = vld [vmem:[%s4988_s29 + $0x3c4] ss:$12 sps:$4 sm:$0xff]  }
  0xf0   : > { %4332 = vmatpush3.bf16.msra.mxu0 %v4895_v7  ;;  %2115 = vmatprep.mubr.bf16.mxu1 %v4778_v3 }
  0xf1   : > { %4541 = vmatprep.mubr.msk.bf16.mxu0 %vm620_vm0, %v4780_v6  ;;  %4333 = vmatprep.subr.bf16.mxu0 %v4896_v8  ;;  %v4909_v6 = vld [vmem:[%s6176_s1 + $0x38] sm:$0xff]  }
  0xf2   : > { %v5279_v1 = vpop.f32.mrb[4].mxu1 }
  0xf3   : > { %v5283_v11 = vpop.f32.mrb[5].mxu1 }
  0xf4   : > { %4334 = vmatpush3.bf16.msra.mxu0 %v4897_v12  ;;  %v5288_v13 = vpop.f32.mrb[6].mxu1 }
  0xf5   : > { %v5292_v16 = vpop.f32.mrb[7].mxu1  ;;  %4335 = vmatprep.subr.bf16.mxu0 %v4898_v17  ;;  %v4802_v17 = vld [vmem:[%s4988_s29 + $0x410] ss:$12 sps:$4 sm:$0xff]  }
  0xf7   : > { %2116 = vmatmul.mubr.bf16.gmra.mrb[112].mxu1 %v4781_v9  ;;  %4542 = vmatmul.mubr.msk.bf16.gmra.mrb[100].mxu0 %vm620_vm0, %v4782_v10 }
  0xf8   : > { %2123 = vmatprep.mubr.bf16.mxu1 %v4783_v14  ;;  %4545 = vmatprep.mubr.msk.bf16.mxu0 %vm620_vm0, %v4785_v15  ;;  %v4801_v15 = vld [vmem:[%s4988_s29 + $0x3c0] ss:$12 sps:$4 sm:$0xff]  }
  0xf9   : > { %4336 = vmatpush3.bf16.msra.mxu0 %v4899_v18 }
  0xfa   : > { %v5302_v19 = vpop.f32.mrb[8].mxu1  ;;  %4337 = vmatprep.subr.bf16.mxu0 %v4900_v20 }
  0xfb   : > { %v5309_v23 = vpop.f32.mrb[9].mxu1 }
  0xfc   : > { %v5311_v24 = vpop.f32.mrb[10].mxu1 }
  0xfd   : > { %v5315_v27 = vpop.f32.mrb[11].mxu1  ;;  %4338 = vmatpush3.bf16.msra.mxu0 %v4901_v28 }
  0xfe   : > { %4339 = vmatprep.subr.bf16.mxu0 %v4902_v29 }
  0xff   : > { %2124 = vmatmul.mubr.bf16.gmra.mrb[116].mxu1 %v4786_v21  ;;  %4546 = vmatmul.mubr.msk.bf16.gmra.mrb[104].mxu0 %vm620_vm0, %v4787_v22  ;;  %v4803_v22 = vld [vmem:[%s4988_s29 + $0x3dc] ss:$12 sps:$4 sm:$0xff]  }
 0x100   : > { %2131 = vmatprep.mubr.bf16.mxu1 %v4788_v25  ;;  %4549 = vmatprep.mubr.msk.bf16.mxu0 %vm620_vm0, %v4790_v26 }
 0x101   : > { %4340 = vmatpush3.bf16.msra.mxu0 %v4903_v30 }
 0x102   : > { %v3957_v32 = vpop.f32.mrb[0].mxu0  ;;  %v5328_v33 = vpop.f32.mrb[12].mxu1  ;;  %4341 = vmatprep.subr.bf16.mxu0 %v4904_v34 }
 0x103   : > { %v3958_v35 = vpop.f32.mrb[1].mxu0  ;;  %v5335_v38 = vpop.f32.mrb[13].mxu1 }
 0x104   : > { %v3959_v39 = vadd.f32 %v3958_v35, %v3957_v32  ;;  %v3960_v4 = vpop.f32.mrb[2].mxu0  ;;  %v5337_v40 = vpop.f32.mrb[14].mxu1 }
 0x105   : > { %v3961_v43 = vpop.f32.mrb[3].mxu0  ;;  %v5341_v44 = vpop.f32.mrb[15].mxu1  ;;  %4342 = vmatpush3.bf16.msra.mxu0 %v4905_v45 }
 0x106   : > { %v5347_v46 = vadd.f32 %v3959_v39, %v5263_v0  ;;  %v3962_v47 = vadd.f32 %v3961_v43, %v3960_v4  ;;  %4343 = vmatprep.subr.bf16.mxu0 %v4906_v48  ;;  %v4800_v0 = vld [vmem:[%s4988_s29 + $0x3f8] ss:$12 sps:$4 sm:$0xff]  }
 0x107   : > { %2132 = vmatmul.mubr.bf16.gmra.mrb[120].mxu1 %v4791_v36  ;;  %4550 = vmatmul.mubr.msk.bf16.gmra.mrb[108].mxu0 %vm620_vm0, %v4792_v37  ;;  %v4806_v36 = vld [vmem:[%s4988_s29 + $0x3d8] ss:$12 sps:$4 sm:$0xff]   ;;  %v4807_v37 = vld [vmem:[%s4988_s29 + $0x440] ss:$12 sps:$4 sm:$0xff]  }
 0x108   : > { %v5354_v49 = vadd.f32 %v3962_v47, %v5268_v5  ;;  %2139 = vmatprep.mubr.bf16.mxu1 %v4793_v41  ;;  %4553 = vmatprep.mubr.msk.bf16.mxu0 %vm620_vm0, %v4795_v42  ;;  %v4808_v42 = vld [vmem:[%s4988_s29 + $0x3f4] ss:$12 sps:$4 sm:$0xff]  }
 0x109   : > { %4344 = vmatpush3.bf16.msra.mxu0 %v4907_v50 }
 0x10a   : > { %v3963_v51 = vpop.f32.mrb[4].mxu0  ;;  %v5360_v53 = vpop.f32.mrb[16].mxu1  ;;  %4345 = vmatprep.subr.bf16.mxu0 %v4908_v54 }
 0x10b   : > { %v3964_v55 = vpop.f32.mrb[5].mxu0  ;;  %v5367_v58 = vpop.f32.mrb[17].mxu1 }
 0x10c   : > { %v3965_v59 = vadd.f32 %v3964_v55, %v3963_v51  ;;  %v3966_v60 = vpop.f32.mrb[6].mxu0  ;;  %v5369_v62 = vpop.f32.mrb[18].mxu1 }
 0x10d   : > { %v3967_v3 = vpop.f32.mrb[7].mxu0  ;;  %v5373_v5 = vpop.f32.mrb[19].mxu1  ;;  %4346 = vmatpush3.bf16.msra.mxu0 %v4909_v6 }
 0x10e   : > { %v5379_v7 = vadd.f32 %v5259_v61, %v3965_v59  ;;  %v3968_v8 = vadd.f32 %v3967_v3, %v3966_v60  ;;  %v4816_v3 = vld [vmem:[%s4988_s29 + $0x49c] ss:$12 sps:$4 sm:$0xff]  }
 0x10f   : > { %2140 = vmatmul.mubr.bf16.gmra.mrb[124].mxu1 %v4796_v56  ;;  %4554 = vmatmul.mubr.msk.bf16.gmra.mrb[112].mxu0 %vm620_vm0, %v4797_v57  ;;  %v4810_v56 = vld [vmem:[%s4988_s29 + $0x480] ss:$12 sps:$4 sm:$0xff]   ;;  %v4813_v57 = vld [vmem:[%s4988_s29 + $0x3f0] ss:$12 sps:$4 sm:$0xff]  }
 0x110   : > { %v5383_v9 = vadd.f32 %v5265_v2, %v3968_v8  ;;  %2147 = vmatprep.mubr.bf16.mxu1 %v4798_v63  ;;  %4557 = vmatprep.mubr.msk.bf16.mxu0 %vm620_vm0, %v4800_v0  ;;  %v4805_v2 = vld [vmem:[%s4988_s29 + $0x428] ss:$12 sps:$4 sm:$0xff]   ;;  %v4814_v0 = vld [vmem:[%s4988_s29 + $0x40c] ss:$12 sps:$4 sm:$0xff]  }
 0x112   : > { %v3969_v10 = vpop.f32.mrb[8].mxu0  ;;  %v5386_v12 = vpop.f32.mrb[20].mxu1 }
 0x113   : > { %v3970_v14 = vpop.f32.mrb[9].mxu0  ;;  %v5390_v61 = vpop.f32.mrb[21].mxu1 }
 0x114   : > { %v3971_v18 = vadd.f32 %v3970_v14, %v3969_v10  ;;  %v3972_v20 = vpop.f32.mrb[10].mxu0  ;;  %v5392_v21 = vpop.f32.mrb[22].mxu1 }
 0x115   : > { %v3973_v25 = vpop.f32.mrb[11].mxu0  ;;  %v5396_v26 = vpop.f32.mrb[23].mxu1 }
 0x116   : > { %v5399_v28 = vadd.f32 %v3971_v18, %v5283_v11  ;;  %v3974_v29 = vadd.f32 %v3973_v25, %v3972_v20  ;;  %v4818_v20 = vld [vmem:[%s4988_s29 + $0x408] ss:$12 sps:$4 sm:$0xff]  }
 0x117   : > { %2148 = vmatmul.mubr.bf16.gmra.mrb[128].mxu1 %v4801_v15  ;;  %4558 = vmatmul.mubr.msk.bf16.gmra.mrb[116].mxu0 %vm620_vm0, %v4802_v17 }
 0x118   : > { %v5403_v30 = vadd.f32 %v3974_v29, %v5292_v16  ;;  %2155 = vmatprep.mubr.bf16.mxu1 %v4803_v22  ;;  %4561 = vmatprep.mubr.msk.bf16.mxu0 %vm620_vm0, %v4805_v2  ;;  %v4812_v16 = vld [vmem:[%s4988_s29 + $0x484] ss:$12 sps:$4 sm:$0xff]  }
 0x119   : > { %v4819_v22 = vld [vmem:[%s4988_s29 + $0x498] ss:$12 sps:$4 sm:$0xff]  }
 0x11a   : > { %v3975_v32 = vpop.f32.mrb[12].mxu0  ;;  %v5406_v34 = vpop.f32.mrb[24].mxu1 }
 0x11b   : > { %v3976_v35 = vpop.f32.mrb[13].mxu0  ;;  %v5410_v11 = vpop.f32.mrb[25].mxu1 }
 0x11c   : > { %v3977_v39 = vadd.f32 %v3976_v35, %v3975_v32  ;;  %v3978_v4 = vpop.f32.mrb[14].mxu0  ;;  %v5412_v41 = vpop.f32.mrb[26].mxu1  ;;  %v4820_v35 = vld [vmem:[%s4988_s29 + $0x424] ss:$12 sps:$4 sm:$0xff]  }
 0x11d   : > { %v3979_v43 = vpop.f32.mrb[15].mxu0  ;;  %v5416_v45 = vpop.f32.mrb[27].mxu1 }
 0x11e   : > { %v5419_v47 = vadd.f32 %v5279_v1, %v3977_v39  ;;  %v3980_v48 = vadd.f32 %v3979_v43, %v3978_v4 }
 0x11f   : > { %2156 = vmatmul.mubr.bf16.gmra.mrb[132].mxu1 %v4806_v36  ;;  %4562 = vmatmul.mubr.msk.bf16.gmra.mrb[120].mxu0 %vm620_vm0, %v4807_v37  ;;  %v4822_v36 = vld [vmem:[%s4988_s29 + $0x4b4] ss:$12 sps:$4 sm:$0xff]  }
 0x120   : > { %v5423_v50 = vadd.f32 %v5288_v13, %v3980_v48  ;;  %2163 = vmatprep.mubr.bf16.mxu1 %v4808_v42  ;;  %2790 = vmatprep.mubr.bf16.mxu0 %v4812_v16 }
 0x122   : > { %v3981_v51 = vpop.f32.mrb[16].mxu0  ;;  %v5425_v54 = vpop.f32.mrb[28].mxu1 }
 0x123   : > { %v3982_v55 = vpop.f32.mrb[17].mxu0  ;;  %v5429_v59 = vpop.f32.mrb[29].mxu1 }
 0x124   : > { %v3983_v1 = vadd.f32 %v3982_v55, %v3981_v51  ;;  %v3984_v60 = vpop.f32.mrb[18].mxu0  ;;  %v5431_v63 = vpop.f32.mrb[30].mxu1  ;;  %v4824_v55 = vld [vmem:[%s4988_s29 + $0x420] ss:$12 sps:$4 sm:$0xff]  }
 0x125   : > { %v3985_v13 = vpop.f32.mrb[19].mxu0  ;;  %v5435_v6 = vpop.f32.mrb[31].mxu1 }
 0x126   : > { %v5438_v8 = vadd.f32 %v3983_v1, %v5309_v23  ;;  %v3986_v10 = vadd.f32 %v3985_v13, %v3984_v60  ;;  %v4828_v13 = vld [vmem:[%s4988_s29 + $0x4cc] ss:$12 sps:$4 sm:$0xff]  }
 0x127   : > { %2164 = vmatmul.mubr.bf16.gmra.mrb[136].mxu1 %v4813_v57  ;;  %2791 = vmatmul.mubr.bf16.vlgmr.msra.gmra.mrb[124].mxu0 %v4810_v56  ;;  %v4825_v56 = vld [vmem:[%s4988_s29 + $0x4b0] ss:$12 sps:$4 sm:$0xff]  }
 0x128   : > { %v5441_v14 = vadd.f32 %v3986_v10, %v5315_v27  ;;  %2171 = vmatprep.mubr.bf16.mxu1 %v4814_v0  ;;  %2798 = vmatprep.mubr.bf16.mxu0 %v4816_v3  ;;  %v4826_v3 = vld [vmem:[%s4988_s29 + $0x43c] ss:$12 sps:$4 sm:$0xff]  }
 0x12a   : > { %v3987_v15 = vpop.f32.mrb[20].mxu0  ;;  %v4087_v17 = vpop.f32.mrb[32].mxu1 }
 0x12b   : > { %v3988_v18 = vpop.f32.mrb[21].mxu0  ;;  %v4088_v2 = vpop.f32.mrb[33].mxu1 }
 0x12c   : > { %v3989_v25 = vadd.f32 %v3988_v18, %v3987_v15  ;;  %v3990_v29 = vpop.f32.mrb[22].mxu0  ;;  %v5445_v23 = vadd.f32 %v4088_v2, %v4087_v17  ;;  %v4090_v32 = vpop.f32.mrb[34].mxu1 }
 0x12d   : > { %v3991_v37 = vpop.f32.mrb[23].mxu0  ;;  %v4091_v27 = vpop.f32.mrb[35].mxu1 }
 0x12e   : > { %v5450_v39 = vadd.f32 %v5302_v19, %v3989_v25  ;;  %v3992_v4 = vadd.f32 %v3991_v37, %v3990_v29  ;;  %v5452_v42 = vadd.f32 %v4091_v27, %v4090_v32  ;;  %v4830_v29 = vld [vmem:[%s4988_s29 + $0x438] ss:$12 sps:$4 sm:$0xff]   ;;  %v4831_v32 = vld [vmem:[%s4988_s29 + $0x4c8] ss:$12 sps:$4 sm:$0xff]  }
 0x12f   : > { %2172 = vmatmul.mubr.bf16.gmra.mrb[140].mxu1 %v4818_v20  ;;  %2799 = vmatmul.mubr.bf16.gmra.mrb[128].mxu0 %v4819_v22 }
 0x130   : > { %v5455_v16 = vadd.f32 %v5311_v24, %v3992_v4  ;;  %2179 = vmatprep.mubr.bf16.mxu1 %v4820_v35  ;;  %2806 = vmatprep.mubr.bf16.mxu0 %v4822_v36  ;;  %v4832_v4 = vld [vmem:[%s4988_s29 + $0x454] ss:$12 sps:$4 sm:$0xff]  }
 0x132   : > { %v3993_v43 = vpop.f32.mrb[24].mxu0  ;;  %v4093_v48 = vpop.f32.mrb[36].mxu1 }
 0x133   : > { %v3994_v51 = vpop.f32.mrb[25].mxu0  ;;  %v4094_v57 = vpop.f32.mrb[37].mxu1 }
 0x134   : > { %v3995_v19 = vadd.f32 %v3994_v51, %v3993_v43  ;;  %v3996_v1 = vpop.f32.mrb[26].mxu0  ;;  %v5459_v60 = vadd.f32 %v4094_v57, %v4093_v48  ;;  %v4096_v0 = vpop.f32.mrb[38].mxu1  ;;  %v4834_v43 = vld [vmem:[%s4988_s29 + $0x4e4] ss:$12 sps:$4 sm:$0xff]  }
 0x135   : > { %v3997_v10 = vpop.f32.mrb[27].mxu0  ;;  %v4097_v24 = vpop.f32.mrb[39].mxu1 }
 0x136   : > { %v5464_v15 = vadd.f32 %v3995_v19, %v5335_v38  ;;  %v3998_v17 = vadd.f32 %v3997_v10, %v3996_v1  ;;  %v5466_v18 = vadd.f32 %v4097_v24, %v4096_v0 }
 0x137   : > { %2180 = vmatmul.mubr.bf16.gmra.mrb[144].mxu1 %v4824_v55  ;;  %2807 = vmatmul.mubr.bf16.gmra.mrb[132].mxu0 %v4825_v56 }
 0x138   : > { %v5469_v20 = vadd.f32 %v3998_v17, %v5341_v44  ;;  %2187 = vmatprep.mubr.bf16.mxu1 %v4826_v3  ;;  %2814 = vmatprep.mubr.bf16.mxu0 %v4828_v13  ;;  %v4836_v3 = vld [vmem:[%s4988_s29 + $0x450] ss:$12 sps:$4 sm:$0xff]   ;;  %v4837_v13 = vld [vmem:[%s4988_s29 + $0x4e0] ss:$12 sps:$4 sm:$0xff]  }
 0x13a   : > { %v3999_v22 = vpop.f32.mrb[28].mxu0  ;;  %v4099_v2 = vpop.f32.mrb[40].mxu1 }
 0x13b   : > { %v4000_v25 = vpop.f32.mrb[29].mxu0  ;;  %v4100_v35 = vpop.f32.mrb[41].mxu1 }
 0x13c   : > { %v4001_v38 = vadd.f32 %v4000_v25, %v3999_v22  ;;  %v4002_v36 = vpop.f32.mrb[30].mxu0  ;;  %v5473_v37 = vadd.f32 %v4100_v35, %v4099_v2  ;;  %v4102_v27 = vpop.f32.mrb[42].mxu1  ;;  %v4838_v2 = vld [vmem:[%s4988_s29 + $0x46c] ss:$12 sps:$4 sm:$0xff]   ;;  %v4840_v25 = vld [vmem:[%s4988_s29 + $0x4fc] ss:$12 sps:$4 sm:$0xff]  }
 0x13d   : > { %v4003_v48 = vpop.f32.mrb[31].mxu0  ;;  %v4103_v44 = vpop.f32.mrb[43].mxu1 }
 0x13e   : > { %v5478_v51 = vadd.f32 %v5328_v33, %v4001_v38  ;;  %v4004_v55 = vadd.f32 %v4003_v48, %v4002_v36  ;;  %v5480_v56 = vadd.f32 %v4103_v44, %v4102_v27  ;;  %v4842_v48 = vld [vmem:[%s4988_s29 + $0x468] ss:$12 sps:$4 sm:$0xff]   ;;  %v4843_v44 = vld [vmem:[%s4988_s29 + $0x4f8] ss:$12 sps:$4 sm:$0xff]  }
 0x13f   : > { %2188 = vmatmul.mubr.bf16.gmra.mrb[148].mxu1 %v4830_v29  ;;  %2815 = vmatmul.mubr.bf16.gmra.mrb[136].mxu0 %v4831_v32 }
 0x140   : > { %v5483_v57 = vadd.f32 %v5337_v40, %v4004_v55  ;;  %2195 = vmatprep.mubr.bf16.mxu1 %v4832_v4  ;;  %2822 = vmatprep.mubr.bf16.mxu0 %v4834_v43 }
 0x142   : > { %v4005_v19 = vpop.f32.mrb[32].mxu0  ;;  %v4105_v1 = vpop.f32.mrb[44].mxu1 }
 0x143   : > { %v4006_v0 = vpop.f32.mrb[33].mxu0  ;;  %v4106_v10 = vpop.f32.mrb[45].mxu1 }
 0x144   : > { %v4007_v33 = vadd.f32 %v4006_v0, %v4005_v19  ;;  %v4008_v24 = vpop.f32.mrb[34].mxu0  ;;  %v5487_v17 = vadd.f32 %v4106_v10, %v4105_v1  ;;  %v4108_v22 = vpop.f32.mrb[46].mxu1 }
 0x145   : > { %v4009_v29 = vpop.f32.mrb[35].mxu0  ;;  %v4109_v40 = vpop.f32.mrb[47].mxu1 }
 0x146   : > { %v5492_v32 = vadd.f32 %v4007_v33, %v5367_v58  ;;  %v4010_v35 = vadd.f32 %v4009_v29, %v4008_v24  ;;  %v5494_v38 = vadd.f32 %v4109_v40, %v4108_v22 }
 0x147   : > { %2196 = vmatmul.mubr.bf16.gmra.mrb[152].mxu1 %v4836_v3  ;;  %2823 = vmatmul.mubr.bf16.gmra.mrb[140].mxu0 %v4837_v13  ;;  %v4844_v3 = vld [vmem:[%s4988_s29 + $0x458] ss:$12 sps:$4 sm:$0xff]   ;;  %v4845_v13 = vld [vmem:[%s4988_s29 + $0x514] ss:$12 sps:$4 sm:$0xff]  }
 0x148   : > { %v5497_v36 = vadd.f32 %v4010_v35, %v5373_v5  ;;  %2203 = vmatprep.mubr.bf16.mxu1 %v4838_v2  ;;  %2830 = vmatprep.mubr.bf16.mxu0 %v4840_v25  ;;  %v4847_v35 = vld [vmem:[%s4988_s29 + $0x470] ss:$12 sps:$4 sm:$0xff]  }
 0x14a   : > { %v4011_v27 = vpop.f32.mrb[36].mxu0  ;;  %v4111_v4 = vpop.f32.mrb[48].mxu1 }
 0x14b   : > { %v4012_v43 = vpop.f32.mrb[37].mxu0  ;;  %v4112_v55 = vpop.f32.mrb[49].mxu1 }
 0x14c   : > { %v4013_v58 = vadd.f32 %v4012_v43, %v4011_v27  ;;  %v4014_v19 = vpop.f32.mrb[38].mxu0  ;;  %v5501_v1 = vadd.f32 %v4112_v55, %v4111_v4  ;;  %v4114_v0 = vpop.f32.mrb[50].mxu1  ;;  %v4848_v27 = vld [vmem:[%s4988_s29 + $0x510] ss:$12 sps:$4 sm:$0xff]  }
 0x14d   : > { %v4015_v10 = vpop.f32.mrb[39].mxu0  ;;  %v4115_v5 = vpop.f32.mrb[51].mxu1 }
 0x14e   : > { %v5506_v33 = vadd.f32 %v5360_v53, %v4013_v58  ;;  %v4016_v24 = vadd.f32 %v4015_v10, %v4014_v19  ;;  %v5508_v22 = vadd.f32 %v4115_v5, %v4114_v0  ;;  %v4851_v19 = vld [vmem:[%s4988_s29 + $0x488] ss:$12 sps:$4 sm:$0xff]  }
 0x14f   : > { %2204 = vmatmul.mubr.bf16.gmra.mrb[156].mxu1 %v4842_v48  ;;  %2831 = vmatmul.mubr.bf16.gmra.mrb[144].mxu0 %v4843_v44  ;;  %v4849_v48 = vld [vmem:[%s4988_s29 + $0x52c] ss:$12 sps:$4 sm:$0xff]  }
 0x150   : > { %v5511_v2 = vadd.f32 %v5369_v62, %v4016_v24  ;;  %4565 = vmatprep.mubr.msk.bf16.mxu1 %vm620_vm0, %v4844_v3  ;;  %2838 = vmatprep.mubr.bf16.mxu0 %v4845_v13 }
 0x152   : > { %v4017_v25 = vpop.f32.mrb[40].mxu0  ;;  %v4117_v29 = vpop.f32.mrb[52].mxu1 }
 0x153   : > { %v4018_v40 = vpop.f32.mrb[41].mxu0  ;;  %v4118_v53 = vpop.f32.mrb[53].mxu1 }
 0x154   : > { %v4019_v4 = vadd.f32 %v4018_v40, %v4017_v25  ;;  %v4020_v43 = vpop.f32.mrb[42].mxu0  ;;  %v5516_v55 = vadd.f32 %v4118_v53, %v4117_v29  ;;  %v4120_v58 = vpop.f32.mrb[54].mxu1  ;;  %v4852_v25 = vld [vmem:[%s4988_s29 + $0x528] ss:$12 sps:$4 sm:$0xff]   ;;  %v4853_v29 = vld [vmem:[%s4988_s29 + $0x4a0] ss:$12 sps:$4 sm:$0xff]  }
 0x155   : > { %v4021_v44 = vpop.f32.mrb[43].mxu0  ;;  %v4121_v62 = vpop.f32.mrb[55].mxu1 }
 0x156   : > { %v5521_v0 = vadd.f32 %v4019_v4, %v5390_v61  ;;  %v4022_v3 = vadd.f32 %v4021_v44, %v4020_v43  ;;  %v5523_v13 = vadd.f32 %v4121_v62, %v4120_v58  ;;  %v4856_v4 = vld [vmem:[%s4988_s29 + $0x4b8] ss:$12 sps:$4 sm:$0xff]  }
 0x157   : > { %4566 = vmatmul.mubr.msk.bf16.vlgmr.msra.gmra.mrb[160].mxu1 %vm620_vm0, %v4847_v35  ;;  %2839 = vmatmul.mubr.bf16.gmra.mrb[148].mxu0 %v4848_v27 }
 0x158   : > { %v5527_v10 = vadd.f32 %v4022_v3, %v5396_v26  ;;  %4570 = vmatpush3.bf16.msra.mxu1 %v5199_v31  ;;  %2846 = vmatprep.mubr.bf16.mxu0 %v4849_v48  ;;  %v4854_v31 = vld [vmem:[%s4988_s29 + $0x544] ss:$12 sps:$4 sm:$0xff]  }
 0x159   : > { %4571 = vmatprep.subr.bf16.mxu1 %v5242_v52  ;;  %4573 = vmatprep.mubr.msk.bf16.mxu1 %vm620_vm0, %v4851_v19 }
 0x15a   : > { %v4023_v61 = vpop.f32.mrb[44].mxu0  ;;  %v4123_v5 = vpop.f32.mrb[56].mxu1 }
 0x15b   : > { %v4024_v24 = vpop.f32.mrb[45].mxu0  ;;  %v4124_v40 = vpop.f32.mrb[57].mxu1 }
 0x15c   : > { %v4025_v35 = vadd.f32 %v4024_v24, %v4023_v61  ;;  %v4026_v27 = vpop.f32.mrb[46].mxu0  ;;  %4572 = vmatpush3.bf16.msra.mxu1 %v5242_v52  ;;  %v5535_v26 = vadd.f32 %v4124_v40, %v4123_v5  ;;  %v4126_v53 = vpop.f32.mrb[58].mxu1  ;;  %v4857_v5 = vld [vmem:[%s4988_s29 + $0x540] ss:$12 sps:$4 sm:$0xff]  }
 0x15d   : > { %v4027_v43 = vpop.f32.mrb[47].mxu0  ;;  %v4127_v58 = vpop.f32.mrb[59].mxu1 }
 0x15e   : > { %v5540_v48 = vadd.f32 %v5386_v12, %v4025_v35  ;;  %v4028_v44 = vadd.f32 %v4027_v43, %v4026_v27  ;;  %v5542_v62 = vadd.f32 %v4127_v58, %v4126_v53  ;;  %v4858_v12 = vld [vmem:[%s4988_s29 + $0x4d0] ss:$12 sps:$4 sm:$0xff]  }
 0x15f   : > { %2847 = vmatmul.mubr.bf16.gmra.mrb[152].mxu0 %v4852_v25  ;;  %4574 = vmatmul.mubr.msk.bf16.vlgmr.msra.gmra.mrb[164].mxu1 %vm620_vm0, %v4853_v29  ;;  %v4859_v53 = vld [vmem:[%s4988_s29 + $0x55c] ss:$12 sps:$4 sm:$0xff]  }
 0x160   : > { %6204 = vst [vmem:[#allocation2_spill] sm:$0xff] %v5540_v48  ;;  %v5546_v52 = vadd.f32 %v5392_v21, %v4028_v44  ;;  %2854 = vmatprep.mubr.bf16.mxu0 %v4854_v31  ;;  %4577 = vmatprep.mubr.msk.bf16.mxu1 %vm620_vm0, %v4856_v4  ;;  %v4861_v29 = vld [vmem:[%s4988_s29 + $0x4e8] ss:$12 sps:$4 sm:$0xff]  }
 0x162   : > { %6205 = vst [vmem:[#allocation3_spill] sm:$0xff] %v5546_v52  ;;  %v4029_v19 = vpop.f32.mrb[48].mxu0  ;;  %v4129_v3 = vpop.f32.mrb[60].mxu1 }
 0x163   : > { %v4030_v61 = vpop.f32.mrb[49].mxu0  ;;  %v4130_v24 = vpop.f32.mrb[61].mxu1 }
 0x164   : > { %v4031_v40 = vadd.f32 %v4030_v61, %v4029_v19  ;;  %v4032_v35 = vpop.f32.mrb[50].mxu0  ;;  %v5551_v27 = vadd.f32 %v4130_v24, %v4129_v3  ;;  %v4132_v25 = vpop.f32.mrb[62].mxu1  ;;  %v4862_v24 = vld [vmem:[%s4988_s29 + $0x558] ss:$12 sps:$4 sm:$0xff]  }
 0x165   : > { %v4033_v21 = vpop.f32.mrb[51].mxu0  ;;  %v4133_v43 = vpop.f32.mrb[63].mxu1 }
 0x166   : > { %v5556_v31 = vadd.f32 %v4031_v40, %v5410_v11  ;;  %v4034_v4 = vadd.f32 %v4033_v21, %v4032_v35  ;;  %v5558_v58 = vadd.f32 %v4133_v43, %v4132_v25  ;;  %v4863_v11 = vld [vmem:[%s4988_s29 + $0x500] ss:$12 sps:$4 sm:$0xff]  }
 0x167   : > { %2855 = vmatmul.mubr.bf16.gmra.mrb[156].mxu0 %v4857_v5  ;;  %4578 = vmatmul.mubr.msk.bf16.gmra.mrb[168].mxu1 %vm620_vm0, %v4858_v12  ;;  %v4864_v43 = vld [vmem:[%s4988_s29 + $0x574] ss:$12 sps:$4 sm:$0xff]   ;;  %v4866_v12 = vld [vmem:[%s4988_s29 + $0x518] ss:$12 sps:$4 sm:$0xff]  }
 0x168   : > { %6206 = vst [vmem:[#allocation4_spill] sm:$0xff] %v5556_v31  ;;  %v5562_v44 = vadd.f32 %v4034_v4, %v5416_v45  ;;  %2862 = vmatprep.mubr.bf16.mxu0 %v4859_v53  ;;  %4581 = vmatprep.mubr.msk.bf16.mxu1 %vm620_vm0, %v4861_v29  ;;  %v4867_v31 = vld [vmem:[%s4988_s29 + $0x570] ss:$12 sps:$4 sm:$0xff]  }
 0x16a   : > { %6207 = vst [vmem:[#allocation5_spill] sm:$0xff] %v5562_v44  ;;  %v4035_v19 = vpop.f32.mrb[52].mxu0  ;;  %v4135_v3 = vpop.f32.mrb[64].mxu1 }
 0x16b   : > { %v4036_v61 = vpop.f32.mrb[53].mxu0  ;;  %v4136_v40 = vpop.f32.mrb[65].mxu1 }
 0x16c   : > { %v4037_v35 = vadd.f32 %v4036_v61, %v4035_v19  ;;  %v4038_v25 = vpop.f32.mrb[54].mxu0  ;;  %v5567_v21 = vadd.f32 %v4136_v40, %v4135_v3  ;;  %v4138_v5 = vpop.f32.mrb[66].mxu1 }
 0x16d   : > { %v4039_v45 = vpop.f32.mrb[55].mxu0  ;;  %v4139_v4 = vpop.f32.mrb[67].mxu1 }
 0x16e   : > { %v5572_v53 = vadd.f32 %v5406_v34, %v4037_v35  ;;  %v4040_v29 = vadd.f32 %v4039_v45, %v4038_v25  ;;  %v5574_v44 = vadd.f32 %v4139_v4, %v4138_v5  ;;  %v4868_v34 = vld [vmem:[%s4988_s29 + $0x530] ss:$12 sps:$4 sm:$0xff]   ;;  %v4869_v4 = vld [vmem:[%s4988_s29 + $0x58c] ss:$12 sps:$4 sm:$0xff]  }
 0x16f   : > { %2863 = vmatmul.mubr.bf16.gmra.mrb[160].mxu0 %v4862_v24  ;;  %4582 = vmatmul.mubr.msk.bf16.gmra.mrb[172].mxu1 %vm620_vm0, %v4863_v11  ;;  %v4871_v11 = vld [vmem:[%s4988_s29 + $0x548] ss:$12 sps:$4 sm:$0xff]  }
 0x170   : > { %6208 = vst [vmem:[#allocation6_spill] sm:$0xff] %v5572_v53  ;;  %v5578_v19 = vadd.f32 %v5412_v41, %v4040_v29  ;;  %2870 = vmatprep.mubr.bf16.mxu0 %v4864_v43  ;;  %4585 = vmatprep.mubr.msk.bf16.mxu1 %vm620_vm0, %v4866_v12  ;;  %v4872_v53 = vld [vmem:[%s4988_s29 + $0x588] ss:$12 sps:$4 sm:$0xff]  }
 0x171   : > { %v6228_v52 = vld [vmem:[#allocation4_spill] sm:$0xff] }
 0x172   : > { %6209 = vst [vmem:[#allocation7_spill] sm:$0xff] %v5578_v19  ;;  %v4041_v3 = vpop.f32.mrb[56].mxu0  ;;  %v4141_v61 = vpop.f32.mrb[68].mxu1 }
 0x173   : > { %v4042_v40 = vpop.f32.mrb[57].mxu0  ;;  %v4142_v35 = vpop.f32.mrb[69].mxu1 }
 0x174   : > { %v4043_v25 = vadd.f32 %v4042_v40, %v4041_v3  ;;  %v4044_v5 = vpop.f32.mrb[58].mxu0  ;;  %v5583_v45 = vadd.f32 %v4142_v35, %v4141_v61  ;;  %v4144_v24 = vpop.f32.mrb[70].mxu1 }
 0x175   : > { %v4045_v41 = vpop.f32.mrb[59].mxu0  ;;  %v4145_v29 = vpop.f32.mrb[71].mxu1 }
 0x176   : > { %v5588_v43 = vadd.f32 %v4043_v25, %v5429_v59  ;;  %v4046_v12 = vadd.f32 %v4045_v41, %v4044_v5  ;;  %v5590_v19 = vadd.f32 %v4145_v29, %v4144_v24  ;;  %v4873_v59 = vld [vmem:[%s4988_s29 + $0x560] ss:$12 sps:$4 sm:$0xff]   ;;  %v4874_v29 = vld [vmem:[%s4988_s29 + $0x5a4] ss:$12 sps:$4 sm:$0xff]  }
 0x177   : > { %2871 = vmatmul.mubr.bf16.gmra.mrb[164].mxu0 %v4867_v31  ;;  %4586 = vmatmul.mubr.msk.bf16.gmra.mrb[176].mxu1 %vm620_vm0, %v4868_v34  ;;  %v4876_v34 = vld [vmem:[%s4988_s29 + $0x578] ss:$12 sps:$4 sm:$0xff]  }
 0x178   : > { %v5594_v3 = vadd.f32 %v4046_v12, %v5435_v6  ;;  %2878 = vmatprep.mubr.bf16.mxu0 %v4869_v4  ;;  %4589 = vmatprep.mubr.msk.bf16.mxu1 %vm620_vm0, %v4871_v11 }
 0x17a   : > { %6210 = vst [vmem:[#allocation8_spill] sm:$0xff] %v5594_v3  ;;  %v4047_v61 = vpop.f32.mrb[60].mxu0  ;;  %v4147_v40 = vpop.f32.mrb[72].mxu1 }
 0x17b   : > { %v4048_v35 = vpop.f32.mrb[61].mxu0  ;;  %v4148_v25 = vpop.f32.mrb[73].mxu1 }
 0x17c   : > { %v4049_v5 = vadd.f32 %v4048_v35, %v4047_v61  ;;  %v4050_v24 = vpop.f32.mrb[62].mxu0  ;;  %v5599_v41 = vadd.f32 %v4148_v25, %v4147_v40  ;;  %v4150_v31 = vpop.f32.mrb[74].mxu1 }
 0x17d   : > { %v4051_v6 = vpop.f32.mrb[63].mxu0  ;;  %v4151_v12 = vpop.f32.mrb[75].mxu1 }
 0x17e   : > { %v5604_v4 = vadd.f32 %v5425_v54, %v4049_v5  ;;  %v4052_v11 = vadd.f32 %v4051_v6, %v4050_v24  ;;  %v5606_v3 = vadd.f32 %v4151_v12, %v4150_v31  ;;  %v4877_v5 = vld [vmem:[%s4988_s29 + $0x5a0] ss:$12 sps:$4 sm:$0xff]   ;;  %v4878_v24 = vld [vmem:[%s4988_s29 + $0x590] ss:$12 sps:$4 sm:$0xff]  }
 0x17f   : > { %2879 = vmatmul.mubr.bf16.gmra.mrb[168].mxu0 %v4872_v53  ;;  %4590 = vmatmul.mubr.msk.bf16.gmra.mrb[180].mxu1 %vm620_vm0, %v4873_v59  ;;  %v4879_v12 = vld [vmem:[%s4988_s29 + $0x5bc] ss:$12 sps:$4 sm:$0xff]  }
 0x180   : > { %6211 = vst [vmem:[#allocation9_spill] sm:$0xff] %v5604_v4  ;;  %v5610_v61 = vadd.f32 %v5431_v63, %v4052_v11  ;;  %2886 = vmatprep.mubr.bf16.mxu0 %v4874_v29  ;;  %4593 = vmatprep.mubr.msk.bf16.mxu1 %vm620_vm0, %v4876_v34  ;;  %v4881_v29 = vld [vmem:[%s4988_s29 + $0x5a8] ss:$12 sps:$4 sm:$0xff]  }
 0x182   : > { %v4503_v40 = vpop.f32.mrb[64].mxu0  ;;  %v4153_v35 = vpop.f32.mrb[76].mxu1 }
 0x183   : > { %v5614_v25 = vadd.f32 %v4503_v40, %v5459_v60  ;;  %v1539_v54 = vpop.f32.mrb[65].mxu0  ;;  %v4154_v31 = vpop.f32.mrb[77].mxu1 }
 0x184   : > { %v5619_v53 = vadd.f32 %v5445_v23, %v1539_v54  ;;  %v4504_v59 = vpop.f32.mrb[66].mxu0  ;;  %v5621_v6 = vadd.f32 %v4154_v31, %v4153_v35  ;;  %v4156_v63 = vpop.f32.mrb[78].mxu1 }
 0x185   : > { %v5628_v11 = vadd.f32 %v4504_v59, %v5466_v18  ;;  %v1542_v60 = vpop.f32.mrb[67].mxu0  ;;  %v4157_v40 = vpop.f32.mrb[79].mxu1  ;;  %v4884_v18 = vld [vmem:[%s4988_s29 + $0x5d4] ss:$12 sps:$4 sm:$0xff]  }
 0x186   : > { %v5633_v54 = vadd.f32 %v5452_v42, %v1542_v60  ;;  %v5635_v35 = vadd.f32 %v4157_v40, %v4156_v63  ;;  %v4882_v60 = vld [vmem:[%s4988_s29 + $0x5b8] ss:$12 sps:$4 sm:$0xff]   ;;  %v4883_v40 = vld [vmem:[%s4988_s29 + $0x5c0] ss:$12 sps:$4 sm:$0xff]  }
 0x187   : > { %6212 = vst [vmem:[#allocation10_spill] sm:$0xff] %v5628_v11  ;;  %2887 = vmatmul.mubr.bf16.gmra.mrb[172].mxu0 %v4877_v5  ;;  %4594 = vmatmul.mubr.msk.bf16.gmra.mrb[184].mxu1 %vm620_vm0, %v4878_v24 }
 0x188   : > { %6213 = vst [vmem:[#allocation11_spill] sm:$0xff] %v5633_v54  ;;  %2894 = vmatprep.mubr.bf16.mxu0 %v4879_v12  ;;  %4597 = vmatprep.mubr.msk.bf16.mxu1 %vm620_vm0, %v4881_v29  ;;  %v4887_v12 = vld [vmem:[%s4988_s29 + $0x5d8] ss:$12 sps:$4 sm:$0xff]  }
 0x18a   : > { %v4507_v59 = vpop.f32.mrb[68].mxu0  ;;  %v4159_v23 = vpop.f32.mrb[80].mxu1 }
 0x18b   : > { %v5644_v42 = vadd.f32 %v4507_v59, %v5487_v17  ;;  %v1555_v63 = vpop.f32.mrb[69].mxu0  ;;  %v4160_v31 = vpop.f32.mrb[81].mxu1 }
 0x18c   : > { %v5649_v5 = vadd.f32 %v5473_v37, %v1555_v63  ;;  %v4508_v24 = vpop.f32.mrb[70].mxu0  ;;  %v5651_v34 = vadd.f32 %v4160_v31, %v4159_v23  ;;  %v4162_v11 = vpop.f32.mrb[82].mxu1 }
 0x18d   : > { %v5658_v54 = vadd.f32 %v4508_v24, %v5494_v38  ;;  %v1558_v17 = vpop.f32.mrb[71].mxu0  ;;  %v4163_v59 = vpop.f32.mrb[83].mxu1  ;;  %v4889_v38 = vld [vmem:[%s4988_s29 + $0x5ec] ss:$12 sps:$4 sm:$0xff]  }
 0x18e   : > { %v5663_v63 = vadd.f32 %v5480_v56, %v1558_v17  ;;  %v5665_v23 = vadd.f32 %v4163_v59, %v4162_v11  ;;  %v4886_v17 = vld [vmem:[%s4988_s29 + $0x5d0] ss:$12 sps:$4 sm:$0xff]  }
 0x18f   : > { %6214 = vst [vmem:[#allocation12_spill] sm:$0xff] %v5658_v54  ;;  %2895 = vmatmul.mubr.bf16.gmra.mrb[176].mxu0 %v4882_v60  ;;  %4598 = vmatmul.mubr.msk.bf16.gmra.mrb[188].mxu1 %vm620_vm0, %v4883_v40  ;;  %v4888_v59 = vld [vmem:[%s4988_s29 + $0x5f0] ss:$12 sps:$4 sm:$0xff]  }
 0x190   : > { %6215 = vst [vmem:[#allocation13_spill] sm:$0xff] %v5663_v63  ;;  %2902 = vmatprep.mubr.bf16.mxu0 %v4884_v18  ;;  %4601 = vmatprep.mubr.msk.bf16.mxu1 %vm620_vm0, %v4887_v12 }
 0x192   : > { %v4511_v24 = vpop.f32.mrb[72].mxu0  ;;  %v4165_v37 = vpop.f32.mrb[84].mxu1 }
 0x193   : > { %v5674_v56 = vadd.f32 %v4511_v24, %v5516_v55  ;;  %v1571_v11 = vpop.f32.mrb[73].mxu0  ;;  %v4166_v29 = vpop.f32.mrb[85].mxu1 }
 0x194   : > { %v5679_v60 = vadd.f32 %v5501_v1, %v1571_v11  ;;  %v4512_v31 = vpop.f32.mrb[74].mxu0  ;;  %v5681_v40 = vadd.f32 %v4166_v29, %v4165_v37  ;;  %v4168_v54 = vpop.f32.mrb[86].mxu1 }
 0x195   : > { %v5687_v12 = vadd.f32 %v4512_v31, %v5523_v13  ;;  %v1574_v55 = vpop.f32.mrb[75].mxu0  ;;  %v4169_v24 = vpop.f32.mrb[87].mxu1 }
 0x196   : > { %v5692_v1 = vadd.f32 %v5508_v22, %v1574_v55  ;;  %v5694_v11 = vadd.f32 %v4169_v24, %v4168_v54  ;;  %v4891_v22 = vld [vmem:[%s4988_s29 + $0x5e8] ss:$12 sps:$4 sm:$0xff]  }
 0x197   : > { %6216 = vst [vmem:[#allocation14_spill] sm:$0xff] %v5687_v12  ;;  %2903 = vmatmul.mubr.bf16.gmra.mrb[180].mxu0 %v4886_v17  ;;  %4602 = vmatmul.mubr.msk.bf16.gmra.mrb[192].mxu1 %vm620_vm0, %v4888_v59 }
 0x198   : > { %2910 = vmatprep.mubr.bf16.mxu0 %v4889_v38 }
 0x19a   : > { %v4515_v37 = vpop.f32.mrb[76].mxu0  ;;  %v4171_v31 = vpop.f32.mrb[88].mxu1 }
 0x19b   : > { %v5702_v18 = vadd.f32 %v4515_v37, %v5551_v27  ;;  %v1587_v63 = vpop.f32.mrb[77].mxu0  ;;  %v4172_v55 = vpop.f32.mrb[89].mxu1 }
 0x19c   : > { %v5706_v54 = vadd.f32 %v5535_v26, %v1587_v63  ;;  %v4516_v24 = vpop.f32.mrb[78].mxu0  ;;  %v5708_v29 = vadd.f32 %v4172_v55, %v4171_v31  ;;  %v4174_v17 = vpop.f32.mrb[90].mxu1 }
 0x19d   : > { %6217 = vst [vmem:[#allocation15_spill] sm:$0xff] %v5702_v18  ;;  %v5713_v38 = vadd.f32 %v4516_v24, %v5558_v58  ;;  %v1590_v13 = vpop.f32.mrb[79].mxu0  ;;  %v4175_v12 = vpop.f32.mrb[91].mxu1 }
 0x19e   : > { %v5718_v37 = vadd.f32 %v5542_v62, %v1590_v13  ;;  %v5720_v26 = vadd.f32 %v4175_v12, %v4174_v17 }
 0x19f   : > { %6218 = vst [vmem:[#allocation16_spill] sm:$0xff] %v5713_v38  ;;  %2911 = vmatmul.mubr.bf16.gmra.mrb[184].mxu0 %v4891_v22 }
 0x1a2   : > { %v4519_v55 = vpop.f32.mrb[80].mxu0  ;;  %v4177_v58 = vpop.f32.mrb[92].mxu1 }
 0x1a3   : > { %v5727_v24 = vadd.f32 %v4519_v55, %v5583_v45  ;;  %v1603_v59 = vpop.f32.mrb[81].mxu0  ;;  %v4178_v18 = vpop.f32.mrb[93].mxu1 }
 0x1a4   : > { %v5730_v27 = vadd.f32 %v5567_v21, %v1603_v59  ;;  %v4520_v62 = vpop.f32.mrb[82].mxu0  ;;  %v4179_v12 = vadd.f32 %v4178_v18, %v4177_v58  ;;  %v4180_v13 = vpop.f32.mrb[94].mxu1 }
 0x1a5   : > { %6219 = vst [vmem:[#allocation17_spill] sm:$0xff] %v5727_v24  ;;  %v5735_v22 = vadd.f32 %v4520_v62, %v5590_v19  ;;  %v1606_v63 = vpop.f32.mrb[83].mxu0  ;;  %v4181_v31 = vpop.f32.mrb[95].mxu1 }
 0x1a6   : > { %v5740_v55 = vadd.f32 %v5574_v44, %v1606_v63  ;;  %v4182_v38 = vadd.f32 %v4181_v31, %v4180_v13 }
 0x1a7   : > { %6220 = vst [vmem:[#allocation18_spill] sm:$0xff] %v5735_v22 }
 0x1aa   : > { %v4523_v59 = vpop.f32.mrb[84].mxu0  ;;  %v4217_v58 = vpop.f32.mrb[96].mxu1 }
 0x1ab   : > { %v5747_v19 = vadd.f32 %v4523_v59, %v5621_v6  ;;  %v1619_v62 = vpop.f32.mrb[85].mxu0  ;;  %v4218_v17 = vpop.f32.mrb[97].mxu1 }
 0x1ac   : > { %v5750_v24 = vadd.f32 %v5599_v41, %v1619_v62  ;;  %v4524_v45 = vpop.f32.mrb[86].mxu0  ;;  %v4219_v44 = vadd.f32 %v4218_v17, %v4217_v58  ;;  %v4220_v63 = vpop.f32.mrb[98].mxu1 }
 0x1ad   : > { %6221 = vst [vmem:[#allocation19_spill] sm:$0xff] %v5747_v19  ;;  %v5755_v13 = vadd.f32 %v4524_v45, %v5635_v35  ;;  %v1622_v21 = vpop.f32.mrb[87].mxu0  ;;  %v4221_v18 = vpop.f32.mrb[99].mxu1 }
 0x1ae   : > { %v5760_v59 = vadd.f32 %v5606_v3, %v1622_v21  ;;  %v4222_v22 = vadd.f32 %v4221_v18, %v4220_v63 }
 0x1af   : > { %6222 = vst [vmem:[#allocation20_spill] sm:$0xff] %v5755_v13 }
 0x1b0   : > { %6223 = vst [vmem:[#allocation21_spill] sm:$0xff] %v5760_v59 }
 0x1b2   : > { %v4527_v58 = vpop.f32.mrb[88].mxu0  ;;  %v4223_v62 = vpop.f32.mrb[100].mxu1 }
 0x1b3   : > { %v5767_v35 = vadd.f32 %v4527_v58, %v5681_v40  ;;  %v1635_v45 = vpop.f32.mrb[89].mxu0  ;;  %v4224_v31 = vpop.f32.mrb[101].mxu1 }
 0x1b4   : > { %v5770_v19 = vadd.f32 %v5651_v34, %v1635_v45  ;;  %v4528_v6 = vpop.f32.mrb[90].mxu0  ;;  %v4225_v3 = vadd.f32 %v4224_v31, %v4223_v62  ;;  %v4226_v21 = vpop.f32.mrb[102].mxu1  ;;  %v6231_v31 = vld [vmem:[#allocation5_spill] sm:$0xff] }
 0x1b5   : > { %6224 = vst [vmem:[#allocation22_spill] sm:$0xff] %v5767_v35  ;;  %v5775_v41 = vadd.f32 %v4528_v6, %v5694_v11  ;;  %v1638_v17 = vpop.f32.mrb[91].mxu0  ;;  %v4227_v13 = vpop.f32.mrb[103].mxu1 }
 0x1b6   : > { %6225 = vst [vmem:[#allocation23_spill] sm:$0xff] %v5770_v19  ;;  %v5780_v58 = vadd.f32 %v5665_v23, %v1638_v17  ;;  %v4228_v48 = vadd.f32 %v4227_v13, %v4226_v21 }
 0x1b7   : > { %6227 = vst [vmem:[#allocation24_spill] sm:$0xff] %v5775_v41 }
 0x1b8   : > { %6229 = vst [vmem:[#allocation4_spill] sm:$0xff] %v5780_v58 }
 0x1ba   : > { %v4531_v59 = vpop.f32.mrb[92].mxu0  ;;  %v4229_v63 = vpop.f32.mrb[104].mxu1 }
 0x1bb   : > { %v5786_v35 = vadd.f32 %v4531_v59, %v4179_v12  ;;  %v1651_v11 = vpop.f32.mrb[93].mxu0  ;;  %v4230_v6 = vpop.f32.mrb[105].mxu1 }
 0x1bc   : > { %v5789_v18 = vadd.f32 %v5708_v29, %v1651_v11  ;;  %v4532_v40 = vpop.f32.mrb[94].mxu0  ;;  %v4231_v19 = vadd.f32 %v4230_v6, %v4229_v63  ;;  %v4232_v23 = vpop.f32.mrb[106].mxu1  ;;  %v6233_v63 = vld [vmem:[#allocation8_spill] sm:$0xff]  ;;  %v6236_v11 = vmax.f32 %v5347_v46, %v5619_v53 }
 0x1bd   : > { %6232 = vst [vmem:[#allocation5_spill] sm:$0xff] %v5786_v35  ;;  %v5793_v17 = vadd.f32 %v4532_v40, %v4182_v38  ;;  %v1654_v21 = vpop.f32.mrb[95].mxu0  ;;  %v4233_v45 = vpop.f32.mrb[107].mxu1 }
 0x1be   : > { %v5798_v12 = vadd.f32 %v5720_v26, %v1654_v21  ;;  %v4234_v59 = vadd.f32 %v4233_v45, %v4232_v23  ;;  %v6234_v26 = vmax.f32 %v5379_v7, %v5614_v25 }
 0x1c2   : > { %v4539_v6 = vpop.f32.mrb[96].mxu0  ;;  %v4235_v41 = vpop.f32.mrb[108].mxu1 }
 0x1c3   : > { %v2255_v13 = vadd.f32 %v4539_v6, %v4225_v3  ;;  %v2246_v38 = vpop.f32.mrb[97].mxu0  ;;  %v4236_v40 = vpop.f32.mrb[109].mxu1 }
 0x1c4   : > { %v2247_v35 = vadd.f32 %v4219_v44, %v2246_v38  ;;  %v4540_v4 = vpop.f32.mrb[98].mxu0  ;;  %v4237_v34 = vadd.f32 %v4236_v40, %v4235_v41  ;;  %v4238_v58 = vpop.f32.mrb[110].mxu1  ;;  %v6237_v44 = vld [vmem:[#allocation10_spill] sm:$0xff]  ;;  %v6239_v40 = vld [vmem:[#allocation11_spill] sm:$0xff] }
 0x1c5   : > { %v5807_v21 = vmax.f32 %v6234_v26, %v2255_v13  ;;  %v2258_v45 = vadd.f32 %v4540_v4, %v4228_v48  ;;  %v2249_v23 = vpop.f32.mrb[99].mxu0  ;;  %v4239_v29 = vpop.f32.mrb[111].mxu1  ;;  %v6238_v38 = vmax.f32 %v5383_v9, %v6237_v44  ;;  %v6240_v7 = vmax.f32 %v5354_v49, %v6239_v40 }
 0x1c6   : > { %v5812_v62 = vmax.f32 %v6236_v11, %v2247_v35  ;;  %v2250_v3 = vadd.f32 %v4222_v22, %v2249_v23  ;;  %v4240_v6 = vadd.f32 %v4239_v29, %v4238_v58  ;;  %v6241_v58 = vmax.f32 %v5419_v47, %v5644_v42 }
 0x1c7   : > { %6235 = vst [vmem:[#allocation8_spill] sm:$0xff] %v5807_v21  ;;  %v5817_v41 = vmax.f32 %v6238_v38, %v2258_v45  ;;  %v6242_v49 = vmax.f32 %v5399_v28, %v5649_v5  ;;  %v6245_v38 = vld [vmem:[#allocation13_spill] sm:$0xff] }
 0x1c8   : > { %v5822_v25 = vmax.f32 %v6240_v7, %v2250_v3  ;;  %v6246_v47 = vmax.f32 %v5403_v30, %v6245_v38 }
 0x1ca   : > { %v4543_v48 = vpop.f32.mrb[100].mxu0  ;;  %v4241_v4 = vpop.f32.mrb[112].mxu1 }
 0x1cb   : > { %v2271_v13 = vadd.f32 %v4543_v48, %v4237_v34  ;;  %v2262_v26 = vpop.f32.mrb[101].mxu0  ;;  %v4242_v21 = vpop.f32.mrb[113].mxu1 }
 0x1cc   : > { %v2263_v46 = vadd.f32 %v4231_v19, %v2262_v26  ;;  %v4544_v53 = vpop.f32.mrb[102].mxu0  ;;  %v4243_v35 = vadd.f32 %v4242_v21, %v4241_v4  ;;  %v4244_v22 = vpop.f32.mrb[114].mxu1  ;;  %v6243_v19 = vld [vmem:[#allocation12_spill] sm:$0xff] }
 0x1cd   : > { %v5827_v9 = vmax.f32 %v6241_v58, %v2271_v13  ;;  %v2274_v29 = vadd.f32 %v4544_v53, %v4240_v6  ;;  %v2265_v11 = vpop.f32.mrb[103].mxu0  ;;  %v4245_v45 = vpop.f32.mrb[115].mxu1  ;;  %v6244_v44 = vmax.f32 %v5423_v50, %v6243_v19  ;;  %v6247_v50 = vmax.f32 %v5438_v8, %v5679_v60  ;;  %v6250_v19 = vld [vmem:[#allocation14_spill] sm:$0xff] }
 0x1ce   : > { %v5832_v23 = vmax.f32 %v6242_v49, %v2263_v46  ;;  %v2266_v34 = vadd.f32 %v4234_v59, %v2265_v11  ;;  %v4246_v3 = vadd.f32 %v4245_v45, %v4244_v22  ;;  %v6251_v8 = vmax.f32 %v5455_v16, %v6250_v19  ;;  %v6256_v19 = vld [vmem:[#allocation16_spill] sm:$0xff] }
 0x1cf   : > { %v5837_v21 = vmax.f32 %v6244_v44, %v2274_v29  ;;  %v6248_v29 = vmax.f32 %v5441_v14, %v5692_v1  ;;  %v6253_v16 = vmax.f32 %v5469_v20, %v5718_v37 }
 0x1d0   : > { %v5842_v42 = vmax.f32 %v6246_v47, %v2266_v34 }
 0x1d2   : > { %v4247_v6 = vpop.f32.mrb[116].mxu1  ;;  %v4547_v40 = vpop.f32.mrb[104].mxu0 }
 0x1d3   : > { %v4248_v7 = vpop.f32.mrb[117].mxu1  ;;  %v2278_v48 = vpop.f32.mrb[105].mxu0 }
 0x1d4   : > { %v4249_v4 = vadd.f32 %v4248_v7, %v4247_v6  ;;  %v2279_v28 = vadd.f32 %v4243_v35, %v2278_v48  ;;  %v4250_v5 = vpop.f32.mrb[118].mxu1  ;;  %v4548_v13 = vpop.f32.mrb[106].mxu0  ;;  %v6249_v35 = vmax.f32 %v5450_v39, %v5674_v56  ;;  %v6252_v39 = vmax.f32 %v5464_v15, %v5706_v54  ;;  %v6254_v54 = vld [vmem:[#allocation15_spill] sm:$0xff] }
 0x1d5   : > { %v4251_v59 = vpop.f32.mrb[119].mxu1  ;;  %v2281_v26 = vpop.f32.mrb[107].mxu0 }
 0x1d6   : > { %v2287_v46 = vadd.f32 %v4547_v40, %v4249_v4  ;;  %v5847_v53 = vmax.f32 %v6247_v50, %v2279_v28  ;;  %v4252_v22 = vadd.f32 %v4251_v59, %v4250_v5  ;;  %v2282_v30 = vadd.f32 %v4246_v3, %v2281_v26 }
 0x1d8   : > { %v2290_v58 = vadd.f32 %v4548_v13, %v4252_v22  ;;  %v5852_v11 = vmax.f32 %v6248_v29, %v2282_v30  ;;  %v5857_v45 = vmax.f32 %v6249_v35, %v2287_v46  ;;  %v6255_v35 = vmax.f32 %v5478_v51, %v6254_v54  ;;  %v6260_v54 = vld [vmem:[#allocation17_spill] sm:$0xff] }
 0x1d9   : > { %v6258_v51 = vmax.f32 %v5492_v32, %v5730_v27 }
 0x1da   : > { %v4253_v49 = vpop.f32.mrb[120].mxu1  ;;  %v4551_v34 = vpop.f32.mrb[108].mxu0  ;;  %v5862_v60 = vmax.f32 %v6251_v8, %v2290_v58  ;;  %v6257_v8 = vmax.f32 %v5483_v57, %v6256_v19  ;;  %v6259_v57 = vmax.f32 %v5497_v36, %v5740_v55  ;;  %v6262_v55 = vld [vmem:[#allocation18_spill] sm:$0xff] }
 0x1db   : > { %v4254_v44 = vpop.f32.mrb[121].mxu1  ;;  %v2294_v3 = vpop.f32.mrb[109].mxu0 }
 0x1dc   : > { %v4255_v38 = vadd.f32 %v4254_v44, %v4253_v49  ;;  %v4256_v47 = vpop.f32.mrb[122].mxu1  ;;  %v4552_v6 = vpop.f32.mrb[110].mxu0 }
 0x1dd   : > { %v4257_v14 = vpop.f32.mrb[123].mxu1  ;;  %v2297_v1 = vpop.f32.mrb[111].mxu0 }
 0x1de   : > { %v2295_v40 = vadd.f32 %v4255_v38, %v2294_v3  ;;  %v4258_v7 = vadd.f32 %v4257_v14, %v4256_v47 }
 0x1e0   : > { %v5867_v56 = vmax.f32 %v6252_v39, %v2295_v40  ;;  %v2298_v48 = vadd.f32 %v4258_v7, %v2297_v1 }
 0x1e2   : > { %v5872_v4 = vmax.f32 %v6253_v16, %v2298_v48  ;;  %v4259_v28 = vpop.f32.mrb[124].mxu1  ;;  %v4555_v5 = vpop.f32.mrb[112].mxu0 }
 0x1e3   : > { %v4260_v13 = vpop.f32.mrb[125].mxu1  ;;  %v2310_v59 = vpop.f32.mrb[113].mxu0 }
 0x1e4   : > { %v4261_v26 = vadd.f32 %v4260_v13, %v4259_v28  ;;  %v4262_v46 = vpop.f32.mrb[126].mxu1  ;;  %v4556_v50 = vpop.f32.mrb[114].mxu0 }
 0x1e5   : > { %v4263_v22 = vpop.f32.mrb[127].mxu1  ;;  %v2313_v30 = vpop.f32.mrb[115].mxu0 }
 0x1e6   : > { %v2303_v58 = vadd.f32 %v4551_v34, %v4261_v26  ;;  %v4264_v29 = vadd.f32 %v4263_v22, %v4262_v46 }
 0x1e8   : > { %v2306_v15 = vadd.f32 %v4552_v6, %v4264_v29  ;;  %v5877_v49 = vmax.f32 %v6255_v35, %v2303_v58  ;;  %v6261_v35 = vmax.f32 %v5506_v33, %v6260_v54 }
 0x1ea   : > { %v4265_v20 = vpop.f32.mrb[128].mxu1  ;;  %v4559_v37 = vpop.f32.mrb[116].mxu0  ;;  %v5882_v44 = vmax.f32 %v6257_v8, %v2306_v15  ;;  %v6263_v8 = vmax.f32 %v5511_v2, %v6262_v55 }
 0x1eb   : > { %v4266_v3 = vpop.f32.mrb[129].mxu1  ;;  %v2326_v38 = vpop.f32.mrb[117].mxu0 }
 0x1ec   : > { %v4267_v47 = vadd.f32 %v4266_v3, %v4265_v20  ;;  %v4268_v14 = vpop.f32.mrb[130].mxu1  ;;  %v4560_v1 = vpop.f32.mrb[118].mxu0 }
 0x1ed   : > { %v4269_v34 = vpop.f32.mrb[131].mxu1  ;;  %v2329_v40 = vpop.f32.mrb[119].mxu0 }
 0x1ee   : > { %v2311_v6 = vadd.f32 %v4267_v47, %v2310_v59  ;;  %v4270_v7 = vadd.f32 %v4269_v34, %v4268_v14 }
 0x1f0   : > { %v2314_v39 = vadd.f32 %v4270_v7, %v2313_v30  ;;  %v5887_v48 = vmax.f32 %v6258_v51, %v2311_v6 }
 0x1f2   : > { %v4271_v16 = vpop.f32.mrb[132].mxu1  ;;  %v5889_v28 = vpop.f32.mrb[120].mxu0  ;;  %v5894_v13 = vmax.f32 %v6259_v57, %v2314_v39 }
 0x1f3   : > { %v4272_v26 = vpop.f32.mrb[133].mxu1  ;;  %v2342_v46 = vpop.f32.mrb[121].mxu0 }
 0x1f4   : > { %v4273_v22 = vadd.f32 %v4272_v26, %v4271_v16  ;;  %v4274_v58 = vpop.f32.mrb[134].mxu1  ;;  %v5896_v59 = vpop.f32.mrb[122].mxu0  ;;  %v6264_v26 = vmax.f32 %v5521_v0, %v5750_v24 }
 0x1f5   : > { %v4275_v30 = vpop.f32.mrb[135].mxu1  ;;  %v2345_v29 = vpop.f32.mrb[123].mxu0 }
 0x1f6   : > { %v2319_v15 = vadd.f32 %v4555_v5, %v4273_v22  ;;  %v4276_v32 = vadd.f32 %v4275_v30, %v4274_v58  ;;  %v6265_v30 = vld [vmem:[#allocation21_spill] sm:$0xff] }
 0x1f8   : > { %v2322_v27 = vadd.f32 %v4556_v50, %v4276_v32  ;;  %v5901_v20 = vmax.f32 %v6261_v35, %v2319_v15  ;;  %v6266_v15 = vmax.f32 %v5527_v10, %v6265_v30 }
 0x1fa   : > { %v4277_v19 = vpop.f32.mrb[136].mxu1  ;;  %v4347_v36 = vpop.f32.mrb[124].mxu0  ;;  %v5906_v3 = vmax.f32 %v6263_v8, %v2322_v27 }
 0x1fb   : > { %v4278_v47 = vpop.f32.mrb[137].mxu1  ;;  %v4348_v14 = vpop.f32.mrb[125].mxu0 }
 0x1fc   : > { %v4279_v34 = vadd.f32 %v4278_v47, %v4277_v19  ;;  %v5908_v6 = vadd.f32 %v4348_v14, %v4347_v36  ;;  %v4280_v5 = vpop.f32.mrb[138].mxu1  ;;  %v4350_v7 = vpop.f32.mrb[126].mxu0  ;;  %v6267_v14 = vld [vmem:[#allocation2_spill] sm:$0xff] }
 0x1fd   : > { %v4281_v50 = vpop.f32.mrb[139].mxu1  ;;  %v4351_v39 = vpop.f32.mrb[127].mxu0 }
 0x1fe   : > { %v2327_v51 = vadd.f32 %v4279_v34, %v2326_v38  ;;  %v4282_v33 = vadd.f32 %v4281_v50, %v4280_v5  ;;  %v5910_v16 = vadd.f32 %v4351_v39, %v4350_v7  ;;  %v6268_v34 = vld [vmem:[#allocation19_spill] sm:$0xff] }
 0x1ff   : > { %v6269_v5 = vmax.f32 %v6267_v14, %v6268_v34  ;;  %v6270_v39 = vld [vmem:[#allocation3_spill] sm:$0xff]  ;;  %v6276_v14 = vld [vmem:[#allocation4_spill] sm:$0xff] }
 0x200   : > { %v2330_v57 = vadd.f32 %v4282_v33, %v2329_v40  ;;  %v5915_v2 = vmax.f32 %v6264_v26, %v2327_v51  ;;  %v6271_v51 = vld [vmem:[#allocation20_spill] sm:$0xff]  ;;  %v6277_v34 = vmax.f32 %v6231_v31, %v6276_v14 }
 0x201   : > { %v6272_v33 = vmax.f32 %v6270_v39, %v6271_v51 }
 0x202   : > { %v4283_v22 = vpop.f32.mrb[140].mxu1  ;;  %v4353_v58 = vpop.f32.mrb[128].mxu0  ;;  %v5920_v32 = vmax.f32 %v6266_v15, %v2330_v57 }
 0x203   : > { %v4284_v27 = vpop.f32.mrb[141].mxu1  ;;  %v4354_v54 = vpop.f32.mrb[129].mxu0 }
 0x204   : > { %v4285_v35 = vadd.f32 %v4284_v27, %v4283_v22  ;;  %v5922_v38 = vadd.f32 %v4354_v54, %v4353_v58  ;;  %v4286_v19 = vpop.f32.mrb[142].mxu1  ;;  %v4356_v36 = vpop.f32.mrb[130].mxu0 }
 0x205   : > { %v4287_v40 = vpop.f32.mrb[143].mxu1  ;;  %v4357_v55 = vpop.f32.mrb[131].mxu0 }
 0x206   : > { %v2335_v8 = vadd.f32 %v4559_v37, %v4285_v35  ;;  %v4288_v0 = vadd.f32 %v4287_v40, %v4286_v19  ;;  %v5924_v24 = vadd.f32 %v4357_v55, %v4356_v36  ;;  %v6273_v40 = vld [vmem:[#allocation23_spill] sm:$0xff] }
 0x207   : > { %v6274_v55 = vmax.f32 %v6228_v52, %v6273_v40 }
 0x208   : > { %v2338_v47 = vadd.f32 %v4560_v1, %v4288_v0  ;;  %v5929_v10 = vmax.f32 %v6269_v5, %v2335_v8 }
 0x20a   : > { %v4289_v7 = vpop.f32.mrb[144].mxu1  ;;  %v4359_v50 = vpop.f32.mrb[132].mxu0  ;;  %v5934_v57 = vmax.f32 %v6272_v33, %v2338_v47 }
 0x20b   : > { %v4290_v26 = vpop.f32.mrb[145].mxu1  ;;  %v4360_v22 = vpop.f32.mrb[133].mxu0 }
 0x20c   : > { %v4291_v58 = vadd.f32 %v4290_v26, %v4289_v7  ;;  %v5936_v37 = vadd.f32 %v4360_v22, %v4359_v50  ;;  %v4292_v30 = vpop.f32.mrb[146].mxu1  ;;  %v4362_v15 = vpop.f32.mrb[134].mxu0 }
 0x20d   : > { %v4293_v1 = vpop.f32.mrb[147].mxu1  ;;  %v4363_v27 = vpop.f32.mrb[135].mxu0 }
 0x20e   : > { %v2343_v54 = vadd.f32 %v4291_v58, %v2342_v46  ;;  %v4294_v35 = vadd.f32 %v4293_v1, %v4292_v30  ;;  %v5938_v19 = vadd.f32 %v4363_v27, %v4362_v15  ;;  %v6279_v30 = vld [vmem:[#allocation6_spill] sm:$0xff] }
 0x20f   : > { %v6280_v15 = vld [vmem:[#allocation22_spill] sm:$0xff] }
 0x210   : > { %v2346_v36 = vadd.f32 %v4294_v35, %v2345_v29  ;;  %v5943_v8 = vmax.f32 %v6274_v55, %v2343_v54  ;;  %v6281_v1 = vmax.f32 %v6279_v30, %v6280_v15  ;;  %v6283_v54 = vld [vmem:[#allocation7_spill] sm:$0xff]  ;;  %v6284_v35 = vld [vmem:[#allocation24_spill] sm:$0xff] }
 0x212   : > { %6275 = vst [vmem:[#allocation10_spill] sm:$0xff] %v5943_v8  ;;  %v4295_v0 = vpop.f32.mrb[148].mxu1  ;;  %v4365_v47 = vpop.f32.mrb[136].mxu0  ;;  %v5948_v5 = vmax.f32 %v6277_v34, %v2346_v36  ;;  %v6285_v36 = vmax.f32 %v6283_v54, %v6284_v35 }
 0x213   : > { %v4296_v7 = vpop.f32.mrb[149].mxu1  ;;  %v4366_v50 = vpop.f32.mrb[137].mxu0 }
 0x214   : > { %6278 = vst [vmem:[#allocation11_spill] sm:$0xff] %v5948_v5  ;;  %v4297_v39 = vadd.f32 %v4296_v7, %v4295_v0  ;;  %v5950_v46 = vadd.f32 %v4366_v50, %v4365_v47  ;;  %v4298_v51 = vpop.f32.mrb[150].mxu1  ;;  %v4368_v33 = vpop.f32.mrb[138].mxu0 }
 0x215   : > { %v4299_v29 = vpop.f32.mrb[151].mxu1  ;;  %v4369_v26 = vpop.f32.mrb[139].mxu0 }
 0x216   : > { %v2351_v52 = vadd.f32 %v5889_v28, %v4297_v39  ;;  %v4300_v22 = vadd.f32 %v4299_v29, %v4298_v51  ;;  %v5953_v58 = vadd.f32 %v4369_v26, %v4368_v33 }
 0x218   : > { %v5958_v31 = vmax.f32 %v6281_v1, %v2351_v52  ;;  %v2354_v27 = vadd.f32 %v5896_v59, %v4300_v22 }
 0x21a   : > { %6282 = vst [vmem:[#allocation12_spill] sm:$0xff] %v5958_v31  ;;  %v5964_v40 = vmax.f32 %v6285_v36, %v2354_v27  ;;  %v4371_v55 = vpop.f32.mrb[140].mxu0  ;;  %v4301_v0 = vpop.f32.mrb[152].mxu1 }
 0x21b   : > { %v4372_v47 = vpop.f32.mrb[141].mxu0  ;;  %v4302_v14 = vpop.f32.mrb[153].mxu1 }
 0x21c   : > { %6286 = vst [vmem:[#allocation13_spill] sm:$0xff] %v5964_v40  ;;  %v5966_v28 = vadd.f32 %v4372_v47, %v4371_v55  ;;  %v4374_v34 = vpop.f32.mrb[142].mxu0  ;;  %v4303_v7 = vadd.f32 %v4302_v14, %v4301_v0  ;;  %v4304_v50 = vpop.f32.mrb[154].mxu1 }
 0x21d   : > { %v4375_v39 = vpop.f32.mrb[143].mxu0  ;;  %v4305_v51 = vpop.f32.mrb[155].mxu1 }
 0x21e   : > { %v5968_v33 = vadd.f32 %v4375_v39, %v4374_v34  ;;  %v4306_v29 = vadd.f32 %v4305_v51, %v4304_v50 }
 0x222   : > { %v4377_v59 = vpop.f32.mrb[144].mxu0  ;;  %v4307_v26 = vpop.f32.mrb[156].mxu1 }
 0x223   : > { %v4378_v52 = vpop.f32.mrb[145].mxu0  ;;  %v4308_v22 = vpop.f32.mrb[157].mxu1 }
 0x224   : > { %v5970_v30 = vadd.f32 %v4378_v52, %v4377_v59  ;;  %v4380_v15 = vpop.f32.mrb[146].mxu0  ;;  %v4309_v1 = vadd.f32 %v4308_v22, %v4307_v26  ;;  %v4310_v27 = vpop.f32.mrb[158].mxu1  ;;  %v6287_v59 = vld [vmem:[#allocation9_spill] sm:$0xff] }
 0x225   : > { %v4381_v54 = vpop.f32.mrb[147].mxu0  ;;  %v4311_v35 = vpop.f32.mrb[159].mxu1  ;;  %v6288_v52 = vld [vmem:[#allocation5_spill] sm:$0xff] }
 0x226   : > { %v5972_v36 = vadd.f32 %v4381_v54, %v4380_v15  ;;  %v4312_v55 = vadd.f32 %v4311_v35, %v4310_v27  ;;  %v6289_v31 = vmax.f32 %v6287_v59, %v6288_v52  ;;  %v6290_v27 = vmax.f32 %v5588_v43, %v5789_v18 }
 0x22a   : > { %v4567_v0 = vpop.f32.mrb[160].mxu1  ;;  %v4383_v47 = vpop.f32.mrb[148].mxu0 }
 0x22b   : > { %v2367_v14 = vadd.f32 %v4567_v0, %v4309_v1  ;;  %v2358_v34 = vpop.f32.mrb[161].mxu1  ;;  %v4384_v39 = vpop.f32.mrb[149].mxu0 }
 0x22c   : > { %v2359_v50 = vadd.f32 %v4303_v7, %v2358_v34  ;;  %v5974_v51 = vadd.f32 %v4384_v39, %v4383_v47  ;;  %v4568_v40 = vpop.f32.mrb[162].mxu1  ;;  %v4386_v5 = vpop.f32.mrb[150].mxu0  ;;  %v6291_v7 = vmax.f32 %v5610_v61, %v5793_v17 }
 0x22d   : > { %v5979_v26 = vmax.f32 %v6289_v31, %v2367_v14  ;;  %v2370_v22 = vadd.f32 %v4568_v40, %v4312_v55  ;;  %v2361_v8 = vpop.f32.mrb[163].mxu1  ;;  %v4387_v15 = vpop.f32.mrb[151].mxu0  ;;  %v6292_v31 = vmax.f32 %v6233_v63, %v5798_v12  ;;  %v6293_v63 = vld [vmem:[#allocation8_spill] sm:$0xff] }
 0x22e   : > { %v5984_v54 = vmax.f32 %v6290_v27, %v2359_v50  ;;  %v2362_v1 = vadd.f32 %v4306_v29, %v2361_v8  ;;  %v5986_v35 = vadd.f32 %v4387_v15, %v4386_v5  ;;  %v6002_v8 = vld [vmem:[%s6177_s2] ss:$0 sm:$0xff] }
 0x22f   : > { %v5991_v0 = vmax.f32 %v6291_v7, %v2370_v22 }
 0x230   : > { %v5996_v47 = vmax.f32 %v6292_v31, %v2362_v1 }
 0x232   : > { %v4389_v40 = vpop.f32.mrb[152].mxu0  ;;  %v4575_v55 = vpop.f32.mrb[164].mxu1 }
 0x233   : > { %v2962_v43 = vadd.f32 %v4575_v55, %v5922_v38  ;;  %v4390_v18 = vpop.f32.mrb[153].mxu0  ;;  %v2953_v14 = vpop.f32.mrb[165].mxu1 }
 0x234   : > { %v6004_v61 = vadd.f32 %v4390_v18, %v4389_v40  ;;  %v2954_v17 = vadd.f32 %v5908_v6, %v2953_v14  ;;  %v4392_v5 = vpop.f32.mrb[154].mxu0  ;;  %v4576_v12 = vpop.f32.mrb[166].mxu1 }
 0x235   : > { %v3082_v29 = vmax.f32 %v6293_v63, %v2962_v43  ;;  %v2965_v34 = vadd.f32 %v4576_v12, %v5924_v24  ;;  %v4393_v39 = vpop.f32.mrb[155].mxu0  ;;  %v2956_v50 = vpop.f32.mrb[167].mxu1 }
 0x236   : > { %v3080_v38 = vmax.f32 %v5812_v62, %v2954_v17  ;;  %v6010_v59 = vadd.f32 %v4393_v39, %v4392_v5  ;;  %v2957_v52 = vadd.f32 %v5910_v16, %v2956_v50 }
 0x237   : > { %v3121_v22 = vadd.f32 %v6002_v8, %v3082_v29  ;;  %v3083_v15 = vmax.f32 %v5817_v41, %v2965_v34 }
 0x238   : > { %v3119_v6 = vadd.f32 %v6002_v8, %v3080_v38  ;;  %v3081_v27 = vmax.f32 %v5822_v25, %v2957_v52 }
 0x239   : > { %v3153_v1 = vmax.f32 %v3121_v22, 0.0  ;;  %v3122_v24 = vadd.f32 %v6002_v8, %v3083_v15 }
 0x23a   : > { %v3151_v62 = vmax.f32 %v3119_v6, 0.0  ;;  %v3120_v16 = vadd.f32 %v6002_v8, %v3081_v27  ;;  %v4395_v7 = vpop.f32.mrb[156].mxu0  ;;  %v4579_v31 = vpop.f32.mrb[168].mxu1 }
 0x23b   : > { %v3911_v41 = vpack.c.bf16 %v3153_v1, %v3153_v1  ;;  %v3154_v40 = vmax.f32 %v3122_v24, 0.0  ;;  %v2978_v25 = vadd.f32 %v4579_v31, %v5950_v46  ;;  %v4396_v55 = vpop.f32.mrb[157].mxu0  ;;  %v2969_v43 = vpop.f32.mrb[169].mxu1 }
 0x23c   : > { %v3909_v18 = vpack.c.bf16 %v3151_v62, %v3151_v62  ;;  %v3152_v14 = vmax.f32 %v3120_v16, 0.0  ;;  %v6026_v17 = vadd.f32 %v4396_v55, %v4395_v7  ;;  %v2970_v5 = vadd.f32 %v5936_v37, %v2969_v43  ;;  %v4398_v12 = vpop.f32.mrb[158].mxu0  ;;  %v4580_v63 = vpop.f32.mrb[170].mxu1 }
 0x23d   : > { %3314 = vst.msk [vmem:[%s6022_s21 + $0x8] sm:$0xf] %vm3311_vm1, %v3911_v41  ;;  %v3912_v29 = vpack.c.bf16 %v3154_v40, %v3154_v40  ;;  %v3086_v34 = vmax.f32 %v5827_v9, %v2978_v25  ;;  %v2981_v39 = vadd.f32 %v4580_v63, %v5953_v58  ;;  %v4399_v46 = vpop.f32.mrb[159].mxu0  ;;  %v2972_v50 = vpop.f32.mrb[171].mxu1 }
 0x23e   : > { %3312 = vst.msk [vmem:[%s6022_s21] sm:$0xf] %vm3311_vm1, %v3909_v18  ;;  %v3910_v38 = vpack.c.bf16 %v3152_v14, %v3152_v14  ;;  %v3084_v52 = vmax.f32 %v5832_v23, %v2970_v5  ;;  %v6036_v22 = vadd.f32 %v4399_v46, %v4398_v12  ;;  %v2973_v37 = vadd.f32 %v5938_v19, %v2972_v50 }
 0x23f   : > { %3315 = vst.msk [vmem:[%s6022_s21 + $0xc] sm:$0xf] %vm3311_vm1, %v3912_v29  ;;  %v3125_v15 = vadd.f32 %v6002_v8, %v3086_v34  ;;  %v3087_v6 = vmax.f32 %v5837_v21, %v2981_v39 }
 0x240   : > { %3313 = vst.msk [vmem:[%s6022_s21 + $0x4] sm:$0xf] %vm3311_vm1, %v3910_v38  ;;  %v3123_v9 = vadd.f32 %v6002_v8, %v3084_v52  ;;  %v3085_v58 = vmax.f32 %v5842_v42, %v2973_v37 }
 0x241   : > { %v3157_v27 = vmax.f32 %v3125_v15, 0.0  ;;  %v3126_v1 = vadd.f32 %v6002_v8, %v3087_v6 }
 0x242   : > { %v3155_v23 = vmax.f32 %v3123_v9, 0.0  ;;  %v3124_v24 = vadd.f32 %v6002_v8, %v3085_v58  ;;  %v4401_v19 = vpop.f32.mrb[160].mxu0  ;;  %v4583_v62 = vpop.f32.mrb[172].mxu1 }
 0x243   : > { %v3915_v16 = vpack.c.bf16 %v3157_v27, %v3157_v27  ;;  %v3158_v7 = vmax.f32 %v3126_v1, 0.0  ;;  %v2994_v21 = vadd.f32 %v4583_v62, %v5970_v30  ;;  %v4402_v31 = vpop.f32.mrb[161].mxu0  ;;  %v2985_v41 = vpop.f32.mrb[173].mxu1 }
 0x244   : > { %v3913_v40 = vpack.c.bf16 %v3155_v23, %v3155_v23  ;;  %v3156_v25 = vmax.f32 %v3124_v24, 0.0  ;;  %v6050_v42 = vadd.f32 %v4402_v31, %v4401_v19  ;;  %v2986_v55 = vadd.f32 %v5966_v28, %v2985_v41  ;;  %v4404_v43 = vpop.f32.mrb[162].mxu0  ;;  %v4584_v18 = vpop.f32.mrb[174].mxu1 }
 0x245   : > { %3318 = vst.msk [vmem:[%s6022_s21 + $0x18] sm:$0xf] %vm3311_vm1, %v3915_v16  ;;  %v3916_v14 = vpack.c.bf16 %v3158_v7, %v3158_v7  ;;  %v3090_v5 = vmax.f32 %v5857_v45, %v2994_v21  ;;  %v2997_v12 = vadd.f32 %v4584_v18, %v5972_v36  ;;  %v4405_v30 = vpop.f32.mrb[163].mxu0  ;;  %v2988_v63 = vpop.f32.mrb[175].mxu1 }
 0x246   : > { %3316 = vst.msk [vmem:[%s6022_s21 + $0x10] sm:$0xf] %vm3311_vm1, %v3913_v40  ;;  %v3914_v29 = vpack.c.bf16 %v3156_v25, %v3156_v25  ;;  %v3088_v34 = vmax.f32 %v5847_v53, %v2986_v55  ;;  %v4406_v39 = vadd.f32 %v4405_v30, %v4404_v43  ;;  %v2989_v28 = vadd.f32 %v5968_v33, %v2988_v63 }
 0x247   : > { %3319 = vst.msk [vmem:[%s6022_s21 + $0x1c] sm:$0xf] %vm3311_vm1, %v3916_v14  ;;  %v3129_v46 = vadd.f32 %v6002_v8, %v3090_v5  ;;  %v3091_v50 = vmax.f32 %v5862_v60, %v2997_v12 }
 0x248   : > { %3317 = vst.msk [vmem:[%s6022_s21 + $0x14] sm:$0xf] %vm3311_vm1, %v3914_v29  ;;  %v3127_v45 = vadd.f32 %v6002_v8, %v3088_v34  ;;  %v3089_v36 = vmax.f32 %v5852_v11, %v2989_v28 }
 0x249   : > { %v3161_v38 = vmax.f32 %v3129_v46, 0.0  ;;  %v3130_v52 = vadd.f32 %v6002_v8, %v3091_v50 }
 0x24a   : > { %v3159_v53 = vmax.f32 %v3127_v45, 0.0  ;;  %v3128_v37 = vadd.f32 %v6002_v8, %v3089_v36  ;;  %v4407_v33 = vpop.f32.mrb[164].mxu0  ;;  %v4587_v15 = vpop.f32.mrb[176].mxu1 }
 0x24b   : > { %v3919_v6 = vpack.c.bf16 %v3161_v38, %v3161_v38  ;;  %v3162_v9 = vmax.f32 %v3130_v52, 0.0  ;;  %v3010_v60 = vadd.f32 %v4587_v15, %v6004_v61  ;;  %v4408_v58 = vpop.f32.mrb[165].mxu0  ;;  %v3001_v27 = vpop.f32.mrb[177].mxu1 }
 0x24c   : > { %v3917_v1 = vpack.c.bf16 %v3159_v53, %v3159_v53  ;;  %v3160_v23 = vmax.f32 %v3128_v37, 0.0  ;;  %v6072_v11 = vadd.f32 %v4408_v58, %v4407_v33  ;;  %v3002_v24 = vadd.f32 %v5974_v51, %v3001_v27  ;;  %v4410_v19 = vpop.f32.mrb[166].mxu0  ;;  %v4588_v62 = vpop.f32.mrb[178].mxu1 }
 0x24d   : > { %3322 = vst.msk [vmem:[%s6022_s21 + $0x28] sm:$0xf] %vm3311_vm1, %v3919_v6  ;;  %v3920_v16 = vpack.c.bf16 %v3162_v9, %v3162_v9  ;;  %v3094_v7 = vmax.f32 %v5877_v49, %v3010_v60  ;;  %v3013_v21 = vadd.f32 %v4588_v62, %v6010_v59  ;;  %v4411_v61 = vpop.f32.mrb[167].mxu0  ;;  %v3004_v31 = vpop.f32.mrb[179].mxu1 }
 0x24e   : > { %3320 = vst.msk [vmem:[%s6022_s21 + $0x20] sm:$0xf] %vm3311_vm1, %v3917_v1  ;;  %v3918_v41 = vpack.c.bf16 %v3160_v23, %v3160_v23  ;;  %v3092_v40 = vmax.f32 %v5867_v56, %v3002_v24  ;;  %v6082_v25 = vadd.f32 %v4411_v61, %v4410_v19  ;;  %v3005_v51 = vadd.f32 %v5986_v35, %v3004_v31 }
 0x24f   : > { %3323 = vst.msk [vmem:[%s6022_s21 + $0x2c] sm:$0xf] %vm3311_vm1, %v3920_v16  ;;  %v3133_v55 = vadd.f32 %v6002_v8, %v3094_v7  ;;  %v3095_v43 = vmax.f32 %v5882_v44, %v3013_v21 }
 0x250   : > { %3321 = vst.msk [vmem:[%s6022_s21 + $0x24] sm:$0xf] %vm3311_vm1, %v3918_v41  ;;  %v3131_v49 = vadd.f32 %v6002_v8, %v3092_v40  ;;  %v3093_v59 = vmax.f32 %v5872_v4, %v3005_v51 }
 0x251   : > { %v3165_v18 = vmax.f32 %v3133_v55, 0.0  ;;  %v3134_v14 = vadd.f32 %v6002_v8, %v3095_v43 }
 0x252   : > { %v3163_v56 = vmax.f32 %v3131_v49, 0.0  ;;  %v3132_v5 = vadd.f32 %v6002_v8, %v3093_v59  ;;  %v4413_v35 = vpop.f32.mrb[168].mxu0  ;;  %v4591_v12 = vpop.f32.mrb[180].mxu1 }
 0x253   : > { %v3923_v30 = vpack.c.bf16 %v3165_v18, %v3165_v18  ;;  %v3166_v63 = vmax.f32 %v3134_v14, 0.0  ;;  %v3026_v44 = vadd.f32 %v4591_v12, %v6050_v42  ;;  %v4414_v29 = vpop.f32.mrb[169].mxu0  ;;  %v3017_v34 = vpop.f32.mrb[181].mxu1 }
 0x254   : > { %v3921_v28 = vpack.c.bf16 %v3163_v56, %v3163_v56  ;;  %v3164_v46 = vmax.f32 %v3132_v5, 0.0  ;;  %v4415_v4 = vadd.f32 %v4414_v29, %v4413_v35  ;;  %v3018_v50 = vadd.f32 %v6026_v17, %v3017_v34  ;;  %v4416_v45 = vpop.f32.mrb[170].mxu0  ;;  %v4592_v36 = vpop.f32.mrb[182].mxu1 }
 0x255   : > { %3326 = vst.msk [vmem:[%s6022_s21 + $0x38] sm:$0xf] %vm3311_vm1, %v3923_v30  ;;  %v3924_v38 = vpack.c.bf16 %v3166_v63, %v3166_v63  ;;  %v3098_v52 = vmax.f32 %v5901_v20, %v3026_v44  ;;  %v3029_v53 = vadd.f32 %v4592_v36, %v4406_v39  ;;  %v4417_v37 = vpop.f32.mrb[171].mxu0  ;;  %v3020_v33 = vpop.f32.mrb[183].mxu1 }
 0x256   : > { %3324 = vst.msk [vmem:[%s6022_s21 + $0x30] sm:$0xf] %vm3311_vm1, %v3921_v28  ;;  %v3922_v42 = vpack.c.bf16 %v3164_v46, %v3164_v46  ;;  %v3096_v15 = vmax.f32 %v5887_v48, %v3018_v50  ;;  %v4418_v6 = vadd.f32 %v4417_v37, %v4416_v45  ;;  %v3021_v9 = vadd.f32 %v6036_v22, %v3020_v33 }
 0x257   : > { %3327 = vst.msk [vmem:[%s6022_s21 + $0x3c] sm:$0xf] %vm3311_vm1, %v3924_v38  ;;  %v3137_v17 = vadd.f32 %v6002_v8, %v3098_v52  ;;  %v3099_v60 = vmax.f32 %v5906_v3, %v3029_v53 }
 0x258   : > { %3325 = vst.msk [vmem:[%s6022_s21 + $0x34] sm:$0xf] %vm3311_vm1, %v3922_v42  ;;  %v3135_v20 = vadd.f32 %v6002_v8, %v3096_v15  ;;  %v3097_v39 = vmax.f32 %v5894_v13, %v3021_v9  ;;  %v6294_v42 = vld [vmem:[#allocation10_spill] sm:$0xff] }
 0x259   : > { %v3169_v58 = vmax.f32 %v3137_v17, 0.0  ;;  %v3138_v27 = vadd.f32 %v6002_v8, %v3099_v60  ;;  %v6295_v17 = vld [vmem:[#allocation12_spill] sm:$0xff] }
 0x25a   : > { %v3167_v48 = vmax.f32 %v3135_v20, 0.0  ;;  %v3136_v1 = vadd.f32 %v6002_v8, %v3097_v39  ;;  %v4419_v22 = vpop.f32.mrb[172].mxu0  ;;  %v4595_v23 = vpop.f32.mrb[184].mxu1 }
 0x25b   : > { %v3927_v24 = vpack.c.bf16 %v3169_v58, %v3169_v58  ;;  %v3170_v19 = vmax.f32 %v3138_v27, 0.0  ;;  %v3042_v62 = vadd.f32 %v4595_v23, %v4415_v4  ;;  %v4420_v3 = vpop.f32.mrb[173].mxu0  ;;  %v3033_v16 = vpop.f32.mrb[185].mxu1  ;;  %v6296_v58 = vld [vmem:[#allocation11_spill] sm:$0xff] }
 0x25c   : > { %v3925_v7 = vpack.c.bf16 %v3167_v48, %v3167_v48  ;;  %v3168_v21 = vmax.f32 %v3136_v1, 0.0  ;;  %v4421_v61 = vadd.f32 %v4420_v3, %v4419_v22  ;;  %v3034_v13 = vadd.f32 %v6072_v11, %v3033_v16  ;;  %v4422_v31 = vpop.f32.mrb[174].mxu0  ;;  %v4596_v41 = vpop.f32.mrb[186].mxu1  ;;  %v6297_v22 = vld [vmem:[#allocation13_spill] sm:$0xff] }
 0x25d   : > { %3330 = vst.msk [vmem:[%s6022_s21 + $0x48] sm:$0xf] %vm3311_vm1, %v3927_v24  ;;  %v3928_v40 = vpack.c.bf16 %v3170_v19, %v3170_v19  ;;  %v3102_v51 = vmax.f32 %v5929_v10, %v3042_v62  ;;  %v3045_v55 = vadd.f32 %v4596_v41, %v4418_v6  ;;  %v4423_v43 = vpop.f32.mrb[175].mxu0  ;;  %v3036_v49 = vpop.f32.mrb[187].mxu1 }
 0x25e   : > { %3328 = vst.msk [vmem:[%s6022_s21 + $0x40] sm:$0xf] %vm3311_vm1, %v3925_v7  ;;  %v3926_v59 = vpack.c.bf16 %v3168_v21, %v3168_v21  ;;  %v3100_v18 = vmax.f32 %v5915_v2, %v3034_v13  ;;  %v4424_v14 = vadd.f32 %v4423_v43, %v4422_v31  ;;  %v3037_v56 = vadd.f32 %v6082_v25, %v3036_v49 }
 0x25f   : > { %3331 = vst.msk [vmem:[%s6022_s21 + $0x4c] sm:$0xf] %vm3311_vm1, %v3928_v40  ;;  %v3141_v11 = vadd.f32 %v6002_v8, %v3102_v51  ;;  %v3103_v5 = vmax.f32 %v5934_v57, %v3045_v55 }
 0x260   : > { %3329 = vst.msk [vmem:[%s6022_s21 + $0x44] sm:$0xf] %vm3311_vm1, %v3926_v59  ;;  %v3139_v10 = vadd.f32 %v6002_v8, %v3100_v18  ;;  %v3101_v35 = vmax.f32 %v5920_v32, %v3037_v56 }
 0x261   : > { %v3173_v12 = vmax.f32 %v3141_v11, 0.0  ;;  %v3142_v30 = vadd.f32 %v6002_v8, %v3103_v5 }
 0x262   : > { %v3171_v2 = vmax.f32 %v3139_v10, 0.0  ;;  %v3140_v63 = vadd.f32 %v6002_v8, %v3101_v35  ;;  %v4425_v25 = vpop.f32.mrb[176].mxu0  ;;  %v4599_v44 = vpop.f32.mrb[188].mxu1 }
 0x263   : > { %v3931_v29 = vpack.c.bf16 %v3173_v12, %v3173_v12  ;;  %v3174_v34 = vmax.f32 %v3142_v30, 0.0  ;;  %v4426_v28 = vpop.f32.mrb[177].mxu0  ;;  %v3049_v57 = vpop.f32.mrb[189].mxu1 }
 0x264   : > { %v3929_v46 = vpack.c.bf16 %v3171_v2, %v3171_v2  ;;  %v3172_v4 = vmax.f32 %v3140_v63, 0.0  ;;  %v4427_v50 = vadd.f32 %v4426_v28, %v4425_v25  ;;  %v3050_v32 = vadd.f32 %v4421_v61, %v3049_v57  ;;  %v4428_v45 = vpop.f32.mrb[178].mxu0  ;;  %v4600_v36 = vpop.f32.mrb[190].mxu1 }
 0x265   : > { %3334 = vst.msk [vmem:[%s6022_s21 + $0x58] sm:$0xf] %vm3311_vm1, %v3931_v29  ;;  %v3932_v38 = vpack.c.bf16 %v3174_v34, %v3174_v34  ;;  %v4429_v52 = vpop.f32.mrb[179].mxu0  ;;  %v3052_v53 = vpop.f32.mrb[191].mxu1 }
 0x266   : > { %3332 = vst.msk [vmem:[%s6022_s21 + $0x50] sm:$0xf] %vm3311_vm1, %v3929_v46  ;;  %v3930_v37 = vpack.c.bf16 %v3172_v4, %v3172_v4  ;;  %v3058_v33 = vadd.f32 %v4599_v44, %v4427_v50  ;;  %v3104_v15 = vmax.f32 %v6294_v42, %v3050_v32  ;;  %v4430_v6 = vadd.f32 %v4429_v52, %v4428_v45 }
 0x267   : > { %3335 = vst.msk [vmem:[%s6022_s21 + $0x5c] sm:$0xf] %vm3311_vm1, %v3932_v38  ;;  %v3053_v9 = vadd.f32 %v4424_v14, %v3052_v53 }
 0x268   : > { %3333 = vst.msk [vmem:[%s6022_s21 + $0x54] sm:$0xf] %vm3311_vm1, %v3930_v37  ;;  %v3106_v60 = vmax.f32 %v6295_v17, %v3058_v33  ;;  %v3143_v20 = vadd.f32 %v6002_v8, %v3104_v15  ;;  %v3061_v39 = vadd.f32 %v4600_v36, %v4430_v6 }
 0x269   : > { %v3105_v27 = vmax.f32 %v6296_v58, %v3053_v9 }
 0x26a   : > { %v3145_v48 = vadd.f32 %v6002_v8, %v3106_v60  ;;  %v3175_v1 = vmax.f32 %v3143_v20, 0.0  ;;  %v3107_v23 = vmax.f32 %v6297_v22, %v3061_v39  ;;  %v4431_v24 = vpop.f32.mrb[180].mxu0  ;;  %v4603_v19 = vpop.f32.mrb[192].mxu1 }
 0x26b   : > { %v3144_v62 = vadd.f32 %v6002_v8, %v3105_v27  ;;  %v4432_v3 = vpop.f32.mrb[181].mxu0  ;;  %v3065_v16 = vpop.f32.mrb[193].mxu1 }
 0x26c   : > { %v3177_v7 = vmax.f32 %v3145_v48, 0.0  ;;  %v3933_v21 = vpack.c.bf16 %v3175_v1, %v3175_v1  ;;  %v3146_v61 = vadd.f32 %v6002_v8, %v3107_v23  ;;  %v4433_v13 = vadd.f32 %v4432_v3, %v4431_v24  ;;  %v4434_v31 = vpop.f32.mrb[182].mxu0  ;;  %v4604_v41 = vpop.f32.mrb[194].mxu1 }
 0x26d   : > { %v3176_v40 = vmax.f32 %v3144_v62, 0.0  ;;  %v4435_v51 = vpop.f32.mrb[183].mxu0  ;;  %v3068_v55 = vpop.f32.mrb[195].mxu1 }
 0x26e   : > { %v3935_v43 = vpack.c.bf16 %v3177_v7, %v3177_v7  ;;  %3336 = vst.msk [vmem:[%s6022_s21 + $0x60] sm:$0xf] %vm3311_vm1, %v3933_v21  ;;  %v3178_v49 = vmax.f32 %v3146_v61, 0.0  ;;  %v4436_v59 = vadd.f32 %v4435_v51, %v4434_v31  ;;  %v3066_v18 = vadd.f32 %v4433_v13, %v3065_v16 }
 0x26f   : > { %v3934_v14 = vpack.c.bf16 %v3176_v40, %v3176_v40 }
 0x270   : > { %3338 = vst.msk [vmem:[%s6022_s21 + $0x68] sm:$0xf] %vm3311_vm1, %v3935_v43  ;;  %v3936_v56 = vpack.c.bf16 %v3178_v49, %v3178_v49  ;;  %v3108_v11 = vmax.f32 %v5984_v54, %v3066_v18  ;;  %v3069_v5 = vadd.f32 %v4436_v59, %v3068_v55 }
 0x271   : > { %3337 = vst.msk [vmem:[%s6022_s21 + $0x64] sm:$0xf] %vm3311_vm1, %v3934_v14 }
 0x272   : > { %3339 = vst.msk [vmem:[%s6022_s21 + $0x6c] sm:$0xf] %vm3311_vm1, %v3936_v56  ;;  %v3147_v10 = vadd.f32 %v6002_v8, %v3108_v11  ;;  %v3109_v35 = vmax.f32 %v5996_v47, %v3069_v5  ;;  %v4437_v12 = vpop.f32.mrb[184].mxu0 }
 0x273   : > { %v4438_v30 = vpop.f32.mrb[185].mxu0 }
 0x274   : > { %v3179_v2 = vmax.f32 %v3147_v10, 0.0  ;;  %v3148_v63 = vadd.f32 %v6002_v8, %v3109_v35  ;;  %v4439_v25 = vadd.f32 %v4438_v30, %v4437_v12  ;;  %v4440_v44 = vpop.f32.mrb[186].mxu0 }
 0x275   : > { %v4441_v29 = vpop.f32.mrb[187].mxu0 }
 0x276   : > { %v3937_v54 = vpack.c.bf16 %v3179_v2, %v3179_v2  ;;  %v3180_v34 = vmax.f32 %v3148_v63, 0.0  ;;  %v3074_v28 = vadd.f32 %v4603_v19, %v4439_v25  ;;  %v4442_v57 = vadd.f32 %v4441_v29, %v4440_v44 }
 0x278   : > { %3340 = vst.msk [vmem:[%s6022_s21 + $0x70] sm:$0xf] %vm3311_vm1, %v3937_v54  ;;  %v3938_v46 = vpack.c.bf16 %v3180_v34, %v3180_v34  ;;  %v3110_v47 = vmax.f32 %v5979_v26, %v3074_v28  ;;  %v3077_v4 = vadd.f32 %v4604_v41, %v4442_v57 }
 0x27a   : > { %3341 = vst.msk [vmem:[%s6022_s21 + $0x74] sm:$0xf] %vm3311_vm1, %v3938_v46  ;;  %v3149_v50 = vadd.f32 %v6002_v8, %v3110_v47  ;;  %v3111_v32 = vmax.f32 %v5991_v0, %v3077_v4 }
 0x27c   : > { %v3181_v45 = vmax.f32 %v3149_v50, 0.0  ;;  %v3150_v36 = vadd.f32 %v6002_v8, %v3111_v32 }
 0x27e   : > { %v3939_v38 = vpack.c.bf16 %v3181_v45, %v3181_v45  ;;  %v3182_v52 = vmax.f32 %v3150_v36, 0.0 }
 0x280   : > { %3342 = vst.msk [vmem:[%s6022_s21 + $0x78] sm:$0xf] %vm3311_vm1, %v3939_v38  ;;  %v3940_v53 = vpack.c.bf16 %v3182_v52, %v3182_v52 }
 0x282   : > { %3343 = vst.msk [vmem:[%s6022_s21 + $0x7c] sm:$0xf] %vm3311_vm1, %v3940_v53 }
 0x283 PF: > { %s13_s12 = sadd.s32 1, %s4916_s12  }
 0x284   : > { %p10_p4 = scmp.ge.s32.totalorder %s13_s12, 4  }
 0x286   :  { %12 = sbr.rel (!%p10_p4) target bundleno = 1 (0x1), region = 65 }

// kernel: dddqn_forward.5
= control target key start
LH: loop header
LB: loop body
LE: loop exit
PB: predicated region body
PF: predicated region fallthrough
CT: control target
= control target key end

     0   :  { %10 = vsyncpa [#allocation4], 0  ;;  %s8174_s18 = smov 0   ;;  %s8912_s0 = inlined_call_operand.vmem [shape: bf16[2,16384], index: 0, kind: input, shape index: {}]   ;;  %s8913_s1 = inlined_call_operand.vmem [shape: bf16[16384,128], index: 1, kind: input, shape index: {}]   ;;  %s8914_s2 = inlined_call_operand.vmem [shape: f32[1,128], index: 2, kind: input, shape index: {}]   ;;  %s8915_s3 = inlined_call_operand.vmem [shape: f32[128,3], index: 3, kind: input, shape index: {}]   ;;  %s8916_s4 = inlined_call_operand.vmem [shape: f32[1,3], index: 4, kind: input, shape index: {}]   ;;  %s8917_s5 = inlined_call_operand.hbm [shape: f32[2,3], index: 5, kind: output, shape index: {}]  }
   0x1 LB: > { %s8180_s19 = sadd.s32 4294967295, %s8136_s18   ;;  %p6256_p0 = scmp.ge.s32.totalorder %s8136_s18, 1  ;;  %s8136_s18 = sphi %s8174_s18, %s16_s18  }
   0x2   : > { %p194_p1 = scmp.lt.s32.totalorder %s8136_s18, 3 }
   0x4   : > { %p195_p2 = pnand %p6256_p0, %p194_p1 }
   0x5   : > { %s6257_s20 = sshll.u32 (!%p195_p2), %s8180_s19, 6  ;;  %s6258_s21 = sshll.u32 (!%p195_p2), %s8180_s19, 10 }
   0x6   : > { %198 = sbr.rel (%p195_p2) target bundleno = 1009 (0x3f1), region = 40  ;;  %p222_p3 = scmp.lt.s32.totalorder (!%p195_p2), %s6257_s20, 127 }
   0x7   : > { %p227_p4 = scmp.lt.s32.totalorder (!%p195_p2), %s6258_s21, 2047  ;;  %p6260_p5 = scmp.ne.s32.totalorder (!%p195_p2), %s8180_s19, 0 }
   0xd   : > { %s8919_s20 = smov (!%p222_p3, %s6257_s20), 127  ;;  %s8921_s21 = smov (!%p227_p4, %s6258_s21), 2047 }
   0xe   : > { %s8189_s24 = scalar_lea.vmem %s8912_s0, %s8919_s20  ;;  %s6259_s25 = sshll.u32 %s8921_s21, 2  ;;  %v8138_v0 = vmov (!%p6260_p5), 0.0  }
   0xf   : > { %s8194_s28 = scalar_lea.vmem %s8913_s1, %s6259_s25  ;;  %236 = sbr.rel (%p6260_p5) target bundleno = 22 (0x16), region = 44  ;;  %237 = vst [vmem:[#allocation2] sm:$0x3] (!%p6260_p5), %v8138_v0 }
  0x16 PF: > { %v7580_v1 = vld [vmem:[%s8194_s28 + $0x40] sm:$0xff]   ;;  %v7584_v5 = vld [vmem:[%s8194_s28 + $0x48] sm:$0xff]   ;;  %v7588_v9 = vld [vmem:[%s8194_s28 + $0x50] sm:$0xff]   ;;  %v1283_v29 = vlaneseq  ;;  %v8139_v37 = vmov 1966171168   ;;  %p6773_p6 = scmp.ne.s32.totalorder %s8180_s19, 1 }
  0x17   : > { %v7581_v2 = vld [vmem:[%s8194_s28 + $0xc0] sm:$0xff]   ;;  %6780 = vmatprep.subr.bf16.mxu0 %v7580_v1  ;;  %v7585_v6 = vld [vmem:[%s8194_s28 + $0xc8] sm:$0xff]   ;;  %v7589_v10 = vld [vmem:[%s8194_s28 + $0xd0] sm:$0xff]   ;;  %v1281_v38 = vunpack.c.l.s4 %v8139_v37  ;;  %vm8141_vm0 = vmmov (!%p6773_p6), 0   ;;  %vm6196_vm1 = vcmask (!%p6773_p6), 17408  }
  0x18   : > { %v7582_v3 = vld [vmem:[%s8194_s28] sm:$0xff]   ;;  %6802 = vmatprep.subr.bf16.mxu1 %v7581_v2  ;;  %v7586_v7 = vld [vmem:[%s8194_s28 + $0x8] sm:$0xff]   ;;  %v7590_v11 = vld [vmem:[%s8194_s28 + $0x10] sm:$0xff]   ;;  %v1284_v34 = vshrl.u32 %v1283_v29, 7 }
  0x19   : > { %v7583_v4 = vld [vmem:[%s8194_s28 + $0x80] sm:$0xff]   ;;  %6781 = vmatpush3.bf16.msra.mxu0 %v7582_v3  ;;  %v7587_v8 = vld [vmem:[%s8194_s28 + $0x88] sm:$0xff]   ;;  %v7591_v12 = vld [vmem:[%s8194_s28 + $0x90] sm:$0xff]   ;;  %v1282_v41 = vunpack.c.0.s8 %v1281_v38 }
  0x1a   : > { %6803 = vmatpush3.bf16.msra.mxu1 %v7583_v4  ;;  %6782 = vmatprep.subr.bf16.mxu0 %v7584_v5  ;;  %v7592_v13 = vld [vmem:[%s8194_s28 + $0x58] sm:$0xff]   ;;  %v7596_v17 = vld [vmem:[%s8194_s28 + $0x60] sm:$0xff]   ;;  %v7600_v21 = vld [vmem:[%s8194_s28 + $0x68] sm:$0xff]  }
  0x1b   : > { %6804 = vmatprep.subr.bf16.mxu1 %v7585_v6  ;;  %v7593_v14 = vld [vmem:[%s8194_s28 + $0xd8] sm:$0xff]   ;;  %v7597_v18 = vld [vmem:[%s8194_s28 + $0xe0] sm:$0xff]   ;;  %v7601_v22 = vld [vmem:[%s8194_s28 + $0xe8] sm:$0xff]   ;;  %v8232_v42 = vsub.s32 %v1282_v41, %v1284_v34 }
  0x1c   : > { %v7594_v15 = vld [vmem:[%s8194_s28 + $0x18] sm:$0xff]   ;;  %v7598_v19 = vld [vmem:[%s8194_s28 + $0x20] sm:$0xff]   ;;  %v7602_v23 = vld [vmem:[%s8194_s28 + $0x28] sm:$0xff]  }
  0x1d   : > { %6783 = vmatpush3.bf16.msra.mxu0 %v7586_v7  ;;  %v7595_v16 = vld [vmem:[%s8194_s28 + $0x98] sm:$0xff]   ;;  %v7599_v20 = vld [vmem:[%s8194_s28 + $0xa0] sm:$0xff]   ;;  %v7603_v24 = vld [vmem:[%s8194_s28 + $0xa8] sm:$0xff]  }
  0x1e   : > { %6805 = vmatpush3.bf16.msra.mxu1 %v7587_v8  ;;  %6784 = vmatprep.subr.bf16.mxu0 %v7588_v9  ;;  %v7604_v25 = vld [vmem:[%s8194_s28 + $0x70] sm:$0xff]   ;;  %v7608_v30 = vld [vmem:[%s8194_s28 + $0x78] sm:$0xff]   ;;  %v239_v35 = vld [vmem:[%s8189_s24] sm:$0xff] }
  0x1f   : > { %6806 = vmatprep.subr.bf16.mxu1 %v7589_v10  ;;  %v7605_v26 = vld [vmem:[%s8194_s28 + $0xf0] sm:$0xff]   ;;  %v7609_v31 = vld [vmem:[%s8194_s28 + $0xf8] sm:$0xff]   ;;  %v7613_v36 = vld [vmem:[%s8194_s28 + $0x140] sm:$0xff]   ;;  %v1279_v40 = vcombine.high %v239_v35, %v239_v35  ;;  %v1286_v43 = vrot.slane %v239_v35, %v8232_v42 }
  0x20   : > { %v7606_v27 = vld [vmem:[%s8194_s28 + $0x30] sm:$0xff]   ;;  %v7610_v32 = vld [vmem:[%s8194_s28 + $0x38] sm:$0xff]   ;;  %v7614_v39 = vld [vmem:[%s8194_s28 + $0x1c0] sm:$0xff]  }
  0x21   : > { %6785 = vmatpush3.bf16.msra.mxu0 %v7590_v11  ;;  %v7607_v28 = vld [vmem:[%s8194_s28 + $0xb0] sm:$0xff]   ;;  %v7611_v33 = vld [vmem:[%s8194_s28 + $0xb8] sm:$0xff]   ;;  %v8236_v44 = vrot.slane %v1279_v40, %v8232_v42  ;;  %v1294_v45 = vcombine.high %v1286_v43, %v1286_v43  ;;  %v1302_v46 = vrot.slane %v1286_v43, %v8232_v42  ;;  %v7615_v48 = vld [vmem:[%s8194_s28 + $0x100] sm:$0xff]  }
  0x22   : > { %6807 = vmatpush3.bf16.msra.mxu1 %v7591_v12  ;;  %6786 = vmatprep.subr.bf16.mxu0 %v7592_v13  ;;  %v7616_v50 = vld [vmem:[%s8194_s28 + $0x180] sm:$0xff]   ;;  %v7617_v53 = vld [vmem:[%s8194_s28 + $0x148] sm:$0xff]   ;;  %v7621_v59 = vld [vmem:[%s8194_s28 + $0x150] sm:$0xff]  }
  0x23   : > { %6808 = vmatprep.subr.bf16.mxu1 %v7593_v14  ;;  %v1295_v47 = vcombine.high %v8236_v44, %v8236_v44  ;;  %v1316_v49 = vrot.slane %v1294_v45, %v8232_v42  ;;  %v1324_v52 = vcombine.high %v1302_v46, %v1302_v46  ;;  %v7618_v55 = vld [vmem:[%s8194_s28 + $0x1c8] sm:$0xff]   ;;  %v7622_v60 = vld [vmem:[%s8194_s28 + $0x1d0] sm:$0xff]   ;;  %v7625_v63 = vld [vmem:[%s8194_s28 + $0x158] sm:$0xff]  }
  0x24   : > { %v7619_v56 = vld [vmem:[%s8194_s28 + $0x108] sm:$0xff]   ;;  %v7623_v61 = vld [vmem:[%s8194_s28 + $0x110] sm:$0xff]   ;;  %v7626_v0 = vld [vmem:[%s8194_s28 + $0x1d8] sm:$0xff]  }
  0x25   : > { %6787 = vmatpush3.bf16.msra.mxu0 %v7594_v15  ;;  %v1323_v51 = vrot.slane %v1295_v47, %v8232_v42  ;;  %4839 = vmatprep.mubr.bf16.mxu0 %v1316_v49  ;;  %v1326_v54 = vcombine.high %v1316_v49, %v1316_v49  ;;  %v7620_v58 = vld [vmem:[%s8194_s28 + $0x188] sm:$0xff]   ;;  %v7624_v62 = vld [vmem:[%s8194_s28 + $0x190] sm:$0xff]   ;;  %v7627_v1 = vld [vmem:[%s8194_s28 + $0x118] sm:$0xff]  }
  0x26   : > { %6809 = vmatpush3.bf16.msra.mxu1 %v7595_v16  ;;  %6788 = vmatprep.subr.bf16.mxu0 %v7596_v17  ;;  %v7628_v2 = vld [vmem:[%s8194_s28 + $0x198] sm:$0xff]   ;;  %v7629_v3 = vld [vmem:[%s8194_s28 + $0x160] sm:$0xff]   ;;  %v7633_v7 = vld [vmem:[%s8194_s28 + $0x168] sm:$0xff]  }
  0x27   : > { %6810 = vmatprep.subr.bf16.mxu1 %v7597_v18  ;;  %v1327_v57 = vcombine.high %v1323_v51, %v1323_v51  ;;  %4879 = vmatprep.mubr.bf16.mxu1 %v1326_v54  ;;  %v7630_v4 = vld [vmem:[%s8194_s28 + $0x1e0] sm:$0xff]   ;;  %v7634_v8 = vld [vmem:[%s8194_s28 + $0x1e8] sm:$0xff]   ;;  %v7637_v11 = vld [vmem:[%s8194_s28 + $0x170] sm:$0xff]  }
  0x28   : > { %v7631_v5 = vld [vmem:[%s8194_s28 + $0x120] sm:$0xff]   ;;  %v7635_v9 = vld [vmem:[%s8194_s28 + $0x128] sm:$0xff]   ;;  %v7638_v12 = vld [vmem:[%s8194_s28 + $0x1f0] sm:$0xff]  }
  0x29   : > { %6789 = vmatpush3.bf16.msra.mxu0 %v7598_v19  ;;  %v7632_v6 = vld [vmem:[%s8194_s28 + $0x1a0] sm:$0xff]   ;;  %v7636_v10 = vld [vmem:[%s8194_s28 + $0x1a8] sm:$0xff]   ;;  %v7639_v13 = vld [vmem:[%s8194_s28 + $0x130] sm:$0xff]   ;;  %v1309_v19 = vrot.slane %v8236_v44, %v8232_v42 }
  0x2a   : > { %6811 = vmatpush3.bf16.msra.mxu1 %v7599_v20  ;;  %6790 = vmatprep.subr.bf16.mxu0 %v7600_v21  ;;  %v7640_v14 = vld [vmem:[%s8194_s28 + $0x1b0] sm:$0xff]   ;;  %v7641_v15 = vld [vmem:[%s8194_s28 + $0x178] sm:$0xff]   ;;  %v7645_v20 = vld [vmem:[%s8194_s28 + $0x240] sm:$0xff]  }
  0x2b   : > { %6812 = vmatprep.subr.bf16.mxu1 %v7601_v22  ;;  %v7642_v16 = vld [vmem:[%s8194_s28 + $0x1f8] sm:$0xff]   ;;  %v7646_v21 = vld [vmem:[%s8194_s28 + $0x2c0] sm:$0xff]   ;;  %v7653_v29 = vld [vmem:[%s8194_s28 + $0x250] sm:$0xff]  }
  0x2c   : > { %v7643_v17 = vld [vmem:[%s8194_s28 + $0x138] sm:$0xff]   ;;  %v7647_v22 = vld [vmem:[%s8194_s28 + $0x200] sm:$0xff]   ;;  %v7665_v41 = vld [vmem:[%s8194_s28 + $0x268] sm:$0xff]  }
  0x2d   : > { %6791 = vmatpush3.bf16.msra.mxu0 %v7602_v23  ;;  %v7644_v18 = vld [vmem:[%s8194_s28 + $0x1b8] sm:$0xff]   ;;  %v7648_v23 = vld [vmem:[%s8194_s28 + $0x280] sm:$0xff]   ;;  %v7666_v43 = vld [vmem:[%s8194_s28 + $0x2e8] sm:$0xff]  }
  0x2e   : > { %6813 = vmatpush3.bf16.msra.mxu1 %v7603_v24  ;;  %6792 = vmatprep.subr.bf16.mxu0 %v7604_v25  ;;  %v1325_v24 = vcombine.high %v1309_v19, %v1309_v19  ;;  %v7649_v25 = vld [vmem:[%s8194_s28 + $0x248] sm:$0xff]   ;;  %v7658_v34 = vld [vmem:[%s8194_s28 + $0x2d8] sm:$0xff]   ;;  %v7661_v37 = vld [vmem:[%s8194_s28 + $0x260] sm:$0xff]  }
  0x2f   : > { %6814 = vmatprep.subr.bf16.mxu1 %v7605_v26  ;;  %v7650_v26 = vld [vmem:[%s8194_s28 + $0x2c8] sm:$0xff]   ;;  %v7659_v35 = vld [vmem:[%s8194_s28 + $0x218] sm:$0xff]   ;;  %v7662_v38 = vld [vmem:[%s8194_s28 + $0x2e0] sm:$0xff]  }
  0x30   : > { %v7664_v40 = vld [vmem:[%s8194_s28 + $0x2a0] sm:$0xff]   ;;  %v7667_v44 = vld [vmem:[%s8194_s28 + $0x228] sm:$0xff]  }
  0x31   : > { %6793 = vmatpush3.bf16.msra.mxu0 %v7606_v27  ;;  %v7651_v27 = vld [vmem:[%s8194_s28 + $0x208] sm:$0xff]  }
  0x32   : > { %6815 = vmatpush3.bf16.msra.mxu1 %v7607_v28  ;;  %6794 = vmatprep.subr.bf16.mxu0 %v7608_v30  ;;  %v7652_v28 = vld [vmem:[%s8194_s28 + $0x288] sm:$0xff]   ;;  %v7654_v30 = vld [vmem:[%s8194_s28 + $0x2d0] sm:$0xff]  }
  0x33   : > { %6816 = vmatprep.subr.bf16.mxu1 %v7609_v31  ;;  %v7655_v31 = vld [vmem:[%s8194_s28 + $0x210] sm:$0xff]   ;;  %v7668_v45 = vld [vmem:[%s8194_s28 + $0x2a8] sm:$0xff]  }
  0x34   : > { %v240_v47 = vld [vmem:[%s8189_s24 + $0x8] sm:$0xff] }
  0x35   : > { %6795 = vmatpush3.bf16.msra.mxu0 %v7610_v32  ;;  %v7656_v32 = vld [vmem:[%s8194_s28 + $0x290] sm:$0xff]   ;;  %v1335_v49 = vrot.slane %v240_v47, %v8232_v42 }
  0x36   : > { %6817 = vmatpush3.bf16.msra.mxu1 %v7611_v33  ;;  %6824 = vmatprep.subr.bf16.mxu0 %v7613_v36  ;;  %v7657_v33 = vld [vmem:[%s8194_s28 + $0x258] sm:$0xff]  }
  0x37   : > { %6846 = vmatprep.subr.bf16.mxu1 %v7614_v39  ;;  %v7660_v36 = vld [vmem:[%s8194_s28 + $0x298] sm:$0xff]   ;;  %v7663_v39 = vld [vmem:[%s8194_s28 + $0x220] sm:$0xff]  }
  0x38   : > { %4840 = vmatmul.mubr.bf16.vlgmr.msra.gmra.mrb[0].mxu0 %v1302_v46  ;;  %v7669_v46 = vld [vmem:[%s8194_s28 + $0x270] sm:$0xff]  }
  0x39   : > { %6825 = vmatpush3.bf16.msra.mxu0 %v7615_v48  ;;  %4880 = vmatmul.mubr.bf16.vlgmr.msra.gmra.mrb[0].mxu1 %v1324_v52  ;;  %v7670_v48 = vld [vmem:[%s8194_s28 + $0x2f0] sm:$0xff]  }
  0x3a   : > { %6826 = vmatprep.subr.bf16.mxu0 %v7617_v53  ;;  %6847 = vmatpush3.bf16.msra.mxu1 %v7616_v50  ;;  %v1328_v50 = vcombine.high %v240_v47, %v240_v47  ;;  %v7672_v52 = vld [vmem:[%s8194_s28 + $0x2b0] sm:$0xff]   ;;  %v1343_v53 = vcombine.high %v1335_v49, %v1335_v49 }
  0x3b   : > { %4919 = vmatprep.mubr.bf16.mxu0 %v1323_v51  ;;  %6848 = vmatprep.subr.bf16.mxu1 %v7618_v55  ;;  %v7671_v51 = vld [vmem:[%s8194_s28 + $0x230] sm:$0xff]   ;;  %v7673_v55 = vld [vmem:[%s8194_s28 + $0x278] sm:$0xff]  }
  0x3c   : > { %4959 = vmatprep.mubr.bf16.mxu1 %v1327_v57  ;;  %v8306_v54 = vrot.slane %v1328_v50, %v8232_v42  ;;  %v1365_v57 = vrot.slane %v1343_v53, %v8232_v42  ;;  %v7720_v47 = vld [vmem:[%s8194_s28 + $0x410] sm:$0xff]   ;;  %v7723_v50 = vld [vmem:[%s8194_s28 + $0x4d8] sm:$0xff]   ;;  %v7726_v53 = vld [vmem:[%s8194_s28 + $0x460] sm:$0xff]  }
  0x3d   : > { %6827 = vmatpush3.bf16.msra.mxu0 %v7619_v56  ;;  %v7674_v56 = vld [vmem:[%s8194_s28 + $0x2f8] sm:$0xff]  }
  0x3e   : > { %6828 = vmatprep.subr.bf16.mxu0 %v7621_v59  ;;  %6849 = vmatpush3.bf16.msra.mxu1 %v7620_v58  ;;  %v1344_v58 = vcombine.high %v8306_v54, %v8306_v54  ;;  %v7675_v59 = vld [vmem:[%s8194_s28 + $0x238] sm:$0xff]  }
  0x3f   : > { %6850 = vmatprep.subr.bf16.mxu1 %v7622_v60  ;;  %v7676_v60 = vld [vmem:[%s8194_s28 + $0x2b8] sm:$0xff]  }
  0x41   : > { %6829 = vmatpush3.bf16.msra.mxu0 %v7623_v61  ;;  %v1375_v61 = vcombine.high %v1365_v57, %v1365_v57 }
  0x42   : > { %6830 = vmatprep.subr.bf16.mxu0 %v7625_v63  ;;  %6851 = vmatpush3.bf16.msra.mxu1 %v7624_v62  ;;  %v1351_v62 = vrot.slane %v1335_v49, %v8232_v42  ;;  %v7677_v63 = vld [vmem:[%s8194_s28 + $0x340] sm:$0xff]   ;;  %v7722_v49 = vld [vmem:[%s8194_s28 + $0x458] sm:$0xff]  }
  0x43   : > { %6852 = vmatprep.subr.bf16.mxu1 %v7626_v0  ;;  %v7678_v0 = vld [vmem:[%s8194_s28 + $0x3c0] sm:$0xff]  }
  0x45   : > { %6831 = vmatpush3.bf16.msra.mxu0 %v7627_v1  ;;  %v1372_v1 = vrot.slane %v1344_v58, %v8232_v42  ;;  %v7731_v58 = vld [vmem:[%s8194_s28 + $0x4e8] sm:$0xff]  }
  0x46   : > { %6832 = vmatprep.subr.bf16.mxu0 %v7629_v3  ;;  %6853 = vmatpush3.bf16.msra.mxu1 %v7628_v2  ;;  %v7679_v2 = vld [vmem:[%s8194_s28 + $0x300] sm:$0xff]  }
  0x47   : > { %6854 = vmatprep.subr.bf16.mxu1 %v7630_v4  ;;  %v7680_v3 = vld [vmem:[%s8194_s28 + $0x380] sm:$0xff]   ;;  %v1373_v4 = vcombine.high %v1351_v62, %v1351_v62 }
  0x49   : > { %6833 = vmatpush3.bf16.msra.mxu0 %v7631_v5  ;;  %v7681_v5 = vld [vmem:[%s8194_s28 + $0x348] sm:$0xff]  }
  0x4a   : > { %6834 = vmatprep.subr.bf16.mxu0 %v7633_v7  ;;  %6855 = vmatpush3.bf16.msra.mxu1 %v7632_v6  ;;  %v7682_v6 = vld [vmem:[%s8194_s28 + $0x3c8] sm:$0xff]   ;;  %v1376_v7 = vcombine.high %v1372_v1, %v1372_v1 }
  0x4b   : > { %6856 = vmatprep.subr.bf16.mxu1 %v7634_v8  ;;  %v7683_v8 = vld [vmem:[%s8194_s28 + $0x308] sm:$0xff]  }
  0x4d   : > { %6835 = vmatpush3.bf16.msra.mxu0 %v7635_v9  ;;  %v7684_v9 = vld [vmem:[%s8194_s28 + $0x388] sm:$0xff]  }
  0x4e   : > { %6836 = vmatprep.subr.bf16.mxu0 %v7637_v11  ;;  %6857 = vmatpush3.bf16.msra.mxu1 %v7636_v10  ;;  %v7685_v10 = vld [vmem:[%s8194_s28 + $0x350] sm:$0xff]  }
  0x4f   : > { %6858 = vmatprep.subr.bf16.mxu1 %v7638_v12  ;;  %v7686_v11 = vld [vmem:[%s8194_s28 + $0x3d0] sm:$0xff]  }
  0x50   : > { %v7687_v12 = vld [vmem:[%s8194_s28 + $0x310] sm:$0xff]  }
  0x51   : > { %6837 = vmatpush3.bf16.msra.mxu0 %v7639_v13  ;;  %v7688_v13 = vld [vmem:[%s8194_s28 + $0x390] sm:$0xff]  }
  0x52   : > { %6838 = vmatprep.subr.bf16.mxu0 %v7641_v15  ;;  %6859 = vmatpush3.bf16.msra.mxu1 %v7640_v14  ;;  %v7689_v14 = vld [vmem:[%s8194_s28 + $0x358] sm:$0xff]  }
  0x53   : > { %6860 = vmatprep.subr.bf16.mxu1 %v7642_v16  ;;  %v7690_v15 = vld [vmem:[%s8194_s28 + $0x3d8] sm:$0xff]  }
  0x54   : > { %v7691_v16 = vld [vmem:[%s8194_s28 + $0x318] sm:$0xff]  }
  0x55   : > { %6839 = vmatpush3.bf16.msra.mxu0 %v7643_v17  ;;  %v7692_v17 = vld [vmem:[%s8194_s28 + $0x398] sm:$0xff]  }
  0x56   : > { %6868 = vmatprep.subr.bf16.mxu0 %v7645_v20  ;;  %6861 = vmatpush3.bf16.msra.mxu1 %v7644_v18  ;;  %v7693_v18 = vld [vmem:[%s8194_s28 + $0x360] sm:$0xff]  }
  0x57   : > { %6890 = vmatprep.subr.bf16.mxu1 %v7646_v21  ;;  %v7695_v20 = vld [vmem:[%s8194_s28 + $0x320] sm:$0xff]  }
  0x58   : > { %4920 = vmatmul.mubr.bf16.vlgmr.msra.gmra.mrb[4].mxu0 %v1309_v19  ;;  %v7694_v19 = vld [vmem:[%s8194_s28 + $0x3e0] sm:$0xff]  }
  0x59   : > { %6869 = vmatpush3.bf16.msra.mxu0 %v7647_v22  ;;  %4960 = vmatmul.mubr.bf16.vlgmr.msra.gmra.mrb[4].mxu1 %v1325_v24  ;;  %v7696_v21 = vld [vmem:[%s8194_s28 + $0x3a0] sm:$0xff]   ;;  %v7697_v22 = vld [vmem:[%s8194_s28 + $0x368] sm:$0xff]  }
  0x5a   : > { %6870 = vmatprep.subr.bf16.mxu0 %v7649_v25  ;;  %6891 = vmatpush3.bf16.msra.mxu1 %v7648_v23  ;;  %v7698_v23 = vld [vmem:[%s8194_s28 + $0x3e8] sm:$0xff]  }
  0x5b   : > { %6892 = vmatprep.subr.bf16.mxu1 %v7650_v26  ;;  %4999 = vmatprep.mubr.bf16.mxu0 %v1365_v57  ;;  %v7699_v24 = vld [vmem:[%s8194_s28 + $0x328] sm:$0xff]   ;;  %v7701_v26 = vld [vmem:[%s8194_s28 + $0x370] sm:$0xff]  }
  0x5c   : > { %5039 = vmatprep.mubr.bf16.mxu1 %v1375_v61  ;;  %v7700_v25 = vld [vmem:[%s8194_s28 + $0x3a8] sm:$0xff]   ;;  %v7734_v61 = vld [vmem:[%s8194_s28 + $0x470] sm:$0xff]  }
  0x5d   : > { %6871 = vmatpush3.bf16.msra.mxu0 %v7651_v27  ;;  %v7702_v27 = vld [vmem:[%s8194_s28 + $0x3f0] sm:$0xff]   ;;  %v7730_v57 = vld [vmem:[%s8194_s28 + $0x468] sm:$0xff]  }
  0x5e   : > { %6872 = vmatprep.subr.bf16.mxu0 %v7653_v29  ;;  %6893 = vmatpush3.bf16.msra.mxu1 %v7652_v28  ;;  %v7703_v28 = vld [vmem:[%s8194_s28 + $0x330] sm:$0xff]  }
  0x5f   : > { %6894 = vmatprep.subr.bf16.mxu1 %v7654_v30  ;;  %v7704_v29 = vld [vmem:[%s8194_s28 + $0x3b0] sm:$0xff]   ;;  %v7705_v30 = vld [vmem:[%s8194_s28 + $0x378] sm:$0xff]  }
  0x61   : > { %6873 = vmatpush3.bf16.msra.mxu0 %v7655_v31  ;;  %v7706_v31 = vld [vmem:[%s8194_s28 + $0x3f8] sm:$0xff]  }
  0x62   : > { %6874 = vmatprep.subr.bf16.mxu0 %v7657_v33  ;;  %6895 = vmatpush3.bf16.msra.mxu1 %v7656_v32  ;;  %v7707_v32 = vld [vmem:[%s8194_s28 + $0x338] sm:$0xff]  }
  0x63   : > { %6896 = vmatprep.subr.bf16.mxu1 %v7658_v34  ;;  %v7708_v33 = vld [vmem:[%s8194_s28 + $0x3b8] sm:$0xff]   ;;  %v1358_v34 = vrot.slane %v8306_v54, %v8232_v42  ;;  %v7727_v54 = vld [vmem:[%s8194_s28 + $0x4e0] sm:$0xff]  }
  0x65   : > { %6875 = vmatpush3.bf16.msra.mxu0 %v7659_v35  ;;  %v7710_v35 = vld [vmem:[%s8194_s28 + $0x440] sm:$0xff]  }
  0x66   : > { %6876 = vmatprep.subr.bf16.mxu0 %v7661_v37  ;;  %6897 = vmatpush3.bf16.msra.mxu1 %v7660_v36  ;;  %v7711_v36 = vld [vmem:[%s8194_s28 + $0x4c0] sm:$0xff]  }
  0x67   : > { %6898 = vmatprep.subr.bf16.mxu1 %v7662_v38  ;;  %v7712_v37 = vld [vmem:[%s8194_s28 + $0x400] sm:$0xff]  }
  0x68   : > { %v7713_v38 = vld [vmem:[%s8194_s28 + $0x480] sm:$0xff]  }
  0x69   : > { %6877 = vmatpush3.bf16.msra.mxu0 %v7663_v39  ;;  %v1374_v39 = vcombine.high %v1358_v34, %v1358_v34 }
  0x6a   : > { %6878 = vmatprep.subr.bf16.mxu0 %v7665_v41  ;;  %6899 = vmatpush3.bf16.msra.mxu1 %v7664_v40  ;;  %v7714_v40 = vld [vmem:[%s8194_s28 + $0x448] sm:$0xff]  }
  0x6b   : > { %6900 = vmatprep.subr.bf16.mxu1 %v7666_v43  ;;  %v7715_v41 = vld [vmem:[%s8194_s28 + $0x4c8] sm:$0xff]  }
  0x6c   : > { %v7716_v43 = vld [vmem:[%s8194_s28 + $0x408] sm:$0xff]  }
  0x6d   : > { %6879 = vmatpush3.bf16.msra.mxu0 %v7667_v44  ;;  %v7717_v44 = vld [vmem:[%s8194_s28 + $0x488] sm:$0xff]  }
  0x6e   : > { %6880 = vmatprep.subr.bf16.mxu0 %v7669_v46  ;;  %6901 = vmatpush3.bf16.msra.mxu1 %v7668_v45  ;;  %v7718_v45 = vld [vmem:[%s8194_s28 + $0x450] sm:$0xff]  }
  0x6f   : > { %6902 = vmatprep.subr.bf16.mxu1 %v7670_v48  ;;  %v7719_v46 = vld [vmem:[%s8194_s28 + $0x4d0] sm:$0xff]  }
  0x70   : > { %v7721_v48 = vld [vmem:[%s8194_s28 + $0x490] sm:$0xff]  }
  0x71   : > { %6881 = vmatpush3.bf16.msra.mxu0 %v7671_v51  ;;  %v7724_v51 = vld [vmem:[%s8194_s28 + $0x418] sm:$0xff]  }
  0x72   : > { %6882 = vmatprep.subr.bf16.mxu0 %v7673_v55  ;;  %6903 = vmatpush3.bf16.msra.mxu1 %v7672_v52  ;;  %v7725_v52 = vld [vmem:[%s8194_s28 + $0x498] sm:$0xff]   ;;  %v7728_v55 = vld [vmem:[%s8194_s28 + $0x420] sm:$0xff]  }
  0x73   : > { %6904 = vmatprep.subr.bf16.mxu1 %v7674_v56  ;;  %v7729_v56 = vld [vmem:[%s8194_s28 + $0x4a0] sm:$0xff]  }
  0x75   : > { %6883 = vmatpush3.bf16.msra.mxu0 %v7675_v59  ;;  %v7732_v59 = vld [vmem:[%s8194_s28 + $0x428] sm:$0xff]  }
  0x76   : > { %6912 = vmatprep.subr.bf16.mxu0 %v7677_v63  ;;  %6905 = vmatpush3.bf16.msra.mxu1 %v7676_v60  ;;  %v7733_v60 = vld [vmem:[%s8194_s28 + $0x4a8] sm:$0xff]   ;;  %v7735_v63 = vld [vmem:[%s8194_s28 + $0x4f0] sm:$0xff]  }
  0x77   : > { %6934 = vmatprep.subr.bf16.mxu1 %v7678_v0 }
  0x78   : > { %5000 = vmatmul.mubr.bf16.vlgmr.msra.gmra.mrb[8].mxu0 %v1351_v62  ;;  %v241_v62 = vld [vmem:[%s8189_s24 + $0x10] sm:$0xff] }
  0x79   : > { %6913 = vmatpush3.bf16.msra.mxu0 %v7679_v2  ;;  %5079 = vmatprep.mubr.bf16.mxu0 %v1372_v1  ;;  %v1384_v0 = vrot.slane %v241_v62, %v8232_v42  ;;  %v1377_v1 = vcombine.high %v241_v62, %v241_v62  ;;  %v7736_v2 = vld [vmem:[%s8194_s28 + $0x430] sm:$0xff]  }
  0x7a   : > { %5040 = vmatmul.mubr.bf16.vlgmr.msra.gmra.mrb[8].mxu1 %v1373_v4  ;;  %6914 = vmatprep.subr.bf16.mxu0 %v7681_v5  ;;  %v7785_v62 = vld [vmem:[%s8194_s28 + $0x610] sm:$0xff]  }
  0x7b   : > { %6935 = vmatpush3.bf16.msra.mxu1 %v7680_v3  ;;  %5119 = vmatprep.mubr.bf16.mxu1 %v1376_v7  ;;  %v7737_v3 = vld [vmem:[%s8194_s28 + $0x4b0] sm:$0xff]   ;;  %v1392_v4 = vcombine.high %v1384_v0, %v1384_v0  ;;  %v8382_v5 = vrot.slane %v1377_v1, %v8232_v42  ;;  %v7739_v7 = vld [vmem:[%s8194_s28 + $0x4f8] sm:$0xff]  }
  0x7c   : > { %6936 = vmatprep.subr.bf16.mxu1 %v7682_v6  ;;  %v7738_v6 = vld [vmem:[%s8194_s28 + $0x478] sm:$0xff]  }
  0x7d   : > { %6915 = vmatpush3.bf16.msra.mxu0 %v7683_v8  ;;  %v1414_v8 = vrot.slane %v1392_v4, %v8232_v42  ;;  %v7788_v1 = vld [vmem:[%s8194_s28 + $0x6d8] sm:$0xff]   ;;  %v7791_v4 = vld [vmem:[%s8194_s28 + $0x660] sm:$0xff]  }
  0x7e   : > { %6916 = vmatprep.subr.bf16.mxu0 %v7685_v10  ;;  %v7740_v10 = vld [vmem:[%s8194_s28 + $0x438] sm:$0xff]  }
  0x7f   : > { %6937 = vmatpush3.bf16.msra.mxu1 %v7684_v9  ;;  %v1393_v9 = vcombine.high %v8382_v5, %v8382_v5 }
  0x80   : > { %6938 = vmatprep.subr.bf16.mxu1 %v7686_v11  ;;  %v7741_v11 = vld [vmem:[%s8194_s28 + $0x4b8] sm:$0xff]  }
  0x81   : > { %6917 = vmatpush3.bf16.msra.mxu0 %v7687_v12  ;;  %v1424_v12 = vcombine.high %v1414_v8, %v1414_v8 }
  0x82   : > { %6918 = vmatprep.subr.bf16.mxu0 %v7689_v14  ;;  %v7742_v14 = vld [vmem:[%s8194_s28 + $0x540] sm:$0xff]  }
  0x83   : > { %6939 = vmatpush3.bf16.msra.mxu1 %v7688_v13  ;;  %v1400_v13 = vrot.slane %v1384_v0, %v8232_v42  ;;  %v7787_v0 = vld [vmem:[%s8194_s28 + $0x658] sm:$0xff]  }
  0x84   : > { %6940 = vmatprep.subr.bf16.mxu1 %v7690_v15  ;;  %v7743_v15 = vld [vmem:[%s8194_s28 + $0x5c0] sm:$0xff]  }
  0x85   : > { %6919 = vmatpush3.bf16.msra.mxu0 %v7691_v16  ;;  %v1421_v16 = vrot.slane %v1393_v9, %v8232_v42  ;;  %v7796_v9 = vld [vmem:[%s8194_s28 + $0x6e8] sm:$0xff]  }
  0x86   : > { %6920 = vmatprep.subr.bf16.mxu0 %v7693_v18  ;;  %v7745_v18 = vld [vmem:[%s8194_s28 + $0x580] sm:$0xff]  }
  0x87   : > { %6941 = vmatpush3.bf16.msra.mxu1 %v7692_v17  ;;  %v7744_v17 = vld [vmem:[%s8194_s28 + $0x500] sm:$0xff]  }
  0x88   : > { %6942 = vmatprep.subr.bf16.mxu1 %v7694_v19  ;;  %v1422_v19 = vcombine.high %v1400_v13, %v1400_v13 }
  0x89   : > { %6921 = vmatpush3.bf16.msra.mxu0 %v7695_v20  ;;  %v7746_v20 = vld [vmem:[%s8194_s28 + $0x548] sm:$0xff]  }
  0x8a   : > { %6922 = vmatprep.subr.bf16.mxu0 %v7697_v22  ;;  %v1425_v22 = vcombine.high %v1421_v16, %v1421_v16 }
  0x8b   : > { %6943 = vmatpush3.bf16.msra.mxu1 %v7696_v21  ;;  %v7747_v21 = vld [vmem:[%s8194_s28 + $0x5c8] sm:$0xff]  }
  0x8c   : > { %6944 = vmatprep.subr.bf16.mxu1 %v7698_v23  ;;  %v7748_v23 = vld [vmem:[%s8194_s28 + $0x508] sm:$0xff]  }
  0x8d   : > { %6923 = vmatpush3.bf16.msra.mxu0 %v7699_v24  ;;  %v7749_v24 = vld [vmem:[%s8194_s28 + $0x588] sm:$0xff]  }
  0x8e   : > { %6924 = vmatprep.subr.bf16.mxu0 %v7701_v26  ;;  %v7751_v26 = vld [vmem:[%s8194_s28 + $0x5d0] sm:$0xff]  }
  0x8f   : > { %6945 = vmatpush3.bf16.msra.mxu1 %v7700_v25  ;;  %v7750_v25 = vld [vmem:[%s8194_s28 + $0x550] sm:$0xff]  }
  0x90   : > { %6946 = vmatprep.subr.bf16.mxu1 %v7702_v27  ;;  %v7752_v27 = vld [vmem:[%s8194_s28 + $0x510] sm:$0xff]  }
  0x91   : > { %6925 = vmatpush3.bf16.msra.mxu0 %v7703_v28  ;;  %v7753_v28 = vld [vmem:[%s8194_s28 + $0x590] sm:$0xff]  }
  0x92   : > { %6926 = vmatprep.subr.bf16.mxu0 %v7705_v30  ;;  %v7755_v30 = vld [vmem:[%s8194_s28 + $0x5d8] sm:$0xff]  }
  0x93   : > { %6947 = vmatpush3.bf16.msra.mxu1 %v7704_v29  ;;  %v7754_v29 = vld [vmem:[%s8194_s28 + $0x558] sm:$0xff]  }
  0x94   : > { %6948 = vmatprep.subr.bf16.mxu1 %v7706_v31  ;;  %v7756_v31 = vld [vmem:[%s8194_s28 + $0x518] sm:$0xff]  }
  0x95   : > { %6927 = vmatpush3.bf16.msra.mxu0 %v7707_v32  ;;  %v7757_v32 = vld [vmem:[%s8194_s28 + $0x598] sm:$0xff]  }
  0x96   : > { %6956 = vmatprep.subr.bf16.mxu0 %v7710_v35  ;;  %v7760_v35 = vld [vmem:[%s8194_s28 + $0x520] sm:$0xff]  }
  0x97   : > { %6949 = vmatpush3.bf16.msra.mxu1 %v7708_v33  ;;  %v7758_v33 = vld [vmem:[%s8194_s28 + $0x560] sm:$0xff]  }
  0x98   : > { %5080 = vmatmul.mubr.bf16.vlgmr.msra.gmra.mrb[12].mxu0 %v1358_v34  ;;  %6978 = vmatprep.subr.bf16.mxu1 %v7711_v36  ;;  %v7759_v34 = vld [vmem:[%s8194_s28 + $0x5e0] sm:$0xff]  }
  0x99   : > { %6957 = vmatpush3.bf16.msra.mxu0 %v7712_v37  ;;  %5159 = vmatprep.mubr.bf16.mxu0 %v1414_v8  ;;  %v7761_v36 = vld [vmem:[%s8194_s28 + $0x5a0] sm:$0xff]   ;;  %v7762_v37 = vld [vmem:[%s8194_s28 + $0x568] sm:$0xff]  }
  0x9a   : > { %5120 = vmatmul.mubr.bf16.vlgmr.msra.gmra.mrb[12].mxu1 %v1374_v39  ;;  %6958 = vmatprep.subr.bf16.mxu0 %v7714_v40  ;;  %v7764_v39 = vld [vmem:[%s8194_s28 + $0x528] sm:$0xff]  }
  0x9b   : > { %6979 = vmatpush3.bf16.msra.mxu1 %v7713_v38  ;;  %5199 = vmatprep.mubr.bf16.mxu1 %v1424_v12  ;;  %v7763_v38 = vld [vmem:[%s8194_s28 + $0x5e8] sm:$0xff]   ;;  %v7799_v12 = vld [vmem:[%s8194_s28 + $0x670] sm:$0xff]  }
  0x9c   : > { %6980 = vmatprep.subr.bf16.mxu1 %v7715_v41  ;;  %v7765_v40 = vld [vmem:[%s8194_s28 + $0x5a8] sm:$0xff]   ;;  %v7766_v41 = vld [vmem:[%s8194_s28 + $0x570] sm:$0xff]  }
  0x9d   : > { %6959 = vmatpush3.bf16.msra.mxu0 %v7716_v43  ;;  %v7767_v43 = vld [vmem:[%s8194_s28 + $0x5f0] sm:$0xff]   ;;  %v7795_v8 = vld [vmem:[%s8194_s28 + $0x668] sm:$0xff]  }
  0x9e   : > { %6960 = vmatprep.subr.bf16.mxu0 %v7718_v45  ;;  %v7769_v45 = vld [vmem:[%s8194_s28 + $0x5b0] sm:$0xff]  }
  0x9f   : > { %6981 = vmatpush3.bf16.msra.mxu1 %v7717_v44  ;;  %v7768_v44 = vld [vmem:[%s8194_s28 + $0x530] sm:$0xff]  }
  0xa0   : > { %6982 = vmatprep.subr.bf16.mxu1 %v7719_v46  ;;  %v7770_v46 = vld [vmem:[%s8194_s28 + $0x578] sm:$0xff]  }
  0xa1   : > { %6961 = vmatpush3.bf16.msra.mxu0 %v7720_v47  ;;  %v7771_v47 = vld [vmem:[%s8194_s28 + $0x5f8] sm:$0xff]  }
  0xa2   : > { %6962 = vmatprep.subr.bf16.mxu0 %v7722_v49  ;;  %v7773_v49 = vld [vmem:[%s8194_s28 + $0x5b8] sm:$0xff]  }
  0xa3   : > { %6983 = vmatpush3.bf16.msra.mxu1 %v7721_v48  ;;  %v7772_v48 = vld [vmem:[%s8194_s28 + $0x538] sm:$0xff]  }
  0xa4   : > { %6984 = vmatprep.subr.bf16.mxu1 %v7723_v50  ;;  %v1407_v50 = vrot.slane %v8382_v5, %v8232_v42  ;;  %v7792_v5 = vld [vmem:[%s8194_s28 + $0x6e0] sm:$0xff]  }
  0xa5   : > { %6963 = vmatpush3.bf16.msra.mxu0 %v7724_v51  ;;  %v7775_v51 = vld [vmem:[%s8194_s28 + $0x640] sm:$0xff]  }
  0xa6   : > { %6964 = vmatprep.subr.bf16.mxu0 %v7726_v53  ;;  %v7777_v53 = vld [vmem:[%s8194_s28 + $0x600] sm:$0xff]  }
  0xa7   : > { %6985 = vmatpush3.bf16.msra.mxu1 %v7725_v52  ;;  %v7776_v52 = vld [vmem:[%s8194_s28 + $0x6c0] sm:$0xff]  }
  0xa8   : > { %6986 = vmatprep.subr.bf16.mxu1 %v7727_v54  ;;  %v7778_v54 = vld [vmem:[%s8194_s28 + $0x680] sm:$0xff]  }
  0xa9   : > { %6965 = vmatpush3.bf16.msra.mxu0 %v7728_v55  ;;  %v1423_v55 = vcombine.high %v1407_v50, %v1407_v50 }
  0xaa   : > { %6966 = vmatprep.subr.bf16.mxu0 %v7730_v57  ;;  %v7780_v57 = vld [vmem:[%s8194_s28 + $0x6c8] sm:$0xff]  }
  0xab   : > { %6987 = vmatpush3.bf16.msra.mxu1 %v7729_v56  ;;  %v7779_v56 = vld [vmem:[%s8194_s28 + $0x648] sm:$0xff]  }
  0xac   : > { %6988 = vmatprep.subr.bf16.mxu1 %v7731_v58  ;;  %v7781_v58 = vld [vmem:[%s8194_s28 + $0x608] sm:$0xff]  }
  0xad   : > { %6967 = vmatpush3.bf16.msra.mxu0 %v7732_v59  ;;  %v7782_v59 = vld [vmem:[%s8194_s28 + $0x688] sm:$0xff]  }
  0xae   : > { %6968 = vmatprep.subr.bf16.mxu0 %v7734_v61  ;;  %v7784_v61 = vld [vmem:[%s8194_s28 + $0x6d0] sm:$0xff]  }
  0xaf   : > { %6989 = vmatpush3.bf16.msra.mxu1 %v7733_v60  ;;  %v7783_v60 = vld [vmem:[%s8194_s28 + $0x650] sm:$0xff]  }
  0xb0   : > { %6990 = vmatprep.subr.bf16.mxu1 %v7735_v63  ;;  %v7786_v63 = vld [vmem:[%s8194_s28 + $0x690] sm:$0xff]  }
  0xb1   : > { %6969 = vmatpush3.bf16.msra.mxu0 %v7736_v2  ;;  %v7789_v2 = vld [vmem:[%s8194_s28 + $0x618] sm:$0xff]  }
  0xb2   : > { %6970 = vmatprep.subr.bf16.mxu0 %v7738_v6  ;;  %v7793_v6 = vld [vmem:[%s8194_s28 + $0x620] sm:$0xff]  }
  0xb3   : > { %6991 = vmatpush3.bf16.msra.mxu1 %v7737_v3  ;;  %v7790_v3 = vld [vmem:[%s8194_s28 + $0x698] sm:$0xff]  }
  0xb4   : > { %6992 = vmatprep.subr.bf16.mxu1 %v7739_v7  ;;  %v7794_v7 = vld [vmem:[%s8194_s28 + $0x6a0] sm:$0xff]  }
  0xb5   : > { %6971 = vmatpush3.bf16.msra.mxu0 %v7740_v10  ;;  %v7797_v10 = vld [vmem:[%s8194_s28 + $0x628] sm:$0xff]  }
  0xb6   : > { %7000 = vmatprep.subr.bf16.mxu0 %v7742_v14  ;;  %v242_v14 = vld [vmem:[%s8189_s24 + $0x18] sm:$0xff] }
  0xb7   : > { %6993 = vmatpush3.bf16.msra.mxu1 %v7741_v11  ;;  %v7798_v11 = vld [vmem:[%s8194_s28 + $0x6a8] sm:$0xff]  }
  0xb8   : > { %5160 = vmatmul.mubr.bf16.vlgmr.msra.gmra.mrb[16].mxu0 %v1400_v13  ;;  %7022 = vmatprep.subr.bf16.mxu1 %v7743_v15  ;;  %v7800_v13 = vld [vmem:[%s8194_s28 + $0x6f0] sm:$0xff]  }
  0xb9   : > { %7001 = vmatpush3.bf16.msra.mxu0 %v7744_v17  ;;  %5239 = vmatprep.mubr.bf16.mxu0 %v1421_v16  ;;  %v7801_v15 = vld [vmem:[%s8194_s28 + $0x630] sm:$0xff]   ;;  %v1433_v16 = vrot.slane %v242_v14, %v8232_v42  ;;  %v1426_v17 = vcombine.high %v242_v14, %v242_v14  ;;  %v7841_v14 = vld [vmem:[%s8194_s28 + $0x8c0] sm:$0xff]  }
  0xba   : > { %5200 = vmatmul.mubr.bf16.vlgmr.msra.gmra.mrb[16].mxu1 %v1422_v19  ;;  %7002 = vmatprep.subr.bf16.mxu0 %v7746_v20  ;;  %v7803_v19 = vld [vmem:[%s8194_s28 + $0x678] sm:$0xff]  }
  0xbb   : > { %7023 = vmatpush3.bf16.msra.mxu1 %v7745_v18  ;;  %5279 = vmatprep.mubr.bf16.mxu1 %v1425_v22  ;;  %v7802_v18 = vld [vmem:[%s8194_s28 + $0x6b0] sm:$0xff]   ;;  %v1441_v20 = vcombine.high %v1433_v16, %v1433_v16  ;;  %v7804_v22 = vld [vmem:[%s8194_s28 + $0x6f8] sm:$0xff]  }
  0xbc   : > { %7024 = vmatprep.subr.bf16.mxu1 %v7747_v21  ;;  %v8459_v21 = vrot.slane %v1426_v17, %v8232_v42 }
  0xbd   : > { %7003 = vmatpush3.bf16.msra.mxu0 %v7748_v23  ;;  %v7805_v23 = vld [vmem:[%s8194_s28 + $0x638] sm:$0xff]  }
  0xbe   : > { %7004 = vmatprep.subr.bf16.mxu0 %v7750_v25  ;;  %v1442_v25 = vcombine.high %v8459_v21, %v8459_v21 }
  0xbf   : > { %7025 = vmatpush3.bf16.msra.mxu1 %v7749_v24  ;;  %v1463_v24 = vrot.slane %v1441_v20, %v8232_v42  ;;  %v7846_v20 = vld [vmem:[%s8194_s28 + $0x808] sm:$0xff]  }
  0xc0   : > { %7026 = vmatprep.subr.bf16.mxu1 %v7751_v26  ;;  %v7806_v26 = vld [vmem:[%s8194_s28 + $0x6b8] sm:$0xff]  }
  0xc1   : > { %7005 = vmatpush3.bf16.msra.mxu0 %v7752_v27  ;;  %v1473_v27 = vcombine.high %v1463_v24, %v1463_v24 }
  0xc2   : > { %7006 = vmatprep.subr.bf16.mxu0 %v7754_v29  ;;  %v7807_v29 = vld [vmem:[%s8194_s28 + $0x740] sm:$0xff]  }
  0xc3   : > { %7027 = vmatpush3.bf16.msra.mxu1 %v7753_v28  ;;  %v1449_v28 = vrot.slane %v1433_v16, %v8232_v42  ;;  %v7843_v16 = vld [vmem:[%s8194_s28 + $0x880] sm:$0xff]  }
  0xc4   : > { %7028 = vmatprep.subr.bf16.mxu1 %v7755_v30  ;;  %v7808_v30 = vld [vmem:[%s8194_s28 + $0x7c0] sm:$0xff]  }
  0xc5   : > { %7007 = vmatpush3.bf16.msra.mxu0 %v7756_v31  ;;  %v1470_v31 = vrot.slane %v1442_v25, %v8232_v42  ;;  %v7851_v25 = vld [vmem:[%s8194_s28 + $0x890] sm:$0xff]  }
  0xc6   : > { %7008 = vmatprep.subr.bf16.mxu0 %v7758_v33  ;;  %v7810_v33 = vld [vmem:[%s8194_s28 + $0x780] sm:$0xff]  }
  0xc7   : > { %7029 = vmatpush3.bf16.msra.mxu1 %v7757_v32  ;;  %v7809_v32 = vld [vmem:[%s8194_s28 + $0x700] sm:$0xff]  }
  0xc8   : > { %7030 = vmatprep.subr.bf16.mxu1 %v7759_v34  ;;  %v1471_v34 = vcombine.high %v1449_v28, %v1449_v28 }
  0xc9   : > { %7009 = vmatpush3.bf16.msra.mxu0 %v7760_v35  ;;  %v7811_v35 = vld [vmem:[%s8194_s28 + $0x748] sm:$0xff]  }
  0xca   : > { %7010 = vmatprep.subr.bf16.mxu0 %v7762_v37  ;;  %v1474_v37 = vcombine.high %v1470_v31, %v1470_v31 }
  0xcb   : > { %7031 = vmatpush3.bf16.msra.mxu1 %v7761_v36  ;;  %v7812_v36 = vld [vmem:[%s8194_s28 + $0x7c8] sm:$0xff]  }
  0xcc   : > { %7032 = vmatprep.subr.bf16.mxu1 %v7763_v38  ;;  %v7813_v38 = vld [vmem:[%s8194_s28 + $0x708] sm:$0xff]  }
  0xcd   : > { %7011 = vmatpush3.bf16.msra.mxu0 %v7764_v39  ;;  %v7814_v39 = vld [vmem:[%s8194_s28 + $0x788] sm:$0xff]  }
  0xce   : > { %7012 = vmatprep.subr.bf16.mxu0 %v7766_v41  ;;  %v7816_v41 = vld [vmem:[%s8194_s28 + $0x7d0] sm:$0xff]  }
  0xcf   : > { %7033 = vmatpush3.bf16.msra.mxu1 %v7765_v40  ;;  %v7815_v40 = vld [vmem:[%s8194_s28 + $0x750] sm:$0xff]  }
  0xd0   : > { %7034 = vmatprep.subr.bf16.mxu1 %v7767_v43  ;;  %v7817_v43 = vld [vmem:[%s8194_s28 + $0x710] sm:$0xff]  }
  0xd1   : > { %7013 = vmatpush3.bf16.msra.mxu0 %v7768_v44  ;;  %v7818_v44 = vld [vmem:[%s8194_s28 + $0x790] sm:$0xff]  }
  0xd2   : > { %7014 = vmatprep.subr.bf16.mxu0 %v7770_v46  ;;  %v7820_v46 = vld [vmem:[%s8194_s28 + $0x7d8] sm:$0xff]  }
  0xd3   : > { %7035 = vmatpush3.bf16.msra.mxu1 %v7769_v45  ;;  %v7819_v45 = vld [vmem:[%s8194_s28 + $0x758] sm:$0xff]  }
  0xd4   : > { %7036 = vmatprep.subr.bf16.mxu1 %v7771_v47  ;;  %v7821_v47 = vld [vmem:[%s8194_s28 + $0x718] sm:$0xff]  }
  0xd5   : > { %7015 = vmatpush3.bf16.msra.mxu0 %v7772_v48  ;;  %v7822_v48 = vld [vmem:[%s8194_s28 + $0x798] sm:$0xff]  }
  0xd6   : > { %7044 = vmatprep.subr.bf16.mxu0 %v7775_v51  ;;  %v7825_v51 = vld [vmem:[%s8194_s28 + $0x720] sm:$0xff]  }
  0xd7   : > { %7037 = vmatpush3.bf16.msra.mxu1 %v7773_v49  ;;  %v7823_v49 = vld [vmem:[%s8194_s28 + $0x760] sm:$0xff]  }
  0xd8   : > { %5240 = vmatmul.mubr.bf16.vlgmr.msra.gmra.mrb[20].mxu0 %v1407_v50  ;;  %7066 = vmatprep.subr.bf16.mxu1 %v7776_v52  ;;  %v7824_v50 = vld [vmem:[%s8194_s28 + $0x7e0] sm:$0xff]  }
  0xd9   : > { %7045 = vmatpush3.bf16.msra.mxu0 %v7777_v53  ;;  %5319 = vmatprep.mubr.bf16.mxu0 %v1463_v24  ;;  %v7826_v52 = vld [vmem:[%s8194_s28 + $0x7a0] sm:$0xff]   ;;  %v7827_v53 = vld [vmem:[%s8194_s28 + $0x768] sm:$0xff]   ;;  %v7850_v24 = vld [vmem:[%s8194_s28 + $0x810] sm:$0xff]  }
  0xda   : > { %5280 = vmatmul.mubr.bf16.vlgmr.msra.gmra.mrb[20].mxu1 %v1423_v55  ;;  %7046 = vmatprep.subr.bf16.mxu0 %v7779_v56  ;;  %v7829_v55 = vld [vmem:[%s8194_s28 + $0x728] sm:$0xff]  }
  0xdb   : > { %7067 = vmatpush3.bf16.msra.mxu1 %v7778_v54  ;;  %5359 = vmatprep.mubr.bf16.mxu1 %v1473_v27  ;;  %v7828_v54 = vld [vmem:[%s8194_s28 + $0x7e8] sm:$0xff]   ;;  %v7853_v27 = vld [vmem:[%s8194_s28 + $0x8d8] sm:$0xff]  }
  0xdc   : > { %7068 = vmatprep.subr.bf16.mxu1 %v7780_v57  ;;  %v7830_v56 = vld [vmem:[%s8194_s28 + $0x7a8] sm:$0xff]   ;;  %v7831_v57 = vld [vmem:[%s8194_s28 + $0x770] sm:$0xff]  }
  0xdd   : > { %7047 = vmatpush3.bf16.msra.mxu0 %v7781_v58 }
  0xde   : > { %7048 = vmatprep.subr.bf16.mxu0 %v7783_v60 }
  0xdf   : > { %7069 = vmatpush3.bf16.msra.mxu1 %v7782_v59  ;;  %v7832_v59 = vld [vmem:[%s8194_s28 + $0x7f0] sm:$0xff]  }
  0xe0   : > { %7070 = vmatprep.subr.bf16.mxu1 %v7784_v61  ;;  %v7833_v61 = vld [vmem:[%s8194_s28 + $0x730] sm:$0xff]  }
  0xe1   : > { %7049 = vmatpush3.bf16.msra.mxu0 %v7785_v62 }
  0xe2   : > { %7050 = vmatprep.subr.bf16.mxu0 %v7787_v0 }
  0xe3   : > { %7071 = vmatpush3.bf16.msra.mxu1 %v7786_v63 }
  0xe4   : > { %7072 = vmatprep.subr.bf16.mxu1 %v7788_v1  ;;  %v7834_v1 = vld [vmem:[%s8194_s28 + $0x7b0] sm:$0xff]  }
  0xe5   : > { %7051 = vmatpush3.bf16.msra.mxu0 %v7789_v2  ;;  %v7835_v2 = vld [vmem:[%s8194_s28 + $0x778] sm:$0xff]  }
  0xe6   : > { %7052 = vmatprep.subr.bf16.mxu0 %v7791_v4 }
  0xe7   : > { %7073 = vmatpush3.bf16.msra.mxu1 %v7790_v3 }
  0xe8   : > { %7074 = vmatprep.subr.bf16.mxu1 %v7792_v5 }
  0xe9   : > { %7053 = vmatpush3.bf16.msra.mxu0 %v7793_v6 }
  0xea   : > { %7054 = vmatprep.subr.bf16.mxu0 %v7795_v8 }
  0xeb   : > { %7075 = vmatpush3.bf16.msra.mxu1 %v7794_v7  ;;  %v7836_v7 = vld [vmem:[%s8194_s28 + $0x7f8] sm:$0xff]  }
  0xec   : > { %7076 = vmatprep.subr.bf16.mxu1 %v7796_v9  ;;  %v7837_v9 = vld [vmem:[%s8194_s28 + $0x738] sm:$0xff]  }
  0xed   : > { %7055 = vmatpush3.bf16.msra.mxu0 %v7797_v10 }
  0xee   : > { %7056 = vmatprep.subr.bf16.mxu0 %v7799_v12  ;;  %v1456_v12 = vrot.slane %v8459_v21, %v8232_v42  ;;  %v7847_v21 = vld [vmem:[%s8194_s28 + $0x888] sm:$0xff]  }
  0xef   : > { %7077 = vmatpush3.bf16.msra.mxu1 %v7798_v11  ;;  %v7838_v11 = vld [vmem:[%s8194_s28 + $0x7b8] sm:$0xff]  }
  0xf0   : > { %7078 = vmatprep.subr.bf16.mxu1 %v7800_v13  ;;  %v7840_v13 = vld [vmem:[%s8194_s28 + $0x840] sm:$0xff]   ;;  %v1472_v17 = vcombine.high %v1456_v12, %v1456_v12 }
  0xf1   : > { %7057 = vmatpush3.bf16.msra.mxu0 %v7801_v15  ;;  %v7842_v15 = vld [vmem:[%s8194_s28 + $0x800] sm:$0xff]  }
  0xf2   : > { %7058 = vmatprep.subr.bf16.mxu0 %v7803_v19  ;;  %v7845_v19 = vld [vmem:[%s8194_s28 + $0x8c8] sm:$0xff]  }
  0xf3   : > { %7079 = vmatpush3.bf16.msra.mxu1 %v7802_v18  ;;  %v7844_v18 = vld [vmem:[%s8194_s28 + $0x848] sm:$0xff]  }
  0xf4   : > { %7080 = vmatprep.subr.bf16.mxu1 %v7804_v22  ;;  %v7848_v22 = vld [vmem:[%s8194_s28 + $0x850] sm:$0xff]  }
  0xf5   : > { %7059 = vmatpush3.bf16.msra.mxu0 %v7805_v23  ;;  %v7849_v23 = vld [vmem:[%s8194_s28 + $0x8d0] sm:$0xff]  }
  0xf6   : > { %7088 = vmatprep.subr.bf16.mxu0 %v7807_v29  ;;  %v7855_v29 = vld [vmem:[%s8194_s28 + $0x898] sm:$0xff]  }
  0xf7   : > { %7081 = vmatpush3.bf16.msra.mxu1 %v7806_v26  ;;  %v7852_v26 = vld [vmem:[%s8194_s28 + $0x858] sm:$0xff]  }
  0xf8   : > { %5320 = vmatmul.mubr.bf16.vlgmr.msra.gmra.mrb[24].mxu0 %v1449_v28  ;;  %7110 = vmatprep.subr.bf16.mxu1 %v7808_v30  ;;  %v7854_v28 = vld [vmem:[%s8194_s28 + $0x818] sm:$0xff]   ;;  %v7856_v30 = vld [vmem:[%s8194_s28 + $0x860] sm:$0xff]  }
  0xf9   : > { %7089 = vmatpush3.bf16.msra.mxu0 %v7809_v32  ;;  %5399 = vmatprep.mubr.bf16.mxu0 %v1470_v31  ;;  %v7857_v31 = vld [vmem:[%s8194_s28 + $0x8e0] sm:$0xff]  }
  0xfa   : > { %5360 = vmatmul.mubr.bf16.vlgmr.msra.gmra.mrb[24].mxu1 %v1471_v34  ;;  %7090 = vmatprep.subr.bf16.mxu0 %v7811_v35  ;;  %v7858_v32 = vld [vmem:[%s8194_s28 + $0x820] sm:$0xff]   ;;  %v7860_v34 = vld [vmem:[%s8194_s28 + $0x868] sm:$0xff]  }
  0xfb   : > { %7111 = vmatpush3.bf16.msra.mxu1 %v7810_v33  ;;  %5439 = vmatprep.mubr.bf16.mxu1 %v1474_v37  ;;  %v7859_v33 = vld [vmem:[%s8194_s28 + $0x8a0] sm:$0xff]   ;;  %v7861_v35 = vld [vmem:[%s8194_s28 + $0x8e8] sm:$0xff]  }
  0xfc   : > { %7112 = vmatprep.subr.bf16.mxu1 %v7812_v36  ;;  %v7862_v36 = vld [vmem:[%s8194_s28 + $0x828] sm:$0xff]  }
  0xfd   : > { %7091 = vmatpush3.bf16.msra.mxu0 %v7813_v38  ;;  %v7863_v37 = vld [vmem:[%s8194_s28 + $0x8a8] sm:$0xff]   ;;  %v7864_v38 = vld [vmem:[%s8194_s28 + $0x870] sm:$0xff]  }
  0xfe   : > { %7092 = vmatprep.subr.bf16.mxu0 %v7815_v40  ;;  %v7865_v40 = vld [vmem:[%s8194_s28 + $0x8f0] sm:$0xff]  }
  0xff   : > { %7113 = vmatpush3.bf16.msra.mxu1 %v7814_v39 }
 0x100   : > { %7114 = vmatprep.subr.bf16.mxu1 %v7816_v41  ;;  %v243_v41 = vld [vmem:[%s8189_s24 + $0x20] sm:$0xff] }
 0x101   : > { %7093 = vmatpush3.bf16.msra.mxu0 %v7817_v43 }
 0x102   : > { %7094 = vmatprep.subr.bf16.mxu0 %v7819_v45  ;;  %v1482_v45 = vrot.slane %v243_v41, %v8232_v42 }
 0x103   : > { %7115 = vmatpush3.bf16.msra.mxu1 %v7818_v44  ;;  %v7866_v44 = vld [vmem:[%s8194_s28 + $0x830] sm:$0xff]  }
 0x104   : > { %7116 = vmatprep.subr.bf16.mxu1 %v7820_v46  ;;  %v1475_v46 = vcombine.high %v243_v41, %v243_v41 }
 0x105   : > { %7095 = vmatpush3.bf16.msra.mxu0 %v7821_v47 }
 0x106   : > { %7096 = vmatprep.subr.bf16.mxu0 %v7823_v49 }
 0x107   : > { %7117 = vmatpush3.bf16.msra.mxu1 %v7822_v48 }
 0x108   : > { %7118 = vmatprep.subr.bf16.mxu1 %v7824_v50 }
 0x109   : > { %7097 = vmatpush3.bf16.msra.mxu0 %v7825_v51 }
 0x10a   : > { %7098 = vmatprep.subr.bf16.mxu0 %v7827_v53  ;;  %v7868_v53 = vld [vmem:[%s8194_s28 + $0x878] sm:$0xff]  }
 0x10b   : > { %7119 = vmatpush3.bf16.msra.mxu1 %v7826_v52  ;;  %v6796_v58 = vpop.f32.mrb[0].mxu0  ;;  %v7867_v52 = vld [vmem:[%s8194_s28 + $0x8b0] sm:$0xff]  }
 0x10c   : > { %v6797_v60 = vpop.f32.mrb[1].mxu0  ;;  %7120 = vmatprep.subr.bf16.mxu1 %v7828_v54  ;;  %v6818_v62 = vpop.f32.mrb[0].mxu1  ;;  %v1490_v54 = vcombine.high %v1482_v45, %v1482_v45 }
 0x10d   : > { %v6798_v63 = vadd.f32 %v6797_v60, %v6796_v58  ;;  %v6799_v0 = vpop.f32.mrb[2].mxu0  ;;  %7099 = vmatpush3.bf16.msra.mxu0 %v7829_v55  ;;  %v6819_v3 = vpop.f32.mrb[1].mxu1  ;;  %v8537_v55 = vrot.slane %v1475_v46, %v8232_v42 }
 0x10e   : > { %v6800_v4 = vpop.f32.mrb[3].mxu0  ;;  %7100 = vmatprep.subr.bf16.mxu0 %v7831_v57  ;;  %v6820_v5 = vadd.f32 %v6819_v3, %v6818_v62  ;;  %v6821_v6 = vpop.f32.mrb[2].mxu1  ;;  %v1512_v62 = vrot.slane %v1490_v54, %v8232_v42  ;;  %v1498_v3 = vrot.slane %v1482_v45, %v8232_v42  ;;  %v7906_v54 = vld [vmem:[%s8194_s28 + $0xac0] sm:$0xff]  }
 0x10f   : > { %7121 = vmatpush3.bf16.msra.mxu1 %v7830_v56  ;;  %v6822_v8 = vpop.f32.mrb[3].mxu1  ;;  %v7872_v4 = vld [vmem:[%s8194_s28 + $0x940] sm:$0xff]  }
 0x110   : > { %7122 = vmatprep.subr.bf16.mxu1 %v7832_v59  ;;  %v8500_v10 = vadd.f32 %v6820_v5, %v6798_v63  ;;  %v7869_v59 = vld [vmem:[%s8194_s28 + $0x8f8] sm:$0xff]   ;;  %v1491_v63 = vcombine.high %v8537_v55, %v8537_v55  ;;  %v7873_v5 = vld [vmem:[%s8194_s28 + $0x9c0] sm:$0xff]  }
 0x111   : > { %7101 = vmatpush3.bf16.msra.mxu0 %v7833_v61  ;;  %v7870_v61 = vld [vmem:[%s8194_s28 + $0x838] sm:$0xff]   ;;  %v7875_v8 = vld [vmem:[%s8194_s28 + $0x980] sm:$0xff]  }
 0x112   : > { %7102 = vmatprep.subr.bf16.mxu0 %v7835_v2  ;;  %v1522_v2 = vcombine.high %v1512_v62, %v1512_v62  ;;  %v1519_v6 = vrot.slane %v1491_v63, %v8232_v42  ;;  %v7914_v63 = vld [vmem:[%s8194_s28 + $0xad0] sm:$0xff]  }
 0x113   : > { %7123 = vmatpush3.bf16.msra.mxu1 %v7834_v1  ;;  %v7871_v1 = vld [vmem:[%s8194_s28 + $0x8b8] sm:$0xff]  }
 0x114   : > { %7124 = vmatprep.subr.bf16.mxu1 %v7836_v7  ;;  %v7874_v7 = vld [vmem:[%s8194_s28 + $0x900] sm:$0xff]  }
 0x115   : > { %7103 = vmatpush3.bf16.msra.mxu0 %v7837_v9  ;;  %v1520_v9 = vcombine.high %v1498_v3, %v1498_v3 }
 0x116   : > { %7132 = vmatprep.subr.bf16.mxu0 %v7840_v13  ;;  %v7878_v13 = vld [vmem:[%s8194_s28 + $0x908] sm:$0xff]  }
 0x117   : > { %7125 = vmatpush3.bf16.msra.mxu1 %v7838_v11  ;;  %v7877_v11 = vld [vmem:[%s8194_s28 + $0x9c8] sm:$0xff]  }
 0x118   : > { %5400 = vmatmul.mubr.bf16.vlgmr.msra.gmra.mrb[28].mxu0 %v1456_v12  ;;  %7154 = vmatprep.subr.bf16.mxu1 %v7841_v14  ;;  %v1523_v12 = vcombine.high %v1519_v6, %v1519_v6  ;;  %v7879_v14 = vld [vmem:[%s8194_s28 + $0x988] sm:$0xff]  }
 0x119   : > { %7133 = vmatpush3.bf16.msra.mxu0 %v7842_v15  ;;  %5479 = vmatprep.mubr.bf16.mxu0 %v1512_v62  ;;  %v7880_v15 = vld [vmem:[%s8194_s28 + $0x950] sm:$0xff]  }
 0x11a   : > { %5440 = vmatmul.mubr.bf16.vlgmr.msra.gmra.mrb[28].mxu1 %v1472_v17  ;;  %7134 = vmatprep.subr.bf16.mxu0 %v7844_v18  ;;  %v7882_v17 = vld [vmem:[%s8194_s28 + $0x910] sm:$0xff]  }
 0x11b   : > { %7155 = vmatpush3.bf16.msra.mxu1 %v7843_v16  ;;  %5519 = vmatprep.mubr.bf16.mxu1 %v1522_v2  ;;  %v7881_v16 = vld [vmem:[%s8194_s28 + $0x9d0] sm:$0xff]   ;;  %v7917_v2 = vld [vmem:[%s8194_s28 + $0xa58] sm:$0xff]  }
 0x11c   : > { %7156 = vmatprep.subr.bf16.mxu1 %v7845_v19  ;;  %v7883_v18 = vld [vmem:[%s8194_s28 + $0x990] sm:$0xff]   ;;  %v7884_v19 = vld [vmem:[%s8194_s28 + $0x958] sm:$0xff]  }
 0x11d   : > { %7135 = vmatpush3.bf16.msra.mxu0 %v7846_v20  ;;  %v7885_v20 = vld [vmem:[%s8194_s28 + $0x9d8] sm:$0xff]   ;;  %v7913_v62 = vld [vmem:[%s8194_s28 + $0xa50] sm:$0xff]  }
 0x11e   : > { %7136 = vmatprep.subr.bf16.mxu0 %v7848_v22  ;;  %v7887_v22 = vld [vmem:[%s8194_s28 + $0x998] sm:$0xff]  }
 0x11f   : > { %7157 = vmatpush3.bf16.msra.mxu1 %v7847_v21  ;;  %v7886_v21 = vld [vmem:[%s8194_s28 + $0x918] sm:$0xff]  }
 0x120   : > { %7158 = vmatprep.subr.bf16.mxu1 %v7849_v23  ;;  %v7888_v23 = vld [vmem:[%s8194_s28 + $0x960] sm:$0xff]  }
 0x121   : > { %7137 = vmatpush3.bf16.msra.mxu0 %v7850_v24  ;;  %v7889_v24 = vld [vmem:[%s8194_s28 + $0x9e0] sm:$0xff]  }
 0x122   : > { %7138 = vmatprep.subr.bf16.mxu0 %v7852_v26  ;;  %v7891_v26 = vld [vmem:[%s8194_s28 + $0x9a0] sm:$0xff]  }
 0x123   : > { %7159 = vmatpush3.bf16.msra.mxu1 %v7851_v25  ;;  %v7890_v25 = vld [vmem:[%s8194_s28 + $0x920] sm:$0xff]  }
 0x124   : > { %7160 = vmatprep.subr.bf16.mxu1 %v7853_v27  ;;  %v7892_v27 = vld [vmem:[%s8194_s28 + $0x968] sm:$0xff]  }
 0x125   : > { %7139 = vmatpush3.bf16.msra.mxu0 %v7854_v28  ;;  %v7893_v28 = vld [vmem:[%s8194_s28 + $0x9e8] sm:$0xff]  }
 0x126   : > { %7140 = vmatprep.subr.bf16.mxu0 %v7856_v30  ;;  %v7895_v30 = vld [vmem:[%s8194_s28 + $0x9a8] sm:$0xff]  }
 0x127   : > { %7161 = vmatpush3.bf16.msra.mxu1 %v7855_v29  ;;  %v7894_v29 = vld [vmem:[%s8194_s28 + $0x928] sm:$0xff]  }
 0x128   : > { %7162 = vmatprep.subr.bf16.mxu1 %v7857_v31  ;;  %v7896_v31 = vld [vmem:[%s8194_s28 + $0x970] sm:$0xff]  }
 0x129   : > { %7141 = vmatpush3.bf16.msra.mxu0 %v7858_v32 }
 0x12a   : > { %7142 = vmatprep.subr.bf16.mxu0 %v7860_v34 }
 0x12b   : > { %7163 = vmatpush3.bf16.msra.mxu1 %v7859_v33  ;;  %v6840_v39 = vpop.f32.mrb[4].mxu0  ;;  %v7897_v33 = vld [vmem:[%s8194_s28 + $0x9f0] sm:$0xff]  }
 0x12c   : > { %v6841_v43 = vpop.f32.mrb[5].mxu0  ;;  %7164 = vmatprep.subr.bf16.mxu1 %v7861_v35  ;;  %v6862_v47 = vpop.f32.mrb[4].mxu1  ;;  %v7898_v35 = vld [vmem:[%s8194_s28 + $0x930] sm:$0xff]  }
 0x12d   : > { %v6842_v48 = vadd.f32 %v6841_v43, %v6840_v39  ;;  %v6843_v49 = vpop.f32.mrb[6].mxu0  ;;  %7143 = vmatpush3.bf16.msra.mxu0 %v7862_v36  ;;  %v6863_v50 = vpop.f32.mrb[5].mxu1  ;;  %v7899_v39 = vld [vmem:[%s8194_s28 + $0x9b0] sm:$0xff]  }
 0x12e   : > { %v6844_v51 = vpop.f32.mrb[7].mxu0  ;;  %7144 = vmatprep.subr.bf16.mxu0 %v7864_v38  ;;  %v6864_v57 = vadd.f32 %v6863_v50, %v6862_v47  ;;  %v6865_v58 = vpop.f32.mrb[6].mxu1  ;;  %v7901_v47 = vld [vmem:[%s8194_s28 + $0x9f8] sm:$0xff]  }
 0x12f   : > { %v4922_v56 = vadd.f32 %v6842_v48, %v8500_v10  ;;  %7165 = vmatpush3.bf16.msra.mxu1 %v7863_v37  ;;  %v6866_v60 = vpop.f32.mrb[7].mxu1  ;;  %v7876_v10 = vld [vmem:[%s8194_s28 + $0x948] sm:$0xff]   ;;  %v7902_v49 = vld [vmem:[%s8194_s28 + $0x938] sm:$0xff]  }
 0x130   : > { %7166 = vmatprep.subr.bf16.mxu1 %v7865_v40  ;;  %v7900_v40 = vld [vmem:[%s8194_s28 + $0x978] sm:$0xff]   ;;  %v7910_v60 = vld [vmem:[%s8194_s28 + $0xac8] sm:$0xff]  }
 0x131   : > { %v8545_v0 = vadd.f32 %v6864_v57, %v4922_v56  ;;  %7145 = vmatpush3.bf16.msra.mxu0 %v7866_v44  ;;  %v7903_v51 = vld [vmem:[%s8194_s28 + $0x9b8] sm:$0xff]   ;;  %v7907_v56 = vld [vmem:[%s8194_s28 + $0xa00] sm:$0xff]  }
 0x132   : > { %7146 = vmatprep.subr.bf16.mxu0 %v7868_v53  ;;  %v7905_v53 = vld [vmem:[%s8194_s28 + $0xa40] sm:$0xff]  }
 0x133   : > { %7167 = vmatpush3.bf16.msra.mxu1 %v7867_v52  ;;  %v1505_v52 = vrot.slane %v8537_v55, %v8232_v42  ;;  %v7908_v57 = vld [vmem:[%s8194_s28 + $0xa80] sm:$0xff]   ;;  %v7911_v55 = vld [vmem:[%s8194_s28 + $0xa08] sm:$0xff]  }
 0x134   : > { %7168 = vmatprep.subr.bf16.mxu1 %v7869_v59  ;;  %v7909_v59 = vld [vmem:[%s8194_s28 + $0xa48] sm:$0xff]  }
 0x135   : > { %7147 = vmatpush3.bf16.msra.mxu0 %v7870_v61  ;;  %v1521_v58 = vcombine.high %v1505_v52, %v1505_v52  ;;  %v7912_v61 = vld [vmem:[%s8194_s28 + $0xa88] sm:$0xff]  }
 0x136   : > { %7176 = vmatprep.subr.bf16.mxu0 %v7872_v4  ;;  %v7919_v4 = vld [vmem:[%s8194_s28 + $0xa18] sm:$0xff]  }
 0x137   : > { %7169 = vmatpush3.bf16.msra.mxu1 %v7871_v1  ;;  %v7916_v1 = vld [vmem:[%s8194_s28 + $0xa90] sm:$0xff]  }
 0x138   : > { %5480 = vmatmul.mubr.bf16.vlgmr.msra.gmra.mrb[32].mxu0 %v1498_v3  ;;  %7198 = vmatprep.subr.bf16.mxu1 %v7873_v5  ;;  %v7918_v3 = vld [vmem:[%s8194_s28 + $0xad8] sm:$0xff]  }
 0x139   : > { %7177 = vmatpush3.bf16.msra.mxu0 %v7874_v7  ;;  %5559 = vmatprep.mubr.bf16.mxu0 %v1519_v6  ;;  %v7920_v5 = vld [vmem:[%s8194_s28 + $0xa98] sm:$0xff]   ;;  %v7921_v6 = vld [vmem:[%s8194_s28 + $0xa60] sm:$0xff]  }
 0x13a   : > { %5520 = vmatmul.mubr.bf16.vlgmr.msra.gmra.mrb[32].mxu1 %v1520_v9  ;;  %7178 = vmatprep.subr.bf16.mxu0 %v7876_v10  ;;  %v7922_v7 = vld [vmem:[%s8194_s28 + $0xae0] sm:$0xff]   ;;  %v7925_v10 = vld [vmem:[%s8194_s28 + $0xa68] sm:$0xff]  }
 0x13b   : > { %7199 = vmatpush3.bf16.msra.mxu1 %v7875_v8  ;;  %5599 = vmatprep.mubr.bf16.mxu1 %v1523_v12  ;;  %v7923_v8 = vld [vmem:[%s8194_s28 + $0xa20] sm:$0xff]   ;;  %v7927_v12 = vld [vmem:[%s8194_s28 + $0xa28] sm:$0xff]  }
 0x13c   : > { %7200 = vmatprep.subr.bf16.mxu1 %v7877_v11  ;;  %v7924_v9 = vld [vmem:[%s8194_s28 + $0xaa0] sm:$0xff]   ;;  %v7926_v11 = vld [vmem:[%s8194_s28 + $0xae8] sm:$0xff]  }
 0x13d   : > { %7179 = vmatpush3.bf16.msra.mxu0 %v7878_v13  ;;  %v7928_v13 = vld [vmem:[%s8194_s28 + $0xaa8] sm:$0xff]  }
 0x13e   : > { %7180 = vmatprep.subr.bf16.mxu0 %v7880_v15 }
 0x13f   : > { %7201 = vmatpush3.bf16.msra.mxu1 %v7879_v14  ;;  %v7929_v14 = vld [vmem:[%s8194_s28 + $0xa70] sm:$0xff]  }
 0x140   : > { %7202 = vmatprep.subr.bf16.mxu1 %v7881_v16  ;;  %v7930_v16 = vld [vmem:[%s8194_s28 + $0xaf0] sm:$0xff]  }
 0x141   : > { %7181 = vmatpush3.bf16.msra.mxu0 %v7882_v17 }
 0x142   : > { %7182 = vmatprep.subr.bf16.mxu0 %v7884_v19  ;;  %v244_v19 = vld [vmem:[%s8189_s24 + $0x28] sm:$0xff] }
 0x143   : > { %7203 = vmatpush3.bf16.msra.mxu1 %v7883_v18  ;;  %v7931_v18 = vld [vmem:[%s8194_s28 + $0xa30] sm:$0xff]  }
 0x144   : > { %7204 = vmatprep.subr.bf16.mxu1 %v7885_v20 }
 0x145   : > { %7183 = vmatpush3.bf16.msra.mxu0 %v7886_v21 }
 0x146   : > { %7184 = vmatprep.subr.bf16.mxu0 %v7888_v23  ;;  %v1531_v23 = vrot.slane %v244_v19, %v8232_v42 }
 0x147   : > { %7205 = vmatpush3.bf16.msra.mxu1 %v7887_v22 }
 0x148   : > { %7206 = vmatprep.subr.bf16.mxu1 %v7889_v24  ;;  %v1524_v24 = vcombine.high %v244_v19, %v244_v19 }
 0x149   : > { %7185 = vmatpush3.bf16.msra.mxu0 %v7890_v25 }
 0x14a   : > { %7186 = vmatprep.subr.bf16.mxu0 %v7892_v27  ;;  %v7932_v27 = vld [vmem:[%s8194_s28 + $0xab0] sm:$0xff]  }
 0x14b   : > { %7207 = vmatpush3.bf16.msra.mxu1 %v7891_v26  ;;  %v6884_v32 = vpop.f32.mrb[8].mxu0 }
 0x14c   : > { %v6885_v34 = vpop.f32.mrb[9].mxu0  ;;  %7208 = vmatprep.subr.bf16.mxu1 %v7893_v28  ;;  %v7933_v28 = vld [vmem:[%s8194_s28 + $0xa78] sm:$0xff]  }
 0x14d   : > { %v6906_v36 = vpop.f32.mrb[8].mxu1  ;;  %v6886_v37 = vadd.f32 %v6885_v34, %v6884_v32  ;;  %v6887_v38 = vpop.f32.mrb[10].mxu0  ;;  %7187 = vmatpush3.bf16.msra.mxu0 %v7894_v29  ;;  %v7934_v32 = vld [vmem:[%s8194_s28 + $0xaf8] sm:$0xff]  }
 0x14e   : > { %v6907_v41 = vpop.f32.mrb[9].mxu1  ;;  %v6888_v43 = vpop.f32.mrb[11].mxu0  ;;  %7188 = vmatprep.subr.bf16.mxu0 %v7896_v31  ;;  %v7936_v38 = vld [vmem:[%s8194_s28 + $0xab8] sm:$0xff]  }
 0x14f   : > { %v5002_v44 = vadd.f32 %v6886_v37, %v8545_v0  ;;  %v6908_v45 = vadd.f32 %v6907_v41, %v6906_v36  ;;  %v6909_v46 = vpop.f32.mrb[10].mxu1  ;;  %7209 = vmatpush3.bf16.msra.mxu1 %v7895_v30  ;;  %v7915_v0 = vld [vmem:[%s8194_s28 + $0xa10] sm:$0xff]   ;;  %v8622_v36 = vrot.slane %v1524_v24, %v8232_v42  ;;  %v7937_v41 = vld [vmem:[%s8194_s28 + $0xb40] sm:$0xff]   ;;  %v7967_v24 = vld [vmem:[%s8194_s28 + $0xb38] sm:$0xff]  }
 0x150   : > { %v6910_v48 = vpop.f32.mrb[11].mxu1  ;;  %7210 = vmatprep.subr.bf16.mxu1 %v7897_v33  ;;  %v1539_v33 = vcombine.high %v1531_v23, %v1531_v23  ;;  %v7939_v46 = vld [vmem:[%s8194_s28 + $0xb00] sm:$0xff]  }
 0x151   : > { %v8582_v50 = vadd.f32 %v6908_v45, %v5002_v44  ;;  %7189 = vmatpush3.bf16.msra.mxu0 %v7898_v35  ;;  %v7935_v35 = vld [vmem:[%s8194_s28 + $0xa38] sm:$0xff]   ;;  %v1540_v43 = vcombine.high %v8622_v36, %v8622_v36  ;;  %v7938_v45 = vld [vmem:[%s8194_s28 + $0xbc0] sm:$0xff]  }
 0x152   : > { %7190 = vmatprep.subr.bf16.mxu0 %v7900_v40  ;;  %v1547_v40 = vrot.slane %v1531_v23, %v8232_v42  ;;  %v7940_v48 = vld [vmem:[%s8194_s28 + $0xb80] sm:$0xff]  }
 0x153   : > { %7211 = vmatpush3.bf16.msra.mxu1 %v7899_v39  ;;  %v1561_v39 = vrot.slane %v1539_v33, %v8232_v42  ;;  %v7974_v33 = vld [vmem:[%s8194_s28 + $0xc48] sm:$0xff]  }
 0x154   : > { %7212 = vmatprep.subr.bf16.mxu1 %v7901_v47  ;;  %v1568_v47 = vrot.slane %v1540_v43, %v8232_v42  ;;  %v7983_v43 = vld [vmem:[%s8194_s28 + $0xcd8] sm:$0xff]  }
 0x155   : > { %7191 = vmatpush3.bf16.msra.mxu0 %v7902_v49  ;;  %v1571_v44 = vcombine.high %v1561_v39, %v1561_v39  ;;  %v1569_v49 = vcombine.high %v1547_v40, %v1547_v40 }
 0x156   : > { %7220 = vmatprep.subr.bf16.mxu0 %v7905_v53  ;;  %v7943_v53 = vld [vmem:[%s8194_s28 + $0xb08] sm:$0xff]  }
 0x157   : > { %7213 = vmatpush3.bf16.msra.mxu1 %v7903_v51  ;;  %v7942_v51 = vld [vmem:[%s8194_s28 + $0xbc8] sm:$0xff]  }
 0x158   : > { %5560 = vmatmul.mubr.bf16.vlgmr.msra.gmra.mrb[36].mxu0 %v1505_v52  ;;  %7242 = vmatprep.subr.bf16.mxu1 %v7906_v54  ;;  %v1572_v52 = vcombine.high %v1568_v47, %v1568_v47  ;;  %v7944_v54 = vld [vmem:[%s8194_s28 + $0xb88] sm:$0xff]  }
 0x159   : > { %7221 = vmatpush3.bf16.msra.mxu0 %v7907_v56  ;;  %5639 = vmatprep.mubr.bf16.mxu0 %v1561_v39  ;;  %v7945_v56 = vld [vmem:[%s8194_s28 + $0xb50] sm:$0xff]  }
 0x15a   : > { %5600 = vmatmul.mubr.bf16.vlgmr.msra.gmra.mrb[36].mxu1 %v1521_v58  ;;  %7222 = vmatprep.subr.bf16.mxu0 %v7909_v59  ;;  %v7947_v58 = vld [vmem:[%s8194_s28 + $0xb10] sm:$0xff]  }
 0x15b   : > { %7243 = vmatpush3.bf16.msra.mxu1 %v7908_v57  ;;  %5679 = vmatprep.mubr.bf16.mxu1 %v1571_v44  ;;  %v7946_v57 = vld [vmem:[%s8194_s28 + $0xbd0] sm:$0xff]   ;;  %v7984_v44 = vld [vmem:[%s8194_s28 + $0xc18] sm:$0xff]  }
 0x15c   : > { %7244 = vmatprep.subr.bf16.mxu1 %v7910_v60  ;;  %v7948_v59 = vld [vmem:[%s8194_s28 + $0xb90] sm:$0xff]   ;;  %v7949_v60 = vld [vmem:[%s8194_s28 + $0xb58] sm:$0xff]  }
 0x15d   : > { %7223 = vmatpush3.bf16.msra.mxu0 %v7911_v55  ;;  %v7950_v55 = vld [vmem:[%s8194_s28 + $0xbd8] sm:$0xff]   ;;  %v7980_v39 = vld [vmem:[%s8194_s28 + $0xc10] sm:$0xff]  }
 0x15e   : > { %7224 = vmatprep.subr.bf16.mxu0 %v7913_v62  ;;  %v7952_v62 = vld [vmem:[%s8194_s28 + $0xb98] sm:$0xff]  }
 0x15f   : > { %7245 = vmatpush3.bf16.msra.mxu1 %v7912_v61  ;;  %v7951_v61 = vld [vmem:[%s8194_s28 + $0xb18] sm:$0xff]  }
 0x160   : > { %7246 = vmatprep.subr.bf16.mxu1 %v7914_v63  ;;  %v7953_v63 = vld [vmem:[%s8194_s28 + $0xb60] sm:$0xff]  }
 0x161   : > { %7225 = vmatpush3.bf16.msra.mxu0 %v7915_v0  ;;  %v7954_v0 = vld [vmem:[%s8194_s28 + $0xbe0] sm:$0xff]  }
 0x162   : > { %7226 = vmatprep.subr.bf16.mxu0 %v7917_v2  ;;  %v7956_v2 = vld [vmem:[%s8194_s28 + $0xba0] sm:$0xff]  }
 0x163   : > { %7247 = vmatpush3.bf16.msra.mxu1 %v7916_v1  ;;  %v7955_v1 = vld [vmem:[%s8194_s28 + $0xb20] sm:$0xff]  }
 0x164   : > { %7248 = vmatprep.subr.bf16.mxu1 %v7918_v3  ;;  %v7957_v3 = vld [vmem:[%s8194_s28 + $0xb68] sm:$0xff]  }
 0x165   : > { %7227 = vmatpush3.bf16.msra.mxu0 %v7919_v4  ;;  %v7958_v4 = vld [vmem:[%s8194_s28 + $0xbe8] sm:$0xff]  }
 0x166   : > { %7228 = vmatprep.subr.bf16.mxu0 %v7921_v6  ;;  %v7960_v6 = vld [vmem:[%s8194_s28 + $0xba8] sm:$0xff]  }
 0x167   : > { %7249 = vmatpush3.bf16.msra.mxu1 %v7920_v5  ;;  %v7959_v5 = vld [vmem:[%s8194_s28 + $0xb28] sm:$0xff]  }
 0x168   : > { %7250 = vmatprep.subr.bf16.mxu1 %v7922_v7  ;;  %v7961_v7 = vld [vmem:[%s8194_s28 + $0xb70] sm:$0xff]  }
 0x169   : > { %7229 = vmatpush3.bf16.msra.mxu0 %v7923_v8 }
 0x16a   : > { %7230 = vmatprep.subr.bf16.mxu0 %v7925_v10 }
 0x16b   : > { %7251 = vmatpush3.bf16.msra.mxu1 %v7924_v9  ;;  %v6928_v15 = vpop.f32.mrb[12].mxu0  ;;  %v7962_v9 = vld [vmem:[%s8194_s28 + $0xbf0] sm:$0xff]  }
 0x16c   : > { %v6929_v17 = vpop.f32.mrb[13].mxu0  ;;  %7252 = vmatprep.subr.bf16.mxu1 %v7926_v11  ;;  %v7963_v11 = vld [vmem:[%s8194_s28 + $0xb30] sm:$0xff]  }
 0x16d   : > { %v6950_v20 = vpop.f32.mrb[12].mxu1  ;;  %v6930_v21 = vadd.f32 %v6929_v17, %v6928_v15  ;;  %v6931_v22 = vpop.f32.mrb[14].mxu0  ;;  %7231 = vmatpush3.bf16.msra.mxu0 %v7927_v12  ;;  %v7964_v15 = vld [vmem:[%s8194_s28 + $0xbb0] sm:$0xff]  }
 0x16e   : > { %v6951_v25 = vpop.f32.mrb[13].mxu1  ;;  %v6932_v26 = vpop.f32.mrb[15].mxu0  ;;  %7232 = vmatprep.subr.bf16.mxu0 %v7929_v14  ;;  %v7966_v22 = vld [vmem:[%s8194_s28 + $0xbf8] sm:$0xff]  }
 0x16f   : > { %v5082_v29 = vadd.f32 %v6930_v21, %v8582_v50  ;;  %v6952_v30 = vadd.f32 %v6951_v25, %v6950_v20  ;;  %v6953_v31 = vpop.f32.mrb[14].mxu1  ;;  %7253 = vmatpush3.bf16.msra.mxu1 %v7928_v13  ;;  %v7941_v50 = vld [vmem:[%s8194_s28 + $0xb48] sm:$0xff]   ;;  %v7968_v26 = vld [vmem:[%s8194_s28 + $0xbb8] sm:$0xff]  }
 0x170   : > { %v6954_v34 = vpop.f32.mrb[15].mxu1  ;;  %7254 = vmatprep.subr.bf16.mxu1 %v7930_v16  ;;  %v7965_v16 = vld [vmem:[%s8194_s28 + $0xb78] sm:$0xff]   ;;  %v7973_v31 = vld [vmem:[%s8194_s28 + $0xc80] sm:$0xff]  }
 0x171   : > { %v8624_v37 = vadd.f32 %v6952_v30, %v5082_v29  ;;  %7233 = vmatpush3.bf16.msra.mxu0 %v7931_v18  ;;  %v7971_v29 = vld [vmem:[%s8194_s28 + $0xcc0] sm:$0xff]   ;;  %v7975_v34 = vld [vmem:[%s8194_s28 + $0xcc8] sm:$0xff]  }
 0x172   : > { %7234 = vmatprep.subr.bf16.mxu0 %v7933_v28  ;;  %v7970_v28 = vld [vmem:[%s8194_s28 + $0xc40] sm:$0xff]  }
 0x173   : > { %7255 = vmatpush3.bf16.msra.mxu1 %v7932_v27  ;;  %v1554_v27 = vrot.slane %v8622_v36, %v8232_v42  ;;  %v7972_v30 = vld [vmem:[%s8194_s28 + $0xc00] sm:$0xff]   ;;  %v7977_v36 = vld [vmem:[%s8194_s28 + $0xc88] sm:$0xff]  }
 0x174   : > { %7256 = vmatprep.subr.bf16.mxu1 %v7934_v32 }
 0x175   : > { %7235 = vmatpush3.bf16.msra.mxu0 %v7935_v35  ;;  %v1570_v32 = vcombine.high %v1554_v27, %v1554_v27  ;;  %v7976_v35 = vld [vmem:[%s8194_s28 + $0xc08] sm:$0xff]  }
 0x176   : > { %7264 = vmatprep.subr.bf16.mxu0 %v7937_v41  ;;  %v7982_v41 = vld [vmem:[%s8194_s28 + $0xc58] sm:$0xff]  }
 0x177   : > { %7257 = vmatpush3.bf16.msra.mxu1 %v7936_v38  ;;  %v7979_v38 = vld [vmem:[%s8194_s28 + $0xcd0] sm:$0xff]  }
 0x178   : > { %5640 = vmatmul.mubr.bf16.vlgmr.msra.gmra.mrb[40].mxu0 %v1547_v40  ;;  %7286 = vmatprep.subr.bf16.mxu1 %v7938_v45  ;;  %v7981_v40 = vld [vmem:[%s8194_s28 + $0xc90] sm:$0xff]   ;;  %v7985_v45 = vld [vmem:[%s8194_s28 + $0xc98] sm:$0xff]  }
 0x179   : > { %7265 = vmatpush3.bf16.msra.mxu0 %v7939_v46  ;;  %5719 = vmatprep.mubr.bf16.mxu0 %v1568_v47  ;;  %v7986_v46 = vld [vmem:[%s8194_s28 + $0xc60] sm:$0xff]  }
 0x17a   : > { %5680 = vmatmul.mubr.bf16.vlgmr.msra.gmra.mrb[40].mxu1 %v1569_v49  ;;  %7266 = vmatprep.subr.bf16.mxu0 %v7941_v50  ;;  %v7987_v47 = vld [vmem:[%s8194_s28 + $0xce0] sm:$0xff]   ;;  %v7990_v50 = vld [vmem:[%s8194_s28 + $0xc68] sm:$0xff]  }
 0x17b   : > { %7287 = vmatpush3.bf16.msra.mxu1 %v7940_v48  ;;  %5759 = vmatprep.mubr.bf16.mxu1 %v1572_v52  ;;  %v7988_v48 = vld [vmem:[%s8194_s28 + $0xc20] sm:$0xff]   ;;  %v7992_v52 = vld [vmem:[%s8194_s28 + $0xc28] sm:$0xff]  }
 0x17c   : > { %7288 = vmatprep.subr.bf16.mxu1 %v7942_v51  ;;  %v7989_v49 = vld [vmem:[%s8194_s28 + $0xca0] sm:$0xff]   ;;  %v7991_v51 = vld [vmem:[%s8194_s28 + $0xce8] sm:$0xff]  }
 0x17d   : > { %7267 = vmatpush3.bf16.msra.mxu0 %v7943_v53  ;;  %v7993_v53 = vld [vmem:[%s8194_s28 + $0xca8] sm:$0xff]  }
 0x17e   : > { %7268 = vmatprep.subr.bf16.mxu0 %v7945_v56 }
 0x17f   : > { %7289 = vmatpush3.bf16.msra.mxu1 %v7944_v54  ;;  %v7994_v54 = vld [vmem:[%s8194_s28 + $0xc70] sm:$0xff]  }
 0x180   : > { %7290 = vmatprep.subr.bf16.mxu1 %v7946_v57  ;;  %v7995_v57 = vld [vmem:[%s8194_s28 + $0xcf0] sm:$0xff]  }
 0x181   : > { %7269 = vmatpush3.bf16.msra.mxu0 %v7947_v58 }
 0x182   : > { %7270 = vmatprep.subr.bf16.mxu0 %v7949_v60 }
 0x183   : > { %7291 = vmatpush3.bf16.msra.mxu1 %v7948_v59  ;;  %v7996_v59 = vld [vmem:[%s8194_s28 + $0xc30] sm:$0xff]  }
 0x184   : > { %7292 = vmatprep.subr.bf16.mxu1 %v7950_v55 }
 0x185   : > { %7271 = vmatpush3.bf16.msra.mxu0 %v7951_v61 }
 0x186   : > { %7272 = vmatprep.subr.bf16.mxu0 %v7953_v63  ;;  %v7998_v63 = vld [vmem:[%s8194_s28 + $0xc78] sm:$0xff]  }
 0x187   : > { %7293 = vmatpush3.bf16.msra.mxu1 %v7952_v62  ;;  %v7997_v62 = vld [vmem:[%s8194_s28 + $0xcb0] sm:$0xff]  }
 0x188   : > { %7294 = vmatprep.subr.bf16.mxu1 %v7954_v0  ;;  %v245_v0 = vld [vmem:[%s8189_s24 + $0x30] sm:$0xff] }
 0x189   : > { %7273 = vmatpush3.bf16.msra.mxu0 %v7955_v1 }
 0x18a   : > { %7274 = vmatprep.subr.bf16.mxu0 %v7957_v3  ;;  %v1580_v3 = vrot.slane %v245_v0, %v8232_v42 }
 0x18b   : > { %7295 = vmatpush3.bf16.msra.mxu1 %v7956_v2  ;;  %v6972_v8 = vpop.f32.mrb[16].mxu0 }
 0x18c   : > { %v6973_v10 = vpop.f32.mrb[17].mxu0  ;;  %7296 = vmatprep.subr.bf16.mxu1 %v7958_v4  ;;  %v1573_v4 = vcombine.high %v245_v0, %v245_v0  ;;  %v8032_v0 = vld [vmem:[%s8194_s28 + $0xd38] sm:$0xff]  }
 0x18d   : > { %v6994_v12 = vpop.f32.mrb[16].mxu1  ;;  %v6974_v13 = vadd.f32 %v6973_v10, %v6972_v8  ;;  %v6975_v14 = vpop.f32.mrb[18].mxu0  ;;  %7275 = vmatpush3.bf16.msra.mxu0 %v7959_v5  ;;  %v7999_v8 = vld [vmem:[%s8194_s28 + $0xcf8] sm:$0xff]  }
 0x18e   : > { %v6995_v17 = vpop.f32.mrb[17].mxu1  ;;  %v6976_v18 = vpop.f32.mrb[19].mxu0  ;;  %7276 = vmatprep.subr.bf16.mxu0 %v7961_v7  ;;  %v8000_v10 = vld [vmem:[%s8194_s28 + $0xc38] sm:$0xff]  }
 0x18f   : > { %v5162_v19 = vadd.f32 %v6974_v13, %v8624_v37  ;;  %v6996_v20 = vadd.f32 %v6995_v17, %v6994_v12  ;;  %v6997_v21 = vpop.f32.mrb[18].mxu1  ;;  %7297 = vmatpush3.bf16.msra.mxu1 %v7960_v6  ;;  %v7978_v37 = vld [vmem:[%s8194_s28 + $0xc50] sm:$0xff]   ;;  %v8704_v12 = vrot.slane %v1573_v4, %v8232_v42  ;;  %v8001_v14 = vld [vmem:[%s8194_s28 + $0xcb8] sm:$0xff]   ;;  %v8002_v17 = vld [vmem:[%s8194_s28 + $0xd40] sm:$0xff]  }
 0x190   : > { %v6998_v23 = vpop.f32.mrb[19].mxu1  ;;  %7298 = vmatprep.subr.bf16.mxu1 %v7962_v9  ;;  %v8004_v21 = vld [vmem:[%s8194_s28 + $0xd00] sm:$0xff]  }
 0x191   : > { %v8664_v25 = vadd.f32 %v6996_v20, %v5162_v19  ;;  %7277 = vmatpush3.bf16.msra.mxu0 %v7963_v11  ;;  %v1588_v11 = vcombine.high %v1580_v3, %v1580_v3  ;;  %v1589_v18 = vcombine.high %v8704_v12, %v8704_v12  ;;  %v8003_v19 = vld [vmem:[%s8194_s28 + $0xdc0] sm:$0xff]  }
 0x192   : > { %7278 = vmatprep.subr.bf16.mxu0 %v7965_v16  ;;  %v1596_v16 = vrot.slane %v1580_v3, %v8232_v42  ;;  %v8005_v23 = vld [vmem:[%s8194_s28 + $0xd80] sm:$0xff]   ;;  %v1603_v3 = vrot.slane %v8704_v12, %v8232_v42  ;;  %v8042_v12 = vld [vmem:[%s8194_s28 + $0xe88] sm:$0xff]  }
 0x193   : > { %7299 = vmatpush3.bf16.msra.mxu1 %v7964_v15  ;;  %v1610_v15 = vrot.slane %v1588_v11, %v8232_v42  ;;  %v8035_v4 = vld [vmem:[%s8194_s28 + $0xe40] sm:$0xff]   ;;  %v8041_v11 = vld [vmem:[%s8194_s28 + $0xe08] sm:$0xff]  }
 0x194   : > { %7300 = vmatprep.subr.bf16.mxu1 %v7966_v22  ;;  %v1617_v22 = vrot.slane %v1589_v18, %v8232_v42  ;;  %v8048_v18 = vld [vmem:[%s8194_s28 + $0xed8] sm:$0xff]  }
 0x195   : > { %7279 = vmatpush3.bf16.msra.mxu0 %v7967_v24  ;;  %v1620_v20 = vcombine.high %v1610_v15, %v1610_v15  ;;  %v1618_v24 = vcombine.high %v1596_v16, %v1596_v16 }
 0x196   : > { %7308 = vmatprep.subr.bf16.mxu0 %v7970_v28  ;;  %v8008_v28 = vld [vmem:[%s8194_s28 + $0xd08] sm:$0xff]  }
 0x197   : > { %7301 = vmatpush3.bf16.msra.mxu1 %v7968_v26  ;;  %v8007_v26 = vld [vmem:[%s8194_s28 + $0xdc8] sm:$0xff]  }
 0x198   : > { %5720 = vmatmul.mubr.bf16.vlgmr.msra.gmra.mrb[44].mxu0 %v1554_v27  ;;  %7330 = vmatprep.subr.bf16.mxu1 %v7971_v29  ;;  %v1621_v27 = vcombine.high %v1617_v22, %v1617_v22  ;;  %v8009_v29 = vld [vmem:[%s8194_s28 + $0xd88] sm:$0xff]  }
 0x199   : > { %7309 = vmatpush3.bf16.msra.mxu0 %v7972_v30  ;;  %5799 = vmatprep.mubr.bf16.mxu0 %v1610_v15  ;;  %v8010_v30 = vld [vmem:[%s8194_s28 + $0xd50] sm:$0xff]  }
 0x19a   : > { %5760 = vmatmul.mubr.bf16.vlgmr.msra.gmra.mrb[44].mxu1 %v1570_v32  ;;  %7310 = vmatprep.subr.bf16.mxu0 %v7974_v33  ;;  %v8012_v32 = vld [vmem:[%s8194_s28 + $0xd10] sm:$0xff]  }
 0x19b   : > { %7331 = vmatpush3.bf16.msra.mxu1 %v7973_v31  ;;  %5839 = vmatprep.mubr.bf16.mxu1 %v1620_v20  ;;  %v8011_v31 = vld [vmem:[%s8194_s28 + $0xdd0] sm:$0xff]   ;;  %v8050_v20 = vld [vmem:[%s8194_s28 + $0xe98] sm:$0xff]  }
 0x19c   : > { %7332 = vmatprep.subr.bf16.mxu1 %v7975_v34  ;;  %v8013_v33 = vld [vmem:[%s8194_s28 + $0xd90] sm:$0xff]   ;;  %v8014_v34 = vld [vmem:[%s8194_s28 + $0xd58] sm:$0xff]  }
 0x19d   : > { %7311 = vmatpush3.bf16.msra.mxu0 %v7976_v35  ;;  %v8015_v35 = vld [vmem:[%s8194_s28 + $0xdd8] sm:$0xff]   ;;  %v8045_v15 = vld [vmem:[%s8194_s28 + $0xe10] sm:$0xff]  }
 0x19e   : > { %7312 = vmatprep.subr.bf16.mxu0 %v7978_v37  ;;  %v8017_v37 = vld [vmem:[%s8194_s28 + $0xd98] sm:$0xff]  }
 0x19f   : > { %7333 = vmatpush3.bf16.msra.mxu1 %v7977_v36  ;;  %v8016_v36 = vld [vmem:[%s8194_s28 + $0xd18] sm:$0xff]  }
 0x1a0   : > { %7334 = vmatprep.subr.bf16.mxu1 %v7979_v38  ;;  %v8018_v38 = vld [vmem:[%s8194_s28 + $0xd60] sm:$0xff]  }
 0x1a1   : > { %7313 = vmatpush3.bf16.msra.mxu0 %v7980_v39  ;;  %v8019_v39 = vld [vmem:[%s8194_s28 + $0xde0] sm:$0xff]  }
 0x1a2   : > { %7314 = vmatprep.subr.bf16.mxu0 %v7982_v41  ;;  %v8021_v41 = vld [vmem:[%s8194_s28 + $0xda0] sm:$0xff]  }
 0x1a3   : > { %7335 = vmatpush3.bf16.msra.mxu1 %v7981_v40  ;;  %v8020_v40 = vld [vmem:[%s8194_s28 + $0xd20] sm:$0xff]  }
 0x1a4   : > { %7336 = vmatprep.subr.bf16.mxu1 %v7983_v43  ;;  %v8022_v43 = vld [vmem:[%s8194_s28 + $0xd68] sm:$0xff]  }
 0x1a5   : > { %7315 = vmatpush3.bf16.msra.mxu0 %v7984_v44  ;;  %v8023_v44 = vld [vmem:[%s8194_s28 + $0xde8] sm:$0xff]  }
 0x1a6   : > { %7316 = vmatprep.subr.bf16.mxu0 %v7986_v46  ;;  %v8025_v46 = vld [vmem:[%s8194_s28 + $0xda8] sm:$0xff]  }
 0x1a7   : > { %7337 = vmatpush3.bf16.msra.mxu1 %v7985_v45  ;;  %v8024_v45 = vld [vmem:[%s8194_s28 + $0xd28] sm:$0xff]  }
 0x1a8   : > { %7338 = vmatprep.subr.bf16.mxu1 %v7987_v47  ;;  %v8026_v47 = vld [vmem:[%s8194_s28 + $0xd70] sm:$0xff]  }
 0x1a9   : > { %7317 = vmatpush3.bf16.msra.mxu0 %v7988_v48 }
 0x1aa   : > { %7318 = vmatprep.subr.bf16.mxu0 %v7990_v50 }
 0x1ab   : > { %7339 = vmatpush3.bf16.msra.mxu1 %v7989_v49  ;;  %v7016_v56 = vpop.f32.mrb[20].mxu0  ;;  %v8027_v49 = vld [vmem:[%s8194_s28 + $0xdf0] sm:$0xff]  }
 0x1ac   : > { %v7017_v58 = vpop.f32.mrb[21].mxu0  ;;  %7340 = vmatprep.subr.bf16.mxu1 %v7991_v51  ;;  %v8028_v51 = vld [vmem:[%s8194_s28 + $0xd30] sm:$0xff]  }
 0x1ad   : > { %v7038_v60 = vpop.f32.mrb[20].mxu1  ;;  %v7018_v55 = vadd.f32 %v7017_v58, %v7016_v56  ;;  %v7019_v61 = vpop.f32.mrb[22].mxu0  ;;  %7319 = vmatpush3.bf16.msra.mxu0 %v7992_v52  ;;  %v8029_v56 = vld [vmem:[%s8194_s28 + $0xdb0] sm:$0xff]  }
 0x1ae   : > { %v7039_v1 = vpop.f32.mrb[21].mxu1  ;;  %v7020_v2 = vpop.f32.mrb[23].mxu0  ;;  %7320 = vmatprep.subr.bf16.mxu0 %v7994_v54 }
 0x1af   : > { %v5242_v5 = vadd.f32 %v7018_v55, %v8664_v25  ;;  %v7040_v6 = vadd.f32 %v7039_v1, %v7038_v60  ;;  %v7041_v7 = vpop.f32.mrb[22].mxu1  ;;  %7341 = vmatpush3.bf16.msra.mxu1 %v7993_v53  ;;  %v8006_v25 = vld [vmem:[%s8194_s28 + $0xd48] sm:$0xff]   ;;  %v8033_v2 = vld [vmem:[%s8194_s28 + $0xdb8] sm:$0xff]  }
 0x1b0   : > { %v7042_v9 = vpop.f32.mrb[23].mxu1  ;;  %7342 = vmatprep.subr.bf16.mxu1 %v7995_v57  ;;  %v8030_v57 = vld [vmem:[%s8194_s28 + $0xd78] sm:$0xff]   ;;  %v8038_v7 = vld [vmem:[%s8194_s28 + $0xe80] sm:$0xff]  }
 0x1b1   : > { %v8706_v13 = vadd.f32 %v7040_v6, %v5242_v5  ;;  %7321 = vmatpush3.bf16.msra.mxu0 %v7996_v59  ;;  %v8036_v5 = vld [vmem:[%s8194_s28 + $0xec0] sm:$0xff]   ;;  %v8039_v9 = vld [vmem:[%s8194_s28 + $0xe48] sm:$0xff]  }
 0x1b2   : > { %7322 = vmatprep.subr.bf16.mxu0 %v7998_v63  ;;  %v8037_v6 = vld [vmem:[%s8194_s28 + $0xe00] sm:$0xff]  }
 0x1b3   : > { %7343 = vmatpush3.bf16.msra.mxu1 %v7997_v62  ;;  %v8031_v62 = vld [vmem:[%s8194_s28 + $0xdf8] sm:$0xff]  }
 0x1b4   : > { %7344 = vmatprep.subr.bf16.mxu1 %v7999_v8  ;;  %v1619_v8 = vcombine.high %v1603_v3, %v1603_v3 }
 0x1b5   : > { %7323 = vmatpush3.bf16.msra.mxu0 %v8000_v10  ;;  %v8040_v10 = vld [vmem:[%s8194_s28 + $0xec8] sm:$0xff]  }
 0x1b6   : > { %7352 = vmatprep.subr.bf16.mxu0 %v8002_v17  ;;  %v8047_v17 = vld [vmem:[%s8194_s28 + $0xe58] sm:$0xff]  }
 0x1b7   : > { %7345 = vmatpush3.bf16.msra.mxu1 %v8001_v14  ;;  %v8044_v14 = vld [vmem:[%s8194_s28 + $0xed0] sm:$0xff]  }
 0x1b8   : > { %5800 = vmatmul.mubr.bf16.vlgmr.msra.gmra.mrb[48].mxu0 %v1596_v16  ;;  %7374 = vmatprep.subr.bf16.mxu1 %v8003_v19  ;;  %v8046_v16 = vld [vmem:[%s8194_s28 + $0xe90] sm:$0xff]   ;;  %v8049_v19 = vld [vmem:[%s8194_s28 + $0xe18] sm:$0xff]  }
 0x1b9   : > { %7353 = vmatpush3.bf16.msra.mxu0 %v8004_v21  ;;  %5879 = vmatprep.mubr.bf16.mxu0 %v1617_v22  ;;  %v8051_v21 = vld [vmem:[%s8194_s28 + $0xe60] sm:$0xff]  }
 0x1ba   : > { %5840 = vmatmul.mubr.bf16.vlgmr.msra.gmra.mrb[48].mxu1 %v1618_v24  ;;  %7354 = vmatprep.subr.bf16.mxu0 %v8006_v25  ;;  %v8052_v22 = vld [vmem:[%s8194_s28 + $0xee0] sm:$0xff]   ;;  %v8055_v25 = vld [vmem:[%s8194_s28 + $0xe68] sm:$0xff]  }
 0x1bb   : > { %7375 = vmatpush3.bf16.msra.mxu1 %v8005_v23  ;;  %5919 = vmatprep.mubr.bf16.mxu1 %v1621_v27  ;;  %v8053_v23 = vld [vmem:[%s8194_s28 + $0xe20] sm:$0xff]   ;;  %v8057_v27 = vld [vmem:[%s8194_s28 + $0xe28] sm:$0xff]  }
 0x1bc   : > { %7376 = vmatprep.subr.bf16.mxu1 %v8007_v26  ;;  %v8054_v24 = vld [vmem:[%s8194_s28 + $0xea0] sm:$0xff]   ;;  %v8056_v26 = vld [vmem:[%s8194_s28 + $0xee8] sm:$0xff]  }
 0x1bd   : > { %7355 = vmatpush3.bf16.msra.mxu0 %v8008_v28  ;;  %v8058_v28 = vld [vmem:[%s8194_s28 + $0xea8] sm:$0xff]  }
 0x1be   : > { %7356 = vmatprep.subr.bf16.mxu0 %v8010_v30 }
 0x1bf   : > { %7377 = vmatpush3.bf16.msra.mxu1 %v8009_v29  ;;  %v8059_v29 = vld [vmem:[%s8194_s28 + $0xe70] sm:$0xff]  }
 0x1c0   : > { %7378 = vmatprep.subr.bf16.mxu1 %v8011_v31  ;;  %v8060_v31 = vld [vmem:[%s8194_s28 + $0xef0] sm:$0xff]  }
 0x1c1   : > { %7357 = vmatpush3.bf16.msra.mxu0 %v8012_v32 }
 0x1c2   : > { %7358 = vmatprep.subr.bf16.mxu0 %v8014_v34 }
 0x1c3   : > { %7379 = vmatpush3.bf16.msra.mxu1 %v8013_v33  ;;  %v8061_v33 = vld [vmem:[%s8194_s28 + $0xe30] sm:$0xff]  }
 0x1c4   : > { %7380 = vmatprep.subr.bf16.mxu1 %v8015_v35 }
 0x1c5   : > { %7359 = vmatpush3.bf16.msra.mxu0 %v8016_v36 }
 0x1c6   : > { %7360 = vmatprep.subr.bf16.mxu0 %v8018_v38  ;;  %v8063_v38 = vld [vmem:[%s8194_s28 + $0xe78] sm:$0xff]  }
 0x1c7   : > { %7381 = vmatpush3.bf16.msra.mxu1 %v8017_v37  ;;  %v8062_v37 = vld [vmem:[%s8194_s28 + $0xeb0] sm:$0xff]  }
 0x1c8   : > { %7382 = vmatprep.subr.bf16.mxu1 %v8019_v39 }
 0x1c9   : > { %7361 = vmatpush3.bf16.msra.mxu0 %v8020_v40 }
 0x1ca   : > { %7362 = vmatprep.subr.bf16.mxu0 %v8022_v43 }
 0x1cb   : > { %7383 = vmatpush3.bf16.msra.mxu1 %v8021_v41  ;;  %v7060_v48 = vpop.f32.mrb[24].mxu0 }
 0x1cc   : > { %v7061_v50 = vpop.f32.mrb[25].mxu0  ;;  %7384 = vmatprep.subr.bf16.mxu1 %v8023_v44 }
 0x1cd   : > { %v7082_v52 = vpop.f32.mrb[24].mxu1  ;;  %v7062_v53 = vadd.f32 %v7061_v50, %v7060_v48  ;;  %v7063_v54 = vpop.f32.mrb[26].mxu0  ;;  %7363 = vmatpush3.bf16.msra.mxu0 %v8024_v45  ;;  %v246_v45 = vld [vmem:[%s8189_s24 + $0x38] sm:$0xff] }
 0x1ce   : > { %v7083_v58 = vpop.f32.mrb[25].mxu1  ;;  %v7064_v59 = vpop.f32.mrb[27].mxu0  ;;  %7364 = vmatprep.subr.bf16.mxu0 %v8026_v47  ;;  %v8064_v47 = vld [vmem:[%s8194_s28 + $0xef8] sm:$0xff]   ;;  %v1629_v48 = vrot.slane %v246_v45, %v8232_v42  ;;  %v8067_v54 = vld [vmem:[%s8194_s28 + $0xf40] sm:$0xff]  }
 0x1cf   : > { %v5322_v60 = vadd.f32 %v7062_v53, %v8706_v13  ;;  %v7084_v55 = vadd.f32 %v7083_v58, %v7082_v52  ;;  %v7085_v61 = vpop.f32.mrb[26].mxu1  ;;  %7385 = vmatpush3.bf16.msra.mxu1 %v8025_v46  ;;  %v8043_v13 = vld [vmem:[%s8194_s28 + $0xe50] sm:$0xff]   ;;  %v8068_v59 = vld [vmem:[%s8194_s28 + $0xfc0] sm:$0xff]  }
 0x1d0   : > { %v7086_v63 = vpop.f32.mrb[27].mxu1  ;;  %7386 = vmatprep.subr.bf16.mxu1 %v8027_v49  ;;  %v1622_v49 = vcombine.high %v246_v45, %v246_v45  ;;  %v1637_v52 = vcombine.high %v1629_v48, %v1629_v48  ;;  %v1645_v53 = vrot.slane %v1629_v48, %v8232_v42 }
 0x1d1   : > { %v8746_v1 = vadd.f32 %v7084_v55, %v5322_v60  ;;  %7365 = vmatpush3.bf16.msra.mxu0 %v8028_v51  ;;  %v8065_v51 = vld [vmem:[%s8194_s28 + $0xe38] sm:$0xff]   ;;  %v8069_v55 = vld [vmem:[%s8194_s28 + $0xf00] sm:$0xff]   ;;  %v8071_v63 = vld [vmem:[%s8194_s28 + $0xf48] sm:$0xff]  }
 0x1d2   : > { %7366 = vmatprep.subr.bf16.mxu0 %v8030_v57  ;;  %v8066_v57 = vld [vmem:[%s8194_s28 + $0xeb8] sm:$0xff]   ;;  %v1659_v58 = vrot.slane %v1637_v52, %v8232_v42 }
 0x1d3   : > { %7387 = vmatpush3.bf16.msra.mxu1 %v8029_v56  ;;  %v8790_v56 = vrot.slane %v1622_v49, %v8232_v42 }
 0x1d4   : > { %7388 = vmatprep.subr.bf16.mxu1 %v8031_v62  ;;  %v1669_v61 = vcombine.high %v1659_v58, %v1659_v58  ;;  %v1667_v62 = vcombine.high %v1645_v53, %v1645_v53 }
 0x1d5   : > { %7367 = vmatpush3.bf16.msra.mxu0 %v8032_v0  ;;  %v1638_v60 = vcombine.high %v8790_v56, %v8790_v56 }
 0x1d6   : > { %7396 = vmatprep.subr.bf16.mxu0 %v8035_v4  ;;  %v8073_v4 = vld [vmem:[%s8194_s28 + $0xf08] sm:$0xff]  }
 0x1d7   : > { %7389 = vmatpush3.bf16.msra.mxu1 %v8033_v2  ;;  %v1666_v0 = vrot.slane %v1638_v60, %v8232_v42  ;;  %v8072_v2 = vld [vmem:[%s8194_s28 + $0xfc8] sm:$0xff]  }
 0x1d8   : > { %5880 = vmatmul.mubr.bf16.vlgmr.msra.gmra.mrb[52].mxu0 %v1603_v3  ;;  %7418 = vmatprep.subr.bf16.mxu1 %v8036_v5  ;;  %v8075_v5 = vld [vmem:[%s8194_s28 + $0xf50] sm:$0xff]  }
 0x1d9   : > { %7397 = vmatpush3.bf16.msra.mxu0 %v8037_v6  ;;  %5959 = vmatprep.mubr.bf16.mxu0 %v1659_v58  ;;  %v1670_v3 = vcombine.high %v1666_v0, %v1666_v0  ;;  %v8074_v6 = vld [vmem:[%s8194_s28 + $0xf88] sm:$0xff]  }
 0x1da   : > { %5920 = vmatmul.mubr.bf16.vlgmr.msra.gmra.mrb[52].mxu1 %v1619_v8  ;;  %7398 = vmatprep.subr.bf16.mxu0 %v8039_v9  ;;  %v8077_v8 = vld [vmem:[%s8194_s28 + $0xf10] sm:$0xff]   ;;  %v8079_v9 = vld [vmem:[%s8194_s28 + $0xf58] sm:$0xff]  }
 0x1db   : > { %7419 = vmatpush3.bf16.msra.mxu1 %v8038_v7  ;;  %5999 = vmatprep.mubr.bf16.mxu1 %v1669_v61  ;;  %v8076_v7 = vld [vmem:[%s8194_s28 + $0xfd0] sm:$0xff]  }
 0x1dc   : > { %7420 = vmatprep.subr.bf16.mxu1 %v8040_v10  ;;  %v8078_v10 = vld [vmem:[%s8194_s28 + $0xf90] sm:$0xff]  }
 0x1dd   : > { %7399 = vmatpush3.bf16.msra.mxu0 %v8041_v11  ;;  %v8080_v11 = vld [vmem:[%s8194_s28 + $0xfd8] sm:$0xff]  }
 0x1de   : > { %7400 = vmatprep.subr.bf16.mxu0 %v8043_v13  ;;  %v8083_v13 = vld [vmem:[%s8194_s28 + $0xf60] sm:$0xff]  }
 0x1df   : > { %7421 = vmatpush3.bf16.msra.mxu1 %v8042_v12  ;;  %v8081_v12 = vld [vmem:[%s8194_s28 + $0xf18] sm:$0xff]  }
 0x1e0   : > { %7422 = vmatprep.subr.bf16.mxu1 %v8044_v14  ;;  %v8082_v14 = vld [vmem:[%s8194_s28 + $0xf98] sm:$0xff]  }
 0x1e1   : > { %7401 = vmatpush3.bf16.msra.mxu0 %v8045_v15  ;;  %v8084_v15 = vld [vmem:[%s8194_s28 + $0xfe0] sm:$0xff]  }
 0x1e2   : > { %7402 = vmatprep.subr.bf16.mxu0 %v8047_v17  ;;  %v8087_v17 = vld [vmem:[%s8194_s28 + $0xf68] sm:$0xff]  }
 0x1e3   : > { %7423 = vmatpush3.bf16.msra.mxu1 %v8046_v16  ;;  %v8085_v16 = vld [vmem:[%s8194_s28 + $0xf20] sm:$0xff]  }
 0x1e4   : > { %7424 = vmatprep.subr.bf16.mxu1 %v8048_v18  ;;  %v8086_v18 = vld [vmem:[%s8194_s28 + $0xfa0] sm:$0xff]  }
 0x1e5   : > { %7403 = vmatpush3.bf16.msra.mxu0 %v8049_v19  ;;  %v8088_v19 = vld [vmem:[%s8194_s28 + $0xfe8] sm:$0xff]  }
 0x1e6   : > { %7404 = vmatprep.subr.bf16.mxu0 %v8051_v21  ;;  %v8091_v21 = vld [vmem:[%s8194_s28 + $0xf70] sm:$0xff]  }
 0x1e7   : > { %7425 = vmatpush3.bf16.msra.mxu1 %v8050_v20  ;;  %v8089_v20 = vld [vmem:[%s8194_s28 + $0xf28] sm:$0xff]  }
 0x1e8   : > { %7426 = vmatprep.subr.bf16.mxu1 %v8052_v22 }
 0x1e9   : > { %7405 = vmatpush3.bf16.msra.mxu0 %v8053_v23  ;;  %v8090_v23 = vld [vmem:[%s8194_s28 + $0xfa8] sm:$0xff]  }
 0x1ea   : > { %7406 = vmatprep.subr.bf16.mxu0 %v8055_v25  ;;  %v8092_v25 = vld [vmem:[%s8194_s28 + $0xff0] sm:$0xff]  }
 0x1eb   : > { %7427 = vmatpush3.bf16.msra.mxu1 %v8054_v24  ;;  %v7104_v30 = vpop.f32.mrb[28].mxu0 }
 0x1ec   : > { %v7105_v32 = vpop.f32.mrb[29].mxu0  ;;  %7428 = vmatprep.subr.bf16.mxu1 %v8056_v26 }
 0x1ed   : > { %v7126_v34 = vpop.f32.mrb[28].mxu1  ;;  %v7106_v35 = vadd.f32 %v7105_v32, %v7104_v30  ;;  %v7107_v36 = vpop.f32.mrb[30].mxu0  ;;  %7407 = vmatpush3.bf16.msra.mxu0 %v8057_v27  ;;  %v8095_v30 = vld [vmem:[%s8194_s28 + $0xf78] sm:$0xff]  }
 0x1ee   : > { %v7127_v39 = vpop.f32.mrb[29].mxu1  ;;  %v7108_v40 = vpop.f32.mrb[31].mxu0  ;;  %7408 = vmatprep.subr.bf16.mxu0 %v8059_v29  ;;  %v8093_v29 = vld [vmem:[%s8194_s28 + $0xf30] sm:$0xff]  }
 0x1ef   : > { %v5402_v41 = vadd.f32 %v7106_v35, %v8746_v1  ;;  %v7128_v43 = vadd.f32 %v7127_v39, %v7126_v34  ;;  %v7129_v44 = vpop.f32.mrb[30].mxu1  ;;  %7429 = vmatpush3.bf16.msra.mxu1 %v8058_v28  ;;  %v8070_v1 = vld [vmem:[%s8194_s28 + $0xf80] sm:$0xff]   ;;  %v8094_v36 = vld [vmem:[%s8194_s28 + $0xfb0] sm:$0xff]   ;;  %v8097_v40 = vld [vmem:[%s8194_s28 + $0xf38] sm:$0xff]  }
 0x1f0   : > { %v7130_v46 = vpop.f32.mrb[31].mxu1  ;;  %7430 = vmatprep.subr.bf16.mxu1 %v8060_v31 }
 0x1f1   : > { %v8784_v50 = vadd.f32 %v7128_v43, %v5402_v41  ;;  %7409 = vmatpush3.bf16.msra.mxu0 %v8061_v33  ;;  %v1652_v41 = vrot.slane %v8790_v56, %v8232_v42  ;;  %v8098_v43 = vld [vmem:[%s8194_s28 + $0xfb8] sm:$0xff]  }
 0x1f2   : > { %7410 = vmatprep.subr.bf16.mxu0 %v8063_v38  ;;  %v8096_v38 = vld [vmem:[%s8194_s28 + $0xff8] sm:$0xff]  }
 0x1f3   : > { %7431 = vmatpush3.bf16.msra.mxu1 %v8062_v37  ;;  %v1668_v44 = vcombine.high %v1652_v41, %v1652_v41 }
 0x1f4   : > { %7432 = vmatprep.subr.bf16.mxu1 %v8064_v47 }
 0x1f5   : > { %7411 = vmatpush3.bf16.msra.mxu0 %v8065_v51 }
 0x1f6   : > { %7440 = vmatprep.subr.bf16.mxu0 %v8067_v54 }
 0x1f7   : > { %7433 = vmatpush3.bf16.msra.mxu1 %v8066_v57 }
 0x1f8   : > { %5960 = vmatmul.mubr.bf16.vlgmr.msra.gmra.mrb[56].mxu0 %v1645_v53  ;;  %7462 = vmatprep.subr.bf16.mxu1 %v8068_v59 }
 0x1f9   : > { %7441 = vmatpush3.bf16.msra.mxu0 %v8069_v55  ;;  %6039 = vmatprep.mubr.bf16.mxu0 %v1666_v0 }
 0x1fa   : > { %6000 = vmatmul.mubr.bf16.vlgmr.msra.gmra.mrb[56].mxu1 %v1667_v62  ;;  %7442 = vmatprep.subr.bf16.mxu0 %v8071_v63 }
 0x1fb   : > { %7463 = vmatpush3.bf16.msra.mxu1 %v8070_v1  ;;  %6079 = vmatprep.mubr.bf16.mxu1 %v1670_v3 }
 0x1fc   : > { %7464 = vmatprep.subr.bf16.mxu1 %v8072_v2 }
 0x1fd   : > { %7443 = vmatpush3.bf16.msra.mxu0 %v8073_v4 }
 0x1fe   : > { %7444 = vmatprep.subr.bf16.mxu0 %v8075_v5 }
 0x1ff   : > { %7465 = vmatpush3.bf16.msra.mxu1 %v8074_v6 }
 0x200   : > { %7466 = vmatprep.subr.bf16.mxu1 %v8076_v7 }
 0x201   : > { %7445 = vmatpush3.bf16.msra.mxu0 %v8077_v8 }
 0x202   : > { %7446 = vmatprep.subr.bf16.mxu0 %v8079_v9 }
 0x203   : > { %7467 = vmatpush3.bf16.msra.mxu1 %v8078_v10 }
 0x204   : > { %7468 = vmatprep.subr.bf16.mxu1 %v8080_v11 }
 0x205   : > { %7447 = vmatpush3.bf16.msra.mxu0 %v8081_v12 }
 0x206   : > { %7448 = vmatprep.subr.bf16.mxu0 %v8083_v13 }
 0x207   : > { %7469 = vmatpush3.bf16.msra.mxu1 %v8082_v14 }
 0x208   : > { %7470 = vmatprep.subr.bf16.mxu1 %v8084_v15 }
 0x209   : > { %7449 = vmatpush3.bf16.msra.mxu0 %v8085_v16 }
 0x20a   : > { %7450 = vmatprep.subr.bf16.mxu0 %v8087_v17 }
 0x20b   : > { %7471 = vmatpush3.bf16.msra.mxu1 %v8086_v18  ;;  %v7148_v22 = vpop.f32.mrb[32].mxu0 }
 0x20c   : > { %v7149_v24 = vpop.f32.mrb[33].mxu0  ;;  %7472 = vmatprep.subr.bf16.mxu1 %v8088_v19 }
 0x20d   : > { %v7170_v26 = vpop.f32.mrb[32].mxu1  ;;  %v7150_v27 = vadd.f32 %v7149_v24, %v7148_v22  ;;  %v7151_v28 = vpop.f32.mrb[34].mxu0  ;;  %7451 = vmatpush3.bf16.msra.mxu0 %v8089_v20 }
 0x20e   : > { %v7171_v31 = vpop.f32.mrb[33].mxu1  ;;  %v7152_v32 = vpop.f32.mrb[35].mxu0  ;;  %7452 = vmatprep.subr.bf16.mxu0 %v8091_v21 }
 0x20f   : > { %v5482_v33 = vadd.f32 %v7150_v27, %v8784_v50  ;;  %v7172_v34 = vadd.f32 %v7171_v31, %v7170_v26  ;;  %v7173_v35 = vpop.f32.mrb[34].mxu1  ;;  %7473 = vmatpush3.bf16.msra.mxu1 %v8090_v23 }
 0x210   : > { %v7174_v37 = vpop.f32.mrb[35].mxu1  ;;  %7474 = vmatprep.subr.bf16.mxu1 %v8092_v25 }
 0x211   : > { %v5522_v39 = vadd.f32 %v7172_v34, %v5482_v33  ;;  %7453 = vmatpush3.bf16.msra.mxu0 %v8093_v29 }
 0x212   : > { %7454 = vmatprep.subr.bf16.mxu0 %v8095_v30 }
 0x213   : > { %7475 = vmatpush3.bf16.msra.mxu1 %v8094_v36 }
 0x214   : > { %7476 = vmatprep.subr.bf16.mxu1 %v8096_v38 }
 0x215   : > { %7455 = vmatpush3.bf16.msra.mxu0 %v8097_v40 }
 0x217   : > { %7477 = vmatpush3.bf16.msra.mxu1 %v8098_v43 }
 0x218   : > { %6040 = vmatmul.mubr.bf16.vlgmr.msra.gmra.mrb[60].mxu0 %v1652_v41 }
 0x21a   : > { %6080 = vmatmul.mubr.bf16.vlgmr.msra.gmra.mrb[60].mxu1 %v1668_v44 }
 0x22b   : > { %v7192_v45 = vpop.f32.mrb[36].mxu0 }
 0x22c   : > { %v7193_v46 = vpop.f32.mrb[37].mxu0 }
 0x22d   : > { %v7214_v47 = vpop.f32.mrb[36].mxu1  ;;  %v7194_v48 = vadd.f32 %v7193_v46, %v7192_v45  ;;  %v7195_v49 = vpop.f32.mrb[38].mxu0 }
 0x22e   : > { %v7215_v50 = vpop.f32.mrb[37].mxu1  ;;  %v7196_v51 = vpop.f32.mrb[39].mxu0 }
 0x22f   : > { %v5562_v52 = vadd.f32 %v7194_v48, %v5522_v39  ;;  %v7216_v53 = vadd.f32 %v7215_v50, %v7214_v47  ;;  %v7217_v54 = vpop.f32.mrb[38].mxu1 }
 0x230   : > { %v7218_v57 = vpop.f32.mrb[39].mxu1 }
 0x231   : > { %v5602_v42 = vadd.f32 %v7216_v53, %v5562_v52 }
 0x24b   : > { %v7236_v56 = vpop.f32.mrb[40].mxu0 }
 0x24c   : > { %v7237_v58 = vpop.f32.mrb[41].mxu0 }
 0x24d   : > { %v7258_v59 = vpop.f32.mrb[40].mxu1  ;;  %v7238_v60 = vadd.f32 %v7237_v58, %v7236_v56  ;;  %v7239_v55 = vpop.f32.mrb[42].mxu0 }
 0x24e   : > { %v7259_v61 = vpop.f32.mrb[41].mxu1  ;;  %v7240_v62 = vpop.f32.mrb[43].mxu0 }
 0x24f   : > { %v5642_v63 = vadd.f32 %v7238_v60, %v5602_v42  ;;  %v7260_v0 = vadd.f32 %v7259_v61, %v7258_v59  ;;  %v7261_v1 = vpop.f32.mrb[42].mxu1  ;;  %v238_v62 = vld [vmem:[#allocation2] sm:$0x3] }
 0x250   : > { %v7262_v2 = vpop.f32.mrb[43].mxu1 }
 0x251   : > { %v5682_v3 = vadd.f32 %v7260_v0, %v5642_v63  ;;  %v6103_v2 = vld [vmem:[%s8915_s3] sm:$0xff] (!%p6773_p6) }
 0x26b   : > { %v7280_v4 = vpop.f32.mrb[44].mxu0 }
 0x26c   : > { %v7281_v5 = vpop.f32.mrb[45].mxu0 }
 0x26d   : > { %v7302_v6 = vpop.f32.mrb[44].mxu1  ;;  %v7282_v7 = vadd.f32 %v7281_v5, %v7280_v4  ;;  %v7283_v8 = vpop.f32.mrb[46].mxu0  ;;  %v6105_v4 = vld [vmem:[%s8915_s3 + $0x10] sm:$0xff] (!%p6773_p6)  ;;  %v8140_v5 = vmov (!%p6773_p6), 0.0|0.0  }
 0x26e   : > { %v7303_v9 = vpop.f32.mrb[45].mxu1  ;;  %v7284_v10 = vpop.f32.mrb[47].mxu0  ;;  %7536 = vmatprep.subr.bf16.mxu0 (!%p6773_p6), %v8140_v5  ;;  %v8142_v8 = vmov (!%p6773_p6), 0.0  }
 0x26f   : > { %v5722_v11 = vadd.f32 %v7282_v7, %v5682_v3  ;;  %v7304_v12 = vadd.f32 %v7303_v9, %v7302_v6  ;;  %v7305_v13 = vpop.f32.mrb[46].mxu1  ;;  %v6104_v3 = vld [vmem:[%s8915_s3 + $0x8] sm:$0xff] (!%p6773_p6)  ;;  %v6106_v7 = vld [vmem:[%s8915_s3 + $0x18] sm:$0xff] (!%p6773_p6)  ;;  %7533 = vmatprep.mubr.msk.f32.mxu0 (!%p6773_p6), %vm8141_vm0, %v8142_v8  ;;  %v6107_v10 = vld [vmem:[%s8915_s3 + $0x20] sm:$0xff] (!%p6773_p6) }
 0x270   : > { %v7306_v14 = vpop.f32.mrb[47].mxu1  ;;  %v7537_v6 = vpack.c.bf16 (!%p6773_p6), %v6104_v3, %v6103_v2  ;;  %v7540_v9 = vpack.c.bf16 (!%p6773_p6), %v6106_v7, %v6105_v4  ;;  %v6109_v13 = vld [vmem:[%s8915_s3 + $0x30] sm:$0xff] (!%p6773_p6) }
 0x271   : > { %v5762_v15 = vadd.f32 %v7304_v12, %v5722_v11  ;;  %v6108_v11 = vld [vmem:[%s8915_s3 + $0x28] sm:$0xff] (!%p6773_p6)  ;;  %v6110_v14 = vld [vmem:[%s8915_s3 + $0x38] sm:$0xff] (!%p6773_p6) }
 0x272   : > { %7538 = vmatpush3.bf16.msra.mxu0 (!%p6773_p6), %v7537_v6  ;;  %v7543_v12 = vpack.c.bf16 (!%p6773_p6), %v6108_v11, %v6107_v10 }
 0x273   : > { %7539 = vmatprep.subr.bf16.mxu0 (!%p6773_p6), %v8140_v5 }
 0x276   : > { %7541 = vmatpush3.bf16.msra.mxu0 (!%p6773_p6), %v7540_v9 }
 0x277   : > { %7542 = vmatprep.subr.bf16.mxu0 (!%p6773_p6), %v8140_v5 }
 0x27a   : > { %7544 = vmatpush3.bf16.msra.mxu0 (!%p6773_p6), %v7543_v12 }
 0x27b   : > { %7545 = vmatprep.subr.bf16.mxu0 (!%p6773_p6), %v8140_v5 }
 0x28b   : > { %v7324_v16 = vpop.f32.mrb[48].mxu0 }
 0x28c   : > { %v7325_v17 = vpop.f32.mrb[49].mxu0 }
 0x28d   : > { %v7346_v18 = vpop.f32.mrb[48].mxu1  ;;  %v7326_v19 = vadd.f32 %v7325_v17, %v7324_v16  ;;  %v7327_v20 = vpop.f32.mrb[50].mxu0  ;;  %v6111_v16 = vld [vmem:[%s8915_s3 + $0x40] sm:$0xff] (!%p6773_p6)  ;;  %v6112_v17 = vld [vmem:[%s8915_s3 + $0x48] sm:$0xff] (!%p6773_p6) }
 0x28e   : > { %v7347_v21 = vpop.f32.mrb[49].mxu1  ;;  %v7328_v22 = vpop.f32.mrb[51].mxu0  ;;  %v6114_v20 = vld [vmem:[%s8915_s3 + $0x58] sm:$0xff] (!%p6773_p6) }
 0x28f   : > { %v5802_v23 = vadd.f32 %v7326_v19, %v5762_v15  ;;  %v7348_v24 = vadd.f32 %v7347_v21, %v7346_v18  ;;  %v7349_v25 = vpop.f32.mrb[50].mxu1  ;;  %v7546_v15 = vpack.c.bf16 (!%p6773_p6), %v6110_v14, %v6109_v13  ;;  %v7549_v18 = vpack.c.bf16 (!%p6773_p6), %v6112_v17, %v6111_v16  ;;  %v6113_v19 = vld [vmem:[%s8915_s3 + $0x50] sm:$0xff] (!%p6773_p6)  ;;  %v6115_v22 = vld [vmem:[%s8915_s3 + $0x60] sm:$0xff] (!%p6773_p6) }
 0x290   : > { %v7350_v26 = vpop.f32.mrb[51].mxu1  ;;  %v7552_v21 = vpack.c.bf16 (!%p6773_p6), %v6114_v20, %v6113_v19 }
 0x291   : > { %v5842_v27 = vadd.f32 %v7348_v24, %v5802_v23  ;;  %7547 = vmatpush3.bf16.msra.mxu0 (!%p6773_p6), %v7546_v15  ;;  %v6116_v23 = vld [vmem:[%s8915_s3 + $0x68] sm:$0xff] (!%p6773_p6)  ;;  %v6774_v26 = vld [vmem:[%s8914_s2] ss:$0 sm:$0xff] (!%p6773_p6) }
 0x292   : > { %7548 = vmatprep.subr.bf16.mxu0 (!%p6773_p6), %v8140_v5  ;;  %v7555_v24 = vpack.c.bf16 (!%p6773_p6), %v6116_v23, %v6115_v22 }
 0x295   : > { %7550 = vmatpush3.bf16.msra.mxu0 (!%p6773_p6), %v7549_v18 }
 0x296   : > { %7551 = vmatprep.subr.bf16.mxu0 (!%p6773_p6), %v8140_v5 }
 0x299   : > { %7553 = vmatpush3.bf16.msra.mxu0 (!%p6773_p6), %v7552_v21 }
 0x29a   : > { %7554 = vmatprep.subr.bf16.mxu0 (!%p6773_p6), %v8140_v5 }
 0x29d   : > { %7556 = vmatpush3.bf16.msra.mxu0 (!%p6773_p6), %v7555_v24 }
 0x29e   : > { %7557 = vmatprep.subr.bf16.mxu0 (!%p6773_p6), %v8140_v5 }
 0x2ab   : > { %v7368_v28 = vpop.f32.mrb[52].mxu0 }
 0x2ac   : > { %v7369_v29 = vpop.f32.mrb[53].mxu0 }
 0x2ad   : > { %v7390_v30 = vpop.f32.mrb[52].mxu1  ;;  %v7370_v31 = vadd.f32 %v7369_v29, %v7368_v28  ;;  %v7371_v32 = vpop.f32.mrb[54].mxu0  ;;  %v6118_v28 = vld [vmem:[%s8915_s3 + $0x78] sm:$0xff] (!%p6773_p6) }
 0x2ae   : > { %v7391_v33 = vpop.f32.mrb[53].mxu1  ;;  %v7372_v34 = vpop.f32.mrb[55].mxu0  ;;  %v6775_v32 = vld [vmem:[%s8916_s4] ss:$0 sm:$0xff] (!%p6773_p6) }
 0x2af   : > { %v5882_v35 = vadd.f32 %v7370_v31, %v5842_v27  ;;  %v7392_v36 = vadd.f32 %v7391_v33, %v7390_v30  ;;  %v7393_v37 = vpop.f32.mrb[54].mxu1  ;;  %v6117_v27 = vld [vmem:[%s8915_s3 + $0x70] sm:$0xff] (!%p6773_p6) }
 0x2b0   : > { %v7394_v38 = vpop.f32.mrb[55].mxu1  ;;  %v7558_v30 = vpack.c.bf16 (!%p6773_p6), %v6118_v28, %v6117_v27 }
 0x2b1   : > { %v5922_v39 = vadd.f32 %v7392_v36, %v5882_v35 }
 0x2b2   : > { %7559 = vmatpush3.bf16.msra.mxu0 (!%p6773_p6), %v7558_v30 }
 0x2cb   : > { %v7412_v40 = vpop.f32.mrb[56].mxu0 }
 0x2cc   : > { %v7413_v41 = vpop.f32.mrb[57].mxu0 }
 0x2cd   : > { %v7434_v43 = vpop.f32.mrb[56].mxu1  ;;  %v7414_v44 = vadd.f32 %v7413_v41, %v7412_v40  ;;  %v7415_v45 = vpop.f32.mrb[58].mxu0 }
 0x2ce   : > { %v7435_v46 = vpop.f32.mrb[57].mxu1  ;;  %v7416_v47 = vpop.f32.mrb[59].mxu0 }
 0x2cf   : > { %v5962_v48 = vadd.f32 %v7414_v44, %v5922_v39  ;;  %v7436_v49 = vadd.f32 %v7435_v46, %v7434_v43  ;;  %v7437_v50 = vpop.f32.mrb[58].mxu1 }
 0x2d0   : > { %v7438_v51 = vpop.f32.mrb[59].mxu1 }
 0x2d1   : > { %v6002_v52 = vadd.f32 %v7436_v49, %v5962_v48 }
 0x2eb   : > { %v7456_v53 = vpop.f32.mrb[60].mxu0 }
 0x2ec   : > { %v7457_v54 = vpop.f32.mrb[61].mxu0 }
 0x2ed   : > { %v7478_v57 = vpop.f32.mrb[60].mxu1  ;;  %v7458_v42 = vadd.f32 %v7457_v54, %v7456_v53  ;;  %v7459_v56 = vpop.f32.mrb[62].mxu0 }
 0x2ee   : > { %v7479_v58 = vpop.f32.mrb[61].mxu1  ;;  %v7460_v59 = vpop.f32.mrb[63].mxu0 }
 0x2ef   : > { %v6042_v60 = vadd.f32 %v7458_v42, %v6002_v52  ;;  %v7480_v55 = vadd.f32 %v7479_v58, %v7478_v57  ;;  %v7481_v61 = vpop.f32.mrb[62].mxu1  ;;  %6092 = sbr.rel (%p6773_p6) target bundleno = 984 (0x3d8), region = 48 }
 0x2f0   : > { %v7482_v63 = vpop.f32.mrb[63].mxu1 }
 0x2f1   : > { %v6082_v0 = vadd.f32 %v7480_v55, %v6042_v60 }
 0x2f3   : > { %v6087_v1 = vadd.f32 %v6082_v0, %v238_v62 }
 0x2f5   : > { %6088 = vst [vmem:[#allocation2] sm:$0x3] %v6087_v1 }
 0x2fc   : > { %v6093_v25 = vld [vmem:[#allocation2] sm:$0x3] }
 0x2fd   : > { %v6101_v29 = vadd.f32 %v6774_v26, %v6093_v25 }
 0x2ff   : > { %v6102_v31 = vmax.f32 %v6101_v29, 0.0 }
 0x301   : > { %7534 = vmatmul.mubr.f32.vlgmr.msra.gmra.mrb[0].mxu0 %v6102_v31 }
 0x3d4   : > { %v6192_v33 = vpop.f32.mrb[0].mxu0 }
 0x3d5   : > { %v6193_v34 = vadd.f32 %v6775_v32, %v6192_v33  ;;  %v7535_v35 = vpop.f32.mrb[1].mxu0 }
 0x3d7   : > { %6197 = vst.msk [vmem:[#allocation3] sm:$0x3] %vm6196_vm1, %v6193_v34 }
 0x3d8 PF: > { %p7564_p7 = scmp.eq.s32.totalorder %s8180_s19, 1  ;;  %s8143_s17 = smov [#allocation3]  }
 0x3d9   : > { %s6205_s20 = sshll.u32 %s8143_s17, 4  ;;  %s6206_s20 = int_to_ptr.vmem [resolvable:$true] %s6205_s20 }
 0x3da   : > { %s8100_s21 = scalar_lea.vmem %s6206_s20, 32  ;;  %p8107_p11 = scmp.lt.s32.totalorder %s6206_s20, %s6206_s20 }
 0x3db   : > { %p8101_p8 = scmp.ne.s32.totalorder %s6206_s20, %s8100_s21  ;;  %p8108_p12 = scmp.lt.s32.totalorder %s8100_s21, %s8100_s21 }
 0x3dd   : > { %p8102_p9 = pnand %p8101_p8, %p7564_p7  ;;  %p8109_p13 = por %p8108_p12, %p8107_p11 }
 0x3df   : > { %p8103_p10 = pneg %p8102_p9 }
 0x3e1   : > { %p8110_p0 = pnand %p8109_p13, %p8103_p10 }
 0x3e3   : > { %8113 = shalt.err (!%p8110_p0)
}
 0x3e4   : > { %s8114_s24 = scalar_lea.hbm %s8917_s5, 32 }
 0x3e5   : > { %p8115_p1 = scmp.ne.s32.totalorder %s8917_s5, %s8114_s24  ;;  %p8120_p4 = scmp.lt.u32.totalorder %s8114_s24, %s8917_s5 }
 0x3e7   : > { %p8116_p2 = pnand %p8115_p1, %p7564_p7 }
 0x3e9   : > { %p8117_p3 = pneg %p8116_p2 }
 0x3eb   : > { %p8122_p5 = pnand %p8120_p4, %p8117_p3 }
 0x3ed   : > { %8125 = shalt.err (!%p8122_p5)
}
 0x3ee   : > { %7561 = dma.vmem_to_hbm [thread:$0]  (%p7564_p7), %s6206_s20, 32, %s8917_s5, [#allocation4]  }
 0x3ef   : > { %8131 = dma.done.wait (%p7564_p7), [#allocation4], 32  }
 0x3f0   : > { %8133 = vsyncadd (%p7564_p7), [#allocation4], 4294967264 }
 0x3f1 PF: > { %s16_s18 = sadd.s32 1, %s8136_s18  }
 0x3f2   : > { %p13_p6 = scmp.ge.s32.totalorder %s16_s18, 4  }
 0x3f4   :  { %15 = sbr.rel (!%p13_p6) target bundleno = 1 (0x1), region = 78 }
 0x3fb   :  { %6218 = vsyncpa [#allocation4], 1 }
 0x3fc   :  { %6220 = vsyncpa [#allocation4 + $0x1], 1 }

</bundles_post_ra>
